<compile_context>
chip_gen: v6e
topology: v6e:2x2x1
jax: 0.10.0
libtpu: 0.0.40
codegen_flags: <defaults>
</compile_context>

<pallas_src>
import functools

import jax
import jax.numpy as jnp
import numpy as np
from jax.experimental import pallas as pl
from jax.experimental.pallas import tpu as pltpu

EPS = 1e-5
# bf16 MXU inputs with f32 accumulation on all generations (v5e/v6e/v7x).
COMPUTE_DTYPE = jnp.bfloat16


def _compiler_params(semantics):
    return pltpu.CompilerParams(
        dimension_semantics=semantics,
        vmem_limit_bytes=32 * 1024 * 1024,
    )


def _row_tile(m, max_tile=512):
    """Largest multiple-of-8 divisor of m that is <= max_tile."""
    t = (min(m, max_tile) // 8) * 8
    while t >= 8:
        if m % t == 0:
            return t
        t -= 8
    return m


# ----------------------------- Pallas kernels ------------------------------ #

def conv1_stats_kernel(x_ref, w1_ref, h1_ref, s_ref, q_ref):
    """K1: h1 = x @ w1 (1x1 conv, bias dropped); per-step per-channel sum/sumsq."""
    h = jnp.dot(x_ref[...], w1_ref[...], preferred_element_type=jnp.float32)
    h1_ref[...] = h.astype(h1_ref.dtype)
    s_ref[...] = jnp.sum(h, axis=0, keepdims=True)
    q_ref[...] = jnp.sum(h * h, axis=0, keepdims=True)


def conv2_stats_kernel(h1_ref, sc1_ref, sh1_ref, w2_ref, h2_ref, s_ref, q_ref,
                       apad_ref, patch_ref, *, hh, ww, base):
    """K2: folded-bn1 + relu on one image, fused im2col into a bf16 patch slab
    (height-only physical zero padding + row masks for the width boundary),
    then a single K = 9*C1 MXU matmul; per-step per-channel sum/sumsq."""
    p = hh * ww
    c1 = h1_ref.shape[-1]
    total = apad_ref.shape[0]
    tail = total - base - p

    # Zero the aligned top/bottom pad bands every step (no cross-step state, so
    # the grid axis can be "parallel"/megacore).
    apad_ref[0:base, :] = jnp.zeros((base, c1), apad_ref.dtype)
    apad_ref[base + p:base + p + tail, :] = jnp.zeros((tail, c1), apad_ref.dtype)

    # bn1 (folded) + relu in f32, cast once to bf16, one aligned contiguous store.
    a = jnp.maximum(
        h1_ref[...].astype(jnp.float32) * sc1_ref[...] + sh1_ref[...], 0.0)
    apad_ref[base:base + p, :] = a.astype(apad_ref.dtype)

    # Width-boundary masks: height padding is physical, width padding is not,
    # so the left/right kernel columns wrap into the neighbouring image row and
    # must be zeroed for the first/last output column of each row.
    row = jax.lax.broadcasted_iota(jnp.int32, (p, 1), 0)
    col = row % ww
    left_ok = col != 0
    right_ok = col != (ww - 1)

    # Build the (p, 9*C1) im2col slab from 9 contiguous static-offset windows.
    for k in range(9):                       # short fixed loop, unrolled at trace
        dy, dx = k // 3, k % 3
        start = base + (dy - 1) * ww + (dx - 1)
        slab = apad_ref[start:start + p, :]
        if dx == 0:
            slab = jnp.where(left_ok, slab, 0)
        elif dx == 2:
            slab = jnp.where(right_ok, slab, 0)
        patch_ref[:, k * c1:(k + 1) * c1] = slab

    # Single K = 9*C1 matmul (fills the 256x256 MXU on v6e/v7x), f32 accumulate.
    h = jnp.dot(patch_ref[...], w2_ref[...], preferred_element_type=jnp.float32)
    h2_ref[...] = h.astype(h2_ref.dtype)
    s_ref[...] = jnp.sum(h, axis=0, keepdims=True)
    q_ref[...] = jnp.sum(h * h, axis=0, keepdims=True)


def conv3_stats_kernel(h2_ref, sc2_ref, sh2_ref, w3_ref, h3_ref, s_ref, q_ref):
    """K3: folded-bn2 + relu, then 1x1 conv; per-step per-channel sum/sumsq."""
    a = jnp.maximum(
        h2_ref[...].astype(jnp.float32) * sc2_ref[...] + sh2_ref[...], 0.0)
    h = jnp.dot(a.astype(COMPUTE_DTYPE), w3_ref[...],
                preferred_element_type=jnp.float32)
    h3_ref[...] = h.astype(h3_ref.dtype)
    s_ref[...] = jnp.sum(h, axis=0, keepdims=True)
    q_ref[...] = jnp.sum(h * h, axis=0, keepdims=True)


def bn3_residual_kernel(h3_ref, x_ref, sc3_ref, sh3_ref, o_ref):
    """K4: folded-bn3 + residual add + relu."""
    y = (h3_ref[...].astype(jnp.float32) * sc3_ref[...] + sh3_ref[...]
         + x_ref[...].astype(jnp.float32))
    o_ref[...] = jnp.maximum(y, 0.0).astype(o_ref.dtype)


# ------------------------------ wrapper (glue) ----------------------------- #

def _fold_bn(stats_s, stats_q, gamma, beta, m):
    """Fold training-mode BN into a single per-channel scale/shift (f32)."""
    mean = stats_s / m
    var = stats_q / m - mean * mean          # biased variance (PyTorch train mode)
    scale = gamma * jax.lax.rsqrt(var + EPS)
    shift = beta - mean * scale
    return scale, shift                      # each (1, C) float32


def resnet50_basic_block(x_nchw, params):
    """Forward pass of ResNet50BasicBlock. x_nchw: (N, Cin, H, W) float32."""
    n, cin, hh, ww = x_nchw.shape
    p = hh * ww
    m = n * p

    w1, w2, w3 = params["w1"], params["w2"], params["w3"]
    c1 = w1.shape[1]
    c2 = w3.shape[0]
    c3 = w3.shape[1]
    assert cin == c3, "identity residual requires in_channel == outs[2]"
    assert p % 8 == 0 and m % 8 == 0 and ww >= 2

    x_flat = (jnp.transpose(x_nchw, (0, 2, 3, 1))
              .reshape(m, cin).astype(COMPUTE_DTYPE))

    tm = _row_tile(m)
    grid_m = m // tm

    # --- K1: conv1 (1x1) + per-step per-channel stats ------------------------
    h1, s1_steps, q1_steps = pl.pallas_call(
        conv1_stats_kernel,
        grid=(grid_m,),
        in_specs=[
            pl.BlockSpec((tm, cin), lambda i: (i, 0)),
            pl.BlockSpec((cin, c1), lambda i: (0, 0)),
        ],
        out_specs=(
            pl.BlockSpec((tm, c1), lambda i: (i, 0)),
            pl.BlockSpec((None, 1, c1), lambda i: (i, 0, 0)),
            pl.BlockSpec((None, 1, c1), lambda i: (i, 0, 0)),
        ),
        out_shape=(
            jax.ShapeDtypeStruct((m, c1), COMPUTE_DTYPE),
            jax.ShapeDtypeStruct((grid_m, 1, c1), jnp.float32),
            jax.ShapeDtypeStruct((grid_m, 1, c1), jnp.float32),
        ),
        compiler_params=_compiler_params(("parallel",)),
        cost_estimate=pl.CostEstimate(
            flops=2 * m * cin * c1, transcendentals=0,
            bytes_accessed=2 * (m * cin + m * c1 + cin * c1)),
    )(x_flat, w1)
    sc1, sh1 = _fold_bn(jnp.sum(s1_steps, axis=0), jnp.sum(q1_steps, axis=0),
                        params["g1"], params["be1"], m)

    # --- K2: bn1+relu, 3x3 conv with fused in-kernel im2col, stats of h2 ----
    base = ((ww + 1 + 7) // 8) * 8           # aligned start of the interior rows
    apad_rows = p + 2 * base                 # height-padded flat scratch rows
    h2, s2_steps, q2_steps = pl.pallas_call(
        functools.partial(conv2_stats_kernel, hh=hh, ww=ww, base=base),
        grid=(n,),
        in_specs=[
            pl.BlockSpec((p, c1), lambda i: (i, 0)),        # one image of rows
            pl.BlockSpec((1, c1), lambda i: (0, 0)),
            pl.BlockSpec((1, c1), lambda i: (0, 0)),
            pl.BlockSpec((9 * c1, c2), lambda i: (0, 0)),
        ],
        out_specs=(
            pl.BlockSpec((p, c2), lambda i: (i, 0)),
            pl.BlockSpec((None, 1, c2), lambda i: (i, 0, 0)),
            pl.BlockSpec((None, 1, c2), lambda i: (i, 0, 0)),
        ),
        out_shape=(
            jax.ShapeDtypeStruct((m, c2), COMPUTE_DTYPE),
            jax.ShapeDtypeStruct((n, 1, c2), jnp.float32),
            jax.ShapeDtypeStruct((n, 1, c2), jnp.float32),
        ),
        scratch_shapes=[
            pltpu.VMEM((apad_rows, c1), COMPUTE_DTYPE),      # height-padded act
            pltpu.VMEM((p, 9 * c1), COMPUTE_DTYPE),          # im2col patch slab
        ],
        compiler_params=_compiler_params(("parallel",)),
        cost_estimate=pl.CostEstimate(
            flops=2 * m * 9 * c1 * c2, transcendentals=0,
            bytes_accessed=2 * (m * c1 + m * c2 + 9 * c1 * c2)),
    )(h1, sc1, sh1, w2)
    sc2, sh2 = _fold_bn(jnp.sum(s2_steps, axis=0), jnp.sum(q2_steps, axis=0),
                        params["g2"], params["be2"], m)

    # --- K3: bn2+relu, conv3 (1x1), stats of h3 ------------------------------
    h3, s3_steps, q3_steps = pl.pallas_call(
        conv3_stats_kernel,
        grid=(grid_m,),
        in_specs=[
            pl.BlockSpec((tm, c2), lambda i: (i, 0)),
            pl.BlockSpec((1, c2), lambda i: (0, 0)),
            pl.BlockSpec((1, c2), lambda i: (0, 0)),
            pl.BlockSpec((c2, c3), lambda i: (0, 0)),
        ],
        out_specs=(
            pl.BlockSpec((tm, c3), lambda i: (i, 0)),
            pl.BlockSpec((None, 1, c3), lambda i: (i, 0, 0)),
            pl.BlockSpec((None, 1, c3), lambda i: (i, 0, 0)),
        ),
        out_shape=(
            jax.ShapeDtypeStruct((m, c3), COMPUTE_DTYPE),
            jax.ShapeDtypeStruct((grid_m, 1, c3), jnp.float32),
            jax.ShapeDtypeStruct((grid_m, 1, c3), jnp.float32),
        ),
        compiler_params=_compiler_params(("parallel",)),
        cost_estimate=pl.CostEstimate(
            flops=2 * m * c2 * c3, transcendentals=0,
            bytes_accessed=2 * (m * c2 + m * c3 + c2 * c3)),
    )(h2, sc2, sh2, w3)
    sc3, sh3 = _fold_bn(jnp.sum(s3_steps, axis=0), jnp.sum(q3_steps, axis=0),
                        params["g3"], params["be3"], m)

    # --- K4: bn3 + residual + relu -------------------------------------------
    out = pl.pallas_call(
        bn3_residual_kernel,
        grid=(grid_m,),
        in_specs=[
            pl.BlockSpec((tm, c3), lambda i: (i, 0)),
            pl.BlockSpec((tm, c3), lambda i: (i, 0)),
            pl.BlockSpec((1, c3), lambda i: (0, 0)),
            pl.BlockSpec((1, c3), lambda i: (0, 0)),
        ],
        out_specs=pl.BlockSpec((tm, c3), lambda i: (i, 0)),
        out_shape=jax.ShapeDtypeStruct((m, c3), jnp.float32),
        compiler_params=_compiler_params(("parallel",)),
        cost_estimate=pl.CostEstimate(
            flops=3 * m * c3, transcendentals=0,
            bytes_accessed=2 * m * c3 + 2 * m * c3 + 4 * m * c3),
    )(h3, x_flat, sc3, sh3)

    return out.reshape(n, hh, ww, c3).transpose(0, 3, 1, 2)


# --------------------------- parameters / reference ------------------------ #

def init_params(key, in_channel, outs):
    """Deterministic synthetic parameters (PyTorch shapes + kernel layouts)."""
    c1, c2, c3 = outs
    ks = jax.random.split(key, 12)
    w1_t = jax.random.normal(ks[0], (c1, in_channel, 1, 1), jnp.float32) * 0.1  # OIHW
    w2_t = jax.random.normal(ks[1], (c2, c1, 3, 3), jnp.float32) * 0.1
    w3_t = jax.random.normal(ks[2], (c3, c2, 1, 1), jnp.float32) * 0.1
    b1 = jax.random.normal(ks[3], (c1,), jnp.float32) * 0.1
    b2 = jax.random.normal(ks[4], (c2,), jnp.float32) * 0.1
    b3 = jax.random.normal(ks[5], (c3,), jnp.float32) * 0.1
    g1 = 1.0 + 0.1 * jax.random.normal(ks[6], (c1,), jnp.float32)
    g2 = 1.0 + 0.1 * jax.random.normal(ks[7], (c2,), jnp.float32)
    g3 = 1.0 + 0.1 * jax.random.normal(ks[8], (c3,), jnp.float32)
    be1 = 0.1 * jax.random.normal(ks[9], (c1,), jnp.float32)
    be2 = 0.1 * jax.random.normal(ks[10], (c2,), jnp.float32)
    be3 = 0.1 * jax.random.normal(ks[11], (c3,), jnp.float32)

    return {
        # PyTorch-layout copies (for the f32 reference implementation).
        "w1_t": w1_t, "w2_t": w2_t, "w3_t": w3_t,
        "b1v": b1, "b2v": b2, "b3v": b3,
        "g1v": g1, "g2v": g2, "g3v": g3,
        "be1v": be1, "be2v": be2, "be3v": be3,
        # Kernel-layout matrices (bf16 MXU inputs; conv biases dropped — they
        # are exactly cancelled by the training-mode BN mean subtraction).
        "w1": jnp.transpose(w1_t[:, :, 0, 0], (1, 0)).astype(COMPUTE_DTYPE),   # (Cin, C1)
        # (9*C1, C2), row block k = 3*kh + kw, matching the im2col patch layout.
        "w2": jnp.transpose(w2_t, (2, 3, 1, 0)).reshape(9 * c1, c2).astype(COMPUTE_DTYPE),
        "w3": jnp.transpose(w3_t[:, :, 0, 0], (1, 0)).astype(COMPUTE_DTYPE),   # (C2, C3)
        "g1": g1[None, :], "g2": g2[None, :], "g3": g3[None, :],
        "be1": be1[None, :], "be2": be2[None, :], "be3": be3[None, :],
    }


def reference_block(x, p):
    """Pure-JAX f32 reference matching the PyTorch forward (training-mode BN)."""
    prec = jax.lax.Precision.HIGHEST

    def conv(x, w, b, pad):
        y = jax.lax.conv_general_dilated(
            x, w, window_strides=(1, 1), padding=[(pad, pad), (pad, pad)],
            dimension_numbers=("NCHW", "OIHW", "NCHW"), precision=prec)
        return y + b[None, :, None, None]

    def bn(x, g, b):
        mu = jnp.mean(x, axis=(0, 2, 3), keepdims=True)
        var = jnp.mean((x - mu) ** 2, axis=(0, 2, 3), keepdims=True)
        return ((x - mu) * jax.lax.rsqrt(var + EPS) * g[None, :, None, None]
                + b[None, :, None, None])

    out = jax.nn.relu(bn(conv(x, p["w1_t"], p["b1v"], 0), p["g1v"], p["be1v"]))
    out = jax.nn.relu(bn(conv(out, p["w2_t"], p["b2v"], 1), p["g2v"], p["be2v"]))
    out = bn(conv(out, p["w3_t"], p["b3v"], 0), p["g3v"], p["be3v"])
    return jax.nn.relu(out + x)


# ----------------------------------- main ----------------------------------- #

if __name__ == "__main__":
    # ResNet50BasicBlock(in_channel=128, outs=[128, 128, 128],
    #                    kernerl_size=[1, 3, 1], stride=[1, 1, 1], padding=[0, 1, 0])
    # Channel widths are multiples of 128 so every matmul/store is lane-dense;
    # stride 1 + in_channel == outs[2] keeps the identity residual `out + x`
    # shape-compatible, as in the module's intended usage.
    N, CIN, H, W = 4, 128, 16, 16
    OUTS = (128, 128, 128)

    key = jax.random.PRNGKey(0)
    kx, kp = jax.random.split(key)
    x = jax.random.normal(kx, (N, CIN, H, W), jnp.float32)
    params = init_params(kp, CIN, OUTS)

    fwd = jax.jit(functools.partial(resnet50_basic_block, params=params))
    out = jax.block_until_ready(fwd(x))

    ref = jax.block_until_ready(reference_block(x, params))
    # bf16 MXU inputs / bf16 HBM activations vs. an f32 HIGHEST-precision
    # reference -> loosened tolerance (structural bugs would be O(1) off).
    np.testing.assert_allclose(np.asarray(out), np.asarray(ref),
                               atol=1e-1, rtol=1e-1)

    print("KERNEL_OK")
</pallas_src>

<mosaic_0001>
module attributes {stable_mosaic.version = 11 : i64} {
  func.func @conv1_stats_kernel(%arg0: i32, %arg1: memref<512x128xbf16, #tpu.memory_space<vmem>>, %arg2: memref<128x128xbf16, #tpu.memory_space<vmem>>, %arg3: memref<512x128xbf16, #tpu.memory_space<vmem>>, %arg4: memref<1x1x128xf32, #tpu.memory_space<vmem>>, %arg5: memref<1x1x128xf32, #tpu.memory_space<vmem>>) attributes {dimension_semantics = [#tpu.dimension_semantics<parallel>], iteration_bounds = array<i64: 2>, scalar_prefetch = 0 : i64, scratch_operands = 0 : i64, tpu.core_type = #tpu.core_type<tc>, window_params = [{transform_indices = @transform_0, window_bounds = array<i64: 512, 128>}, {pipeline_mode = #tpu.pipeline_mode<synchronous>, transform_indices = @transform_1, window_bounds = array<i64: 128, 128>}, {transform_indices = @transform_2, window_bounds = array<i64: 512, 128>}, {transform_indices = @transform_3, window_bounds = array<i64: 1, 1, 128>}, {transform_indices = @transform_4, window_bounds = array<i64: 1, 1, 128>}]} {
    %c0 = arith.constant 0 : index
    %c0_0 = arith.constant 0 : index
    %0 = vector.load %arg1[%c0, %c0_0] : memref<512x128xbf16, #tpu.memory_space<vmem>>, vector<512x128xbf16>
    %c0_1 = arith.constant 0 : index
    %c0_2 = arith.constant 0 : index
    %1 = vector.load %arg2[%c0_1, %c0_2] : memref<128x128xbf16, #tpu.memory_space<vmem>>, vector<128x128xbf16>
    %cst = arith.constant dense<0.000000e+00> : vector<512x128xf32>
    %2 = tpu.matmul %0, %1, %cst {dimension_numbers = #tpu.dot_dimension_numbers<[1], [0], [0], [1], [0, 0, 1, 1], [], []>} : vector<512x128xbf16>, vector<128x128xbf16>, vector<512x128xf32> -> vector<512x128xf32>
    %3 = arith.truncf %2 : vector<512x128xf32> to vector<512x128xbf16>
    %c0_3 = arith.constant 0 : index
    %c0_4 = arith.constant 0 : index
    %4 = vector.load %arg3[%c0_3, %c0_4] : memref<512x128xbf16, #tpu.memory_space<vmem>>, vector<512x128xbf16>
    tpu.vector_store %arg3[%c0_3, %c0_4], %3 {strides = array<i32>} : memref<512x128xbf16, #tpu.memory_space<vmem>>, vector<512x128xbf16>,
    %cst_5 = arith.constant dense<0.000000e+00> : vector<128xf32>
    %5 = vector.multi_reduction <add>, %2, %cst_5 [0] : vector<512x128xf32> to vector<128xf32>
    %6 = vector.shape_cast %5 : vector<128xf32> to vector<1x128xf32>
    %c0_6 = arith.constant 0 : index
    %c0_7 = arith.constant 0 : index
    %c0_8 = arith.constant 0 : index
    %7 = vector.load %arg4[%c0_6, %c0_7, %c0_8] : memref<1x1x128xf32, #tpu.memory_space<vmem>>, vector<1x1x128xf32>
    %8 = vector.shape_cast %7 : vector<1x1x128xf32> to vector<1x128xf32>
    %9 = vector.shape_cast %6 : vector<1x128xf32> to vector<1x1x128xf32>
    tpu.vector_store %arg4[%c0_6, %c0_7, %c0_8], %9 {strides = array<i32>} : memref<1x1x128xf32, #tpu.memory_space<vmem>>, vector<1x1x128xf32>,
    %10 = arith.mulf %2, %2 : vector<512x128xf32>
    %cst_9 = arith.constant dense<0.000000e+00> : vector<128xf32>
    %11 = vector.multi_reduction <add>, %10, %cst_9 [0] : vector<512x128xf32> to vector<128xf32>
    %12 = vector.shape_cast %11 : vector<128xf32> to vector<1x128xf32>
    %c0_10 = arith.constant 0 : index
    %c0_11 = arith.constant 0 : index
    %c0_12 = arith.constant 0 : index
    %13 = vector.load %arg5[%c0_10, %c0_11, %c0_12] : memref<1x1x128xf32, #tpu.memory_space<vmem>>, vector<1x1x128xf32>
    %14 = vector.shape_cast %13 : vector<1x1x128xf32> to vector<1x128xf32>
    %15 = vector.shape_cast %12 : vector<1x128xf32> to vector<1x1x128xf32>
    tpu.vector_store %arg5[%c0_10, %c0_11, %c0_12], %15 {strides = array<i32>} : memref<1x1x128xf32, #tpu.memory_space<vmem>>, vector<1x1x128xf32>,
    return
  }
  func.func @transform_0(%arg0: i32) -> (i32, i32) {
    %c0_i32 = arith.constant 0 : i32
    %c0_i32_0 = arith.constant 0 : i32
    return %arg0, %c0_i32 : i32, i32
  }
  func.func @transform_1(%arg0: i32) -> (i32, i32) {
    %c0_i32 = arith.constant 0 : i32
    %c0_i32_0 = arith.constant 0 : i32
    %c0_i32_1 = arith.constant 0 : i32
    return %c0_i32, %c0_i32_0 : i32, i32
  }
  func.func @transform_2(%arg0: i32) -> (i32, i32) {
    %c0_i32 = arith.constant 0 : i32
    %c0_i32_0 = arith.constant 0 : i32
    return %arg0, %c0_i32 : i32, i32
  }
  func.func @transform_3(%arg0: i32) -> (i32, i32, i32) {
    %c0_i32 = arith.constant 0 : i32
    %c0_i32_0 = arith.constant 0 : i32
    %c0_i32_1 = arith.constant 0 : i32
    return %arg0, %c0_i32, %c0_i32_0 : i32, i32, i32
  }
  func.func @transform_4(%arg0: i32) -> (i32, i32, i32) {
    %c0_i32 = arith.constant 0 : i32
    %c0_i32_0 = arith.constant 0 : i32
    %c0_i32_1 = arith.constant 0 : i32
    return %arg0, %c0_i32, %c0_i32_0 : i32, i32, i32
  }
}

module attributes {stable_mosaic.version = 11 : i64} {
  func.func @conv2_stats_kernel(%arg0: i32, %arg1: memref<256x128xbf16, #tpu.memory_space<vmem>>, %arg2: memref<1x128xf32, #tpu.memory_space<vmem>>, %arg3: memref<1x128xf32, #tpu.memory_space<vmem>>, %arg4: memref<1152x128xbf16, #tpu.memory_space<vmem>>, %arg5: memref<256x128xbf16, #tpu.memory_space<vmem>>, %arg6: memref<1x1x128xf32, #tpu.memory_space<vmem>>, %arg7: memref<1x1x128xf32, #tpu.memory_space<vmem>>, %arg8: memref<304x128xbf16, #tpu.memory_space<vmem>>, %arg9: memref<256x1152xbf16, #tpu.memory_space<vmem>>) attributes {dimension_semantics = [#tpu.dimension_semantics<parallel>], iteration_bounds = array<i64: 4>, scalar_prefetch = 0 : i64, scratch_operands = 2 : i64, tpu.core_type = #tpu.core_type<tc>, window_params = [{transform_indices = @transform_0, window_bounds = array<i64: 256, 128>}, {pipeline_mode = #tpu.pipeline_mode<synchronous>, transform_indices = @transform_1, window_bounds = array<i64: 1, 128>}, {pipeline_mode = #tpu.pipeline_mode<synchronous>, transform_indices = @transform_2, window_bounds = array<i64: 1, 128>}, {pipeline_mode = #tpu.pipeline_mode<synchronous>, transform_indices = @transform_3, window_bounds = array<i64: 1152, 128>}, {transform_indices = @transform_4, window_bounds = array<i64: 256, 128>}, {transform_indices = @transform_5, window_bounds = array<i64: 1, 1, 128>}, {transform_indices = @transform_6, window_bounds = array<i64: 1, 1, 128>}]} {
    %cst = arith.constant 0.000000e+00 : bf16
    %0 = vector.broadcast %cst : bf16 to vector<24x128xbf16>
    %c0 = arith.constant 0 : index
    %c0_0 = arith.constant 0 : index
    %1 = vector.load %arg8[%c0, %c0_0] : memref<304x128xbf16, #tpu.memory_space<vmem>>, vector<24x128xbf16>
    tpu.vector_store %arg8[%c0, %c0_0], %0 {strides = array<i32>} : memref<304x128xbf16, #tpu.memory_space<vmem>>, vector<24x128xbf16>,
    %cst_1 = arith.constant 0.000000e+00 : bf16
    %2 = vector.broadcast %cst_1 : bf16 to vector<24x128xbf16>
    %c280 = arith.constant 280 : index
    %c0_2 = arith.constant 0 : index
    %3 = vector.load %arg8[%c280, %c0_2] : memref<304x128xbf16, #tpu.memory_space<vmem>>, vector<24x128xbf16>
    tpu.vector_store %arg8[%c280, %c0_2], %2 {strides = array<i32>} : memref<304x128xbf16, #tpu.memory_space<vmem>>, vector<24x128xbf16>,
    %c0_3 = arith.constant 0 : index
    %c0_4 = arith.constant 0 : index
    %4 = vector.load %arg1[%c0_3, %c0_4] : memref<256x128xbf16, #tpu.memory_space<vmem>>, vector<256x128xbf16>
    %5 = arith.extf %4 : vector<256x128xbf16> to vector<256x128xf32>
    %c0_5 = arith.constant 0 : index
    %c0_6 = arith.constant 0 : index
    %6 = vector.load %arg2[%c0_5, %c0_6] : memref<1x128xf32, #tpu.memory_space<vmem>>, vector<1x128xf32>
    %7 = vector.broadcast %6 : vector<1x128xf32> to vector<256x128xf32>
    %8 = arith.mulf %5, %7 : vector<256x128xf32>
    %c0_7 = arith.constant 0 : index
    %c0_8 = arith.constant 0 : index
    %9 = vector.load %arg3[%c0_7, %c0_8] : memref<1x128xf32, #tpu.memory_space<vmem>>, vector<1x128xf32>
    %10 = vector.broadcast %9 : vector<1x128xf32> to vector<256x128xf32>
    %11 = arith.addf %8, %10 : vector<256x128xf32>
    %cst_9 = arith.constant 0.000000e+00 : f32
    %12 = vector.broadcast %cst_9 : f32 to vector<256x128xf32>
    %13 = arith.maximumf %11, %12 : vector<256x128xf32>
    %14 = arith.truncf %13 : vector<256x128xf32> to vector<256x128xbf16>
    %c24 = arith.constant 24 : index
    %c0_10 = arith.constant 0 : index
    %15 = vector.load %arg8[%c24, %c0_10] : memref<304x128xbf16, #tpu.memory_space<vmem>>, vector<256x128xbf16>
    tpu.vector_store %arg8[%c24, %c0_10], %14 {strides = array<i32>} : memref<304x128xbf16, #tpu.memory_space<vmem>>, vector<256x128xbf16>,
    %16 = tpu.iota {dimensions = array<i32: 0>} : vector<256x1xi32>
    %c16_i32 = arith.constant 16 : i32
    %c0_i32 = arith.constant 0 : i32
    %17 = arith.cmpi eq, %c16_i32, %c0_i32 : i32
    %c1_i32 = arith.constant 1 : i32
    %18 = arith.select %17, %c1_i32, %c16_i32 : i32
    %19 = vector.broadcast %18 : i32 to vector<256x1xi32>
    %20 = arith.remsi %16, %19 : vector<256x1xi32>
    %c0_i32_11 = arith.constant 0 : i32
    %21 = vector.broadcast %c0_i32_11 : i32 to vector<256x1xi32>
    %22 = arith.cmpi ne, %20, %21 : vector<256x1xi32>
    %c0_i32_12 = arith.constant 0 : i32
    %23 = vector.broadcast %c0_i32_12 : i32 to vector<256x1xi32>
    %24 = arith.cmpi slt, %20, %23 : vector<256x1xi32>
    %c0_i32_13 = arith.constant 0 : i32
    %25 = arith.cmpi slt, %18, %c0_i32_13 : i32
    %26 = vector.broadcast %25 : i1 to vector<256x1xi1>
    %27 = vector.broadcast %26 : vector<256x1xi1> to vector<256x1xi1>
    %28 = arith.xori %24, %27 : vector<256x1xi1>
    %29 = arith.andi %28, %22 : vector<256x1xi1>
    %30 = vector.broadcast %18 : i32 to vector<256x1xi32>
    %31 = arith.addi %20, %30 : vector<256x1xi32>
    %32 = arith.select %29, %31, %20 : vector<256x1xi1>, vector<256x1xi32>
    %c0_i32_14 = arith.constant 0 : i32
    %33 = vector.broadcast %c0_i32_14 : i32 to vector<256x1xi32>
    %34 = arith.cmpi ne, %32, %33 : vector<256x1xi32>
    %c15_i32 = arith.constant 15 : i32
    %35 = vector.broadcast %c15_i32 : i32 to vector<256x1xi32>
    %36 = arith.cmpi ne, %32, %35 : vector<256x1xi32>
    %c7 = arith.constant 7 : index
    %c0_15 = arith.constant 0 : index
    %37 = vector.load %arg8[%c7, %c0_15] : memref<304x128xbf16, #tpu.memory_space<vmem>>, vector<256x128xbf16>
    %c0_i32_16 = arith.constant 0 : i32
    %38 = arith.sitofp %c0_i32_16 : i32 to bf16
    %39 = vector.shape_cast %34 : vector<256x1xi1> to vector<256x1xi1>
    %40 = vector.broadcast %39 : vector<256x1xi1> to vector<256x128xi1>
    %41 = vector.broadcast %38 : bf16 to vector<256x128xbf16>
    %42 = arith.select %40, %37, %41 : vector<256x128xi1>, vector<256x128xbf16>
    %c0_17 = arith.constant 0 : index
    %c0_18 = arith.constant 0 : index
    %43 = vector.load %arg9[%c0_17, %c0_18] : memref<256x1152xbf16, #tpu.memory_space<vmem>>, vector<256x128xbf16>
    tpu.vector_store %arg9[%c0_17, %c0_18], %42 {strides = array<i32>} : memref<256x1152xbf16, #tpu.memory_space<vmem>>, vector<256x128xbf16>,
    %c8 = arith.constant 8 : index
    %c0_19 = arith.constant 0 : index
    %44 = vector.load %arg8[%c8, %c0_19] : memref<304x128xbf16, #tpu.memory_space<vmem>>, vector<256x128xbf16>
    %c0_20 = arith.constant 0 : index
    %c128 = arith.constant 128 : index
    %45 = vector.load %arg9[%c0_20, %c128] : memref<256x1152xbf16, #tpu.memory_space<vmem>>, vector<256x128xbf16>
    tpu.vector_store %arg9[%c0_20, %c128], %44 {strides = array<i32>} : memref<256x1152xbf16, #tpu.memory_space<vmem>>, vector<256x128xbf16>,
    %c9 = arith.constant 9 : index
    %c0_21 = arith.constant 0 : index
    %46 = vector.load %arg8[%c9, %c0_21] : memref<304x128xbf16, #tpu.memory_space<vmem>>, vector<256x128xbf16>
    %c0_i32_22 = arith.constant 0 : i32
    %47 = arith.sitofp %c0_i32_22 : i32 to bf16
    %48 = vector.shape_cast %36 : vector<256x1xi1> to vector<256x1xi1>
    %49 = vector.broadcast %48 : vector<256x1xi1> to vector<256x128xi1>
    %50 = vector.broadcast %47 : bf16 to vector<256x128xbf16>
    %51 = arith.select %49, %46, %50 : vector<256x128xi1>, vector<256x128xbf16>
    %c0_23 = arith.constant 0 : index
    %c256 = arith.constant 256 : index
    %52 = vector.load %arg9[%c0_23, %c256] : memref<256x1152xbf16, #tpu.memory_space<vmem>>, vector<256x128xbf16>
    tpu.vector_store %arg9[%c0_23, %c256], %51 {strides = array<i32>} : memref<256x1152xbf16, #tpu.memory_space<vmem>>, vector<256x128xbf16>,
    %c23 = arith.constant 23 : index
    %c0_24 = arith.constant 0 : index
    %53 = vector.load %arg8[%c23, %c0_24] : memref<304x128xbf16, #tpu.memory_space<vmem>>, vector<256x128xbf16>
    %c0_i32_25 = arith.constant 0 : i32
    %54 = arith.sitofp %c0_i32_25 : i32 to bf16
    %55 = vector.shape_cast %34 : vector<256x1xi1> to vector<256x1xi1>
    %56 = vector.broadcast %55 : vector<256x1xi1> to vector<256x128xi1>
    %57 = vector.broadcast %54 : bf16 to vector<256x128xbf16>
    %58 = arith.select %56, %53, %57 : vector<256x128xi1>, vector<256x128xbf16>
    %c0_26 = arith.constant 0 : index
    %c384 = arith.constant 384 : index
    %59 = vector.load %arg9[%c0_26, %c384] : memref<256x1152xbf16, #tpu.memory_space<vmem>>, vector<256x128xbf16>
    tpu.vector_store %arg9[%c0_26, %c384], %58 {strides = array<i32>} : memref<256x1152xbf16, #tpu.memory_space<vmem>>, vector<256x128xbf16>,
    %c24_27 = arith.constant 24 : index
    %c0_28 = arith.constant 0 : index
    %60 = vector.load %arg8[%c24_27, %c0_28] : memref<304x128xbf16, #tpu.memory_space<vmem>>, vector<256x128xbf16>
    %c0_29 = arith.constant 0 : index
    %c512 = arith.constant 512 : index
    %61 = vector.load %arg9[%c0_29, %c512] : memref<256x1152xbf16, #tpu.memory_space<vmem>>, vector<256x128xbf16>
    tpu.vector_store %arg9[%c0_29, %c512], %60 {strides = array<i32>} : memref<256x1152xbf16, #tpu.memory_space<vmem>>, vector<256x128xbf16>,
    %c25 = arith.constant 25 : index
    %c0_30 = arith.constant 0 : index
    %62 = vector.load %arg8[%c25, %c0_30] : memref<304x128xbf16, #tpu.memory_space<vmem>>, vector<256x128xbf16>
    %c0_i32_31 = arith.constant 0 : i32
    %63 = arith.sitofp %c0_i32_31 : i32 to bf16
    %64 = vector.shape_cast %36 : vector<256x1xi1> to vector<256x1xi1>
    %65 = vector.broadcast %64 : vector<256x1xi1> to vector<256x128xi1>
    %66 = vector.broadcast %63 : bf16 to vector<256x128xbf16>
    %67 = arith.select %65, %62, %66 : vector<256x128xi1>, vector<256x128xbf16>
    %c0_32 = arith.constant 0 : index
    %c640 = arith.constant 640 : index
    %68 = vector.load %arg9[%c0_32, %c640] : memref<256x1152xbf16, #tpu.memory_space<vmem>>, vector<256x128xbf16>
    tpu.vector_store %arg9[%c0_32, %c640], %67 {strides = array<i32>} : memref<256x1152xbf16, #tpu.memory_space<vmem>>, vector<256x128xbf16>,
    %c39 = arith.constant 39 : index
    %c0_33 = arith.constant 0 : index
    %69 = vector.load %arg8[%c39, %c0_33] : memref<304x128xbf16, #tpu.memory_space<vmem>>, vector<256x128xbf16>
    %c0_i32_34 = arith.constant 0 : i32
    %70 = arith.sitofp %c0_i32_34 : i32 to bf16
    %71 = vector.shape_cast %34 : vector<256x1xi1> to vector<256x1xi1>
    %72 = vector.broadcast %71 : vector<256x1xi1> to vector<256x128xi1>
    %73 = vector.broadcast %70 : bf16 to vector<256x128xbf16>
    %74 = arith.select %72, %69, %73 : vector<256x128xi1>, vector<256x128xbf16>
    %c0_35 = arith.constant 0 : index
    %c768 = arith.constant 768 : index
    %75 = vector.load %arg9[%c0_35, %c768] : memref<256x1152xbf16, #tpu.memory_space<vmem>>, vector<256x128xbf16>
    tpu.vector_store %arg9[%c0_35, %c768], %74 {strides = array<i32>} : memref<256x1152xbf16, #tpu.memory_space<vmem>>, vector<256x128xbf16>,
    %c40 = arith.constant 40 : index
    %c0_36 = arith.constant 0 : index
    %76 = vector.load %arg8[%c40, %c0_36] : memref<304x128xbf16, #tpu.memory_space<vmem>>, vector<256x128xbf16>
    %c0_37 = arith.constant 0 : index
    %c896 = arith.constant 896 : index
    %77 = vector.load %arg9[%c0_37, %c896] : memref<256x1152xbf16, #tpu.memory_space<vmem>>, vector<256x128xbf16>
    tpu.vector_store %arg9[%c0_37, %c896], %76 {strides = array<i32>} : memref<256x1152xbf16, #tpu.memory_space<vmem>>, vector<256x128xbf16>,
    %c41 = arith.constant 41 : index
    %c0_38 = arith.constant 0 : index
    %78 = vector.load %arg8[%c41, %c0_38] : memref<304x128xbf16, #tpu.memory_space<vmem>>, vector<256x128xbf16>
    %c0_i32_39 = arith.constant 0 : i32
    %79 = arith.sitofp %c0_i32_39 : i32 to bf16
    %80 = vector.shape_cast %36 : vector<256x1xi1> to vector<256x1xi1>
    %81 = vector.broadcast %80 : vector<256x1xi1> to vector<256x128xi1>
    %82 = vector.broadcast %79 : bf16 to vector<256x128xbf16>
    %83 = arith.select %81, %78, %82 : vector<256x128xi1>, vector<256x128xbf16>
    %c0_40 = arith.constant 0 : index
    %c1024 = arith.constant 1024 : index
    %84 = vector.load %arg9[%c0_40, %c1024] : memref<256x1152xbf16, #tpu.memory_space<vmem>>, vector<256x128xbf16>
    tpu.vector_store %arg9[%c0_40, %c1024], %83 {strides = array<i32>} : memref<256x1152xbf16, #tpu.memory_space<vmem>>, vector<256x128xbf16>,
    %c0_41 = arith.constant 0 : index
    %c0_42 = arith.constant 0 : index
    %85 = vector.load %arg9[%c0_41, %c0_42] : memref<256x1152xbf16, #tpu.memory_space<vmem>>, vector<256x1152xbf16>
    %c0_43 = arith.constant 0 : index
    %c0_44 = arith.constant 0 : index
    %86 = vector.load %arg4[%c0_43, %c0_44] : memref<1152x128xbf16, #tpu.memory_space<vmem>>, vector<1152x128xbf16>
    %cst_45 = arith.constant dense<0.000000e+00> : vector<256x128xf32>
    %87 = tpu.matmul %85, %86, %cst_45 {dimension_numbers = #tpu.dot_dimension_numbers<[1], [0], [0], [1], [0, 0, 1, 1], [], []>} : vector<256x1152xbf16>, vector<1152x128xbf16>, vector<256x128xf32> -> vector<256x128xf32>
    %88 = arith.truncf %87 : vector<256x128xf32> to vector<256x128xbf16>
    %c0_46 = arith.constant 0 : index
    %c0_47 = arith.constant 0 : index
    %89 = vector.load %arg5[%c0_46, %c0_47] : memref<256x128xbf16, #tpu.memory_space<vmem>>, vector<256x128xbf16>
    tpu.vector_store %arg5[%c0_46, %c0_47], %88 {strides = array<i32>} : memref<256x128xbf16, #tpu.memory_space<vmem>>, vector<256x128xbf16>,
    %cst_48 = arith.constant dense<0.000000e+00> : vector<128xf32>
    %90 = vector.multi_reduction <add>, %87, %cst_48 [0] : vector<256x128xf32> to vector<128xf32>
    %91 = vector.shape_cast %90 : vector<128xf32> to vector<1x128xf32>
    %c0_49 = arith.constant 0 : index
    %c0_50 = arith.constant 0 : index
    %c0_51 = arith.constant 0 : index
    %92 = vector.load %arg6[%c0_49, %c0_50, %c0_51] : memref<1x1x128xf32, #tpu.memory_space<vmem>>, vector<1x1x128xf32>
    %93 = vector.shape_cast %92 : vector<1x1x128xf32> to vector<1x128xf32>
    %94 = vector.shape_cast %91 : vector<1x128xf32> to vector<1x1x128xf32>
    tpu.vector_store %arg6[%c0_49, %c0_50, %c0_51], %94 {strides = array<i32>} : memref<1x1x128xf32, #tpu.memory_space<vmem>>, vector<1x1x128xf32>,
    %95 = arith.mulf %87, %87 : vector<256x128xf32>
    %cst_52 = arith.constant dense<0.000000e+00> : vector<128xf32>
    %96 = vector.multi_reduction <add>, %95, %cst_52 [0] : vector<256x128xf32> to vector<128xf32>
    %97 = vector.shape_cast %96 : vector<128xf32> to vector<1x128xf32>
    %c0_53 = arith.constant 0 : index
    %c0_54 = arith.constant 0 : index
    %c0_55 = arith.constant 0 : index
    %98 = vector.load %arg7[%c0_53, %c0_54, %c0_55] : memref<1x1x128xf32, #tpu.memory_space<vmem>>, vector<1x1x128xf32>
    %99 = vector.shape_cast %98 : vector<1x1x128xf32> to vector<1x128xf32>
    %100 = vector.shape_cast %97 : vector<1x128xf32> to vector<1x1x128xf32>
    tpu.vector_store %arg7[%c0_53, %c0_54, %c0_55], %100 {strides = array<i32>} : memref<1x1x128xf32, #tpu.memory_space<vmem>>, vector<1x1x128xf32>,
    return
  }
  func.func @transform_0(%arg0: i32) -> (i32, i32) {
    %c0_i32 = arith.constant 0 : i32
    %c0_i32_0 = arith.constant 0 : i32
    return %arg0, %c0_i32 : i32, i32
  }
  func.func @transform_1(%arg0: i32) -> (i32, i32) {
    %c0_i32 = arith.constant 0 : i32
    %c0_i32_0 = arith.constant 0 : i32
    %c0_i32_1 = arith.constant 0 : i32
    return %c0_i32, %c0_i32_0 : i32, i32
  }
  func.func @transform_2(%arg0: i32) -> (i32, i32) {
    %c0_i32 = arith.constant 0 : i32
    %c0_i32_0 = arith.constant 0 : i32
    %c0_i32_1 = arith.constant 0 : i32
    return %c0_i32, %c0_i32_0 : i32, i32
  }
  func.func @transform_3(%arg0: i32) -> (i32, i32) {
    %c0_i32 = arith.constant 0 : i32
    %c0_i32_0 = arith.constant 0 : i32
    %c0_i32_1 = arith.constant 0 : i32
    return %c0_i32, %c0_i32_0 : i32, i32
  }
  func.func @transform_4(%arg0: i32) -> (i32, i32) {
    %c0_i32 = arith.constant 0 : i32
    %c0_i32_0 = arith.constant 0 : i32
    return %arg0, %c0_i32 : i32, i32
  }
  func.func @transform_5(%arg0: i32) -> (i32, i32, i32) {
    %c0_i32 = arith.constant 0 : i32
    %c0_i32_0 = arith.constant 0 : i32
    %c0_i32_1 = arith.constant 0 : i32
    return %arg0, %c0_i32, %c0_i32_0 : i32, i32, i32
  }
  func.func @transform_6(%arg0: i32) -> (i32, i32, i32) {
    %c0_i32 = arith.constant 0 : i32
    %c0_i32_0 = arith.constant 0 : i32
    %c0_i32_1 = arith.constant 0 : i32
    return %arg0, %c0_i32, %c0_i32_0 : i32, i32, i32
  }
}

module attributes {stable_mosaic.version = 11 : i64} {
  func.func @conv3_stats_kernel(%arg0: i32, %arg1: memref<512x128xbf16, #tpu.memory_space<vmem>>, %arg2: memref<1x128xf32, #tpu.memory_space<vmem>>, %arg3: memref<1x128xf32, #tpu.memory_space<vmem>>, %arg4: memref<128x128xbf16, #tpu.memory_space<vmem>>, %arg5: memref<512x128xbf16, #tpu.memory_space<vmem>>, %arg6: memref<1x1x128xf32, #tpu.memory_space<vmem>>, %arg7: memref<1x1x128xf32, #tpu.memory_space<vmem>>) attributes {dimension_semantics = [#tpu.dimension_semantics<parallel>], iteration_bounds = array<i64: 2>, scalar_prefetch = 0 : i64, scratch_operands = 0 : i64, tpu.core_type = #tpu.core_type<tc>, window_params = [{transform_indices = @transform_0, window_bounds = array<i64: 512, 128>}, {pipeline_mode = #tpu.pipeline_mode<synchronous>, transform_indices = @transform_1, window_bounds = array<i64: 1, 128>}, {pipeline_mode = #tpu.pipeline_mode<synchronous>, transform_indices = @transform_2, window_bounds = array<i64: 1, 128>}, {pipeline_mode = #tpu.pipeline_mode<synchronous>, transform_indices = @transform_3, window_bounds = array<i64: 128, 128>}, {transform_indices = @transform_4, window_bounds = array<i64: 512, 128>}, {transform_indices = @transform_5, window_bounds = array<i64: 1, 1, 128>}, {transform_indices = @transform_6, window_bounds = array<i64: 1, 1, 128>}]} {
    %c0 = arith.constant 0 : index
    %c0_0 = arith.constant 0 : index
    %0 = vector.load %arg1[%c0, %c0_0] : memref<512x128xbf16, #tpu.memory_space<vmem>>, vector<512x128xbf16>
    %1 = arith.extf %0 : vector<512x128xbf16> to vector<512x128xf32>
    %c0_1 = arith.constant 0 : index
    %c0_2 = arith.constant 0 : index
    %2 = vector.load %arg2[%c0_1, %c0_2] : memref<1x128xf32, #tpu.memory_space<vmem>>, vector<1x128xf32>
    %3 = vector.broadcast %2 : vector<1x128xf32> to vector<512x128xf32>
    %4 = arith.mulf %1, %3 : vector<512x128xf32>
    %c0_3 = arith.constant 0 : index
    %c0_4 = arith.constant 0 : index
    %5 = vector.load %arg3[%c0_3, %c0_4] : memref<1x128xf32, #tpu.memory_space<vmem>>, vector<1x128xf32>
    %6 = vector.broadcast %5 : vector<1x128xf32> to vector<512x128xf32>
    %7 = arith.addf %4, %6 : vector<512x128xf32>
    %cst = arith.constant 0.000000e+00 : f32
    %8 = vector.broadcast %cst : f32 to vector<512x128xf32>
    %9 = arith.maximumf %7, %8 : vector<512x128xf32>
    %10 = arith.truncf %9 : vector<512x128xf32> to vector<512x128xbf16>
    %c0_5 = arith.constant 0 : index
    %c0_6 = arith.constant 0 : index
    %11 = vector.load %arg4[%c0_5, %c0_6] : memref<128x128xbf16, #tpu.memory_space<vmem>>, vector<128x128xbf16>
    %cst_7 = arith.constant dense<0.000000e+00> : vector<512x128xf32>
    %12 = tpu.matmul %10, %11, %cst_7 {dimension_numbers = #tpu.dot_dimension_numbers<[1], [0], [0], [1], [0, 0, 1, 1], [], []>} : vector<512x128xbf16>, vector<128x128xbf16>, vector<512x128xf32> -> vector<512x128xf32>
    %13 = arith.truncf %12 : vector<512x128xf32> to vector<512x128xbf16>
    %c0_8 = arith.constant 0 : index
    %c0_9 = arith.constant 0 : index
    %14 = vector.load %arg5[%c0_8, %c0_9] : memref<512x128xbf16, #tpu.memory_space<vmem>>, vector<512x128xbf16>
    tpu.vector_store %arg5[%c0_8, %c0_9], %13 {strides = array<i32>} : memref<512x128xbf16, #tpu.memory_space<vmem>>, vector<512x128xbf16>,
    %cst_10 = arith.constant dense<0.000000e+00> : vector<128xf32>
    %15 = vector.multi_reduction <add>, %12, %cst_10 [0] : vector<512x128xf32> to vector<128xf32>
    %16 = vector.shape_cast %15 : vector<128xf32> to vector<1x128xf32>
    %c0_11 = arith.constant 0 : index
    %c0_12 = arith.constant 0 : index
    %c0_13 = arith.constant 0 : index
    %17 = vector.load %arg6[%c0_11, %c0_12, %c0_13] : memref<1x1x128xf32, #tpu.memory_space<vmem>>, vector<1x1x128xf32>
    %18 = vector.shape_cast %17 : vector<1x1x128xf32> to vector<1x128xf32>
    %19 = vector.shape_cast %16 : vector<1x128xf32> to vector<1x1x128xf32>
    tpu.vector_store %arg6[%c0_11, %c0_12, %c0_13], %19 {strides = array<i32>} : memref<1x1x128xf32, #tpu.memory_space<vmem>>, vector<1x1x128xf32>,
    %20 = arith.mulf %12, %12 : vector<512x128xf32>
    %cst_14 = arith.constant dense<0.000000e+00> : vector<128xf32>
    %21 = vector.multi_reduction <add>, %20, %cst_14 [0] : vector<512x128xf32> to vector<128xf32>
    %22 = vector.shape_cast %21 : vector<128xf32> to vector<1x128xf32>
    %c0_15 = arith.constant 0 : index
    %c0_16 = arith.constant 0 : index
    %c0_17 = arith.constant 0 : index
    %23 = vector.load %arg7[%c0_15, %c0_16, %c0_17] : memref<1x1x128xf32, #tpu.memory_space<vmem>>, vector<1x1x128xf32>
    %24 = vector.shape_cast %23 : vector<1x1x128xf32> to vector<1x128xf32>
    %25 = vector.shape_cast %22 : vector<1x128xf32> to vector<1x1x128xf32>
    tpu.vector_store %arg7[%c0_15, %c0_16, %c0_17], %25 {strides = array<i32>} : memref<1x1x128xf32, #tpu.memory_space<vmem>>, vector<1x1x128xf32>,
    return
  }
  func.func @transform_0(%arg0: i32) -> (i32, i32) {
    %c0_i32 = arith.constant 0 : i32
    %c0_i32_0 = arith.constant 0 : i32
    return %arg0, %c0_i32 : i32, i32
  }
  func.func @transform_1(%arg0: i32) -> (i32, i32) {
    %c0_i32 = arith.constant 0 : i32
    %c0_i32_0 = arith.constant 0 : i32
    %c0_i32_1 = arith.constant 0 : i32
    return %c0_i32, %c0_i32_0 : i32, i32
  }
  func.func @transform_2(%arg0: i32) -> (i32, i32) {
    %c0_i32 = arith.constant 0 : i32
    %c0_i32_0 = arith.constant 0 : i32
    %c0_i32_1 = arith.constant 0 : i32
    return %c0_i32, %c0_i32_0 : i32, i32
  }
  func.func @transform_3(%arg0: i32) -> (i32, i32) {
    %c0_i32 = arith.constant 0 : i32
    %c0_i32_0 = arith.constant 0 : i32
    %c0_i32_1 = arith.constant 0 : i32
    return %c0_i32, %c0_i32_0 : i32, i32
  }
  func.func @transform_4(%arg0: i32) -> (i32, i32) {
    %c0_i32 = arith.constant 0 : i32
    %c0_i32_0 = arith.constant 0 : i32
    return %arg0, %c0_i32 : i32, i32
  }
  func.func @transform_5(%arg0: i32) -> (i32, i32, i32) {
    %c0_i32 = arith.constant 0 : i32
    %c0_i32_0 = arith.constant 0 : i32
    %c0_i32_1 = arith.constant 0 : i32
    return %arg0, %c0_i32, %c0_i32_0 : i32, i32, i32
  }
  func.func @transform_6(%arg0: i32) -> (i32, i32, i32) {
    %c0_i32 = arith.constant 0 : i32
    %c0_i32_0 = arith.constant 0 : i32
    %c0_i32_1 = arith.constant 0 : i32
    return %arg0, %c0_i32, %c0_i32_0 : i32, i32, i32
  }
}

module attributes {stable_mosaic.version = 11 : i64} {
  func.func @bn3_residual_kernel(%arg0: i32, %arg1: memref<512x128xbf16, #tpu.memory_space<vmem>>, %arg2: memref<512x128xbf16, #tpu.memory_space<vmem>>, %arg3: memref<1x128xf32, #tpu.memory_space<vmem>>, %arg4: memref<1x128xf32, #tpu.memory_space<vmem>>, %arg5: memref<512x128xf32, #tpu.memory_space<vmem>>) attributes {dimension_semantics = [#tpu.dimension_semantics<parallel>], iteration_bounds = array<i64: 2>, scalar_prefetch = 0 : i64, scratch_operands = 0 : i64, tpu.core_type = #tpu.core_type<tc>, window_params = [{transform_indices = @transform_0, window_bounds = array<i64: 512, 128>}, {transform_indices = @transform_1, window_bounds = array<i64: 512, 128>}, {pipeline_mode = #tpu.pipeline_mode<synchronous>, transform_indices = @transform_2, window_bounds = array<i64: 1, 128>}, {pipeline_mode = #tpu.pipeline_mode<synchronous>, transform_indices = @transform_3, window_bounds = array<i64: 1, 128>}, {transform_indices = @transform_4, window_bounds = array<i64: 512, 128>}]} {
    %c0 = arith.constant 0 : index
    %c0_0 = arith.constant 0 : index
    %0 = vector.load %arg1[%c0, %c0_0] : memref<512x128xbf16, #tpu.memory_space<vmem>>, vector<512x128xbf16>
    %1 = arith.extf %0 : vector<512x128xbf16> to vector<512x128xf32>
    %c0_1 = arith.constant 0 : index
    %c0_2 = arith.constant 0 : index
    %2 = vector.load %arg3[%c0_1, %c0_2] : memref<1x128xf32, #tpu.memory_space<vmem>>, vector<1x128xf32>
    %3 = vector.broadcast %2 : vector<1x128xf32> to vector<512x128xf32>
    %4 = arith.mulf %1, %3 : vector<512x128xf32>
    %c0_3 = arith.constant 0 : index
    %c0_4 = arith.constant 0 : index
    %5 = vector.load %arg4[%c0_3, %c0_4] : memref<1x128xf32, #tpu.memory_space<vmem>>, vector<1x128xf32>
    %6 = vector.broadcast %5 : vector<1x128xf32> to vector<512x128xf32>
    %7 = arith.addf %4, %6 : vector<512x128xf32>
    %c0_5 = arith.constant 0 : index
    %c0_6 = arith.constant 0 : index
    %8 = vector.load %arg2[%c0_5, %c0_6] : memref<512x128xbf16, #tpu.memory_space<vmem>>, vector<512x128xbf16>
    %9 = arith.extf %8 : vector<512x128xbf16> to vector<512x128xf32>
    %10 = arith.addf %7, %9 : vector<512x128xf32>
    %cst = arith.constant 0.000000e+00 : f32
    %11 = vector.broadcast %cst : f32 to vector<512x128xf32>
    %12 = arith.maximumf %10, %11 : vector<512x128xf32>
    %c0_7 = arith.constant 0 : index
    %c0_8 = arith.constant 0 : index
    %13 = vector.load %arg5[%c0_7, %c0_8] : memref<512x128xf32, #tpu.memory_space<vmem>>, vector<512x128xf32>
    tpu.vector_store %arg5[%c0_7, %c0_8], %12 {strides = array<i32>} : memref<512x128xf32, #tpu.memory_space<vmem>>, vector<512x128xf32>,
    return
  }
  func.func @transform_0(%arg0: i32) -> (i32, i32) {
    %c0_i32 = arith.constant 0 : i32
    %c0_i32_0 = arith.constant 0 : i32
    return %arg0, %c0_i32 : i32, i32
  }
  func.func @transform_1(%arg0: i32) -> (i32, i32) {
    %c0_i32 = arith.constant 0 : i32
    %c0_i32_0 = arith.constant 0 : i32
    return %arg0, %c0_i32 : i32, i32
  }
  func.func @transform_2(%arg0: i32) -> (i32, i32) {
    %c0_i32 = arith.constant 0 : i32
    %c0_i32_0 = arith.constant 0 : i32
    %c0_i32_1 = arith.constant 0 : i32
    return %c0_i32, %c0_i32_0 : i32, i32
  }
  func.func @transform_3(%arg0: i32) -> (i32, i32) {
    %c0_i32 = arith.constant 0 : i32
    %c0_i32_0 = arith.constant 0 : i32
    %c0_i32_1 = arith.constant 0 : i32
    return %c0_i32, %c0_i32_0 : i32, i32
  }
  func.func @transform_4(%arg0: i32) -> (i32, i32) {
    %c0_i32 = arith.constant 0 : i32
    %c0_i32_0 = arith.constant 0 : i32
    return %arg0, %c0_i32 : i32, i32
  }
}

</mosaic_0001>

<bundles_post_ra>
// kernel: resnet50_basic_block.4
= control target key start
LH: loop header
LB: loop body
LE: loop exit
PB: predicated region body
PF: predicated region fallthrough
CT: control target
= control target key end

     0   :  { %s2045_s15 = smov 0   ;;  %s2364_s0 = inlined_call_operand.vmem [shape: bf16[1024,128], index: 0, kind: input, shape index: {}]   ;;  %s2365_s1 = inlined_call_operand.vmem [shape: bf16[128,128], index: 1, kind: input, shape index: {}]   ;;  %s2366_s2 = inlined_call_operand.vmem [shape: bf16[1024,128], index: 2, kind: output, shape index: {0}]   ;;  %s2367_s3 = inlined_call_operand.vmem [shape: f32[2,1,128], index: 3, kind: output, shape index: {1}]   ;;  %s2368_s4 = inlined_call_operand.vmem [shape: f32[2,1,128], index: 4, kind: output, shape index: {2}]  }
   0x1 LB: > { %s2051_s16 = sadd.s32 4294967295, %s2018_s15   ;;  %p1462_p0 = scmp.ge.s32.totalorder %s2018_s15, 1  ;;  %s2018_s15 = sphi %s2045_s15, %s15_s15  }
   0x2   : > { %p168_p1 = scmp.lt.s32.totalorder %s2018_s15, 3 }
   0x4   : > { %p169_p2 = pnand %p1462_p0, %p168_p1 }
   0x5   : > { %s1463_s19 = sshll.u32 (!%p169_p2), %s2051_s16, 6  ;;  %p212_p4 = scmp.lt.s32.totalorder (!%p169_p2), %s2051_s16, 1 }
   0x6   : > { %172 = sbr.rel (%p169_p2) target bundleno = 384 (0x180), region = 28  ;;  %p201_p3 = scmp.lt.s32.totalorder (!%p169_p2), %s1463_s19, 127 }
   0xb   : > { %v1972_v0 = vld [vmem:[%s2365_s1 + $0x38] sm:$0xff]   ;;  %v1973_v1 = vld [vmem:[%s2365_s1 + $0x30] sm:$0xff]   ;;  %s2370_s19 = smov (!%p201_p3, %s1463_s19), 127  ;;  %v1974_v2 = vld [vmem:[%s2365_s1 + $0x28] sm:$0xff]   ;;  %s2372_s16 = smov (!%p212_p4, %s2051_s16), 1 }
   0xc   : > { %1868 = vmatprep.subr.bf16.mxu0 %v1972_v0  ;;  %1948 = vmatprep.subr.bf16.mxu1 %v1972_v0  ;;  %s1464_s24 = sshll.u32 %s2370_s19, 2  ;;  %v1975_v3 = vld [vmem:[%s2365_s1 + $0x20] sm:$0xff]   ;;  %v1976_v5 = vld [vmem:[%s2365_s1 + $0x18] sm:$0xff]   ;;  %v1977_v6 = vld [vmem:[%s2365_s1 + $0x10] sm:$0xff]   ;;  %s214_s19 = scalar_lea.vmem %s2367_s3, %s2372_s16 }
   0xd   : > { %1869 = vmatpush3.bf16.msra.mxu0 %v1972_v0  ;;  %1956 = vmatpush3.bf16.msra.mxu1 %v1972_v0  ;;  %s2073_s27 = scalar_lea.vmem %s2364_s0, %s1464_s24  ;;  %v1978_v7 = vld [vmem:[%s2365_s1 + $0x8] sm:$0xff]   ;;  %v1979_v8 = vld [vmem:[%s2365_s1] sm:$0xff]   ;;  %s2131_s14 = scalar_lea.vmem %s2366_s2, %s1464_s24 }
   0xe   : > { %1870 = vmatprep.subr.bf16.mxu0 %v1973_v1  ;;  %1949 = vmatprep.subr.bf16.mxu1 %v1973_v1  ;;  %v1980_v4 = vld [vmem:[%s2073_s27] sm:$0xff]   ;;  %v1981_v10 = vld [vmem:[%s2073_s27 + $0x8] sm:$0xff]   ;;  %v1982_v11 = vld [vmem:[%s2073_s27 + $0x10] sm:$0xff]   ;;  %s217_s22 = scalar_lea.vmem %s2368_s4, %s2372_s16 }
   0xf   : > { %1884 = vmatprep.mubr.bf16.mxu0 %v1980_v4  ;;  %v1996_v9 = vld [vmem:[%s2073_s27 + $0x80] sm:$0xff]   ;;  %v1997_v12 = vld [vmem:[%s2073_s27 + $0x88] sm:$0xff]   ;;  %v1998_v13 = vld [vmem:[%s2073_s27 + $0x90] sm:$0xff]  }
  0x10   : > { %1916 = vmatprep.mubr.bf16.mxu1 %v1996_v9  ;;  %v1983_v14 = vld [vmem:[%s2073_s27 + $0x18] sm:$0xff]   ;;  %v1984_v15 = vld [vmem:[%s2073_s27 + $0x20] sm:$0xff]   ;;  %v1985_v18 = vld [vmem:[%s2073_s27 + $0x28] sm:$0xff]  }
  0x11   : > { %1871 = vmatpush3.bf16.msra.mxu0 %v1973_v1  ;;  %1957 = vmatpush3.bf16.msra.mxu1 %v1973_v1  ;;  %v1999_v16 = vld [vmem:[%s2073_s27 + $0x98] sm:$0xff]   ;;  %v2000_v17 = vld [vmem:[%s2073_s27 + $0xa0] sm:$0xff]   ;;  %v2001_v19 = vld [vmem:[%s2073_s27 + $0xa8] sm:$0xff]  }
  0x12   : > { %1872 = vmatprep.subr.bf16.mxu0 %v1974_v2  ;;  %1950 = vmatprep.subr.bf16.mxu1 %v1974_v2  ;;  %v1986_v20 = vld [vmem:[%s2073_s27 + $0x30] sm:$0xff]   ;;  %v1987_v22 = vld [vmem:[%s2073_s27 + $0x38] sm:$0xff]   ;;  %v1988_v24 = vld [vmem:[%s2073_s27 + $0x40] sm:$0xff]  }
  0x13   : > { %v2002_v21 = vld [vmem:[%s2073_s27 + $0xb0] sm:$0xff]   ;;  %v2003_v23 = vld [vmem:[%s2073_s27 + $0xb8] sm:$0xff]   ;;  %v2004_v25 = vld [vmem:[%s2073_s27 + $0xc0] sm:$0xff]  }
  0x14   : > { %v1989_v26 = vld [vmem:[%s2073_s27 + $0x48] sm:$0xff]   ;;  %v1990_v28 = vld [vmem:[%s2073_s27 + $0x50] sm:$0xff]   ;;  %v1991_v30 = vld [vmem:[%s2073_s27 + $0x58] sm:$0xff]  }
  0x15   : > { %1873 = vmatpush3.bf16.msra.mxu0 %v1974_v2  ;;  %1958 = vmatpush3.bf16.msra.mxu1 %v1974_v2  ;;  %v2005_v27 = vld [vmem:[%s2073_s27 + $0xc8] sm:$0xff]   ;;  %v2006_v29 = vld [vmem:[%s2073_s27 + $0xd0] sm:$0xff]   ;;  %v2007_v31 = vld [vmem:[%s2073_s27 + $0xd8] sm:$0xff]  }
  0x16   : > { %1874 = vmatprep.subr.bf16.mxu0 %v1975_v3  ;;  %1951 = vmatprep.subr.bf16.mxu1 %v1975_v3  ;;  %v1992_v32 = vld [vmem:[%s2073_s27 + $0x60] sm:$0xff]   ;;  %v1993_v34 = vld [vmem:[%s2073_s27 + $0x68] sm:$0xff]   ;;  %v1994_v36 = vld [vmem:[%s2073_s27 + $0x70] sm:$0xff]  }
  0x17   : > { %v2008_v33 = vld [vmem:[%s2073_s27 + $0xe0] sm:$0xff]   ;;  %v2009_v35 = vld [vmem:[%s2073_s27 + $0xe8] sm:$0xff]   ;;  %v2010_v37 = vld [vmem:[%s2073_s27 + $0xf0] sm:$0xff]  }
  0x18   : > { %v1995_v38 = vld [vmem:[%s2073_s27 + $0x78] sm:$0xff]  }
  0x19   : > { %1875 = vmatpush3.bf16.msra.mxu0 %v1975_v3  ;;  %1959 = vmatpush3.bf16.msra.mxu1 %v1975_v3  ;;  %v2011_v39 = vld [vmem:[%s2073_s27 + $0xf8] sm:$0xff]  }
  0x1a   : > { %1876 = vmatprep.subr.bf16.mxu0 %v1976_v5  ;;  %1952 = vmatprep.subr.bf16.mxu1 %v1976_v5 }
  0x1d   : > { %1877 = vmatpush3.bf16.msra.mxu0 %v1976_v5  ;;  %1960 = vmatpush3.bf16.msra.mxu1 %v1976_v5 }
  0x1e   : > { %1878 = vmatprep.subr.bf16.mxu0 %v1977_v6  ;;  %1953 = vmatprep.subr.bf16.mxu1 %v1977_v6 }
  0x21   : > { %1879 = vmatpush3.bf16.msra.mxu0 %v1977_v6  ;;  %1961 = vmatpush3.bf16.msra.mxu1 %v1977_v6 }
  0x22   : > { %1880 = vmatprep.subr.bf16.mxu0 %v1978_v7  ;;  %1954 = vmatprep.subr.bf16.mxu1 %v1978_v7 }
  0x25   : > { %1881 = vmatpush3.bf16.msra.mxu0 %v1978_v7  ;;  %1962 = vmatpush3.bf16.msra.mxu1 %v1978_v7 }
  0x26   : > { %1882 = vmatprep.subr.bf16.mxu0 %v1979_v8  ;;  %1955 = vmatprep.subr.bf16.mxu1 %v1979_v8 }
  0x29   : > { %1883 = vmatpush3.bf16.msra.mxu0 %v1979_v8  ;;  %1963 = vmatpush3.bf16.msra.mxu1 %v1979_v8 }
  0x2c   : > { %1885 = vmatmul.mubr.bf16.vlgmr.msra.gmra.mxu0 %v1981_v10  ;;  %1917 = vmatmul.mubr.bf16.vlgmr.msra.gmra.mxu1 %v1997_v12 }
  0x2d   : > { %1888 = vmatprep.mubr.bf16.mxu0 %v1982_v11  ;;  %1920 = vmatprep.mubr.bf16.mxu1 %v1998_v13 }
  0x34   : > { %1889 = vmatmul.mubr.bf16.gmra.mxu0 %v1983_v14  ;;  %1921 = vmatmul.mubr.bf16.gmra.mxu1 %v1999_v16 }
  0x35   : > { %1892 = vmatprep.mubr.bf16.mxu0 %v1984_v15  ;;  %1924 = vmatprep.mubr.bf16.mxu1 %v2000_v17 }
  0x3c   : > { %1893 = vmatmul.mubr.bf16.gmra.mxu0 %v1985_v18  ;;  %1925 = vmatmul.mubr.bf16.gmra.mxu1 %v2001_v19 }
  0x3d   : > { %1896 = vmatprep.mubr.bf16.mxu0 %v1986_v20  ;;  %1928 = vmatprep.mubr.bf16.mxu1 %v2002_v21 }
  0x44   : > { %1897 = vmatmul.mubr.bf16.gmra.mxu0 %v1987_v22  ;;  %1929 = vmatmul.mubr.bf16.gmra.mxu1 %v2003_v23 }
  0x45   : > { %1900 = vmatprep.mubr.bf16.mxu0 %v1988_v24  ;;  %1932 = vmatprep.mubr.bf16.mxu1 %v2004_v25 }
  0x4c   : > { %1901 = vmatmul.mubr.bf16.gmra.mxu0 %v1989_v26  ;;  %1933 = vmatmul.mubr.bf16.gmra.mxu1 %v2005_v27 }
  0x4d   : > { %1904 = vmatprep.mubr.bf16.mxu0 %v1990_v28  ;;  %1936 = vmatprep.mubr.bf16.mxu1 %v2006_v29 }
  0x54   : > { %1905 = vmatmul.mubr.bf16.gmra.mxu0 %v1991_v30  ;;  %1937 = vmatmul.mubr.bf16.gmra.mxu1 %v2007_v31 }
  0x55   : > { %1908 = vmatprep.mubr.bf16.mxu0 %v1992_v32  ;;  %1940 = vmatprep.mubr.bf16.mxu1 %v2008_v33 }
  0x5c   : > { %1909 = vmatmul.mubr.bf16.gmra.mxu0 %v1993_v34  ;;  %1941 = vmatmul.mubr.bf16.gmra.mxu1 %v2009_v35 }
  0x5d   : > { %1912 = vmatprep.mubr.bf16.mxu0 %v1994_v36  ;;  %1944 = vmatprep.mubr.bf16.mxu1 %v2010_v37 }
  0x64   : > { %1913 = vmatmul.mubr.bf16.gmra.mxu0 %v1995_v38  ;;  %1945 = vmatmul.mubr.bf16.gmra.mxu1 %v2011_v39 }
  0xec   : > { %v1886_v40 = vpop.f32.mrf.mxu0  ;;  %v2122_v41 = vpop.f32.mrf.mxu1 }
  0xed   : > { %v1220_v57 = vmul.f32 %v1886_v40, %v1886_v40 }
  0xee   : > { %v573_v42 = vpop.f32.mrf.mxu0  ;;  %v2124_v43 = vpop.f32.mrf.mxu1 }
  0xef   : > { %v1218_v48 = vmul.f32 %v573_v42, %v573_v42 }
  0xf0   : > { %v1887_v44 = vpop.f32.mrf.mxu0  ;;  %v2133_v45 = vpop.f32.mrf.mxu1 }
  0xf1   : > { %v1645_v46 = vpack.c.bf16 %v1887_v44, %v1886_v40  ;;  %v1725_v47 = vpack.c.bf16 %v2133_v45, %v2122_v41  ;;  %v1221_v62 = vmul.f32 %v1887_v44, %v1887_v44 }
  0xf2   : > { %v576_v49 = vpop.f32.mrf.mxu0  ;;  %v2137_v50 = vpop.f32.mrf.mxu1 }
  0xf3   : > { %1797 = vst [vmem:[%s2131_s14 + $0x8] sm:$0xff] %v1645_v46   ;;  %v1640_v51 = vpack.c.bf16 %v576_v49, %v573_v42  ;;  %v1148_v52 = vadd.f32 %v576_v49, %v573_v42  ;;  %v1219_v53 = vmul.f32 %v576_v49, %v576_v49  ;;  %1813 = vst [vmem:[%s2131_s14 + $0x88] sm:$0xff] %v1725_v47  }
  0xf4   : > { %v1720_v54 = vpack.c.bf16 %v2137_v50, %v2124_v43  ;;  %v1890_v55 = vpop.f32.mrf.mxu0  ;;  %v2143_v56 = vpop.f32.mrf.mxu1 }
  0xf5   : > { %1641 = vst [vmem:[%s2131_s14] sm:$0xff] %v1640_v51   ;;  %v1149_v58 = vadd.f32 %v1886_v40, %v1148_v52  ;;  %v1282_v59 = vadd.f32 %v1219_v53, %v1218_v48  ;;  %v1224_v17 = vmul.f32 %v1890_v55, %v1890_v55 }
  0xf6   : > { %1812 = vst [vmem:[%s2131_s14 + $0x80] sm:$0xff] %v1720_v54   ;;  %v589_v60 = vpop.f32.mrf.mxu0  ;;  %v2147_v61 = vpop.f32.mrf.mxu1 }
  0xf7   : > { %v1283_v63 = vadd.f32 %v1282_v59, %v1220_v57  ;;  %v1150_v0 = vadd.f32 %v1887_v44, %v1149_v58  ;;  %v1222_v4 = vmul.f32 %v589_v60, %v589_v60 }
  0xf8   : > { %v1891_v1 = vpop.f32.mrf.mxu0  ;;  %v2149_v2 = vpop.f32.mrf.mxu1 }
  0xf9   : > { %v1151_v3 = vadd.f32 %v1150_v0, %v589_v60  ;;  %v1284_v5 = vadd.f32 %v1283_v63, %v1221_v62  ;;  %v1655_v6 = vpack.c.bf16 %v1891_v1, %v1890_v55  ;;  %v1735_v8 = vpack.c.bf16 %v2149_v2, %v2143_v56 }
  0xfa   : > { %v592_v7 = vpop.f32.mrf.mxu0  ;;  %v2153_v9 = vpop.f32.mrf.mxu1  ;;  %v1225_v22 = vmul.f32 %v1891_v1, %v1891_v1 }
  0xfb   : > { %v1285_v10 = vadd.f32 %v1284_v5, %v1222_v4  ;;  %1799 = vst [vmem:[%s2131_s14 + $0x18] sm:$0xff] %v1655_v6   ;;  %v1650_v11 = vpack.c.bf16 %v592_v7, %v589_v60  ;;  %v1152_v12 = vadd.f32 %v1151_v3, %v592_v7  ;;  %v1223_v13 = vmul.f32 %v592_v7, %v592_v7 }
  0xfc   : > { %v1894_v14 = vpop.f32.mrf.mxu0  ;;  %1815 = vst [vmem:[%s2131_s14 + $0x98] sm:$0xff] %v1735_v8   ;;  %v1730_v15 = vpack.c.bf16 %v2153_v9, %v2147_v61  ;;  %v2159_v16 = vpop.f32.mrf.mxu1 }
  0xfd   : > { %1798 = vst [vmem:[%s2131_s14 + $0x10] sm:$0xff] %v1650_v11   ;;  %v1153_v18 = vadd.f32 %v1890_v55, %v1152_v12  ;;  %v1286_v19 = vadd.f32 %v1285_v10, %v1223_v13  ;;  %v1228_v42 = vmul.f32 %v1894_v14, %v1894_v14 }
  0xfe   : > { %v605_v20 = vpop.f32.mrf.mxu0  ;;  %1814 = vst [vmem:[%s2131_s14 + $0x90] sm:$0xff] %v1730_v15   ;;  %v2163_v21 = vpop.f32.mrf.mxu1 }
  0xff   : > { %v1287_v23 = vadd.f32 %v1286_v19, %v1224_v17  ;;  %v1154_v24 = vadd.f32 %v1891_v1, %v1153_v18  ;;  %v1226_v28 = vmul.f32 %v605_v20, %v605_v20 }
 0x100   : > { %v1895_v25 = vpop.f32.mrf.mxu0  ;;  %v2165_v26 = vpop.f32.mrf.mxu1 }
 0x101   : > { %v1155_v27 = vadd.f32 %v1154_v24, %v605_v20  ;;  %v1288_v29 = vadd.f32 %v1287_v23, %v1225_v22  ;;  %v1665_v30 = vpack.c.bf16 %v1895_v25, %v1894_v14  ;;  %v1745_v32 = vpack.c.bf16 %v2165_v26, %v2159_v16 }
 0x102   : > { %v608_v31 = vpop.f32.mrf.mxu0  ;;  %v2169_v33 = vpop.f32.mrf.mxu1  ;;  %v1229_v49 = vmul.f32 %v1895_v25, %v1895_v25 }
 0x103   : > { %v1289_v34 = vadd.f32 %v1288_v29, %v1226_v28  ;;  %1801 = vst [vmem:[%s2131_s14 + $0x28] sm:$0xff] %v1665_v30   ;;  %v1660_v35 = vpack.c.bf16 %v608_v31, %v605_v20  ;;  %v1156_v36 = vadd.f32 %v1155_v27, %v608_v31  ;;  %v1227_v37 = vmul.f32 %v608_v31, %v608_v31 }
 0x104   : > { %v1898_v38 = vpop.f32.mrf.mxu0  ;;  %1817 = vst [vmem:[%s2131_s14 + $0xa8] sm:$0xff] %v1745_v32   ;;  %v1740_v39 = vpack.c.bf16 %v2169_v33, %v2163_v21  ;;  %v2175_v40 = vpop.f32.mrf.mxu1 }
 0x105   : > { %1800 = vst [vmem:[%s2131_s14 + $0x20] sm:$0xff] %v1660_v35   ;;  %v1157_v44 = vadd.f32 %v1894_v14, %v1156_v36  ;;  %v1290_v46 = vadd.f32 %v1289_v34, %v1227_v37  ;;  %v1232_v8 = vmul.f32 %v1898_v38, %v1898_v38 }
 0x106   : > { %v621_v47 = vpop.f32.mrf.mxu0  ;;  %1816 = vst [vmem:[%s2131_s14 + $0xa0] sm:$0xff] %v1740_v39   ;;  %v2179_v48 = vpop.f32.mrf.mxu1 }
 0x107   : > { %v1291_v51 = vadd.f32 %v1290_v46, %v1228_v42  ;;  %v1158_v52 = vadd.f32 %v1895_v25, %v1157_v44  ;;  %v1230_v57 = vmul.f32 %v621_v47, %v621_v47 }
 0x108   : > { %v1899_v53 = vpop.f32.mrf.mxu0  ;;  %v2181_v54 = vpop.f32.mrf.mxu1 }
 0x109   : > { %v1159_v55 = vadd.f32 %v1158_v52, %v621_v47  ;;  %v1292_v58 = vadd.f32 %v1291_v51, %v1229_v49  ;;  %v1675_v59 = vpack.c.bf16 %v1899_v53, %v1898_v38  ;;  %v1755_v62 = vpack.c.bf16 %v2181_v54, %v2175_v40 }
 0x10a   : > { %v624_v60 = vpop.f32.mrf.mxu0  ;;  %v2185_v63 = vpop.f32.mrf.mxu1  ;;  %v1233_v14 = vmul.f32 %v1899_v53, %v1899_v53 }
 0x10b   : > { %v1293_v0 = vadd.f32 %v1292_v58, %v1230_v57  ;;  %1803 = vst [vmem:[%s2131_s14 + $0x38] sm:$0xff] %v1675_v59   ;;  %v1670_v1 = vpack.c.bf16 %v624_v60, %v621_v47  ;;  %v1160_v3 = vadd.f32 %v1159_v55, %v624_v60  ;;  %v1231_v4 = vmul.f32 %v624_v60, %v624_v60 }
 0x10c   : > { %v1902_v5 = vpop.f32.mrf.mxu0  ;;  %1819 = vst [vmem:[%s2131_s14 + $0xb8] sm:$0xff] %v1755_v62   ;;  %v1750_v6 = vpack.c.bf16 %v2185_v63, %v2179_v48  ;;  %v2191_v7 = vpop.f32.mrf.mxu1 }
 0x10d   : > { %1802 = vst [vmem:[%s2131_s14 + $0x30] sm:$0xff] %v1670_v1   ;;  %v1161_v10 = vadd.f32 %v1898_v38, %v1160_v3  ;;  %v1294_v11 = vadd.f32 %v1293_v0, %v1231_v4  ;;  %v1236_v37 = vmul.f32 %v1902_v5, %v1902_v5 }
 0x10e   : > { %v637_v12 = vpop.f32.mrf.mxu0  ;;  %1818 = vst [vmem:[%s2131_s14 + $0xb0] sm:$0xff] %v1750_v6   ;;  %v2195_v13 = vpop.f32.mrf.mxu1 }
 0x10f   : > { %v1295_v15 = vadd.f32 %v1294_v11, %v1232_v8  ;;  %v1162_v17 = vadd.f32 %v1899_v53, %v1161_v10  ;;  %v1234_v22 = vmul.f32 %v637_v12, %v637_v12 }
 0x110   : > { %v1903_v18 = vpop.f32.mrf.mxu0  ;;  %v2197_v19 = vpop.f32.mrf.mxu1 }
 0x111   : > { %v1163_v20 = vadd.f32 %v1162_v17, %v637_v12  ;;  %v1296_v23 = vadd.f32 %v1295_v15, %v1233_v14  ;;  %v1685_v24 = vpack.c.bf16 %v1903_v18, %v1902_v5  ;;  %v1765_v27 = vpack.c.bf16 %v2197_v19, %v2191_v7 }
 0x112   : > { %v640_v25 = vpop.f32.mrf.mxu0  ;;  %v2201_v28 = vpop.f32.mrf.mxu1  ;;  %v1237_v46 = vmul.f32 %v1903_v18, %v1903_v18 }
 0x113   : > { %v1297_v29 = vadd.f32 %v1296_v23, %v1234_v22  ;;  %1805 = vst [vmem:[%s2131_s14 + $0x48] sm:$0xff] %v1685_v24   ;;  %v1680_v30 = vpack.c.bf16 %v640_v25, %v637_v12  ;;  %v1164_v31 = vadd.f32 %v1163_v20, %v640_v25  ;;  %v1235_v32 = vmul.f32 %v640_v25, %v640_v25 }
 0x114   : > { %v1906_v34 = vpop.f32.mrf.mxu0  ;;  %1821 = vst [vmem:[%s2131_s14 + $0xc8] sm:$0xff] %v1765_v27   ;;  %v1760_v35 = vpack.c.bf16 %v2201_v28, %v2195_v13  ;;  %v2207_v36 = vpop.f32.mrf.mxu1 }
 0x115   : > { %1804 = vst [vmem:[%s2131_s14 + $0x40] sm:$0xff] %v1680_v30   ;;  %v1165_v38 = vadd.f32 %v1902_v5, %v1164_v31  ;;  %v1298_v39 = vadd.f32 %v1297_v29, %v1235_v32  ;;  %v1240_v10 = vmul.f32 %v1906_v34, %v1906_v34 }
 0x116   : > { %v653_v42 = vpop.f32.mrf.mxu0  ;;  %1820 = vst [vmem:[%s2131_s14 + $0xc0] sm:$0xff] %v1760_v35   ;;  %v2211_v44 = vpop.f32.mrf.mxu1 }
 0x117   : > { %v1299_v47 = vadd.f32 %v1298_v39, %v1236_v37  ;;  %v1166_v49 = vadd.f32 %v1903_v18, %v1165_v38  ;;  %v1238_v55 = vmul.f32 %v653_v42, %v653_v42 }
 0x118   : > { %v1907_v51 = vpop.f32.mrf.mxu0  ;;  %v2213_v52 = vpop.f32.mrf.mxu1 }
 0x119   : > { %v1167_v53 = vadd.f32 %v1166_v49, %v653_v42  ;;  %v1300_v57 = vadd.f32 %v1299_v47, %v1237_v46  ;;  %v1695_v58 = vpack.c.bf16 %v1907_v51, %v1906_v34  ;;  %v1775_v60 = vpack.c.bf16 %v2213_v52, %v2207_v36 }
 0x11a   : > { %v656_v59 = vpop.f32.mrf.mxu0  ;;  %v2217_v62 = vpop.f32.mrf.mxu1  ;;  %v1241_v17 = vmul.f32 %v1907_v51, %v1907_v51 }
 0x11b   : > { %v1301_v0 = vadd.f32 %v1300_v57, %v1238_v55  ;;  %1807 = vst [vmem:[%s2131_s14 + $0x58] sm:$0xff] %v1695_v58   ;;  %v1690_v1 = vpack.c.bf16 %v656_v59, %v653_v42  ;;  %v1168_v3 = vadd.f32 %v1167_v53, %v656_v59  ;;  %v1239_v4 = vmul.f32 %v656_v59, %v656_v59 }
 0x11c   : > { %v1910_v5 = vpop.f32.mrf.mxu0  ;;  %1823 = vst [vmem:[%s2131_s14 + $0xd8] sm:$0xff] %v1775_v60   ;;  %v1770_v6 = vpack.c.bf16 %v2217_v62, %v2211_v44  ;;  %v2223_v8 = vpop.f32.mrf.mxu1 }
 0x11d   : > { %1806 = vst [vmem:[%s2131_s14 + $0x50] sm:$0xff] %v1690_v1   ;;  %v1169_v11 = vadd.f32 %v1906_v34, %v1168_v3  ;;  %v1302_v12 = vadd.f32 %v1301_v0, %v1239_v4  ;;  %v1244_v47 = vmul.f32 %v1910_v5, %v1910_v5 }
 0x11e   : > { %v669_v14 = vpop.f32.mrf.mxu0  ;;  %1822 = vst [vmem:[%s2131_s14 + $0xd0] sm:$0xff] %v1770_v6   ;;  %v2227_v15 = vpop.f32.mrf.mxu1 }
 0x11f   : > { %v1303_v18 = vadd.f32 %v1302_v12, %v1240_v10  ;;  %v1170_v20 = vadd.f32 %v1907_v51, %v1169_v11  ;;  %v1242_v25 = vmul.f32 %v669_v14, %v669_v14 }
 0x120   : > { %v1911_v22 = vpop.f32.mrf.mxu0  ;;  %v2229_v23 = vpop.f32.mrf.mxu1 }
 0x121   : > { %v1171_v24 = vadd.f32 %v1170_v20, %v669_v14  ;;  %v1304_v27 = vadd.f32 %v1303_v18, %v1241_v17  ;;  %v1705_v29 = vpack.c.bf16 %v1911_v22, %v1910_v5  ;;  %v1785_v31 = vpack.c.bf16 %v2229_v23, %v2223_v8 }
 0x122   : > { %v672_v30 = vpop.f32.mrf.mxu0  ;;  %v2233_v32 = vpop.f32.mrf.mxu1  ;;  %v1245_v57 = vmul.f32 %v1911_v22, %v1911_v22 }
 0x123   : > { %v1305_v34 = vadd.f32 %v1304_v27, %v1242_v25  ;;  %1809 = vst [vmem:[%s2131_s14 + $0x68] sm:$0xff] %v1705_v29   ;;  %v1700_v35 = vpack.c.bf16 %v672_v30, %v669_v14  ;;  %v1172_v37 = vadd.f32 %v1171_v24, %v672_v30  ;;  %v1243_v38 = vmul.f32 %v672_v30, %v672_v30 }
 0x124   : > { %v1914_v39 = vpop.f32.mrf.mxu0  ;;  %1825 = vst [vmem:[%s2131_s14 + $0xe8] sm:$0xff] %v1785_v31   ;;  %v1780_v42 = vpack.c.bf16 %v2233_v32, %v2227_v15  ;;  %v2239_v46 = vpop.f32.mrf.mxu1  ;;  %v1250_v31 = vmul.f32 %v2124_v43, %v2124_v43 }
 0x125   : > { %1808 = vst [vmem:[%s2131_s14 + $0x60] sm:$0xff] %v1700_v35   ;;  %v1173_v49 = vadd.f32 %v1910_v5, %v1172_v37  ;;  %v1306_v51 = vadd.f32 %v1305_v34, %v1243_v38  ;;  %v1251_v38 = vmul.f32 %v2137_v50, %v2137_v50 }
 0x126   : > { %v685_v53 = vpop.f32.mrf.mxu0  ;;  %1824 = vst [vmem:[%s2131_s14 + $0xe0] sm:$0xff] %v1780_v42   ;;  %v2243_v55 = vpop.f32.mrf.mxu1 }
 0x127   : > { %v1307_v58 = vadd.f32 %v1306_v51, %v1244_v47  ;;  %v1174_v59 = vadd.f32 %v1911_v22, %v1173_v49  ;;  %v1246_v3 = vmul.f32 %v685_v53, %v685_v53  ;;  %v1248_v22 = vmul.f32 %v1914_v39, %v1914_v39 }
 0x128   : > { %v1915_v60 = vpop.f32.mrf.mxu0  ;;  %v2245_v0 = vpop.f32.mrf.mxu1  ;;  %v1253_v51 = vmul.f32 %v2133_v45, %v2133_v45 }
 0x129   : > { %v1175_v1 = vadd.f32 %v1174_v59, %v685_v53  ;;  %v1308_v4 = vadd.f32 %v1307_v58, %v1245_v57  ;;  %v1715_v6 = vpack.c.bf16 %v1915_v60, %v1914_v39  ;;  %v1795_v10 = vpack.c.bf16 %v2245_v0, %v2239_v46 }
 0x12a   : > { %v688_v5 = vpop.f32.mrf.mxu0  ;;  %v2249_v11 = vpop.f32.mrf.mxu1  ;;  %v1249_v27 = vmul.f32 %v1915_v60, %v1915_v60  ;;  %v1254_v58 = vmul.f32 %v2147_v61, %v2147_v61 }
 0x12b   : > { %v1309_v12 = vadd.f32 %v1308_v4, %v1246_v3  ;;  %1811 = vst [vmem:[%s2131_s14 + $0x78] sm:$0xff] %v1715_v6   ;;  %v1710_v14 = vpack.c.bf16 %v688_v5, %v685_v53  ;;  %v1176_v17 = vadd.f32 %v1175_v1, %v688_v5  ;;  %v1247_v18 = vmul.f32 %v688_v5, %v688_v5 }
 0x12c   : > { %1827 = vst [vmem:[%s2131_s14 + $0xf8] sm:$0xff] %v1795_v10   ;;  %v1790_v20 = vpack.c.bf16 %v2249_v11, %v2243_v55  ;;  %v1255_v1 = vmul.f32 %v2153_v9, %v2153_v9  ;;  %v1258_v10 = vmul.f32 %v2163_v21, %v2163_v21 }
 0x12d   : > { %1810 = vst [vmem:[%s2131_s14 + $0x70] sm:$0xff] %v1710_v14   ;;  %v1177_v24 = vadd.f32 %v1914_v39, %v1176_v17  ;;  %v1310_v25 = vadd.f32 %v1309_v12, %v1247_v18  ;;  %v1252_v39 = vmul.f32 %v2122_v41, %v2122_v41  ;;  %v1259_v17 = vmul.f32 %v2169_v33, %v2169_v33 }
 0x12e   : > { %1826 = vst [vmem:[%s2131_s14 + $0xf0] sm:$0xff] %v1790_v20  }
 0x12f   : > { %v1178_v29 = vadd.f32 %v1915_v60, %v1177_v24  ;;  %v1311_v30 = vadd.f32 %v1310_v25, %v1248_v22  ;;  %v1262_v25 = vmul.f32 %v2179_v48, %v2179_v48 }
 0x131   : > { %v1312_v34 = vadd.f32 %v1311_v30, %v1249_v27  ;;  %v1179_v35 = vadd.f32 %v1178_v29, %v2124_v43  ;;  %v1263_v30 = vmul.f32 %v2185_v63, %v2185_v63 }
 0x133   : > { %v1180_v37 = vadd.f32 %v1179_v35, %v2137_v50  ;;  %v1313_v42 = vadd.f32 %v1312_v34, %v1250_v31 }
 0x135   : > { %v1181_v47 = vadd.f32 %v2122_v41, %v1180_v37  ;;  %v1314_v49 = vadd.f32 %v1313_v42, %v1251_v38  ;;  %v1256_v41 = vmul.f32 %v2143_v56, %v2143_v56  ;;  %v1266_v38 = vmul.f32 %v2195_v13, %v2195_v13 }
 0x137   : > { %v1315_v53 = vadd.f32 %v1314_v49, %v1252_v39  ;;  %v1182_v57 = vadd.f32 %v2133_v45, %v1181_v47  ;;  %v1257_v45 = vmul.f32 %v2149_v2, %v2149_v2  ;;  %v1267_v47 = vmul.f32 %v2201_v28, %v2201_v28 }
 0x139   : > { %v1183_v43 = vadd.f32 %v1182_v57, %v2147_v61  ;;  %v1316_v59 = vadd.f32 %v1315_v53, %v1253_v51 }
 0x13b   : > { %v1317_v50 = vadd.f32 %v1316_v59, %v1254_v58  ;;  %v1184_v60 = vadd.f32 %v1183_v43, %v2153_v9  ;;  %v1270_v43 = vmul.f32 %v2211_v44, %v2211_v44 }
 0x13d   : > { %v1185_v3 = vadd.f32 %v2143_v56, %v1184_v60  ;;  %v1318_v4 = vadd.f32 %v1317_v50, %v1255_v1  ;;  %v1260_v56 = vmul.f32 %v2159_v16, %v2159_v16  ;;  %v1271_v50 = vmul.f32 %v2217_v62, %v2217_v62 }
 0x13f   : > { %v1319_v6 = vadd.f32 %v1318_v4, %v1256_v41  ;;  %v1186_v5 = vadd.f32 %v2149_v2, %v1185_v3  ;;  %v1261_v2 = vmul.f32 %v2165_v26, %v2165_v26  ;;  %v1274_v4 = vmul.f32 %v2227_v15, %v2227_v15 }
 0x141   : > { %v1187_v61 = vadd.f32 %v1186_v5, %v2163_v21  ;;  %v1320_v12 = vadd.f32 %v1319_v6, %v1257_v45  ;;  %v1275_v5 = vmul.f32 %v2233_v32, %v2233_v32 }
 0x143   : > { %v1321_v14 = vadd.f32 %v1320_v12, %v1258_v10  ;;  %v1188_v9 = vadd.f32 %v1187_v61, %v2169_v33 }
 0x145   : > { %v1189_v18 = vadd.f32 %v2159_v16, %v1188_v9  ;;  %v1322_v20 = vadd.f32 %v1321_v14, %v1259_v17  ;;  %v1264_v16 = vmul.f32 %v2175_v40, %v2175_v40  ;;  %v1278_v9 = vmul.f32 %v2243_v55, %v2243_v55 }
 0x147   : > { %v1323_v22 = vadd.f32 %v1322_v20, %v1260_v56  ;;  %v1190_v24 = vadd.f32 %v2165_v26, %v1189_v18  ;;  %v1265_v26 = vmul.f32 %v2181_v54, %v2181_v54  ;;  %v1280_v18 = vmul.f32 %v2239_v46, %v2239_v46 }
 0x149   : > { %v1191_v21 = vadd.f32 %v1190_v24, %v2179_v48  ;;  %v1324_v27 = vadd.f32 %v1323_v22, %v1261_v2 }
 0x14b   : > { %v1325_v29 = vadd.f32 %v1324_v27, %v1262_v25  ;;  %v1192_v33 = vadd.f32 %v1191_v21, %v2185_v63 }
 0x14d   : > { %v1193_v31 = vadd.f32 %v2175_v40, %v1192_v33  ;;  %v1326_v34 = vadd.f32 %v1325_v29, %v1263_v30  ;;  %v1268_v40 = vmul.f32 %v2191_v7, %v2191_v7 }
 0x14f   : > { %v1327_v35 = vadd.f32 %v1326_v34, %v1264_v16  ;;  %v1194_v37 = vadd.f32 %v2181_v54, %v1193_v31  ;;  %v1269_v54 = vmul.f32 %v2197_v19, %v2197_v19 }
 0x151   : > { %v1195_v48 = vadd.f32 %v1194_v37, %v2195_v13  ;;  %v1328_v42 = vadd.f32 %v1327_v35, %v1265_v26 }
 0x153   : > { %v1329_v39 = vadd.f32 %v1328_v42, %v1266_v38  ;;  %v1196_v63 = vadd.f32 %v1195_v48, %v2201_v28 }
 0x155   : > { %v1197_v49 = vadd.f32 %v2191_v7, %v1196_v63  ;;  %v1330_v51 = vadd.f32 %v1329_v39, %v1267_v47  ;;  %v1272_v7 = vmul.f32 %v2207_v36, %v2207_v36 }
 0x157   : > { %v1331_v53 = vadd.f32 %v1330_v51, %v1268_v40  ;;  %v1198_v57 = vadd.f32 %v2197_v19, %v1197_v49  ;;  %v1273_v19 = vmul.f32 %v2213_v52, %v2213_v52 }
 0x159   : > { %v1199_v13 = vadd.f32 %v1198_v57, %v2211_v44  ;;  %v1332_v58 = vadd.f32 %v1331_v53, %v1269_v54 }
 0x15b   : > { %v1333_v59 = vadd.f32 %v1332_v58, %v1270_v43  ;;  %v1200_v28 = vadd.f32 %v1199_v13, %v2217_v62 }
 0x15d   : > { %v1201_v60 = vadd.f32 %v2207_v36, %v1200_v28  ;;  %v1334_v1 = vadd.f32 %v1333_v59, %v1271_v50  ;;  %v1276_v36 = vmul.f32 %v2223_v8, %v2223_v8 }
 0x15f   : > { %v1335_v41 = vadd.f32 %v1334_v1, %v1272_v7  ;;  %v1202_v3 = vadd.f32 %v2213_v52, %v1201_v60  ;;  %v1277_v52 = vmul.f32 %v2229_v23, %v2229_v23 }
 0x161   : > { %v1203_v44 = vadd.f32 %v1202_v3, %v2227_v15  ;;  %v1336_v45 = vadd.f32 %v1335_v41, %v1273_v19 }
 0x163   : > { %v1337_v6 = vadd.f32 %v1336_v45, %v1274_v4  ;;  %v1204_v62 = vadd.f32 %v1203_v44, %v2233_v32 }
 0x165   : > { %v1205_v61 = vadd.f32 %v2223_v8, %v1204_v62  ;;  %v1338_v10 = vadd.f32 %v1337_v6, %v1275_v5  ;;  %v1279_v8 = vmul.f32 %v2249_v11, %v2249_v11 }
 0x167   : > { %v1339_v12 = vadd.f32 %v1338_v10, %v1276_v36  ;;  %v1206_v15 = vadd.f32 %v2229_v23, %v1205_v61  ;;  %v1281_v23 = vmul.f32 %v2245_v0, %v2245_v0 }
 0x169   : > { %v1207_v14 = vadd.f32 %v1206_v15, %v2243_v55  ;;  %v1340_v17 = vadd.f32 %v1339_v12, %v1277_v52 }
 0x16b   : > { %v1341_v32 = vadd.f32 %v1340_v17, %v1278_v9  ;;  %v1208_v56 = vadd.f32 %v1207_v14, %v2249_v11 }
 0x16d   : > { %v1209_v20 = vadd.f32 %v2239_v46, %v1208_v56  ;;  %v1342_v2 = vadd.f32 %v1341_v32, %v1279_v8 }
 0x16f   : > { %v1210_v22 = vadd.f32 %v2245_v0, %v1209_v20  ;;  %v1343_v55 = vadd.f32 %v1342_v2, %v1280_v18 }
 0x171   : > { %v1211_v24 = vrot.slane %v1210_v22, 4  ;;  %v1344_v21 = vadd.f32 %v1343_v55, %v1281_v23 }
 0x173   : > { %v1212_v25 = vadd.f32 %v1211_v24, %v1210_v22  ;;  %v1345_v27 = vrot.slane %v1344_v21, 4 }
 0x175   : > { %v1213_v29 = vrot.slane %v1212_v25, 2  ;;  %v1346_v33 = vadd.f32 %v1345_v27, %v1344_v21 }
 0x177   : > { %v1214_v11 = vadd.f32 %v1213_v29, %v1212_v25  ;;  %v1347_v30 = vrot.slane %v1346_v33, 2 }
 0x179   : > { %v1215_v16 = vrot.slane %v1214_v11, 1  ;;  %v1348_v31 = vadd.f32 %v1347_v30, %v1346_v33 }
 0x17b   : > { %v1216_v46 = vadd.f32 %v1215_v16, %v1214_v11  ;;  %v1349_v34 = vrot.slane %v1348_v31, 1 }
 0x17d   : > { %1217 = vst [vmem:[%s214_s19] sm:$0x1] %v1216_v46  ;;  %v1350_v0 = vadd.f32 %v1349_v34, %v1348_v31 }
 0x17f   : > { %1351 = vst [vmem:[%s217_s22] sm:$0x1] %v1350_v0 }
 0x180 PF: > { %s15_s15 = sadd.s32 1, %s2018_s15  }
 0x181   : > { %p12_p5 = scmp.ge.s32.totalorder %s15_s15, 4  }
 0x183   :  { %14 = sbr.rel (!%p12_p5) target bundleno = 1 (0x1), region = 82 }

// kernel: resnet50_basic_block.7
= control target key start
LH: loop header
LB: loop body
LE: loop exit
PB: predicated region body
PF: predicated region fallthrough
CT: control target
= control target key end

     0   :  { %9 = vsyncpa [#allocation3], 0  ;;  %s1746_s0 = inlined_call_operand.vmem [shape: bf16[1024,128], index: 0, kind: input, shape index: {}]   ;;  %s1747_s1 = inlined_call_operand.vmem [shape: bf16[1024,128], index: 1, kind: input, shape index: {}]   ;;  %s1748_s2 = inlined_call_operand.vmem [shape: f32[1,128], index: 2, kind: input, shape index: {}]   ;;  %s1749_s3 = inlined_call_operand.vmem [shape: f32[1,128], index: 3, kind: input, shape index: {}]   ;;  %s1750_s4 = inlined_call_operand.hbm [shape: f32[1024,128], index: 4, kind: output, shape index: {}]  }
   0x1   :  { %11 = vsyncpa [#allocation3 + $0x1], 0  ;;  %s1365_s15 = smov 0   ;;  %s1367_s16 = smov 0  }
   0x2   :  { %s1369_s17 = smov 0   ;;  %s1371_s18 = smov 0  }
   0x3 LB: > { %s1386_s19 = sadd.s32 4294967295, %s1335_s18   ;;  %s899_s20 = sadd.s32 4294967294, %s1335_s18   ;;  %s1335_s18 = sphi %s1371_s18, %s1756_s18   ;;  %s1331_s17 = sphi %s1369_s17, %s1755_s17   ;;  %s1327_s16 = sphi %s1367_s16, %s1754_s16   ;;  %s1323_s15 = sphi %s1365_s15, %s1753_s15  }
   0x4   : > { %s1390_s21 = sadd.s32 1, %s1335_s18   ;;  %s118_s22 = sadd.s32 1, %s1331_s17 }
   0x5   : > { %s115_s23 = ssub.s32 %s1335_s18, %s1390_s21  ;;  %p128_p0 = scmp.ne.s32.totalorder %s1331_s17, %s1327_s16 }
   0x6   : > { %p116_p1 = scmp.eq.s32.totalorder %s115_s23, 0  ;;  %p129_p2 = scmp.eq.s32.totalorder %s1386_s19, 1 }
   0x7   : > { %p134_p3 = scmp.ne.s32.totalorder %s1327_s16, %s1323_s15  ;;  %p135_p4 = scmp.eq.s32.totalorder %s899_s20, 1 }
   0x8   : > { %s1401_s24 = scalar_select %p116_p1, %s1331_s17, %s118_s22  }
   0x9   : > { %p1403_p5 = por %p129_p2, %p128_p0  ;;  %p1407_p6 = por %p135_p4, %p134_p3 }
   0xa   : > { %p902_p7 = scmp.ge.s32.totalorder %s1335_s18, 1  ;;  %p177_p8 = scmp.lt.s32.totalorder %s1335_s18, 3 }
   0xc   : > { %p178_p9 = pnand %p902_p7, %p177_p8 }
   0xd   : > { %s904_s27 = sshll.u32 (!%p178_p9), %s1386_s19, 6  ;;  %s205_s11 = sand.u32 (!%p178_p9), 1, %s1327_s16  }
   0xe   : > { %181 = sbr.rel (%p178_p9) target bundleno = 138 (0x8a), region = 36  ;;  %p209_p10 = scmp.lt.s32.totalorder (!%p178_p9), %s904_s27, 127 }
   0xf   : > { %s903_s14 = sshll.u32 (!%p178_p9), %s205_s11, 9  ;;  %s915_s22 = sshll.u32 (!%p178_p9), %s1386_s19, 13 }
  0x10   : > { %s1463_s20 = scalar_lea.vmem (!%p178_p9), [#allocation2], %s903_s14  ;;  %s1698_s29 = scalar_lea.hbm (!%p178_p9), %s1750_s4, %s915_s22 }
  0x11   : > { %s825_s23 = sshll.u32 (!%p178_p9), %s1463_s20, 4  ;;  %s1706_s19 = scalar_lea.sflag (!%p178_p9), [#allocation3], %s205_s11  ;;  %s1700_s23 = int_to_ptr.vmem [resolvable:$true] %s825_s23 }
  0x12   : > { %s1275_s30 = scalar_lea.vmem (!%p178_p9), %s1700_s23, 8192 }
  0x13   : > { %s1758_s27 = smov (!%p209_p10, %s904_s27), 127  ;;  %v1427_v0 = vld [vmem:[%s1748_s2] ss:$0 sm:$0xff]  ;;  %p1276_p11 = scmp.ne.s32.totalorder %s1700_s23, %s1275_s30 }
  0x14   : > { %s905_s28 = sshll.u32 %s1758_s27, 2  ;;  %v1439_v11 = vld [vmem:[%s1749_s3] ss:$0 sm:$0xff] }
  0x15   : > { %s1417_s5 = scalar_lea.vmem %s1746_s0, %s905_s28  ;;  %s1422_s8 = scalar_lea.vmem %s1747_s1, %s905_s28 }
  0x16   : > { %v917_v1 = vld [vmem:[%s1417_s5] sm:$0xff]   ;;  %v1172_v3 = vld [vmem:[%s1417_s5 + $0x8] sm:$0xff]   ;;  %v1173_v9 = vld [vmem:[%s1417_s5 + $0x10] sm:$0xff]   ;;  %p1277_p12 = pnand %p1276_p11, %p1403_p5 }
  0x17   : > { %v1045_v2 = vld [vmem:[%s1422_s8] sm:$0xff]   ;;  %v918_v4 = vunpack.c.l.bf16 %v917_v1  ;;  %v919_v6 = vunpack.c.h.bf16 %v917_v1  ;;  %v1203_v8 = vld [vmem:[%s1422_s8 + $0x8] sm:$0xff]   ;;  %v1204_v10 = vld [vmem:[%s1422_s8 + $0x10] sm:$0xff]   ;;  %v922_v12 = vunpack.c.l.bf16 %v1172_v3  ;;  %v923_v14 = vunpack.c.h.bf16 %v1172_v3 }
  0x18   : > { %v1046_v5 = vunpack.c.l.bf16 %v1045_v2  ;;  %v1047_v7 = vunpack.c.h.bf16 %v1045_v2  ;;  %v1050_v13 = vunpack.c.l.bf16 %v1203_v8  ;;  %v1051_v15 = vunpack.c.h.bf16 %v1203_v8  ;;  %v1174_v16 = vld [vmem:[%s1417_s5 + $0x18] sm:$0xff]   ;;  %v1175_v42 = vld [vmem:[%s1417_s5 + $0x20] sm:$0xff]   ;;  %v1176_v52 = vld [vmem:[%s1417_s5 + $0x28] sm:$0xff]   ;;  %p1278_p13 = pneg %p1277_p12 }
  0x19   : > { %v356_v17 = vmul.f32 %v918_v4, %v1427_v0  ;;  %v357_v18 = vmul.f32 %v919_v6, %v1427_v0  ;;  %v926_v19 = vunpack.c.l.bf16 %v1173_v9  ;;  %v1054_v20 = vunpack.c.l.bf16 %v1204_v10  ;;  %v1205_v21 = vld [vmem:[%s1422_s8 + $0x18] sm:$0xff]   ;;  %v1206_v47 = vld [vmem:[%s1422_s8 + $0x20] sm:$0xff]   ;;  %v1207_v57 = vld [vmem:[%s1422_s8 + $0x28] sm:$0xff]  }
  0x1a   : > { %v358_v22 = vmul.f32 %v922_v12, %v1427_v0  ;;  %v359_v23 = vmul.f32 %v923_v14, %v1427_v0  ;;  %v927_v24 = vunpack.c.h.bf16 %v1173_v9  ;;  %v1055_v25 = vunpack.c.h.bf16 %v1204_v10  ;;  %v1177_v62 = vld [vmem:[%s1417_s5 + $0x30] sm:$0xff]   ;;  %v1178_v14 = vld [vmem:[%s1417_s5 + $0x38] sm:$0xff]  }
  0x1b   : > { %v427_v26 = vadd.f32 %v1439_v11, %v356_v17  ;;  %v428_v27 = vadd.f32 %v1439_v11, %v357_v18  ;;  %v360_v28 = vmul.f32 %v926_v19, %v1427_v0  ;;  %v930_v29 = vunpack.c.l.bf16 %v1174_v16  ;;  %v1208_v4 = vld [vmem:[%s1422_s8 + $0x30] sm:$0xff]  }
  0x1c   : > { %v429_v30 = vadd.f32 %v1439_v11, %v358_v22  ;;  %v430_v31 = vadd.f32 %v1439_v11, %v359_v23  ;;  %v361_v32 = vmul.f32 %v927_v24, %v1427_v0  ;;  %v1058_v33 = vunpack.c.l.bf16 %v1205_v21  ;;  %v1209_v23 = vld [vmem:[%s1422_s8 + $0x38] sm:$0xff]  }
  0x1d   : > { %v619_v34 = vadd.f32 %v1046_v5, %v427_v26  ;;  %v620_v35 = vadd.f32 %v1047_v7, %v428_v27  ;;  %v431_v36 = vadd.f32 %v1439_v11, %v360_v28  ;;  %v362_v37 = vmul.f32 %v930_v29, %v1427_v0 }
  0x1e   : > { %v621_v38 = vadd.f32 %v1050_v13, %v429_v30  ;;  %v622_v39 = vadd.f32 %v1051_v15, %v430_v31  ;;  %v432_v40 = vadd.f32 %v1439_v11, %v361_v32  ;;  %v931_v41 = vunpack.c.h.bf16 %v1174_v16  ;;  %v1179_v32 = vld [vmem:[%s1417_s5 + $0x40] sm:$0xff]  }
  0x1f   : > { %v683_v43 = vmax.f32 %v619_v34, 0.0  ;;  %v684_v44 = vmax.f32 %v620_v35, 0.0  ;;  %v623_v45 = vadd.f32 %v1054_v20, %v431_v36  ;;  %v433_v46 = vadd.f32 %v1439_v11, %v362_v37  ;;  %v1210_v37 = vld [vmem:[%s1422_s8 + $0x40] sm:$0xff]  }
  0x20   : > { %v685_v48 = vmax.f32 %v621_v38, 0.0  ;;  %v686_v49 = vmax.f32 %v622_v39, 0.0  ;;  %v624_v50 = vadd.f32 %v1055_v25, %v432_v40  ;;  %v363_v51 = vmul.f32 %v931_v41, %v1427_v0 }
  0x21   : > { %747 = vst [vmem:[%s1463_s20] sm:$0xff] %v683_v43  ;;  %748 = vst [vmem:[%s1463_s20 + $0x8] sm:$0xff] %v684_v44  ;;  %v687_v53 = vmax.f32 %v623_v45, 0.0  ;;  %v625_v54 = vadd.f32 %v1058_v33, %v433_v46  ;;  %v1059_v55 = vunpack.c.h.bf16 %v1205_v21  ;;  %v934_v56 = vunpack.c.l.bf16 %v1175_v42  ;;  %v1180_v46 = vld [vmem:[%s1417_s5 + $0x48] sm:$0xff]  }
  0x22   : > { %749 = vst [vmem:[%s1463_s20 + $0x10] sm:$0xff] %v685_v48  ;;  %750 = vst [vmem:[%s1463_s20 + $0x18] sm:$0xff] %v686_v49  ;;  %v688_v58 = vmax.f32 %v624_v50, 0.0  ;;  %v434_v59 = vadd.f32 %v1439_v11, %v363_v51  ;;  %v1062_v60 = vunpack.c.l.bf16 %v1206_v47  ;;  %v935_v61 = vunpack.c.h.bf16 %v1175_v42 }
  0x23   : > { %751 = vst [vmem:[%s1463_s20 + $0x20] sm:$0xff] %v687_v53  ;;  %v689_v63 = vmax.f32 %v625_v54, 0.0  ;;  %v364_v1 = vmul.f32 %v934_v56, %v1427_v0  ;;  %v1063_v2 = vunpack.c.h.bf16 %v1206_v47  ;;  %v938_v3 = vunpack.c.l.bf16 %v1176_v52  ;;  %v1211_v47 = vld [vmem:[%s1422_s8 + $0x48] sm:$0xff]   ;;  %v1181_v56 = vld [vmem:[%s1417_s5 + $0x50] sm:$0xff]  }
  0x24   : > { %752 = vst [vmem:[%s1463_s20 + $0x28] sm:$0xff] %v688_v58  ;;  %v626_v5 = vadd.f32 %v1059_v55, %v434_v59  ;;  %v365_v6 = vmul.f32 %v935_v61, %v1427_v0  ;;  %v1066_v7 = vunpack.c.l.bf16 %v1207_v57  ;;  %v939_v8 = vunpack.c.h.bf16 %v1176_v52  ;;  %v1212_v61 = vld [vmem:[%s1422_s8 + $0x50] sm:$0xff]  }
  0x25   : > { %753 = vst [vmem:[%s1463_s20 + $0x30] sm:$0xff] %v689_v63  ;;  %v435_v9 = vadd.f32 %v1439_v11, %v364_v1  ;;  %v366_v10 = vmul.f32 %v938_v3, %v1427_v0  ;;  %v1067_v12 = vunpack.c.h.bf16 %v1207_v57  ;;  %v942_v13 = vunpack.c.l.bf16 %v1177_v62 }
  0x26   : > { %v690_v15 = vmax.f32 %v626_v5, 0.0  ;;  %v436_v16 = vadd.f32 %v1439_v11, %v365_v6  ;;  %v367_v17 = vmul.f32 %v939_v8, %v1427_v0  ;;  %v1070_v18 = vunpack.c.l.bf16 %v1208_v4 }
  0x27   : > { %v627_v19 = vadd.f32 %v1062_v60, %v435_v9  ;;  %v437_v20 = vadd.f32 %v1439_v11, %v366_v10  ;;  %v368_v21 = vmul.f32 %v942_v13, %v1427_v0  ;;  %v943_v22 = vunpack.c.h.bf16 %v1177_v62 }
  0x28   : > { %754 = vst [vmem:[%s1463_s20 + $0x38] sm:$0xff] %v690_v15  ;;  %v628_v24 = vadd.f32 %v1063_v2, %v436_v16  ;;  %v438_v25 = vadd.f32 %v1439_v11, %v367_v17  ;;  %v1071_v26 = vunpack.c.h.bf16 %v1208_v4  ;;  %v946_v27 = vunpack.c.l.bf16 %v1178_v14  ;;  %v1213_v17 = vld [vmem:[%s1422_s8 + $0x58] sm:$0xff]  }
  0x29   : > { %v691_v28 = vmax.f32 %v627_v19, 0.0  ;;  %v629_v29 = vadd.f32 %v1066_v7, %v437_v20  ;;  %v439_v30 = vadd.f32 %v1439_v11, %v368_v21  ;;  %v369_v31 = vmul.f32 %v943_v22, %v1427_v0 }
  0x2a   : > { %v692_v33 = vmax.f32 %v628_v24, 0.0  ;;  %v630_v34 = vadd.f32 %v1067_v12, %v438_v25  ;;  %v370_v35 = vmul.f32 %v946_v27, %v1427_v0  ;;  %v1074_v36 = vunpack.c.l.bf16 %v1209_v23  ;;  %v1182_v12 = vld [vmem:[%s1417_s5 + $0x58] sm:$0xff]  }
  0x2b   : > { %755 = vst [vmem:[%s1463_s20 + $0x40] sm:$0xff] %v691_v28  ;;  %v693_v38 = vmax.f32 %v629_v29, 0.0  ;;  %v631_v39 = vadd.f32 %v1070_v18, %v439_v30  ;;  %v440_v40 = vadd.f32 %v1439_v11, %v369_v31  ;;  %v947_v41 = vunpack.c.h.bf16 %v1178_v14  ;;  %v1214_v31 = vld [vmem:[%s1422_s8 + $0x60] sm:$0xff]  }
  0x2c   : > { %756 = vst [vmem:[%s1463_s20 + $0x48] sm:$0xff] %v692_v33  ;;  %v694_v42 = vmax.f32 %v630_v34, 0.0  ;;  %v441_v43 = vadd.f32 %v1439_v11, %v370_v35  ;;  %v1075_v44 = vunpack.c.h.bf16 %v1209_v23  ;;  %v950_v45 = vunpack.c.l.bf16 %v1179_v32 }
  0x2d   : > { %757 = vst [vmem:[%s1463_s20 + $0x50] sm:$0xff] %v693_v38  ;;  %v695_v48 = vmax.f32 %v631_v39, 0.0  ;;  %v632_v49 = vadd.f32 %v1071_v26, %v440_v40  ;;  %v371_v50 = vmul.f32 %v947_v41, %v1427_v0  ;;  %v1078_v51 = vunpack.c.l.bf16 %v1210_v37  ;;  %v1183_v26 = vld [vmem:[%s1417_s5 + $0x60] sm:$0xff]   ;;  %v1184_v40 = vld [vmem:[%s1417_s5 + $0x68] sm:$0xff]  }
  0x2e   : > { %758 = vst [vmem:[%s1463_s20 + $0x58] sm:$0xff] %v694_v42  ;;  %v633_v52 = vadd.f32 %v1074_v36, %v441_v43  ;;  %v372_v53 = vmul.f32 %v950_v45, %v1427_v0  ;;  %v951_v54 = vunpack.c.h.bf16 %v1179_v32  ;;  %v1079_v55 = vunpack.c.h.bf16 %v1210_v37  ;;  %v1215_v41 = vld [vmem:[%s1422_s8 + $0x68] sm:$0xff]  }
  0x2f   : > { %759 = vst [vmem:[%s1463_s20 + $0x60] sm:$0xff] %v695_v48  ;;  %v696_v57 = vmax.f32 %v632_v49, 0.0  ;;  %v442_v58 = vadd.f32 %v1439_v11, %v371_v50  ;;  %v954_v59 = vunpack.c.l.bf16 %v1180_v46  ;;  %v1082_v60 = vunpack.c.l.bf16 %v1211_v47  ;;  %v1185_v50 = vld [vmem:[%s1417_s5 + $0x70] sm:$0xff]  }
  0x30   : > { %v697_v62 = vmax.f32 %v633_v52, 0.0  ;;  %v443_v63 = vadd.f32 %v1439_v11, %v372_v53  ;;  %v373_v1 = vmul.f32 %v951_v54, %v1427_v0  ;;  %v955_v2 = vunpack.c.h.bf16 %v1180_v46 }
  0x31   : > { %760 = vst [vmem:[%s1463_s20 + $0x68] sm:$0xff] %v696_v57  ;;  %v634_v3 = vadd.f32 %v1075_v44, %v442_v58  ;;  %v374_v4 = vmul.f32 %v954_v59, %v1427_v0  ;;  %v1083_v5 = vunpack.c.h.bf16 %v1211_v47  ;;  %v958_v6 = vunpack.c.l.bf16 %v1181_v56  ;;  %v1216_v59 = vld [vmem:[%s1422_s8 + $0x70] sm:$0xff]  }
  0x32   : > { %761 = vst [vmem:[%s1463_s20 + $0x70] sm:$0xff] %v697_v62  ;;  %v635_v7 = vadd.f32 %v1078_v51, %v443_v63  ;;  %v444_v8 = vadd.f32 %v1439_v11, %v373_v1  ;;  %v375_v9 = vmul.f32 %v955_v2, %v1427_v0  ;;  %v1086_v10 = vunpack.c.l.bf16 %v1212_v61 }
  0x33   : > { %v698_v13 = vmax.f32 %v634_v3, 0.0  ;;  %v445_v14 = vadd.f32 %v1439_v11, %v374_v4  ;;  %v376_v15 = vmul.f32 %v958_v6, %v1427_v0  ;;  %v959_v16 = vunpack.c.h.bf16 %v1181_v56 }
  0x34   : > { %v699_v18 = vmax.f32 %v635_v7, 0.0  ;;  %v636_v19 = vadd.f32 %v1079_v55, %v444_v8  ;;  %v446_v20 = vadd.f32 %v1439_v11, %v375_v9  ;;  %v1087_v21 = vunpack.c.h.bf16 %v1212_v61 }
  0x35   : > { %762 = vst [vmem:[%s1463_s20 + $0x78] sm:$0xff] %v698_v13  ;;  %v637_v22 = vadd.f32 %v1082_v60, %v445_v14  ;;  %v447_v23 = vadd.f32 %v1439_v11, %v376_v15  ;;  %v377_v24 = vmul.f32 %v959_v16, %v1427_v0  ;;  %v962_v25 = vunpack.c.l.bf16 %v1182_v12 }
  0x36   : > { %763 = vst [vmem:[%s1463_s20 + $0x80] sm:$0xff] %v699_v18  ;;  %v700_v27 = vmax.f32 %v636_v19, 0.0  ;;  %v638_v28 = vadd.f32 %v1083_v5, %v446_v20  ;;  %v1090_v29 = vunpack.c.l.bf16 %v1213_v17  ;;  %v963_v30 = vunpack.c.h.bf16 %v1182_v12  ;;  %v1186_v5 = vld [vmem:[%s1417_s5 + $0x78] sm:$0xff]   ;;  %v1187_v20 = vld [vmem:[%s1417_s5 + $0x80] sm:$0xff]  }
  0x37   : > { %v701_v32 = vmax.f32 %v637_v22, 0.0  ;;  %v639_v33 = vadd.f32 %v1086_v10, %v447_v23  ;;  %v448_v34 = vadd.f32 %v1439_v11, %v377_v24  ;;  %v378_v35 = vmul.f32 %v962_v25, %v1427_v0  ;;  %v1217_v10 = vld [vmem:[%s1422_s8 + $0x78] sm:$0xff]   ;;  %v1218_v25 = vld [vmem:[%s1422_s8 + $0x80] sm:$0xff]  }
  0x38   : > { %764 = vst [vmem:[%s1463_s20 + $0x88] sm:$0xff] %v700_v27  ;;  %v702_v36 = vmax.f32 %v638_v28, 0.0  ;;  %v379_v37 = vmul.f32 %v963_v30, %v1427_v0  ;;  %v1091_v38 = vunpack.c.h.bf16 %v1213_v17  ;;  %v966_v39 = vunpack.c.l.bf16 %v1183_v26 }
  0x39   : > { %765 = vst [vmem:[%s1463_s20 + $0x90] sm:$0xff] %v701_v32  ;;  %v703_v42 = vmax.f32 %v639_v33, 0.0  ;;  %v640_v43 = vadd.f32 %v1087_v21, %v448_v34  ;;  %v449_v44 = vadd.f32 %v1439_v11, %v378_v35  ;;  %v1094_v45 = vunpack.c.l.bf16 %v1214_v31  ;;  %v1188_v34 = vld [vmem:[%s1417_s5 + $0x88] sm:$0xff]  }
  0x3a   : > { %766 = vst [vmem:[%s1463_s20 + $0x98] sm:$0xff] %v702_v36  ;;  %v450_v46 = vadd.f32 %v1439_v11, %v379_v37  ;;  %v380_v47 = vmul.f32 %v966_v39, %v1427_v0  ;;  %v967_v48 = vunpack.c.h.bf16 %v1183_v26  ;;  %v1095_v49 = vunpack.c.h.bf16 %v1214_v31  ;;  %v1219_v35 = vld [vmem:[%s1422_s8 + $0x88] sm:$0xff]  }
  0x3b   : > { %767 = vst [vmem:[%s1463_s20 + $0xa0] sm:$0xff] %v703_v42  ;;  %v704_v51 = vmax.f32 %v640_v43, 0.0  ;;  %v641_v52 = vadd.f32 %v1090_v29, %v449_v44  ;;  %v970_v53 = vunpack.c.l.bf16 %v1184_v40  ;;  %v1098_v54 = vunpack.c.l.bf16 %v1215_v41  ;;  %v1189_v44 = vld [vmem:[%s1417_s5 + $0x90] sm:$0xff]  }
  0x3c   : > { %v642_v55 = vadd.f32 %v1091_v38, %v450_v46  ;;  %v451_v56 = vadd.f32 %v1439_v11, %v380_v47  ;;  %v381_v57 = vmul.f32 %v967_v48, %v1427_v0  ;;  %v971_v58 = vunpack.c.h.bf16 %v1184_v40 }
  0x3d   : > { %768 = vst [vmem:[%s1463_s20 + $0xa8] sm:$0xff] %v704_v51  ;;  %v705_v60 = vmax.f32 %v641_v52, 0.0  ;;  %v382_v61 = vmul.f32 %v970_v53, %v1427_v0  ;;  %v1099_v62 = vunpack.c.h.bf16 %v1215_v41  ;;  %v974_v63 = vunpack.c.l.bf16 %v1185_v50  ;;  %v1220_v53 = vld [vmem:[%s1422_s8 + $0x90] sm:$0xff]  }
  0x3e   : > { %v706_v1 = vmax.f32 %v642_v55, 0.0  ;;  %v643_v2 = vadd.f32 %v1094_v45, %v451_v56  ;;  %v452_v3 = vadd.f32 %v1439_v11, %v381_v57  ;;  %v383_v4 = vmul.f32 %v971_v58, %v1427_v0 }
  0x3f   : > { %769 = vst [vmem:[%s1463_s20 + $0xb0] sm:$0xff] %v705_v60  ;;  %v453_v6 = vadd.f32 %v1439_v11, %v382_v61  ;;  %v384_v7 = vmul.f32 %v974_v63, %v1427_v0  ;;  %v1102_v8 = vunpack.c.l.bf16 %v1216_v59  ;;  %v975_v9 = vunpack.c.h.bf16 %v1185_v50 }
  0x40   : > { %770 = vst [vmem:[%s1463_s20 + $0xb8] sm:$0xff] %v706_v1  ;;  %v707_v12 = vmax.f32 %v643_v2, 0.0  ;;  %v644_v13 = vadd.f32 %v1095_v49, %v452_v3  ;;  %v454_v14 = vadd.f32 %v1439_v11, %v383_v4  ;;  %v1103_v15 = vunpack.c.h.bf16 %v1216_v59  ;;  %v1221_v4 = vld [vmem:[%s1422_s8 + $0x98] sm:$0xff]  }
  0x41   : > { %v645_v16 = vadd.f32 %v1098_v54, %v453_v6  ;;  %v455_v17 = vadd.f32 %v1439_v11, %v384_v7  ;;  %v385_v18 = vmul.f32 %v975_v9, %v1427_v0  ;;  %v978_v19 = vunpack.c.l.bf16 %v1186_v5 }
  0x42   : > { %771 = vst [vmem:[%s1463_s20 + $0xc0] sm:$0xff] %v707_v12  ;;  %v708_v21 = vmax.f32 %v644_v13, 0.0  ;;  %v646_v22 = vadd.f32 %v1099_v62, %v454_v14  ;;  %v1106_v23 = vunpack.c.l.bf16 %v1217_v10  ;;  %v979_v24 = vunpack.c.h.bf16 %v1186_v5  ;;  %v1190_v62 = vld [vmem:[%s1417_s5 + $0x98] sm:$0xff]   ;;  %v1191_v14 = vld [vmem:[%s1417_s5 + $0xa0] sm:$0xff]  }
  0x43   : > { %v709_v26 = vmax.f32 %v645_v16, 0.0  ;;  %v647_v27 = vadd.f32 %v1102_v8, %v455_v17  ;;  %v456_v28 = vadd.f32 %v1439_v11, %v385_v18  ;;  %v386_v29 = vmul.f32 %v978_v19, %v1427_v0  ;;  %v1222_v19 = vld [vmem:[%s1422_s8 + $0xa0] sm:$0xff]  }
  0x44   : > { %772 = vst [vmem:[%s1463_s20 + $0xc8] sm:$0xff] %v708_v21  ;;  %v710_v30 = vmax.f32 %v646_v22, 0.0  ;;  %v387_v31 = vmul.f32 %v979_v24, %v1427_v0  ;;  %v1107_v32 = vunpack.c.h.bf16 %v1217_v10  ;;  %v982_v33 = vunpack.c.l.bf16 %v1187_v20 }
  0x45   : > { %773 = vst [vmem:[%s1463_s20 + $0xd0] sm:$0xff] %v709_v26  ;;  %v711_v36 = vmax.f32 %v647_v27, 0.0  ;;  %v648_v37 = vadd.f32 %v1103_v15, %v456_v28  ;;  %v457_v38 = vadd.f32 %v1439_v11, %v386_v29  ;;  %v1110_v39 = vunpack.c.l.bf16 %v1218_v25  ;;  %v1192_v28 = vld [vmem:[%s1417_s5 + $0xa8] sm:$0xff]  }
  0x46   : > { %774 = vst [vmem:[%s1463_s20 + $0xd8] sm:$0xff] %v710_v30  ;;  %v458_v40 = vadd.f32 %v1439_v11, %v387_v31  ;;  %v388_v41 = vmul.f32 %v982_v33, %v1427_v0  ;;  %v983_v42 = vunpack.c.h.bf16 %v1187_v20  ;;  %v1111_v43 = vunpack.c.h.bf16 %v1218_v25  ;;  %v1223_v29 = vld [vmem:[%s1422_s8 + $0xa8] sm:$0xff]  }
  0x47   : > { %775 = vst [vmem:[%s1463_s20 + $0xe0] sm:$0xff] %v711_v36  ;;  %v712_v45 = vmax.f32 %v648_v37, 0.0  ;;  %v649_v46 = vadd.f32 %v1106_v23, %v457_v38  ;;  %v986_v47 = vunpack.c.l.bf16 %v1188_v34  ;;  %v1114_v48 = vunpack.c.l.bf16 %v1219_v35  ;;  %v1193_v38 = vld [vmem:[%s1417_s5 + $0xb0] sm:$0xff]  }
  0x48   : > { %v650_v49 = vadd.f32 %v1107_v32, %v458_v40  ;;  %v459_v50 = vadd.f32 %v1439_v11, %v388_v41  ;;  %v389_v51 = vmul.f32 %v983_v42, %v1427_v0  ;;  %v987_v52 = vunpack.c.h.bf16 %v1188_v34 }
  0x49   : > { %776 = vst [vmem:[%s1463_s20 + $0xe8] sm:$0xff] %v712_v45  ;;  %v713_v54 = vmax.f32 %v649_v46, 0.0  ;;  %v390_v55 = vmul.f32 %v986_v47, %v1427_v0  ;;  %v1115_v56 = vunpack.c.h.bf16 %v1219_v35  ;;  %v990_v57 = vunpack.c.l.bf16 %v1189_v44  ;;  %v1224_v47 = vld [vmem:[%s1422_s8 + $0xb0] sm:$0xff]  }
  0x4a   : > { %v714_v58 = vmax.f32 %v650_v49, 0.0  ;;  %v651_v59 = vadd.f32 %v1110_v39, %v459_v50  ;;  %v460_v60 = vadd.f32 %v1439_v11, %v389_v51  ;;  %v391_v61 = vmul.f32 %v987_v52, %v1427_v0 }
  0x4b   : > { %777 = vst [vmem:[%s1463_s20 + $0xf0] sm:$0xff] %v713_v54  ;;  %v461_v63 = vadd.f32 %v1439_v11, %v390_v55  ;;  %v392_v1 = vmul.f32 %v990_v57, %v1427_v0  ;;  %v1118_v2 = vunpack.c.l.bf16 %v1220_v53  ;;  %v991_v3 = vunpack.c.h.bf16 %v1189_v44 }
  0x4c   : > { %778 = vst [vmem:[%s1463_s20 + $0xf8] sm:$0xff] %v714_v58  ;;  %v715_v5 = vmax.f32 %v651_v59, 0.0  ;;  %v652_v6 = vadd.f32 %v1111_v43, %v460_v60  ;;  %v462_v7 = vadd.f32 %v1439_v11, %v391_v61  ;;  %v1119_v8 = vunpack.c.h.bf16 %v1220_v53  ;;  %v1225_v61 = vld [vmem:[%s1422_s8 + $0xb8] sm:$0xff]  }
  0x4d   : > { %v653_v9 = vadd.f32 %v1114_v48, %v461_v63  ;;  %v463_v10 = vadd.f32 %v1439_v11, %v392_v1  ;;  %v393_v12 = vmul.f32 %v991_v3, %v1427_v0  ;;  %v994_v13 = vunpack.c.l.bf16 %v1190_v62 }
  0x4e   : > { %779 = vst [vmem:[%s1463_s20 + $0x100] sm:$0xff] %v715_v5  ;;  %v716_v15 = vmax.f32 %v652_v6, 0.0  ;;  %v654_v16 = vadd.f32 %v1115_v56, %v462_v7  ;;  %v1122_v17 = vunpack.c.l.bf16 %v1221_v4  ;;  %v995_v18 = vunpack.c.h.bf16 %v1190_v62  ;;  %v1194_v56 = vld [vmem:[%s1417_s5 + $0xb8] sm:$0xff]   ;;  %v1195_v7 = vld [vmem:[%s1417_s5 + $0xc0] sm:$0xff]  }
  0x4f   : > { %v717_v20 = vmax.f32 %v653_v9, 0.0  ;;  %v655_v21 = vadd.f32 %v1118_v2, %v463_v10  ;;  %v464_v22 = vadd.f32 %v1439_v11, %v393_v12  ;;  %v394_v23 = vmul.f32 %v994_v13, %v1427_v0  ;;  %v1226_v13 = vld [vmem:[%s1422_s8 + $0xc0] sm:$0xff]  }
  0x50   : > { %780 = vst [vmem:[%s1463_s20 + $0x108] sm:$0xff] %v716_v15  ;;  %v718_v24 = vmax.f32 %v654_v16, 0.0  ;;  %v395_v25 = vmul.f32 %v995_v18, %v1427_v0  ;;  %v1123_v26 = vunpack.c.h.bf16 %v1221_v4  ;;  %v998_v27 = vunpack.c.l.bf16 %v1191_v14 }
  0x51   : > { %781 = vst [vmem:[%s1463_s20 + $0x110] sm:$0xff] %v717_v20  ;;  %v719_v30 = vmax.f32 %v655_v21, 0.0  ;;  %v656_v31 = vadd.f32 %v1119_v8, %v464_v22  ;;  %v465_v32 = vadd.f32 %v1439_v11, %v394_v23  ;;  %v1126_v33 = vunpack.c.l.bf16 %v1222_v19  ;;  %v1196_v22 = vld [vmem:[%s1417_s5 + $0xc8] sm:$0xff]  }
  0x52   : > { %782 = vst [vmem:[%s1463_s20 + $0x118] sm:$0xff] %v718_v24  ;;  %v466_v34 = vadd.f32 %v1439_v11, %v395_v25  ;;  %v396_v35 = vmul.f32 %v998_v27, %v1427_v0  ;;  %v999_v36 = vunpack.c.h.bf16 %v1191_v14  ;;  %v1127_v37 = vunpack.c.h.bf16 %v1222_v19  ;;  %v1227_v23 = vld [vmem:[%s1422_s8 + $0xc8] sm:$0xff]  }
  0x53   : > { %783 = vst [vmem:[%s1463_s20 + $0x120] sm:$0xff] %v719_v30  ;;  %v720_v39 = vmax.f32 %v656_v31, 0.0  ;;  %v657_v40 = vadd.f32 %v1122_v17, %v465_v32  ;;  %v1002_v41 = vunpack.c.l.bf16 %v1192_v28  ;;  %v1130_v42 = vunpack.c.l.bf16 %v1223_v29  ;;  %v1197_v32 = vld [vmem:[%s1417_s5 + $0xd0] sm:$0xff]  }
  0x54   : > { %v658_v43 = vadd.f32 %v1123_v26, %v466_v34  ;;  %v467_v44 = vadd.f32 %v1439_v11, %v396_v35  ;;  %v397_v45 = vmul.f32 %v999_v36, %v1427_v0  ;;  %v1003_v46 = vunpack.c.h.bf16 %v1192_v28 }
  0x55   : > { %784 = vst [vmem:[%s1463_s20 + $0x128] sm:$0xff] %v720_v39  ;;  %v721_v48 = vmax.f32 %v657_v40, 0.0  ;;  %v398_v49 = vmul.f32 %v1002_v41, %v1427_v0  ;;  %v1131_v50 = vunpack.c.h.bf16 %v1223_v29  ;;  %v1006_v51 = vunpack.c.l.bf16 %v1193_v38  ;;  %v1228_v41 = vld [vmem:[%s1422_s8 + $0xd0] sm:$0xff]  }
  0x56   : > { %v722_v52 = vmax.f32 %v658_v43, 0.0  ;;  %v659_v53 = vadd.f32 %v1126_v33, %v467_v44  ;;  %v468_v54 = vadd.f32 %v1439_v11, %v397_v45  ;;  %v399_v55 = vmul.f32 %v1003_v46, %v1427_v0 }
  0x57   : > { %785 = vst [vmem:[%s1463_s20 + $0x130] sm:$0xff] %v721_v48  ;;  %v469_v57 = vadd.f32 %v1439_v11, %v398_v49  ;;  %v400_v58 = vmul.f32 %v1006_v51, %v1427_v0  ;;  %v1134_v59 = vunpack.c.l.bf16 %v1224_v47  ;;  %v1007_v60 = vunpack.c.h.bf16 %v1193_v38 }
  0x58   : > { %786 = vst [vmem:[%s1463_s20 + $0x138] sm:$0xff] %v722_v52  ;;  %v723_v62 = vmax.f32 %v659_v53, 0.0  ;;  %v660_v63 = vadd.f32 %v1127_v37, %v468_v54  ;;  %v470_v1 = vadd.f32 %v1439_v11, %v399_v55  ;;  %v1135_v2 = vunpack.c.h.bf16 %v1224_v47  ;;  %v1229_v55 = vld [vmem:[%s1422_s8 + $0xd8] sm:$0xff]  }
  0x59   : > { %v661_v3 = vadd.f32 %v1130_v42, %v469_v57  ;;  %v471_v4 = vadd.f32 %v1439_v11, %v400_v58  ;;  %v401_v5 = vmul.f32 %v1007_v60, %v1427_v0  ;;  %v1010_v6 = vunpack.c.l.bf16 %v1194_v56 }
  0x5a   : > { %787 = vst [vmem:[%s1463_s20 + $0x140] sm:$0xff] %v723_v62  ;;  %v724_v8 = vmax.f32 %v660_v63, 0.0  ;;  %v662_v9 = vadd.f32 %v1131_v50, %v470_v1  ;;  %v1138_v10 = vunpack.c.l.bf16 %v1225_v61  ;;  %v1011_v12 = vunpack.c.h.bf16 %v1194_v56  ;;  %v1198_v50 = vld [vmem:[%s1417_s5 + $0xd8] sm:$0xff]   ;;  %v1199_v1 = vld [vmem:[%s1417_s5 + $0xe0] sm:$0xff]  }
  0x5b   : > { %v725_v14 = vmax.f32 %v661_v3, 0.0  ;;  %v663_v15 = vadd.f32 %v1134_v59, %v471_v4  ;;  %v472_v16 = vadd.f32 %v1439_v11, %v401_v5  ;;  %v402_v17 = vmul.f32 %v1010_v6, %v1427_v0  ;;  %v1230_v6 = vld [vmem:[%s1422_s8 + $0xe0] sm:$0xff]  }
  0x5c   : > { %788 = vst [vmem:[%s1463_s20 + $0x148] sm:$0xff] %v724_v8  ;;  %v726_v18 = vmax.f32 %v662_v9, 0.0  ;;  %v403_v19 = vmul.f32 %v1011_v12, %v1427_v0  ;;  %v1139_v20 = vunpack.c.h.bf16 %v1225_v61  ;;  %v1014_v21 = vunpack.c.l.bf16 %v1195_v7 }
  0x5d   : > { %789 = vst [vmem:[%s1463_s20 + $0x150] sm:$0xff] %v725_v14  ;;  %v727_v24 = vmax.f32 %v663_v15, 0.0  ;;  %v664_v25 = vadd.f32 %v1135_v2, %v472_v16  ;;  %v473_v26 = vadd.f32 %v1439_v11, %v402_v17  ;;  %v1142_v27 = vunpack.c.l.bf16 %v1226_v13  ;;  %v1200_v16 = vld [vmem:[%s1417_s5 + $0xe8] sm:$0xff]  }
  0x5e   : > { %790 = vst [vmem:[%s1463_s20 + $0x158] sm:$0xff] %v726_v18  ;;  %v474_v28 = vadd.f32 %v1439_v11, %v403_v19  ;;  %v404_v29 = vmul.f32 %v1014_v21, %v1427_v0  ;;  %v1015_v30 = vunpack.c.h.bf16 %v1195_v7  ;;  %v1143_v31 = vunpack.c.h.bf16 %v1226_v13  ;;  %v1231_v17 = vld [vmem:[%s1422_s8 + $0xe8] sm:$0xff]  }
  0x5f   : > { %791 = vst [vmem:[%s1463_s20 + $0x160] sm:$0xff] %v727_v24  ;;  %v728_v33 = vmax.f32 %v664_v25, 0.0  ;;  %v665_v34 = vadd.f32 %v1138_v10, %v473_v26  ;;  %v1018_v35 = vunpack.c.l.bf16 %v1196_v22  ;;  %v1146_v36 = vunpack.c.l.bf16 %v1227_v23  ;;  %v1201_v26 = vld [vmem:[%s1417_s5 + $0xf0] sm:$0xff]  }
  0x60   : > { %v666_v37 = vadd.f32 %v1139_v20, %v474_v28  ;;  %v475_v38 = vadd.f32 %v1439_v11, %v404_v29  ;;  %v405_v39 = vmul.f32 %v1015_v30, %v1427_v0  ;;  %v1019_v40 = vunpack.c.h.bf16 %v1196_v22 }
  0x61   : > { %792 = vst [vmem:[%s1463_s20 + $0x168] sm:$0xff] %v728_v33  ;;  %v729_v42 = vmax.f32 %v665_v34, 0.0  ;;  %v406_v43 = vmul.f32 %v1018_v35, %v1427_v0  ;;  %v1147_v44 = vunpack.c.h.bf16 %v1227_v23  ;;  %v1022_v45 = vunpack.c.l.bf16 %v1197_v32  ;;  %v1232_v35 = vld [vmem:[%s1422_s8 + $0xf0] sm:$0xff]  }
  0x62   : > { %v730_v46 = vmax.f32 %v666_v37, 0.0  ;;  %v667_v47 = vadd.f32 %v1142_v27, %v475_v38  ;;  %v476_v48 = vadd.f32 %v1439_v11, %v405_v39  ;;  %v407_v49 = vmul.f32 %v1019_v40, %v1427_v0 }
  0x63   : > { %793 = vst [vmem:[%s1463_s20 + $0x170] sm:$0xff] %v729_v42  ;;  %v477_v51 = vadd.f32 %v1439_v11, %v406_v43  ;;  %v408_v52 = vmul.f32 %v1022_v45, %v1427_v0  ;;  %v1150_v53 = vunpack.c.l.bf16 %v1228_v41  ;;  %v1023_v54 = vunpack.c.h.bf16 %v1197_v32 }
  0x64   : > { %794 = vst [vmem:[%s1463_s20 + $0x178] sm:$0xff] %v730_v46  ;;  %v731_v56 = vmax.f32 %v667_v47, 0.0  ;;  %v668_v57 = vadd.f32 %v1143_v31, %v476_v48  ;;  %v478_v58 = vadd.f32 %v1439_v11, %v407_v49  ;;  %v1151_v59 = vunpack.c.h.bf16 %v1228_v41  ;;  %v1233_v49 = vld [vmem:[%s1422_s8 + $0xf8] sm:$0xff]  }
  0x65   : > { %v669_v60 = vadd.f32 %v1146_v36, %v477_v51  ;;  %v479_v61 = vadd.f32 %v1439_v11, %v408_v52  ;;  %v409_v62 = vmul.f32 %v1023_v54, %v1427_v0  ;;  %v1026_v63 = vunpack.c.l.bf16 %v1198_v50 }
  0x66   : > { %795 = vst [vmem:[%s1463_s20 + $0x180] sm:$0xff] %v731_v56  ;;  %v732_v2 = vmax.f32 %v668_v57, 0.0  ;;  %v670_v3 = vadd.f32 %v1147_v44, %v478_v58  ;;  %v1154_v4 = vunpack.c.l.bf16 %v1229_v55  ;;  %v1027_v5 = vunpack.c.h.bf16 %v1198_v50  ;;  %v1202_v44 = vld [vmem:[%s1417_s5 + $0xf8] sm:$0xff]   ;;  %s1337_s5 = smov [#allocation2]  }
  0x67   : > { %v733_v7 = vmax.f32 %v669_v60, 0.0  ;;  %v671_v8 = vadd.f32 %v1150_v53, %v479_v61  ;;  %v480_v9 = vadd.f32 %v1439_v11, %v409_v62  ;;  %v410_v10 = vmul.f32 %v1026_v63, %v1427_v0  ;;  %s1279_s6 = sshll.u32 %s1337_s5, 4  ;;  %s1280_s6 = int_to_ptr.vmem [resolvable:$false] %s1279_s6 }
  0x68   : > { %796 = vst [vmem:[%s1463_s20 + $0x188] sm:$0xff] %v732_v2  ;;  %v734_v12 = vmax.f32 %v670_v3, 0.0  ;;  %v411_v13 = vmul.f32 %v1027_v5, %v1427_v0  ;;  %v1155_v14 = vunpack.c.h.bf16 %v1229_v55  ;;  %v1030_v15 = vunpack.c.l.bf16 %v1199_v1  ;;  %s1281_s7 = scalar_lea.vmem %s1280_s6, 16384  ;;  %p1282_p0 = scmp.lt.s32.totalorder %s1700_s23, %s1280_s6 }
  0x69   : > { %797 = vst [vmem:[%s1463_s20 + $0x190] sm:$0xff] %v733_v7  ;;  %v735_v18 = vmax.f32 %v671_v8, 0.0  ;;  %v672_v19 = vadd.f32 %v1151_v59, %v480_v9  ;;  %v481_v20 = vadd.f32 %v1439_v11, %v410_v10  ;;  %v1158_v21 = vunpack.c.l.bf16 %v1230_v6  ;;  %p1283_p1 = scmp.lt.s32.totalorder %s1281_s7, %s1275_s30 }
  0x6a   : > { %798 = vst [vmem:[%s1463_s20 + $0x198] sm:$0xff] %v734_v12  ;;  %v482_v22 = vadd.f32 %v1439_v11, %v411_v13  ;;  %v412_v23 = vmul.f32 %v1030_v15, %v1427_v0  ;;  %v1031_v24 = vunpack.c.h.bf16 %v1199_v1  ;;  %v1159_v25 = vunpack.c.h.bf16 %v1230_v6 }
  0x6b   : > { %799 = vst [vmem:[%s1463_s20 + $0x1a0] sm:$0xff] %v735_v18  ;;  %v736_v27 = vmax.f32 %v672_v19, 0.0  ;;  %v673_v28 = vadd.f32 %v1154_v4, %v481_v20  ;;  %v1034_v29 = vunpack.c.l.bf16 %v1200_v16  ;;  %v1162_v30 = vunpack.c.l.bf16 %v1231_v17  ;;  %p1284_p2 = por %p1283_p1, %p1282_p0 }
  0x6c   : > { %v674_v31 = vadd.f32 %v1155_v14, %v482_v22  ;;  %v483_v32 = vadd.f32 %v1439_v11, %v412_v23  ;;  %v413_v33 = vmul.f32 %v1031_v24, %v1427_v0  ;;  %v1035_v34 = vunpack.c.h.bf16 %v1200_v16 }
  0x6d   : > { %800 = vst [vmem:[%s1463_s20 + $0x1a8] sm:$0xff] %v736_v27  ;;  %v737_v36 = vmax.f32 %v673_v28, 0.0  ;;  %v414_v37 = vmul.f32 %v1034_v29, %v1427_v0  ;;  %v1163_v38 = vunpack.c.h.bf16 %v1231_v17  ;;  %v1038_v39 = vunpack.c.l.bf16 %v1201_v26  ;;  %p1285_p3 = pnand %p1284_p2, %p1278_p13 }
  0x6e   : > { %v738_v40 = vmax.f32 %v674_v31, 0.0  ;;  %v675_v41 = vadd.f32 %v1158_v21, %v483_v32  ;;  %v484_v42 = vadd.f32 %v1439_v11, %v413_v33  ;;  %v415_v43 = vmul.f32 %v1035_v34, %v1427_v0 }
  0x6f   : > { %801 = vst [vmem:[%s1463_s20 + $0x1b0] sm:$0xff] %v737_v36  ;;  %v485_v45 = vadd.f32 %v1439_v11, %v414_v37  ;;  %v416_v46 = vmul.f32 %v1038_v39, %v1427_v0  ;;  %v1166_v47 = vunpack.c.l.bf16 %v1232_v35  ;;  %v1039_v48 = vunpack.c.h.bf16 %v1201_v26 }
  0x70   : > { %802 = vst [vmem:[%s1463_s20 + $0x1b8] sm:$0xff] %v738_v40  ;;  %v739_v50 = vmax.f32 %v675_v41, 0.0  ;;  %v676_v51 = vadd.f32 %v1159_v25, %v484_v42  ;;  %v486_v52 = vadd.f32 %v1439_v11, %v415_v43  ;;  %v1167_v53 = vunpack.c.h.bf16 %v1232_v35 }
  0x71   : > { %v677_v54 = vadd.f32 %v1162_v30, %v485_v45  ;;  %v487_v55 = vadd.f32 %v1439_v11, %v416_v46  ;;  %v417_v56 = vmul.f32 %v1039_v48, %v1427_v0  ;;  %v1042_v57 = vunpack.c.l.bf16 %v1202_v44 }
  0x72   : > { %803 = vst [vmem:[%s1463_s20 + $0x1c0] sm:$0xff] %v739_v50  ;;  %v740_v58 = vmax.f32 %v676_v51, 0.0  ;;  %v678_v59 = vadd.f32 %v1163_v38, %v486_v52  ;;  %v1170_v60 = vunpack.c.l.bf16 %v1233_v49  ;;  %v1043_v61 = vunpack.c.h.bf16 %v1202_v44 }
  0x73   : > { %v741_v62 = vmax.f32 %v677_v54, 0.0  ;;  %v679_v63 = vadd.f32 %v1166_v47, %v487_v55  ;;  %v488_v1 = vadd.f32 %v1439_v11, %v417_v56  ;;  %v418_v2 = vmul.f32 %v1042_v57, %v1427_v0 }
  0x74   : > { %804 = vst [vmem:[%s1463_s20 + $0x1c8] sm:$0xff] %v740_v58  ;;  %v742_v3 = vmax.f32 %v678_v59, 0.0  ;;  %v419_v4 = vmul.f32 %v1043_v61, %v1427_v0  ;;  %v1171_v5 = vunpack.c.h.bf16 %v1233_v49 }
  0x75   : > { %805 = vst [vmem:[%s1463_s20 + $0x1d0] sm:$0xff] %v741_v62  ;;  %v743_v6 = vmax.f32 %v679_v63, 0.0  ;;  %v680_v7 = vadd.f32 %v1167_v53, %v488_v1  ;;  %v489_v8 = vadd.f32 %v1439_v11, %v418_v2 }
  0x76   : > { %806 = vst [vmem:[%s1463_s20 + $0x1d8] sm:$0xff] %v742_v3  ;;  %v490_v9 = vadd.f32 %v1439_v11, %v419_v4 }
  0x77   : > { %807 = vst [vmem:[%s1463_s20 + $0x1e0] sm:$0xff] %v743_v6  ;;  %v744_v10 = vmax.f32 %v680_v7, 0.0  ;;  %v681_v12 = vadd.f32 %v1170_v60, %v489_v8 }
  0x78   : > { %v682_v13 = vadd.f32 %v1171_v5, %v490_v9 }
  0x79   : > { %808 = vst [vmem:[%s1463_s20 + $0x1e8] sm:$0xff] %v744_v10  ;;  %v745_v0 = vmax.f32 %v681_v12, 0.0 }
  0x7a   : > { %v746_v11 = vmax.f32 %v682_v13, 0.0 }
  0x7b   : > { %809 = vst [vmem:[%s1463_s20 + $0x1f0] sm:$0xff] %v745_v0 }
  0x7c   : > { %810 = vst [vmem:[%s1463_s20 + $0x1f8] sm:$0xff] %v746_v11 }
  0x7d   : > { %1288 = shalt.err (!%p1285_p3)
}
  0x7e   : > { %s1289_s8 = scalar_lea.hbm %s1698_s29, 8192  ;;  %s1293_s11 = scalar_lea.hbm %s1750_s4, 16384 }
  0x7f   : > { %p1290_p4 = scmp.ne.s32.totalorder %s1698_s29, %s1289_s8  ;;  %p1294_p9 = scmp.lt.s32.totalorder %s1698_s29, %s1750_s4 }
  0x80   : > { %p1295_p10 = scmp.lt.s32.totalorder %s1293_s11, %s1289_s8 }
  0x81   : > { %p1291_p7 = pnand %p1290_p4, %p1403_p5 }
  0x82   : > { %p1296_p11 = por %p1295_p10, %p1294_p9 }
  0x83   : > { %p1292_p8 = pneg %p1291_p7 }
  0x85   : > { %p1297_p12 = pnand %p1296_p11, %p1292_p8 }
  0x87   : > { %1300 = shalt.err (!%p1297_p12)
}
  0x88   : > { %s1338_s14 = smov 128   ;;  %s1339_s20 = smov 8  }
  0x89   : > { %1234 = dma.vmem_to_hbm [thread:$0]  (%p1403_p5), %s1700_s23, 8192, %s1698_s29, %s1706_s19, %s1338_s14, %s1338_s14, %s1339_s20  }
  0x8a PF: > { %p1240_p13 = scmp.ge.s32.totalorder %s1335_s18, 2  ;;  %s840_s22 = sand.u32 1, %s1323_s15  }
  0x8b   : > { %s841_s27 = scalar_lea.sflag [#allocation3], %s840_s22 }
  0x8c   : > { %p1237_p0 = pnand %p1240_p13, %p1407_p6 }
  0x8e   : > { %p1238_p1 = pneg %p1237_p0 }
  0x90   : > { %1318 = dma.done.wait (%p1238_p1), %s841_s27, 8192  }
  0x91   : > { %1320 = vsyncadd (%p1238_p1), %s841_s27, 4294959104  ;;  %p14_p2 = scmp.ge.s32.totalorder %s1390_s21, 4   ;;  %s1753_s15 = smov %s1327_s16 }
  0x92   : > { %s1754_s16 = smov %s1331_s17  ;;  %s1755_s17 = smov %s1401_s24 }
  0x93   : > { %s1756_s18 = smov %s1390_s21  ;;  %16 = sbr.rel (!%p14_p2) target bundleno = 3 (0x3), region = 74 }
  0x98   :  { %846 = vsyncpa [#allocation3], 1 }
  0x99   :  { %848 = vsyncpa [#allocation3 + $0x1], 1 }

// kernel: resnet50_basic_block.6
= control target key start
LH: loop header
LB: loop body
LE: loop exit
PB: predicated region body
PF: predicated region fallthrough
CT: control target
= control target key end

     0   :  { %s2316_s21 = smov 0   ;;  %s2807_s0 = inlined_call_operand.vmem [shape: bf16[1024,128], index: 0, kind: input, shape index: {}]   ;;  %s2808_s1 = inlined_call_operand.vmem [shape: f32[1,128], index: 1, kind: input, shape index: {}]   ;;  %s2809_s2 = inlined_call_operand.vmem [shape: f32[1,128], index: 2, kind: input, shape index: {}]   ;;  %s2810_s3 = inlined_call_operand.vmem [shape: bf16[128,128], index: 3, kind: input, shape index: {}]   ;;  %s2811_s4 = inlined_call_operand.vmem [shape: bf16[1024,128], index: 4, kind: output, shape index: {0}]   ;;  %s2812_s5 = inlined_call_operand.vmem [shape: f32[2,1,128], index: 5, kind: output, shape index: {1}]   ;;  %s2813_s6 = inlined_call_operand.vmem [shape: f32[2,1,128], index: 6, kind: output, shape index: {2}]  }
   0x1 LB: > { %s2322_s22 = sadd.s32 4294967295, %s2279_s21   ;;  %p1626_p0 = scmp.ge.s32.totalorder %s2279_s21, 1  ;;  %s2279_s21 = sphi %s2316_s21, %s17_s21  }
   0x2   : > { %p218_p1 = scmp.lt.s32.totalorder %s2279_s21, 3 }
   0x4   : > { %p219_p2 = pnand %p1626_p0, %p218_p1 }
   0x5   : > { %s1627_s25 = sshll.u32 (!%p219_p2), %s2322_s22, 6  ;;  %p266_p4 = scmp.lt.s32.totalorder (!%p219_p2), %s2322_s22, 1 }
   0x6   : > { %222 = sbr.rel (%p219_p2) target bundleno = 384 (0x180), region = 36  ;;  %p255_p3 = scmp.lt.s32.totalorder (!%p219_p2), %s1627_s25, 127 }
   0xb   : > { %v2265_v0 = vld [vmem:[%s2810_s3 + $0x38] sm:$0xff]   ;;  %v2266_v1 = vld [vmem:[%s2810_s3 + $0x30] sm:$0xff]   ;;  %s2815_s25 = smov (!%p255_p3, %s1627_s25), 127  ;;  %v2267_v2 = vld [vmem:[%s2810_s3 + $0x28] sm:$0xff]   ;;  %s2817_s22 = smov (!%p266_p4, %s2322_s22), 1 }
   0xc   : > { %2161 = vmatprep.subr.bf16.mxu0 %v2265_v0  ;;  %2241 = vmatprep.subr.bf16.mxu1 %v2265_v0  ;;  %s1628_s30 = sshll.u32 %s2815_s25, 2  ;;  %v2268_v3 = vld [vmem:[%s2810_s3 + $0x20] sm:$0xff]   ;;  %v2269_v13 = vld [vmem:[%s2810_s3 + $0x18] sm:$0xff]   ;;  %v2270_v22 = vld [vmem:[%s2810_s3 + $0x10] sm:$0xff]   ;;  %s268_s7 = scalar_lea.vmem %s2812_s5, %s2817_s22 }
   0xd   : > { %2162 = vmatpush3.bf16.msra.mxu0 %v2265_v0  ;;  %2249 = vmatpush3.bf16.msra.mxu1 %v2265_v0  ;;  %s2344_s9 = scalar_lea.vmem %s2807_s0, %s1628_s30  ;;  %v2353_v5 = vld [vmem:[%s2808_s1] ss:$0 sm:$0xff]  ;;  %v2271_v31 = vld [vmem:[%s2810_s3 + $0x8] sm:$0xff]   ;;  %s2570_s29 = scalar_lea.vmem %s2811_s4, %s1628_s30 }
   0xe   : > { %2163 = vmatprep.subr.bf16.mxu0 %v2266_v1  ;;  %2242 = vmatprep.subr.bf16.mxu1 %v2266_v1  ;;  %v1772_v4 = vld [vmem:[%s2344_s9] sm:$0xff]   ;;  %v2059_v8 = vld [vmem:[%s2344_s9 + $0x8] sm:$0xff]   ;;  %v2060_v9 = vld [vmem:[%s2344_s9 + $0x10] sm:$0xff]   ;;  %s271_s10 = scalar_lea.vmem %s2813_s6, %s2817_s22 }
   0xf   : > { %v1773_v6 = vunpack.c.l.bf16 %v1772_v4  ;;  %v1774_v7 = vunpack.c.h.bf16 %v1772_v4  ;;  %v2360_v10 = vld [vmem:[%s2809_s2] ss:$0 sm:$0xff]  ;;  %v1777_v14 = vunpack.c.l.bf16 %v2059_v8  ;;  %v1778_v15 = vunpack.c.h.bf16 %v2059_v8  ;;  %v2061_v26 = vld [vmem:[%s2344_s9 + $0x18] sm:$0xff]   ;;  %v2063_v38 = vld [vmem:[%s2344_s9 + $0x28] sm:$0xff]  }
  0x10   : > { %v1781_v16 = vunpack.c.l.bf16 %v2060_v9  ;;  %v1782_v19 = vunpack.c.h.bf16 %v2060_v9  ;;  %v2062_v29 = vld [vmem:[%s2344_s9 + $0x20] sm:$0xff]   ;;  %v1785_v30 = vunpack.c.l.bf16 %v2061_v26  ;;  %v1786_v35 = vunpack.c.h.bf16 %v2061_v26  ;;  %v2064_v41 = vld [vmem:[%s2344_s9 + $0x30] sm:$0xff]   ;;  %v2065_v42 = vld [vmem:[%s2344_s9 + $0x38] sm:$0xff]  }
  0x11   : > { %2164 = vmatpush3.bf16.msra.mxu0 %v2266_v1  ;;  %2250 = vmatpush3.bf16.msra.mxu1 %v2266_v1  ;;  %v408_v11 = vmul.f32 %v1773_v6, %v2353_v5  ;;  %v409_v12 = vmul.f32 %v1774_v7, %v2353_v5  ;;  %v410_v23 = vmul.f32 %v1777_v14, %v2353_v5  ;;  %v1789_v37 = vunpack.c.l.bf16 %v2062_v29  ;;  %v2272_v43 = vld [vmem:[%s2810_s3] sm:$0xff]   ;;  %v2067_v63 = vld [vmem:[%s2344_s9 + $0x48] sm:$0xff]   ;;  %v2068_v4 = vld [vmem:[%s2344_s9 + $0x50] sm:$0xff]  }
  0x12   : > { %2165 = vmatprep.subr.bf16.mxu0 %v2267_v2  ;;  %2243 = vmatprep.subr.bf16.mxu1 %v2267_v2  ;;  %v411_v24 = vmul.f32 %v1778_v15, %v2353_v5  ;;  %v412_v25 = vmul.f32 %v1781_v16, %v2353_v5  ;;  %v413_v28 = vmul.f32 %v1782_v19, %v2353_v5  ;;  %v1790_v40 = vunpack.c.h.bf16 %v2062_v29  ;;  %v2066_v48 = vld [vmem:[%s2344_s9 + $0x40] sm:$0xff]  }
  0x13   : > { %v479_v17 = vadd.f32 %v2360_v10, %v408_v11  ;;  %v480_v18 = vadd.f32 %v2360_v10, %v409_v12  ;;  %v481_v32 = vadd.f32 %v2360_v10, %v410_v23  ;;  %v414_v39 = vmul.f32 %v1785_v30, %v2353_v5  ;;  %v2069_v23 = vld [vmem:[%s2344_s9 + $0x58] sm:$0xff]  }
  0x14   : > { %v482_v33 = vadd.f32 %v2360_v10, %v411_v24  ;;  %v483_v34 = vadd.f32 %v2360_v10, %v412_v25  ;;  %v484_v36 = vadd.f32 %v2360_v10, %v413_v28  ;;  %v415_v47 = vmul.f32 %v1786_v35, %v2353_v5 }
  0x15   : > { %2166 = vmatpush3.bf16.msra.mxu0 %v2267_v2  ;;  %2251 = vmatpush3.bf16.msra.mxu1 %v2267_v2  ;;  %v543_v20 = vmax.f32 %v479_v17, 0.0  ;;  %v544_v21 = vmax.f32 %v480_v18, 0.0  ;;  %v545_v44 = vmax.f32 %v481_v32, 0.0  ;;  %v416_v50 = vmul.f32 %v1789_v37, %v2353_v5 }
  0x16   : > { %2167 = vmatprep.subr.bf16.mxu0 %v2268_v3  ;;  %2244 = vmatprep.subr.bf16.mxu1 %v2268_v3  ;;  %v546_v45 = vmax.f32 %v482_v33, 0.0  ;;  %v547_v46 = vmax.f32 %v483_v34, 0.0  ;;  %v548_v49 = vmax.f32 %v484_v36, 0.0  ;;  %v1793_v51 = vunpack.c.l.bf16 %v2063_v38 }
  0x17   : > { %v607_v27 = vpack.c.bf16 %v544_v21, %v543_v20  ;;  %v1794_v52 = vunpack.c.h.bf16 %v2063_v38  ;;  %v1797_v53 = vunpack.c.l.bf16 %v2064_v41  ;;  %v1798_v54 = vunpack.c.h.bf16 %v2064_v41 }
  0x18   : > { %v1801_v55 = vunpack.c.l.bf16 %v2065_v42  ;;  %v1802_v56 = vunpack.c.h.bf16 %v2065_v42  ;;  %v417_v57 = vmul.f32 %v1790_v40, %v2353_v5  ;;  %v1805_v58 = vunpack.c.l.bf16 %v2066_v48 }
  0x19   : > { %2168 = vmatpush3.bf16.msra.mxu0 %v2268_v3  ;;  %2252 = vmatpush3.bf16.msra.mxu1 %v2268_v3  ;;  %v1806_v59 = vunpack.c.h.bf16 %v2066_v48  ;;  %v608_v60 = vpack.c.bf16 %v546_v45, %v545_v44  ;;  %v485_v61 = vadd.f32 %v2360_v10, %v414_v39  ;;  %v486_v62 = vadd.f32 %v2360_v10, %v415_v47  ;;  %v2074_v44 = vld [vmem:[%s2344_s9 + $0x80] sm:$0xff]  }
  0x1a   : > { %2169 = vmatprep.subr.bf16.mxu0 %v2269_v13  ;;  %2245 = vmatprep.subr.bf16.mxu1 %v2269_v13  ;;  %v609_v0 = vpack.c.bf16 %v548_v49, %v547_v46  ;;  %v487_v1 = vadd.f32 %v2360_v10, %v416_v50  ;;  %v418_v2 = vmul.f32 %v1793_v51, %v2353_v5  ;;  %v1809_v14 = vunpack.c.l.bf16 %v2067_v63 }
  0x1b   : > { %2177 = vmatprep.mubr.bf16.mxu0 %v607_v27  ;;  %v419_v3 = vmul.f32 %v1794_v52, %v2353_v5  ;;  %v420_v6 = vmul.f32 %v1797_v53, %v2353_v5  ;;  %v421_v7 = vmul.f32 %v1798_v54, %v2353_v5  ;;  %v422_v8 = vmul.f32 %v1801_v55, %v2353_v5  ;;  %v2431_v52 = vld [vmem:[%s2344_s9 + $0x60] sm:$0xff]  }
  0x1c   : > { %v423_v9 = vmul.f32 %v1802_v56, %v2353_v5  ;;  %v488_v11 = vadd.f32 %v2360_v10, %v417_v57  ;;  %v424_v12 = vmul.f32 %v1805_v58, %v2353_v5  ;;  %v549_v15 = vmax.f32 %v485_v61, 0.0 }
  0x1d   : > { %2170 = vmatpush3.bf16.msra.mxu0 %v2269_v13  ;;  %2253 = vmatpush3.bf16.msra.mxu1 %v2269_v13  ;;  %v425_v13 = vmul.f32 %v1806_v59, %v2353_v5  ;;  %v550_v16 = vmax.f32 %v486_v62, 0.0  ;;  %v1810_v17 = vunpack.c.h.bf16 %v2067_v63  ;;  %v1813_v18 = vunpack.c.l.bf16 %v2068_v4  ;;  %v2075_v59 = vld [vmem:[%s2344_s9 + $0x88] sm:$0xff]  }
  0x1e   : > { %2171 = vmatprep.subr.bf16.mxu0 %v2270_v22  ;;  %2246 = vmatprep.subr.bf16.mxu1 %v2270_v22  ;;  %v551_v19 = vmax.f32 %v487_v1, 0.0  ;;  %v489_v20 = vadd.f32 %v2360_v10, %v418_v2  ;;  %v490_v21 = vadd.f32 %v2360_v10, %v419_v3  ;;  %v491_v24 = vadd.f32 %v2360_v10, %v420_v6 }
  0x1f   : > { %v492_v25 = vadd.f32 %v2360_v10, %v421_v7  ;;  %v493_v26 = vadd.f32 %v2360_v10, %v422_v8  ;;  %v494_v27 = vadd.f32 %v2360_v10, %v423_v9  ;;  %v552_v28 = vmax.f32 %v488_v11, 0.0  ;;  %v2077_v11 = vld [vmem:[%s2344_s9 + $0x98] sm:$0xff]  }
  0x20   : > { %v495_v29 = vadd.f32 %v2360_v10, %v424_v12  ;;  %v496_v30 = vadd.f32 %v2360_v10, %v425_v13  ;;  %v610_v32 = vpack.c.bf16 %v550_v16, %v549_v15  ;;  %v427_v33 = vmul.f32 %v1810_v17, %v2353_v5 }
  0x21   : > { %2172 = vmatpush3.bf16.msra.mxu0 %v2270_v22  ;;  %2254 = vmatpush3.bf16.msra.mxu1 %v2270_v22  ;;  %v1814_v22 = vunpack.c.h.bf16 %v2068_v4  ;;  %v428_v34 = vmul.f32 %v1813_v18, %v2353_v5  ;;  %v1817_v35 = vunpack.c.l.bf16 %v2069_v23  ;;  %v553_v36 = vmax.f32 %v489_v20, 0.0 }
  0x22   : > { %2173 = vmatprep.subr.bf16.mxu0 %v2271_v31  ;;  %2247 = vmatprep.subr.bf16.mxu1 %v2271_v31  ;;  %v554_v37 = vmax.f32 %v490_v21, 0.0  ;;  %v1818_v39 = vunpack.c.h.bf16 %v2069_v23  ;;  %v555_v40 = vmax.f32 %v491_v24, 0.0  ;;  %v556_v41 = vmax.f32 %v492_v25, 0.0  ;;  %v2078_v24 = vld [vmem:[%s2344_s9 + $0xa0] sm:$0xff]  }
  0x23   : > { %v429_v38 = vmul.f32 %v1814_v22, %v2353_v5  ;;  %v557_v42 = vmax.f32 %v493_v26, 0.0  ;;  %v611_v45 = vpack.c.bf16 %v552_v28, %v551_v19  ;;  %v559_v46 = vmax.f32 %v495_v29, 0.0 }
  0x24   : > { %v560_v47 = vmax.f32 %v496_v30, 0.0  ;;  %v498_v49 = vadd.f32 %v2360_v10, %v427_v33  ;;  %v2427_v50 = vadd.f32 %v2360_v10, %v428_v34  ;;  %v430_v51 = vmul.f32 %v1817_v35, %v2353_v5  ;;  %v2079_v33 = vld [vmem:[%s2344_s9 + $0xa8] sm:$0xff]  }
  0x25   : > { %2174 = vmatpush3.bf16.msra.mxu0 %v2271_v31  ;;  %2255 = vmatpush3.bf16.msra.mxu1 %v2271_v31  ;;  %v426_v31 = vmul.f32 %v1809_v14, %v2353_v5  ;;  %v2434_v53 = vadd.f32 %v2360_v10, %v429_v38  ;;  %v431_v54 = vmul.f32 %v1818_v39, %v2353_v5  ;;  %v1837_v55 = vunpack.c.l.bf16 %v2074_v44 }
  0x26   : > { %2175 = vmatprep.subr.bf16.mxu0 %v2272_v43  ;;  %2248 = vmatprep.subr.bf16.mxu1 %v2272_v43  ;;  %v612_v56 = vpack.c.bf16 %v554_v37, %v553_v36  ;;  %v613_v57 = vpack.c.bf16 %v556_v41, %v555_v40  ;;  %v1821_v62 = vunpack.c.l.bf16 %v2431_v52  ;;  %v1838_v63 = vunpack.c.h.bf16 %v2074_v44 }
  0x27   : > { %v497_v48 = vadd.f32 %v2360_v10, %v426_v31  ;;  %v562_v1 = vmax.f32 %v498_v49, 0.0  ;;  %v563_v2 = vmax.f32 %v2427_v50, 0.0  ;;  %v2446_v3 = vadd.f32 %v2360_v10, %v430_v51 }
  0x28   : > { %v440_v4 = vmul.f32 %v1837_v55, %v2353_v5  ;;  %v564_v6 = vmax.f32 %v2434_v53, 0.0  ;;  %v2451_v7 = vadd.f32 %v2360_v10, %v431_v54  ;;  %v441_v8 = vmul.f32 %v1838_v63, %v2353_v5 }
  0x29   : > { %2176 = vmatpush3.bf16.msra.mxu0 %v2272_v43  ;;  %2256 = vmatpush3.bf16.msra.mxu1 %v2272_v43  ;;  %v558_v43 = vmax.f32 %v494_v27, 0.0  ;;  %v561_v61 = vmax.f32 %v497_v48, 0.0  ;;  %v1841_v9 = vunpack.c.l.bf16 %v2075_v59  ;;  %v1822_v12 = vunpack.c.h.bf16 %v2431_v52 }
  0x2a   : > { %v511_v13 = vadd.f32 %v2360_v10, %v440_v4  ;;  %v1842_v14 = vunpack.c.h.bf16 %v2075_v59  ;;  %v2458_v16 = vmul.f32 %v1821_v62, %v2353_v5  ;;  %v512_v17 = vadd.f32 %v2360_v10, %v441_v8 }
  0x2b   : > { %v2437_v58 = vpack.c.bf16 %v558_v43, %v557_v42  ;;  %v442_v18 = vmul.f32 %v1841_v9, %v2353_v5  ;;  %v1849_v23 = vunpack.c.l.bf16 %v2077_v11  ;;  %v2465_v25 = vpack.c.bf16 %v562_v1, %v561_v61  ;;  %v2081_v1 = vld [vmem:[%s2344_s9 + $0xb8] sm:$0xff]  }
  0x2c   : > { %2178 = vmatmul.mubr.bf16.vlgmr.msra.gmra.mxu0 %v608_v60  ;;  %v2440_v60 = vpack.c.bf16 %v560_v47, %v559_v46  ;;  %v575_v20 = vmax.f32 %v511_v13, 0.0  ;;  %v443_v21 = vmul.f32 %v1842_v14, %v2353_v5  ;;  %v576_v26 = vmax.f32 %v512_v17, 0.0  ;;  %v2080_v46 = vld [vmem:[%s2344_s9 + $0xb0] sm:$0xff]   ;;  %v2071_v47 = vld [vmem:[%s2344_s9 + $0x68] sm:$0xff]  }
  0x2d   : > { %2181 = vmatprep.mubr.bf16.mxu0 %v609_v0  ;;  %v2076_v0 = vld [vmem:[%s2344_s9 + $0x90] sm:$0xff]   ;;  %v513_v27 = vadd.f32 %v2360_v10, %v442_v18  ;;  %v1850_v31 = vunpack.c.h.bf16 %v2077_v11  ;;  %v1853_v37 = vunpack.c.l.bf16 %v2078_v24  ;;  %v1854_v43 = vunpack.c.h.bf16 %v2078_v24  ;;  %v2082_v18 = vld [vmem:[%s2344_s9 + $0xc0] sm:$0xff]  }
  0x2e   : > { %v1845_v15 = vunpack.c.l.bf16 %v2076_v0  ;;  %v1846_v19 = vunpack.c.h.bf16 %v2076_v0  ;;  %v514_v29 = vadd.f32 %v2360_v10, %v443_v21  ;;  %v623_v34 = vpack.c.bf16 %v576_v26, %v575_v20 }
  0x2f   : > { %v577_v35 = vmax.f32 %v513_v27, 0.0  ;;  %v447_v40 = vmul.f32 %v1850_v31, %v2353_v5  ;;  %v448_v44 = vmul.f32 %v1853_v37, %v2353_v5  ;;  %v1858_v54 = vunpack.c.h.bf16 %v2079_v33 }
  0x30   : > { %v444_v22 = vmul.f32 %v1845_v15, %v2353_v5  ;;  %v445_v28 = vmul.f32 %v1846_v19, %v2353_v5  ;;  %v578_v38 = vmax.f32 %v514_v29, 0.0  ;;  %2209 = vmatprep.mubr.bf16.mxu1 %v623_v34  ;;  %v1861_v63 = vunpack.c.l.bf16 %v2080_v46  ;;  %v2072_v19 = vld [vmem:[%s2344_s9 + $0x70] sm:$0xff]  }
  0x31   : > { %v518_v49 = vadd.f32 %v2360_v10, %v447_v40  ;;  %v451_v62 = vmul.f32 %v1858_v54, %v2353_v5  ;;  %v1862_v0 = vunpack.c.h.bf16 %v2080_v46  ;;  %v565_v4 = vmax.f32 %v2446_v3, 0.0  ;;  %v2084_v40 = vld [vmem:[%s2344_s9 + $0xd0] sm:$0xff]  }
  0x32   : > { %v515_v30 = vadd.f32 %v2360_v10, %v444_v22  ;;  %v516_v36 = vadd.f32 %v2360_v10, %v445_v28  ;;  %v624_v48 = vpack.c.bf16 %v578_v38, %v577_v35  ;;  %v1825_v8 = vunpack.c.l.bf16 %v2071_v47 }
  0x33   : > { %v582_v61 = vmax.f32 %v518_v49, 0.0  ;;  %v566_v13 = vmax.f32 %v2451_v7, 0.0  ;;  %v1826_v14 = vunpack.c.h.bf16 %v2071_v47  ;;  %v452_v15 = vmul.f32 %v1861_v63, %v2353_v5 }
  0x34   : > { %2182 = vmatmul.mubr.bf16.gmra.mxu0 %v610_v32  ;;  %v446_v32 = vmul.f32 %v1849_v23, %v2353_v5  ;;  %v579_v39 = vmax.f32 %v515_v30, 0.0  ;;  %v580_v42 = vmax.f32 %v516_v36, 0.0  ;;  %2210 = vmatmul.mubr.bf16.vlgmr.msra.gmra.mxu1 %v624_v48  ;;  %v453_v17 = vmul.f32 %v1862_v0, %v2353_v5 }
  0x35   : > { %2185 = vmatprep.mubr.bf16.mxu0 %v611_v45  ;;  %v1857_v45 = vunpack.c.l.bf16 %v2079_v33  ;;  %v433_v3 = vmul.f32 %v1822_v12, %v2353_v5  ;;  %v1865_v21 = vunpack.c.l.bf16 %v2081_v1  ;;  %v1866_v22 = vunpack.c.h.bf16 %v2081_v1  ;;  %v2073_v33 = vld [vmem:[%s2344_s9 + $0x78] sm:$0xff]  }
  0x36   : > { %v517_v41 = vadd.f32 %v2360_v10, %v446_v32  ;;  %v625_v55 = vpack.c.bf16 %v580_v42, %v579_v39  ;;  %v522_v23 = vadd.f32 %v2360_v10, %v451_v62  ;;  %v523_v24 = vadd.f32 %v2360_v10, %v452_v15  ;;  %v2085_v15 = vld [vmem:[%s2344_s9 + $0xd8] sm:$0xff]  }
  0x37   : > { %v450_v59 = vmul.f32 %v1857_v45, %v2353_v5  ;;  %v524_v27 = vadd.f32 %v2360_v10, %v453_v17  ;;  %v1870_v28 = vunpack.c.h.bf16 %v2082_v18  ;;  %v617_v52 = vpack.c.bf16 %v564_v6, %v563_v2  ;;  %v2083_v6 = vld [vmem:[%s2344_s9 + $0xc8] sm:$0xff]  }
  0x38   : > { %v581_v51 = vmax.f32 %v517_v41, 0.0  ;;  %2213 = vmatprep.mubr.bf16.mxu1 %v625_v55  ;;  %v503_v12 = vadd.f32 %v2360_v10, %v2458_v16  ;;  %v1829_v29 = vunpack.c.l.bf16 %v2072_v19  ;;  %v1830_v30 = vunpack.c.h.bf16 %v2072_v19 }
  0x39   : > { %v521_v7 = vadd.f32 %v2360_v10, %v450_v59  ;;  %v504_v31 = vadd.f32 %v2360_v10, %v433_v3  ;;  %v434_v32 = vmul.f32 %v1825_v8, %v2353_v5  ;;  %v454_v34 = vmul.f32 %v1865_v21, %v2353_v5 }
  0x3a   : > { %v455_v35 = vmul.f32 %v1866_v22, %v2353_v5  ;;  %v618_v36 = vpack.c.bf16 %v566_v13, %v565_v4  ;;  %v435_v50 = vmul.f32 %v1826_v14, %v2353_v5  ;;  %v586_v2 = vmax.f32 %v522_v23, 0.0 }
  0x3b   : > { %v585_v53 = vmax.f32 %v521_v7, 0.0  ;;  %v587_v16 = vmax.f32 %v523_v24, 0.0  ;;  %v588_v37 = vmax.f32 %v524_v27, 0.0  ;;  %v457_v39 = vmul.f32 %v1870_v28, %v2353_v5 }
  0x3c   : > { %2186 = vmatmul.mubr.bf16.gmra.mxu0 %v612_v56  ;;  %v449_v56 = vmul.f32 %v1854_v43, %v2353_v5  ;;  %v567_v41 = vmax.f32 %v503_v12, 0.0  ;;  %v436_v42 = vmul.f32 %v1829_v29, %v2353_v5  ;;  %v437_v43 = vmul.f32 %v1830_v30, %v2353_v5 }
  0x3d   : > { %2189 = vmatprep.mubr.bf16.mxu0 %v613_v57  ;;  %v519_v57 = vadd.f32 %v2360_v10, %v448_v44  ;;  %v1833_v44 = vunpack.c.l.bf16 %v2073_v33  ;;  %v568_v45 = vmax.f32 %v504_v31, 0.0  ;;  %v525_v46 = vadd.f32 %v2360_v10, %v454_v34 }
  0x3e   : > { %v520_v9 = vadd.f32 %v2360_v10, %v449_v56  ;;  %v526_v47 = vadd.f32 %v2360_v10, %v455_v35  ;;  %v1873_v48 = vunpack.c.l.bf16 %v2083_v6  ;;  %v628_v49 = vpack.c.bf16 %v586_v2, %v585_v53 }
  0x3f   : > { %v583_v11 = vmax.f32 %v519_v57, 0.0  ;;  %v1877_v54 = vunpack.c.l.bf16 %v2084_v40  ;;  %v1878_v55 = vunpack.c.h.bf16 %v2084_v40  ;;  %v505_v56 = vadd.f32 %v2360_v10, %v434_v32 }
  0x40   : > { %v584_v20 = vmax.f32 %v520_v9, 0.0  ;;  %v528_v59 = vadd.f32 %v2360_v10, %v457_v39  ;;  %v507_v62 = vadd.f32 %v2360_v10, %v436_v42  ;;  %v508_v63 = vadd.f32 %v2360_v10, %v437_v43 }
  0x41   : > { %v1834_v0 = vunpack.c.h.bf16 %v2073_v33  ;;  %v619_v1 = vpack.c.bf16 %v568_v45, %v567_v41  ;;  %v589_v4 = vmax.f32 %v525_v46, 0.0  ;;  %v590_v8 = vmax.f32 %v526_v47, 0.0  ;;  %v2088_v41 = vld [vmem:[%s2344_s9 + $0xf0] sm:$0xff]  }
  0x42   : > { %v627_v26 = vpack.c.bf16 %v584_v20, %v583_v11  ;;  %v458_v9 = vmul.f32 %v1873_v48, %v2353_v5  ;;  %v460_v13 = vmul.f32 %v1877_v54, %v2353_v5  ;;  %v461_v14 = vmul.f32 %v1878_v55, %v2353_v5 }
  0x43   : > { %v438_v17 = vmul.f32 %v1833_v44, %v2353_v5  ;;  %v592_v3 = vmax.f32 %v528_v59, 0.0  ;;  %v569_v19 = vmax.f32 %v505_v56, 0.0  ;;  %v571_v21 = vmax.f32 %v507_v62, 0.0 }
  0x44   : > { %2190 = vmatmul.mubr.bf16.gmra.mxu0 %v2437_v58  ;;  %v626_v58 = vpack.c.bf16 %v582_v61, %v581_v51  ;;  %v1874_v51 = vunpack.c.h.bf16 %v2083_v6  ;;  %v506_v61 = vadd.f32 %v2360_v10, %v435_v50  ;;  %v439_v22 = vmul.f32 %v1834_v0, %v2353_v5 }
  0x45   : > { %2193 = vmatprep.mubr.bf16.mxu0 %v2440_v60  ;;  %v1869_v60 = vunpack.c.l.bf16 %v2082_v18  ;;  %v572_v7 = vmax.f32 %v508_v63, 0.0  ;;  %v630_v23 = vpack.c.bf16 %v590_v8, %v589_v4  ;;  %v529_v24 = vadd.f32 %v2360_v10, %v458_v9 }
  0x46   : > { %2214 = vmatmul.mubr.bf16.gmra.mxu1 %v626_v58  ;;  %v459_v11 = vmul.f32 %v1874_v51, %v2353_v5  ;;  %v570_v20 = vmax.f32 %v506_v61, 0.0  ;;  %v2086_v58 = vld [vmem:[%s2344_s9 + $0xe0] sm:$0xff]   ;;  %v532_v28 = vadd.f32 %v2360_v10, %v461_v14  ;;  %v509_v32 = vadd.f32 %v2360_v10, %v438_v17 }
  0x47   : > { %2217 = vmatprep.mubr.bf16.mxu1 %v627_v26  ;;  %v456_v38 = vmul.f32 %v1869_v60, %v2353_v5  ;;  %v1881_v26 = vunpack.c.l.bf16 %v2085_v15  ;;  %v531_v60 = vadd.f32 %v2360_v10, %v460_v13  ;;  %v1885_v29 = vunpack.c.l.bf16 %v2086_v58 }
  0x48   : > { %v530_v27 = vadd.f32 %v2360_v10, %v459_v11  ;;  %v1886_v30 = vunpack.c.h.bf16 %v2086_v58  ;;  %v620_v31 = vpack.c.bf16 %v570_v20, %v569_v19  ;;  %v510_v33 = vadd.f32 %v2360_v10, %v439_v22 }
  0x49   : > { %v527_v57 = vadd.f32 %v2360_v10, %v456_v38  ;;  %v621_v34 = vpack.c.bf16 %v572_v7, %v571_v21  ;;  %v593_v35 = vmax.f32 %v529_v24, 0.0  ;;  %v595_v53 = vmax.f32 %v531_v60, 0.0 }
  0x4a   : > { %v594_v50 = vmax.f32 %v530_v27, 0.0  ;;  %v596_v2 = vmax.f32 %v532_v28, 0.0  ;;  %v465_v38 = vmul.f32 %v1886_v30, %v2353_v5  ;;  %v573_v39 = vmax.f32 %v509_v32, 0.0 }
  0x4b   : > { %v591_v18 = vmax.f32 %v527_v57, 0.0  ;;  %v574_v40 = vmax.f32 %v510_v33, 0.0  ;;  %v1893_v51 = vunpack.c.l.bf16 %v2088_v41  ;;  %v1894_v54 = vunpack.c.h.bf16 %v2088_v41 }
  0x4c   : > { %2194 = vmatmul.mubr.bf16.gmra.mxu0 %v2465_v25  ;;  %v629_v25 = vpack.c.bf16 %v588_v37, %v587_v16  ;;  %v2087_v16 = vld [vmem:[%s2344_s9 + $0xe8] sm:$0xff]   ;;  %v464_v37 = vmul.f32 %v1885_v29, %v2353_v5  ;;  %v632_v44 = vpack.c.bf16 %v594_v50, %v593_v35  ;;  %v633_v45 = vpack.c.bf16 %v596_v2, %v595_v53 }
  0x4d   : > { %2197 = vmatprep.mubr.bf16.mxu0 %v617_v52  ;;  %v1882_v52 = vunpack.c.h.bf16 %v2085_v15  ;;  %v631_v12 = vpack.c.bf16 %v592_v3, %v591_v18  ;;  %v1889_v43 = vunpack.c.l.bf16 %v2087_v16  ;;  %v1890_v47 = vunpack.c.h.bf16 %v2087_v16 }
  0x4e   : > { %2218 = vmatmul.mubr.bf16.gmra.mxu1 %v628_v49  ;;  %v535_v48 = vadd.f32 %v2360_v10, %v464_v37  ;;  %v536_v49 = vadd.f32 %v2360_v10, %v465_v38  ;;  %v622_v55 = vpack.c.bf16 %v574_v40, %v573_v39  ;;  %v468_v63 = vmul.f32 %v1893_v51, %v2353_v5 }
  0x4f   : > { %2221 = vmatprep.mubr.bf16.mxu1 %v629_v25  ;;  %v463_v6 = vmul.f32 %v1882_v52, %v2353_v5  ;;  %v466_v56 = vmul.f32 %v1889_v43, %v2353_v5  ;;  %v467_v59 = vmul.f32 %v1890_v47, %v2353_v5  ;;  %v469_v0 = vmul.f32 %v1894_v54, %v2353_v5 }
  0x50   : > { %v599_v61 = vmax.f32 %v535_v48, 0.0  ;;  %v600_v62 = vmax.f32 %v536_v49, 0.0  ;;  %v539_v15 = vadd.f32 %v2360_v10, %v468_v63 }
  0x51   : > { %v534_v46 = vadd.f32 %v2360_v10, %v463_v6  ;;  %v537_v4 = vadd.f32 %v2360_v10, %v466_v56  ;;  %v538_v9 = vadd.f32 %v2360_v10, %v467_v59  ;;  %v540_v17 = vadd.f32 %v2360_v10, %v469_v0 }
  0x52   : > { %v635_v14 = vpack.c.bf16 %v600_v62, %v599_v61  ;;  %v603_v21 = vmax.f32 %v539_v15, 0.0 }
  0x53   : > { %v598_v57 = vmax.f32 %v534_v46, 0.0  ;;  %v601_v18 = vmax.f32 %v537_v4, 0.0  ;;  %v602_v3 = vmax.f32 %v538_v9, 0.0  ;;  %v604_v22 = vmax.f32 %v540_v17, 0.0 }
  0x54   : > { %2198 = vmatmul.mubr.bf16.gmra.mxu0 %v618_v36  ;;  %v462_v36 = vmul.f32 %v1881_v26, %v2353_v5 }
  0x55   : > { %2201 = vmatprep.mubr.bf16.mxu0 %v619_v1  ;;  %v2089_v1 = vld [vmem:[%s2344_s9 + $0xf8] sm:$0xff]   ;;  %v636_v58 = vpack.c.bf16 %v602_v3, %v601_v18  ;;  %v637_v24 = vpack.c.bf16 %v604_v22, %v603_v21 }
  0x56   : > { %2222 = vmatmul.mubr.bf16.gmra.mxu1 %v630_v23  ;;  %v533_v42 = vadd.f32 %v2360_v10, %v462_v36  ;;  %v1897_v11 = vunpack.c.l.bf16 %v2089_v1  ;;  %v1898_v13 = vunpack.c.h.bf16 %v2089_v1 }
  0x57   : > { %2225 = vmatprep.mubr.bf16.mxu1 %v631_v12 }
  0x58   : > { %v597_v25 = vmax.f32 %v533_v42, 0.0  ;;  %v470_v19 = vmul.f32 %v1897_v11, %v2353_v5  ;;  %v471_v20 = vmul.f32 %v1898_v13, %v2353_v5 }
  0x5a   : > { %v634_v8 = vpack.c.bf16 %v598_v57, %v597_v25  ;;  %v541_v7 = vadd.f32 %v2360_v10, %v470_v19  ;;  %v542_v23 = vadd.f32 %v2360_v10, %v471_v20 }
  0x5c   : > { %2202 = vmatmul.mubr.bf16.gmra.mxu0 %v620_v31  ;;  %v605_v26 = vmax.f32 %v541_v7, 0.0  ;;  %v606_v27 = vmax.f32 %v542_v23, 0.0 }
  0x5d   : > { %2205 = vmatprep.mubr.bf16.mxu0 %v621_v34 }
  0x5e   : > { %2226 = vmatmul.mubr.bf16.gmra.mxu1 %v632_v44  ;;  %v638_v60 = vpack.c.bf16 %v606_v27, %v605_v26 }
  0x5f   : > { %2229 = vmatprep.mubr.bf16.mxu1 %v633_v45 }
  0x64   : > { %2206 = vmatmul.mubr.bf16.gmra.mxu0 %v622_v55 }
  0x66   : > { %2230 = vmatmul.mubr.bf16.gmra.mxu1 %v634_v8 }
  0x67   : > { %2233 = vmatprep.mubr.bf16.mxu1 %v635_v14 }
  0x6e   : > { %2234 = vmatmul.mubr.bf16.gmra.mxu1 %v636_v58 }
  0x6f   : > { %2237 = vmatprep.mubr.bf16.mxu1 %v637_v24 }
  0x76   : > { %2238 = vmatmul.mubr.bf16.gmra.mxu1 %v638_v60 }
  0xec   : > { %v2179_v28 = vpop.f32.mrf.mxu0 }
  0xed   : > { %v1384_v34 = vmul.f32 %v2179_v28, %v2179_v28 }
  0xee   : > { %v737_v52 = vpop.f32.mrf.mxu0 }
  0xef   : > { %v1382_v29 = vmul.f32 %v737_v52, %v737_v52 }
  0xf0   : > { %v2180_v5 = vpop.f32.mrf.mxu0 }
  0xf1   : > { %v1907_v12 = vpack.c.bf16 %v2180_v5, %v2179_v28  ;;  %v1385_v53 = vmul.f32 %v2180_v5, %v2180_v5 }
  0xf2   : > { %v740_v10 = vpop.f32.mrf.mxu0 }
  0xf3   : > { %2090 = vst [vmem:[%s2570_s29 + $0x8] sm:$0xff] %v1907_v12   ;;  %v1902_v30 = vpack.c.bf16 %v740_v10, %v737_v52  ;;  %v1312_v31 = vadd.f32 %v740_v10, %v737_v52  ;;  %v1383_v32 = vmul.f32 %v740_v10, %v740_v10 }
  0xf4   : > { %v2183_v33 = vpop.f32.mrf.mxu0  ;;  %v2576_v0 = vpop.f32.mrf.mxu1 }
  0xf5   : > { %1903 = vst [vmem:[%s2570_s29] sm:$0xff] %v1902_v30   ;;  %v1313_v35 = vadd.f32 %v2179_v28, %v1312_v31  ;;  %v1446_v36 = vadd.f32 %v1383_v32, %v1382_v29  ;;  %v1388_v47 = vmul.f32 %v2183_v33, %v2183_v33 }
  0xf6   : > { %v753_v50 = vpop.f32.mrf.mxu0  ;;  %v2579_v13 = vpop.f32.mrf.mxu1 }
  0xf7   : > { %v1447_v2 = vadd.f32 %v1446_v36, %v1384_v34  ;;  %v1314_v6 = vadd.f32 %v2180_v5, %v1313_v35  ;;  %v1386_v38 = vmul.f32 %v753_v50, %v753_v50 }
  0xf8   : > { %v2184_v16 = vpop.f32.mrf.mxu0  ;;  %v2582_v3 = vpop.f32.mrf.mxu1 }
  0xf9   : > { %v1315_v37 = vadd.f32 %v1314_v6, %v753_v50  ;;  %v1448_v39 = vadd.f32 %v1447_v2, %v1385_v53  ;;  %v1917_v40 = vpack.c.bf16 %v2184_v16, %v2183_v33  ;;  %v1389_v54 = vmul.f32 %v2184_v16, %v2184_v16 }
  0xfa   : > { %v756_v41 = vpop.f32.mrf.mxu0  ;;  %v1987_v22 = vpack.c.bf16 %v2582_v3, %v2576_v0  ;;  %v2586_v7 = vpop.f32.mrf.mxu1 }
  0xfb   : > { %v1449_v42 = vadd.f32 %v1448_v39, %v1386_v38  ;;  %2092 = vst [vmem:[%s2570_s29 + $0x18] sm:$0xff] %v1917_v40   ;;  %v1912_v43 = vpack.c.bf16 %v756_v41, %v753_v50  ;;  %v1316_v44 = vadd.f32 %v1315_v37, %v756_v41  ;;  %v1387_v45 = vmul.f32 %v756_v41, %v756_v41 }
  0xfc   : > { %v2187_v46 = vpop.f32.mrf.mxu0  ;;  %2106 = vst [vmem:[%s2570_s29 + $0x88] sm:$0xff] %v1987_v22   ;;  %v1982_v28 = vpack.c.bf16 %v2586_v7, %v2579_v13 }
  0xfd   : > { %2091 = vst [vmem:[%s2570_s29 + $0x10] sm:$0xff] %v1912_v43   ;;  %v1317_v48 = vadd.f32 %v2183_v33, %v1316_v44  ;;  %v1450_v49 = vadd.f32 %v1449_v42, %v1387_v45  ;;  %v1392_v14 = vmul.f32 %v2187_v46, %v2187_v46 }
  0xfe   : > { %v769_v51 = vpop.f32.mrf.mxu0  ;;  %2105 = vst [vmem:[%s2570_s29 + $0x80] sm:$0xff] %v1982_v28  }
  0xff   : > { %v1451_v55 = vadd.f32 %v1450_v49, %v1388_v47  ;;  %v1318_v56 = vadd.f32 %v2184_v16, %v1317_v48  ;;  %v1390_v59 = vmul.f32 %v769_v51, %v769_v51 }
 0x100   : > { %v2188_v25 = vpop.f32.mrf.mxu0 }
 0x101   : > { %v1319_v57 = vadd.f32 %v1318_v56, %v769_v51  ;;  %v1452_v61 = vadd.f32 %v1451_v55, %v1389_v54  ;;  %v1927_v62 = vpack.c.bf16 %v2188_v25, %v2187_v46  ;;  %v1393_v19 = vmul.f32 %v2188_v25, %v2188_v25 }
 0x102   : > { %v772_v63 = vpop.f32.mrf.mxu0 }
 0x103   : > { %v1453_v1 = vadd.f32 %v1452_v61, %v1390_v59  ;;  %2094 = vst [vmem:[%s2570_s29 + $0x28] sm:$0xff] %v1927_v62   ;;  %v1922_v4 = vpack.c.bf16 %v772_v63, %v769_v51  ;;  %v1320_v8 = vadd.f32 %v1319_v57, %v772_v63  ;;  %v1391_v9 = vmul.f32 %v772_v63, %v772_v63 }
 0x104   : > { %v2191_v11 = vpop.f32.mrf.mxu0 }
 0x105   : > { %2093 = vst [vmem:[%s2570_s29 + $0x20] sm:$0xff] %v1922_v4   ;;  %v1321_v15 = vadd.f32 %v2187_v46, %v1320_v8  ;;  %v1454_v17 = vadd.f32 %v1453_v1, %v1391_v9  ;;  %v1396_v32 = vmul.f32 %v2191_v11, %v2191_v11 }
 0x106   : > { %v785_v18 = vpop.f32.mrf.mxu0  ;;  %v2591_v52 = vpop.f32.mrf.mxu1 }
 0x107   : > { %v1455_v20 = vadd.f32 %v1454_v17, %v1392_v14  ;;  %v1322_v21 = vadd.f32 %v2188_v25, %v1321_v15  ;;  %v1394_v24 = vmul.f32 %v785_v18, %v785_v18 }
 0x108   : > { %v2192_v58 = vpop.f32.mrf.mxu0  ;;  %v2595_v31 = vpop.f32.mrf.mxu1 }
 0x109   : > { %v1323_v23 = vadd.f32 %v1322_v21, %v785_v18  ;;  %v1456_v26 = vadd.f32 %v1455_v20, %v1393_v19  ;;  %v1937_v27 = vpack.c.bf16 %v2192_v58, %v2191_v11  ;;  %v1397_v50 = vmul.f32 %v2192_v58, %v2192_v58 }
 0x10a   : > { %v788_v60 = vpop.f32.mrf.mxu0  ;;  %v2598_v36 = vpop.f32.mrf.mxu1 }
 0x10b   : > { %v1457_v5 = vadd.f32 %v1456_v26, %v1394_v24  ;;  %2096 = vst [vmem:[%s2570_s29 + $0x38] sm:$0xff] %v1937_v27   ;;  %v1932_v12 = vpack.c.bf16 %v788_v60, %v785_v18  ;;  %v1324_v10 = vadd.f32 %v1323_v23, %v788_v60  ;;  %v1395_v29 = vmul.f32 %v788_v60, %v788_v60 }
 0x10c   : > { %v2195_v30 = vpop.f32.mrf.mxu0  ;;  %v1997_v6 = vpack.c.bf16 %v2598_v36, %v2591_v52  ;;  %v2602_v37 = vpop.f32.mrf.mxu1 }
 0x10d   : > { %2095 = vst [vmem:[%s2570_s29 + $0x30] sm:$0xff] %v1932_v12   ;;  %v1325_v33 = vadd.f32 %v2191_v11, %v1324_v10  ;;  %v1458_v34 = vadd.f32 %v1457_v5, %v1395_v29  ;;  %v1992_v43 = vpack.c.bf16 %v2602_v37, %v2595_v31  ;;  %v1400_v54 = vmul.f32 %v2195_v30, %v2195_v30 }
 0x10e   : > { %v801_v35 = vpop.f32.mrf.mxu0  ;;  %2108 = vst [vmem:[%s2570_s29 + $0x98] sm:$0xff] %v1997_v6   ;;  %v2607_v44 = vpop.f32.mrf.mxu1 }
 0x10f   : > { %v1459_v53 = vadd.f32 %v1458_v34, %v1396_v32  ;;  %v1326_v2 = vadd.f32 %v2192_v58, %v1325_v33  ;;  %v1398_v39 = vmul.f32 %v801_v35, %v801_v35  ;;  %2107 = vst [vmem:[%s2570_s29 + $0x90] sm:$0xff] %v1992_v43  }
 0x110   : > { %v2196_v16 = vpop.f32.mrf.mxu0  ;;  %v2611_v51 = vpop.f32.mrf.mxu1 }
 0x111   : > { %v1327_v38 = vadd.f32 %v1326_v2, %v801_v35  ;;  %v1460_v40 = vadd.f32 %v1459_v53, %v1397_v50  ;;  %v1947_v41 = vpack.c.bf16 %v2196_v16, %v2195_v30  ;;  %v1401_v59 = vmul.f32 %v2196_v16, %v2196_v16 }
 0x112   : > { %v804_v42 = vpop.f32.mrf.mxu0  ;;  %v2614_v57 = vpop.f32.mrf.mxu1 }
 0x113   : > { %v1461_v45 = vadd.f32 %v1460_v40, %v1398_v39  ;;  %2098 = vst [vmem:[%s2570_s29 + $0x48] sm:$0xff] %v1947_v41   ;;  %v1942_v46 = vpack.c.bf16 %v804_v42, %v801_v35  ;;  %v1328_v47 = vadd.f32 %v1327_v38, %v804_v42  ;;  %v1399_v48 = vmul.f32 %v804_v42, %v804_v42 }
 0x114   : > { %v2199_v49 = vpop.f32.mrf.mxu0  ;;  %v2007_v63 = vpack.c.bf16 %v2614_v57, %v2607_v44  ;;  %v2618_v4 = vpop.f32.mrf.mxu1 }
 0x115   : > { %2097 = vst [vmem:[%s2570_s29 + $0x40] sm:$0xff] %v1942_v46   ;;  %v1329_v55 = vadd.f32 %v2195_v30, %v1328_v47  ;;  %v1462_v56 = vadd.f32 %v1461_v45, %v1399_v48  ;;  %v2002_v17 = vpack.c.bf16 %v2618_v4, %v2611_v51  ;;  %v1404_v24 = vmul.f32 %v2199_v49, %v2199_v49 }
 0x116   : > { %v817_v25 = vpop.f32.mrf.mxu0  ;;  %2110 = vst [vmem:[%s2570_s29 + $0xa8] sm:$0xff] %v2007_v63   ;;  %v2623_v18 = vpop.f32.mrf.mxu1 }
 0x117   : > { %v1463_v61 = vadd.f32 %v1462_v56, %v1400_v54  ;;  %v1330_v62 = vadd.f32 %v2196_v16, %v1329_v55  ;;  %v1402_v9 = vmul.f32 %v817_v25, %v817_v25  ;;  %2109 = vst [vmem:[%s2570_s29 + $0xa0] sm:$0xff] %v2002_v17  }
 0x118   : > { %v2200_v1 = vpop.f32.mrf.mxu0  ;;  %v2627_v23 = vpop.f32.mrf.mxu1 }
 0x119   : > { %v1331_v8 = vadd.f32 %v1330_v62, %v817_v25  ;;  %v1464_v11 = vadd.f32 %v1463_v61, %v1401_v59  ;;  %v1957_v14 = vpack.c.bf16 %v2200_v1, %v2199_v49  ;;  %v1405_v5 = vmul.f32 %v2200_v1, %v2200_v1 }
 0x11a   : > { %v820_v15 = vpop.f32.mrf.mxu0  ;;  %v2630_v28 = vpop.f32.mrf.mxu1 }
 0x11b   : > { %v1465_v19 = vadd.f32 %v1464_v11, %v1402_v9  ;;  %2100 = vst [vmem:[%s2570_s29 + $0x58] sm:$0xff] %v1957_v14   ;;  %v1952_v20 = vpack.c.bf16 %v820_v15, %v817_v25  ;;  %v1332_v21 = vadd.f32 %v1331_v8, %v820_v15  ;;  %v1403_v22 = vmul.f32 %v820_v15, %v820_v15 }
 0x11c   : > { %v2203_v58 = vpop.f32.mrf.mxu0  ;;  %v2017_v29 = vpack.c.bf16 %v2630_v28, %v2623_v18  ;;  %v2634_v32 = vpop.f32.mrf.mxu1 }
 0x11d   : > { %2099 = vst [vmem:[%s2570_s29 + $0x50] sm:$0xff] %v1952_v20   ;;  %v1333_v26 = vadd.f32 %v2199_v49, %v1332_v21  ;;  %v1466_v27 = vadd.f32 %v1465_v19, %v1403_v22  ;;  %v2012_v2 = vpack.c.bf16 %v2634_v32, %v2627_v23  ;;  %v1408_v43 = vmul.f32 %v2203_v58, %v2203_v58 }
 0x11e   : > { %v833_v60 = vpop.f32.mrf.mxu0  ;;  %2112 = vst [vmem:[%s2570_s29 + $0xb8] sm:$0xff] %v2017_v29   ;;  %v2639_v6 = vpop.f32.mrf.mxu1 }
 0x11f   : > { %v1467_v12 = vadd.f32 %v1466_v27, %v1404_v24  ;;  %v1334_v10 = vadd.f32 %v2200_v1, %v1333_v26  ;;  %v1406_v34 = vmul.f32 %v833_v60, %v833_v60  ;;  %2111 = vst [vmem:[%s2570_s29 + $0xb0] sm:$0xff] %v2012_v2  }
 0x120   : > { %v2204_v30 = vpop.f32.mrf.mxu0  ;;  %v2643_v42 = vpop.f32.mrf.mxu1 }
 0x121   : > { %v1335_v33 = vadd.f32 %v1334_v10, %v833_v60  ;;  %v1468_v35 = vadd.f32 %v1467_v12, %v1405_v5  ;;  %v1967_v50 = vpack.c.bf16 %v2204_v30, %v2203_v58  ;;  %v1409_v49 = vmul.f32 %v2204_v30, %v2204_v30 }
 0x122   : > { %v836_v53 = vpop.f32.mrf.mxu0  ;;  %v2646_v48 = vpop.f32.mrf.mxu1  ;;  %v1414_v10 = vmul.f32 %v2579_v13, %v2579_v13 }
 0x123   : > { %v1469_v16 = vadd.f32 %v1468_v35, %v1406_v34  ;;  %2102 = vst [vmem:[%s2570_s29 + $0x68] sm:$0xff] %v1967_v50   ;;  %v1962_v38 = vpack.c.bf16 %v836_v53, %v833_v60  ;;  %v1336_v39 = vadd.f32 %v1335_v33, %v836_v53  ;;  %v1407_v40 = vmul.f32 %v836_v53, %v836_v53 }
 0x124   : > { %v2207_v41 = vpop.f32.mrf.mxu0  ;;  %v2027_v56 = vpack.c.bf16 %v2646_v48, %v2639_v6  ;;  %v2650_v59 = vpop.f32.mrf.mxu1  ;;  %v1415_v50 = vmul.f32 %v2586_v7, %v2586_v7 }
 0x125   : > { %2101 = vst [vmem:[%s2570_s29 + $0x60] sm:$0xff] %v1962_v38   ;;  %v1337_v45 = vadd.f32 %v2203_v58, %v1336_v39  ;;  %v1470_v46 = vadd.f32 %v1469_v16, %v1407_v40  ;;  %v2022_v9 = vpack.c.bf16 %v2650_v59, %v2643_v42  ;;  %v1412_v21 = vmul.f32 %v2207_v41, %v2207_v41 }
 0x126   : > { %v849_v47 = vpop.f32.mrf.mxu0  ;;  %2114 = vst [vmem:[%s2570_s29 + $0xc8] sm:$0xff] %v2027_v56   ;;  %v2655_v11 = vpop.f32.mrf.mxu1  ;;  %v1416_v16 = vmul.f32 %v2576_v0, %v2576_v0  ;;  %v1417_v40 = vmul.f32 %v2582_v3, %v2582_v3  ;;  %v1419_v56 = vmul.f32 %v2602_v37, %v2602_v37 }
 0x127   : > { %v1471_v54 = vadd.f32 %v1470_v46, %v1408_v43  ;;  %v1338_v55 = vadd.f32 %v2204_v30, %v1337_v45  ;;  %v1410_v62 = vmul.f32 %v849_v47, %v849_v47  ;;  %2113 = vst [vmem:[%s2570_s29 + $0xc0] sm:$0xff] %v2022_v9  }
 0x128   : > { %v2208_v25 = vpop.f32.mrf.mxu0  ;;  %v2659_v20 = vpop.f32.mrf.mxu1 }
 0x129   : > { %v1339_v61 = vadd.f32 %v1338_v55, %v849_v47  ;;  %v1472_v63 = vadd.f32 %v1471_v54, %v1409_v49  ;;  %v1977_v1 = vpack.c.bf16 %v2208_v25, %v2207_v41  ;;  %v1413_v26 = vmul.f32 %v2208_v25, %v2208_v25 }
 0x12a   : > { %v852_v8 = vpop.f32.mrf.mxu0  ;;  %v2662_v24 = vpop.f32.mrf.mxu1 }
 0x12b   : > { %v1473_v14 = vadd.f32 %v1472_v63, %v1410_v62  ;;  %2104 = vst [vmem:[%s2570_s29 + $0x78] sm:$0xff] %v1977_v1   ;;  %v1972_v15 = vpack.c.bf16 %v852_v8, %v849_v47  ;;  %v1340_v17 = vadd.f32 %v1339_v61, %v852_v8  ;;  %v1411_v19 = vmul.f32 %v852_v8, %v852_v8 }
 0x12c   : > { %v2037_v5 = vpack.c.bf16 %v2662_v24, %v2655_v11  ;;  %v2666_v12 = vpop.f32.mrf.mxu1  ;;  %v1421_v1 = vmul.f32 %v2598_v36, %v2598_v36 }
 0x12d   : > { %2103 = vst [vmem:[%s2570_s29 + $0x70] sm:$0xff] %v1972_v15   ;;  %v1341_v22 = vadd.f32 %v2207_v41, %v1340_v17  ;;  %v1474_v58 = vadd.f32 %v1473_v14, %v1411_v19  ;;  %v2032_v33 = vpack.c.bf16 %v2666_v12, %v2659_v20 }
 0x12e   : > { %2116 = vst [vmem:[%s2570_s29 + $0xd8] sm:$0xff] %v2037_v5   ;;  %v2674_v34 = vpop.f32.mrf.mxu1 }
 0x12f   : > { %v1342_v27 = vadd.f32 %v2208_v25, %v1341_v22  ;;  %v1475_v60 = vadd.f32 %v1474_v58, %v1412_v21  ;;  %2115 = vst [vmem:[%s2570_s29 + $0xd0] sm:$0xff] %v2032_v33   ;;  %v1424_v58 = vmul.f32 %v2607_v44, %v2607_v44 }
 0x130   : > { %v2680_v2 = vpop.f32.mrf.mxu1 }
 0x131   : > { %v1476_v29 = vadd.f32 %v1475_v60, %v1413_v26  ;;  %v1343_v30 = vadd.f32 %v1342_v27, %v2579_v13 }
 0x132   : > { %v2685_v39 = vpop.f32.mrf.mxu1 }
 0x133   : > { %v1344_v35 = vadd.f32 %v1343_v30, %v2586_v7  ;;  %v1477_v53 = vadd.f32 %v1476_v29, %v1414_v10  ;;  %v2047_v43 = vpack.c.bf16 %v2685_v39, %v2674_v34  ;;  %v1426_v29 = vmul.f32 %v2627_v23, %v2627_v23 }
 0x134   : > { %v2692_v45 = vpop.f32.mrf.mxu1 }
 0x135   : > { %v1345_v13 = vadd.f32 %v2576_v0, %v1344_v35  ;;  %v1478_v38 = vadd.f32 %v1477_v53, %v1415_v50  ;;  %v1418_v0 = vmul.f32 %v2595_v31, %v2595_v31  ;;  %2118 = vst [vmem:[%s2570_s29 + $0xe8] sm:$0xff] %v2047_v43   ;;  %v2042_v49 = vpack.c.bf16 %v2692_v45, %v2680_v2 }
 0x136   : > { %v2700_v54 = vpop.f32.mrf.mxu1  ;;  %v1427_v35 = vmul.f32 %v2634_v32, %v2634_v32 }
 0x137   : > { %v1479_v41 = vadd.f32 %v1478_v38, %v1416_v16  ;;  %v1346_v7 = vadd.f32 %v2582_v3, %v1345_v13  ;;  %2117 = vst [vmem:[%s2570_s29 + $0xe0] sm:$0xff] %v2042_v49   ;;  %v1430_v38 = vmul.f32 %v2643_v42, %v2643_v42  ;;  %v1434_v49 = vmul.f32 %v2659_v20, %v2659_v20 }
 0x138   : > { %v2706_v25 = vpop.f32.mrf.mxu1 }
 0x139   : > { %v1347_v46 = vadd.f32 %v1346_v7, %v2595_v31  ;;  %v1480_v47 = vadd.f32 %v1479_v41, %v1417_v40  ;;  %v1420_v31 = vmul.f32 %v2591_v52, %v2591_v52  ;;  %v1431_v7 = vmul.f32 %v2650_v59, %v2650_v59 }
 0x13a   : > { %v2711_v63 = vpop.f32.mrf.mxu1 }
 0x13b   : > { %v1481_v55 = vadd.f32 %v1480_v47, %v1418_v0  ;;  %v1348_v3 = vadd.f32 %v1347_v46, %v2602_v37  ;;  %v2057_v37 = vpack.c.bf16 %v2711_v63, %v2700_v54 }
 0x13c   : > { %v2718_v14 = vpop.f32.mrf.mxu1 }
 0x13d   : > { %v1349_v61 = vadd.f32 %v2591_v52, %v1348_v3  ;;  %v1482_v62 = vadd.f32 %v1481_v55, %v1419_v56  ;;  %v1422_v52 = vmul.f32 %v2611_v51, %v2611_v51  ;;  %2120 = vst [vmem:[%s2570_s29 + $0xf8] sm:$0xff] %v2057_v37   ;;  %v2052_v19 = vpack.c.bf16 %v2718_v14, %v2706_v25 }
 0x13e   : > { %v1435_v56 = vmul.f32 %v2666_v12, %v2666_v12 }
 0x13f   : > { %v1483_v8 = vadd.f32 %v1482_v62, %v1420_v31  ;;  %v1350_v9 = vadd.f32 %v2598_v36, %v1349_v61  ;;  %v1423_v36 = vmul.f32 %v2618_v4, %v2618_v4  ;;  %2119 = vst [vmem:[%s2570_s29 + $0xf0] sm:$0xff] %v2052_v19  }
 0x141   : > { %v1351_v15 = vadd.f32 %v1350_v9, %v2611_v51  ;;  %v1484_v17 = vadd.f32 %v1483_v8, %v1421_v1  ;;  %v1425_v51 = vmul.f32 %v2614_v57, %v2614_v57  ;;  %v1438_v8 = vmul.f32 %v2680_v2, %v2680_v2 }
 0x143   : > { %v1485_v21 = vadd.f32 %v1484_v17, %v1422_v52  ;;  %v1352_v22 = vadd.f32 %v1351_v15, %v2618_v4  ;;  %v1439_v15 = vmul.f32 %v2692_v45, %v2692_v45 }
 0x145   : > { %v1353_v26 = vadd.f32 %v2607_v44, %v1352_v22  ;;  %v1486_v27 = vadd.f32 %v1485_v21, %v1423_v36  ;;  %v1428_v44 = vmul.f32 %v2623_v18, %v2623_v18  ;;  %v1442_v22 = vmul.f32 %v2706_v25, %v2706_v25 }
 0x147   : > { %v1487_v60 = vadd.f32 %v1486_v27, %v1424_v58  ;;  %v1354_v5 = vadd.f32 %v2614_v57, %v1353_v26  ;;  %v1429_v57 = vmul.f32 %v2630_v28, %v2630_v28  ;;  %v1444_v26 = vmul.f32 %v2700_v54, %v2700_v54 }
 0x149   : > { %v1355_v10 = vadd.f32 %v1354_v5, %v2627_v23  ;;  %v1488_v30 = vadd.f32 %v1487_v60, %v1425_v51 }
 0x14b   : > { %v1489_v4 = vadd.f32 %v1488_v30, %v1426_v29  ;;  %v1356_v33 = vadd.f32 %v1355_v10, %v2634_v32 }
 0x14d   : > { %v1357_v50 = vadd.f32 %v2623_v18, %v1356_v33  ;;  %v1490_v53 = vadd.f32 %v1489_v4, %v1427_v35  ;;  %v1432_v18 = vmul.f32 %v2639_v6, %v2639_v6 }
 0x14f   : > { %v1491_v16 = vadd.f32 %v1490_v53, %v1428_v44  ;;  %v1358_v13 = vadd.f32 %v2630_v28, %v1357_v50  ;;  %v1433_v28 = vmul.f32 %v2646_v48, %v2646_v48 }
 0x151   : > { %v1359_v23 = vadd.f32 %v1358_v13, %v2643_v42  ;;  %v1492_v40 = vadd.f32 %v1491_v16, %v1429_v57 }
 0x153   : > { %v1493_v41 = vadd.f32 %v1492_v40, %v1430_v38  ;;  %v1360_v32 = vadd.f32 %v1359_v23, %v2650_v59 }
 0x155   : > { %v1361_v43 = vadd.f32 %v2639_v6, %v1360_v32  ;;  %v1494_v46 = vadd.f32 %v1493_v41, %v1431_v7  ;;  %v1436_v6 = vmul.f32 %v2655_v11, %v2655_v11 }
 0x157   : > { %v1495_v0 = vadd.f32 %v1494_v46, %v1432_v18  ;;  %v1362_v47 = vadd.f32 %v2646_v48, %v1361_v43  ;;  %v1437_v48 = vmul.f32 %v2662_v24, %v2662_v24 }
 0x159   : > { %v1363_v42 = vadd.f32 %v1362_v47, %v2659_v20  ;;  %v1496_v55 = vadd.f32 %v1495_v0, %v1433_v28 }
 0x15b   : > { %v1497_v3 = vadd.f32 %v1496_v55, %v1434_v49  ;;  %v1364_v59 = vadd.f32 %v1363_v42, %v2666_v12 }
 0x15d   : > { %v1365_v31 = vadd.f32 %v2655_v11, %v1364_v59  ;;  %v1498_v61 = vadd.f32 %v1497_v3, %v1435_v56  ;;  %v1440_v11 = vmul.f32 %v2674_v34, %v2674_v34 }
 0x15f   : > { %v1499_v62 = vadd.f32 %v1498_v61, %v1436_v6  ;;  %v1366_v1 = vadd.f32 %v2662_v24, %v1365_v31  ;;  %v1441_v24 = vmul.f32 %v2685_v39, %v2685_v39 }
 0x161   : > { %v1367_v20 = vadd.f32 %v1366_v1, %v2680_v2  ;;  %v1500_v9 = vadd.f32 %v1499_v62, %v1437_v48 }
 0x163   : > { %v1501_v37 = vadd.f32 %v1500_v9, %v1438_v8  ;;  %v1368_v12 = vadd.f32 %v1367_v20, %v2692_v45 }
 0x165   : > { %v1369_v52 = vadd.f32 %v2674_v34, %v1368_v12  ;;  %v1502_v17 = vadd.f32 %v1501_v37, %v1439_v15  ;;  %v1443_v34 = vmul.f32 %v2718_v14, %v2718_v14 }
 0x167   : > { %v1503_v19 = vadd.f32 %v1502_v17, %v1440_v11  ;;  %v1370_v2 = vadd.f32 %v2685_v39, %v1369_v52  ;;  %v1445_v39 = vmul.f32 %v2711_v63, %v2711_v63 }
 0x169   : > { %v1371_v21 = vadd.f32 %v1370_v2, %v2706_v25  ;;  %v1504_v36 = vadd.f32 %v1503_v19, %v1441_v24 }
 0x16b   : > { %v1505_v45 = vadd.f32 %v1504_v36, %v1442_v22  ;;  %v1372_v58 = vadd.f32 %v1371_v21, %v2718_v14 }
 0x16d   : > { %v1373_v27 = vadd.f32 %v2700_v54, %v1372_v58  ;;  %v1506_v51 = vadd.f32 %v1505_v45, %v1443_v34 }
 0x16f   : > { %v1374_v60 = vadd.f32 %v2711_v63, %v1373_v27  ;;  %v1507_v25 = vadd.f32 %v1506_v51, %v1444_v26 }
 0x171   : > { %v1375_v5 = vrot.slane %v1374_v60, 4  ;;  %v1508_v10 = vadd.f32 %v1507_v25, %v1445_v39 }
 0x173   : > { %v1376_v29 = vadd.f32 %v1375_v5, %v1374_v60  ;;  %v1509_v30 = vrot.slane %v1508_v10, 4 }
 0x175   : > { %v1377_v4 = vrot.slane %v1376_v29, 2  ;;  %v1510_v33 = vadd.f32 %v1509_v30, %v1508_v10 }
 0x177   : > { %v1378_v14 = vadd.f32 %v1377_v4, %v1376_v29  ;;  %v1511_v35 = vrot.slane %v1510_v33, 2 }
 0x179   : > { %v1379_v44 = vrot.slane %v1378_v14, 1  ;;  %v1512_v50 = vadd.f32 %v1511_v35, %v1510_v33 }
 0x17b   : > { %v1380_v54 = vadd.f32 %v1379_v44, %v1378_v14  ;;  %v1513_v53 = vrot.slane %v1512_v50, 1 }
 0x17d   : > { %1381 = vst [vmem:[%s268_s7] sm:$0x1] %v1380_v54  ;;  %v1514_v63 = vadd.f32 %v1513_v53, %v1512_v50 }
 0x17f   : > { %1515 = vst [vmem:[%s271_s10] sm:$0x1] %v1514_v63 }
 0x180 PF: > { %s17_s21 = sadd.s32 1, %s2279_s21  }
 0x181   : > { %p14_p5 = scmp.ge.s32.totalorder %s17_s21, 4  }
 0x183   :  { %16 = sbr.rel (!%p14_p5) target bundleno = 1 (0x1), region = 90 }

// kernel: resnet50_basic_block.5
= control target key start
LH: loop header
LB: loop body
LE: loop exit
PB: predicated region body
PF: predicated region fallthrough
CT: control target
= control target key end

     0   :  { %s9004_s21 = smov 0   ;;  %s12205_s0 = inlined_call_operand.vmem [shape: bf16[1024,128], index: 0, kind: input, shape index: {}]   ;;  %s12206_s1 = inlined_call_operand.vmem [shape: f32[1,128], index: 1, kind: input, shape index: {}]   ;;  %s12207_s2 = inlined_call_operand.vmem [shape: f32[1,128], index: 2, kind: input, shape index: {}]   ;;  %s12208_s3 = inlined_call_operand.vmem [shape: bf16[1152,128], index: 3, kind: input, shape index: {}]   ;;  %s12209_s4 = inlined_call_operand.vmem [shape: bf16[1024,128], index: 4, kind: output, shape index: {0}]   ;;  %s12210_s5 = inlined_call_operand.vmem [shape: f32[4,1,128], index: 5, kind: output, shape index: {1}]   ;;  %s12211_s6 = inlined_call_operand.vmem [shape: f32[4,1,128], index: 6, kind: output, shape index: {2}]  }
   0x1 LB: > { %s9010_s22 = sadd.s32 4294967295, %s8965_s21   ;;  %p7505_p0 = scmp.ge.s32.totalorder %s8965_s21, 1  ;;  %s8965_s21 = sphi %s9004_s21, %s17_s21  }
   0x2   : > { %p218_p1 = scmp.lt.s32.totalorder %s8965_s21, 5 }
   0x4   : > { %p219_p2 = pnand %p7505_p0, %p218_p1 }
   0x6   : > { %222 = sbr.rel (%p219_p2) target bundleno = 851 (0x353), region = 36 }
   0xb   : > { %v8671_v0 = vld [vmem:[%s12208_s3 + $0x78] sm:$0xff]   ;;  %v12226_v2 = vmov 0   ;;  %v8673_v3 = vld [vmem:[%s12208_s3 + $0x70] sm:$0xff]   ;;  %v615_v4 = vlaneseq  ;;  %v8675_v6 = vld [vmem:[%s12208_s3 + $0x68] sm:$0xff]   ;;  %s7506_s9 = sshll.u32 %s9010_s22, 5  ;;  %vm8968_vm4 = vmmov 1  }
   0xc   : > { %v8672_v1 = vld [vmem:[%s12208_s3 + $0x38] sm:$0xff]   ;;  %275 = vst [vmem:[#allocation2] sm:$0xf] %v12226_v2  ;;  %276 = vst [vmem:[#allocation2 + $0x4] sm:$0xf] %v12226_v2  ;;  %8125 = vmatprep.subr.bf16.mxu0 %v8671_v0  ;;  %8645 = vmatprep.subr.bf16.mxu1 %v8671_v0  ;;  %v8674_v5 = vld [vmem:[%s12208_s3 + $0x30] sm:$0xff]  }
   0xd   : > { %277 = vst [vmem:[#allocation2 + $0x8] sm:$0xf] %v12226_v2  ;;  %278 = vst [vmem:[#allocation2 + $0x8c] sm:$0xf] %v12226_v2  ;;  %8126 = vmatpush3.bf16.msra.mxu0 %v8672_v1  ;;  %8653 = vmatpush3.bf16.msra.mxu1 %v8672_v1  ;;  %v9035_v7 = vshrl.u32 %v615_v4, 7  ;;  %v8676_v8 = vld [vmem:[%s12208_s3 + $0x28] sm:$0xff]  }
   0xe   : > { %279 = vst [vmem:[#allocation2 + $0x90] sm:$0xf] %v12226_v2  ;;  %280 = vst [vmem:[#allocation2 + $0x94] sm:$0xf] %v12226_v2  ;;  %8127 = vmatprep.subr.bf16.mxu0 %v8673_v3  ;;  %8646 = vmatprep.subr.bf16.mxu1 %v8673_v3  ;;  %v8677_v9 = vld [vmem:[%s12208_s3 + $0x60] sm:$0xff]   ;;  %p255_p3 = scmp.lt.s32.totalorder %s7506_s9, 127 }
   0xf   : > { %v618_v10 = vadd.s32 16, %v9035_v7  ;;  %v652_v11 = vand.u32 15, %v9035_v7  ;;  %v8678_v12 = vld [vmem:[%s12208_s3 + $0x20] sm:$0xff]   ;;  %v8679_v13 = vld [vmem:[%s12208_s3 + $0x58] sm:$0xff]   ;;  %v9056_v15 = vadd.s32 192, %v9035_v7  ;;  %v8681_v18 = vld [vmem:[%s12208_s3 + $0x50] sm:$0xff]  }
  0x10   : > { %s12792_s9 = smov (!%p255_p3, %s7506_s9), 127  ;;  %v8680_v17 = vld [vmem:[%s12208_s3 + $0x18] sm:$0xff]   ;;  %v8682_v20 = vld [vmem:[%s12208_s3 + $0x10] sm:$0xff]   ;;  %vm1257_vm3 = vsmask.f32 3328  ;;  %v9086_v21 = vadd.s32 208, %v9035_v7  ;;  %vm1194_vm5 = vmpackc.low %vm8968_vm4, %vm8968_vm4 }
  0x11   : > { %8128 = vmatpush3.bf16.msra.mxu0 %v8674_v5  ;;  %8654 = vmatpush3.bf16.msra.mxu1 %v8674_v5  ;;  %v666_v14 = vand.u32 15, %v618_v10  ;;  %s7507_s18 = sshll.u32 %s12792_s9, 2  ;;  %vm9058_vm0 = vcmp.ne.s32.totalorder %v652_v11, 0  ;;  %v820_v22 = vand.u32 15, %v9056_v15  ;;  %v8683_v23 = vld [vmem:[%s12208_s3 + $0x48] sm:$0xff]   ;;  %v9100_v27 = vsel %vm1194_vm5, 65537, %v12226_v2 }
  0x12   : > { %8129 = vmatprep.subr.bf16.mxu0 %v8675_v6  ;;  %8647 = vmatprep.subr.bf16.mxu1 %v8675_v6  ;;  %s9070_s25 = scalar_lea.vmem %s12205_s0, %s7507_s18  ;;  %vm1193_vm2 = vmpackc.low %vm9058_vm0, %vm9058_vm0  ;;  %vm1258_vm6 = vsmask.f32 7440  ;;  %v1270_v34 = vshll.u32 %v9100_v27, 16  ;;  %v1274_v35 = vshrl.u32 %v9100_v27, 16  ;;  %v8684_v38 = vld [vmem:[%s12208_s3 + $0x8] sm:$0xff]   ;;  %v8685_v48 = vld [vmem:[%s12208_s3 + $0x40] sm:$0xff]   ;;  %s12088_s13 = scalar_lea.vmem %s12209_s4, %s7507_s18 }
  0x13   : > { %vm9075_vm1 = vcmp.ne.s32.totalorder %v666_v14, 0  ;;  %v1225_v24 = vsel %vm1193_vm2, 65537, %v12226_v2  ;;  %v2004_v25 = vld [vmem:[#allocation2 + $0x4] sm:$0xf]  ;;  %v9094_v26 = vld [vmem:[%s9070_s25 + $0x50] sm:$0xff]   ;;  %v8090_v31 = vld [vmem:[%s9070_s25 + $0x58] sm:$0xff]  }
  0x14   : > { %vm1195_vm7 = vmpackc.low %vm9075_vm1, %vm9075_vm1  ;;  %v1261_v28 = vshll.u32 %v1225_v24, 16  ;;  %v1264_v29 = vshrl.u32 %v1225_v24, 16  ;;  %v2005_v30 = vld [vmem:[#allocation2 + $0x8] sm:$0xf]  ;;  %2036 = vst [vmem:[#allocation3 + $0x4] sm:$0xf] %v2004_v25  ;;  %v7904_v36 = vunpack.c.h.bf16 %v9094_v26  ;;  %v7907_v46 = vunpack.c.l.bf16 %v8090_v31 }
  0x15   : > { %8130 = vmatpush3.bf16.msra.mxu0 %v8676_v8  ;;  %8655 = vmatpush3.bf16.msra.mxu1 %v8676_v8  ;;  %v1096_v32 = vld [vmem:[#allocation2] sm:$0x8]  ;;  %v1227_v33 = vsel %vm1195_vm7, 65537, %v12226_v2  ;;  %2037 = vst [vmem:[#allocation3 + $0x28] sm:$0xf] %v2005_v30  ;;  %v9122_v44 = vrot.slane %v1270_v34, 5  ;;  %v7908_v47 = vunpack.c.h.bf16 %v8090_v31  ;;  %vm9133_vm11 = vmor %vm1257_vm3, %vm1258_vm6 }
  0x16   : > { %8131 = vmatprep.subr.bf16.mxu0 %v8677_v9  ;;  %8648 = vmatprep.subr.bf16.mxu1 %v8677_v9  ;;  %v9108_v37 = vld [vmem:[%s9070_s25 + $0x60] sm:$0xff]   ;;  %v9113_v39 = vrot.slane %v1261_v28, 5  ;;  %v1266_v40 = vrot.slane %v1264_v29, 4  ;;  %v1280_v41 = vshll.u32 %v1227_v33, 16  ;;  %v1284_v42 = vshrl.u32 %v1227_v33, 16  ;;  %v8693_v6 = vld [vmem:[%s12208_s3 + $0xf8] sm:$0xff]  }
  0x17   : > { %vm1645_vm8 = vsmask.f32 256  ;;  %vm1646_vm9 = vsmask.f32 4368  ;;  %v9118_v43 = vld [vmem:[%s12206_s1] ss:$0 sm:$0xff]  ;;  %v7911_v56 = vunpack.c.l.bf16 %v9108_v37 }
  0x18   : > { %12351 = vst [vmem:[#allocation4_spill] sm:$0xff] %v9113_v39  ;;  %v1276_v45 = vrot.slane %v1274_v35, 4  ;;  %v1267_v49 = vor.u32 %v1266_v40, %v9113_v39  ;;  %v1282_v50 = vrot.slane %v1280_v41, 5  ;;  %v1286_v51 = vrot.slane %v1284_v42, 4  ;;  %v1097_v52 = vld [vmem:[#allocation2 + $0x4] sm:$0xf]  ;;  %vm9192_vm14 = vmor %vm1645_vm8, %vm1646_vm9 }
  0x19   : > { %8132 = vmatpush3.bf16.msra.mxu0 %v8678_v12  ;;  %8656 = vmatpush3.bf16.msra.mxu1 %v8678_v12  ;;  %vm12212_vm10 = vcmp.ne.s16.totalorder %v9113_v39, 0  ;;  %v9144_v57 = vld [vmem:[%s12207_s2] ss:$0 sm:$0xff]  ;;  %v834_v58 = vand.u32 15, %v9086_v21  ;;  %v1098_v60 = vld [vmem:[#allocation2 + $0x8] sm:$0xf]  ;;  %v373_v0 = vmul.f32 %v7904_v36, %v9118_v43  ;;  %v374_v3 = vmul.f32 %v7907_v46, %v9118_v43 }
  0x1a   : > { %8133 = vmatprep.subr.bf16.mxu0 %v8679_v13  ;;  %8649 = vmatprep.subr.bf16.mxu1 %v8679_v13  ;;  %v1277_v54 = vor.u32 %v1276_v45, %v9122_v44  ;;  %v1612_v55 = vsel %vm12212_vm10, %v1096_v32, 0  ;;  %v8686_v59 = vld [vmem:[%s12208_s3] sm:$0xff]   ;;  %v1268_v61 = vrot.slane %v1267_v49, 4  ;;  %v1287_v62 = vor.u32 %v1286_v51, %v1282_v50  ;;  %v9188_v30 = vld [vmem:[%s9070_s25 + $0x8] sm:$0xff]   ;;  %p266_p4 = scmp.lt.s32.totalorder %s9010_s22, 3 }
  0x1b   : > { %v1649_v63 = vshrl.u32 %v1612_v55, 16  ;;  %v375_v4 = vmul.f32 %v7908_v47, %v9118_v43  ;;  %v376_v5 = vmul.f32 %v7911_v56, %v9118_v43  ;;  %v412_v11 = vadd.f32 %v9144_v57, %v373_v0  ;;  %v7862_v29 = vld [vmem:[%s9070_s25] sm:$0xff]  }
  0x1c   : > { %v9151_v1 = vrot.slane %v1277_v54, 4  ;;  %v1273_v8 = vsel %vm9133_vm11, %v1268_v61, %v9122_v44  ;;  %v9162_v9 = vrot.slane %v1287_v62, 4  ;;  %v12355_v13 = vmov 0  ;;  %s12794_s22 = smov (!%p266_p4, %s9010_s22), 3 }
  0x1d   : > { %8134 = vmatpush3.bf16.msra.mxu0 %v8680_v17  ;;  %8657 = vmatpush3.bf16.msra.mxu1 %v8680_v17  ;;  %v7544_v10 = vrot.slane %v1649_v63, 11  ;;  %vm9168_vm12 = vcmp.ne.s16.totalorder %v1273_v8, 0  ;;  %v413_v14 = vadd.f32 %v9144_v57, %v374_v3  ;;  %v414_v16 = vadd.f32 %v9144_v57, %v375_v4  ;;  %v8694_v17 = vld [vmem:[%s12208_s3 + $0x178] sm:$0xff]   ;;  %v9218_v3 = vld [vmem:[%s9070_s25 + $0x68] sm:$0xff]   ;;  %s268_s14 = scalar_lea.vmem %s12210_s5, %s12794_s22  ;;  %s271_s17 = scalar_lea.vmem %s12211_s6, %s12794_s22 }
  0x1e   : > { %8135 = vmatprep.subr.bf16.mxu0 %v8681_v18  ;;  %8650 = vmatprep.subr.bf16.mxu1 %v8681_v18  ;;  %12354 = vst [vmem:[#allocation5_spill] sm:$0xff] %v9151_v1  ;;  %v1283_v12 = vsel %vm9133_vm11, %v9151_v1, %v1282_v50  ;;  %v12356_v13 = vsel %vm9168_vm12, 4294967295, %v12355_v13  ;;  %v12358_v18 = vmov 0  ;;  %v1613_v19 = vsel %vm9168_vm12, %v1097_v52, 0 }
  0x1f   : > { %12357 = vst [vmem:[#allocation6_spill] sm:$0xff] %v12356_v13  ;;  %vm9177_vm13 = vcmp.ne.s16.totalorder %v1283_v12, 0  ;;  %v444_v21 = vmax.f32 %v412_v11, 0.0  ;;  %v1654_v24 = vshrl.u32 %v1613_v19, 16  ;;  %v1657_v25 = vshll.u32 %v1613_v19, 16 }
  0x20   : > { %v12359_v18 = vsel %vm9177_vm13, 4294967295, %v12358_v18  ;;  %v445_v28 = vmax.f32 %v413_v14, 0.0  ;;  %v446_v33 = vmax.f32 %v414_v16, 0.0  ;;  %vm1056_vm15 = vcmp.ne.s32.totalorder %v820_v22, 0 }
  0x21   : > { %8136 = vmatpush3.bf16.msra.mxu0 %v8682_v20  ;;  %8658 = vmatpush3.bf16.msra.mxu1 %v8682_v20  ;;  %12360 = vst [vmem:[#allocation7_spill] sm:$0xff] %v12359_v18  ;;  %v415_v20 = vadd.f32 %v9144_v57, %v376_v5  ;;  %v1656_v40 = vrot.slane %v1654_v24, 7  ;;  %vm9198_vm0 = vcmp.ne.s32.totalorder %v834_v58, 0  ;;  %vm1217_vm1 = vmpackc.low %vm1056_vm15, %vm1056_vm15  ;;  %v7863_v47 = vunpack.c.l.bf16 %v7862_v29 }
  0x22   : > { %8137 = vmatprep.subr.bf16.mxu0 %v8683_v23  ;;  %8651 = vmatprep.subr.bf16.mxu1 %v8683_v23  ;;  %v1614_v23 = vsel %vm9177_vm13, %v1098_v60, 0  ;;  %v7978_v41 = vpack.c.bf16 %v445_v28, %v444_v21  ;;  %vm1219_vm2 = vmpackc.low %vm9198_vm0, %vm9198_vm0  ;;  %v1249_v15 = vsel %vm1217_vm1, 65537, %v12226_v2  ;;  %v7867_v22 = vunpack.c.l.bf16 %v9188_v30 }
  0x23   : > { %v1663_v31 = vshrl.u32 %v1614_v23, 16  ;;  %v1666_v32 = vshll.u32 %v1614_v23, 16  ;;  %v447_v36 = vmax.f32 %v415_v20, 0.0  ;;  %v1659_v49 = vor.u32 %v1657_v25, %v1656_v40 }
  0x24   : > { %v1661_v50 = vrot.slane %v1656_v40, 4  ;;  %8105 = vst [vmem:[#allocation2 + $0x60] sm:$0xff] %v7978_v41   ;;  %v1251_v52 = vsel %vm1219_vm2, 65537, %v12226_v2  ;;  %v1500_v54 = vshll.u32 %v1249_v15, 16  ;;  %v1504_v55 = vshrl.u32 %v1249_v15, 16 }
  0x25   : > { %8138 = vmatpush3.bf16.msra.mxu0 %v8684_v38  ;;  %8659 = vmatpush3.bf16.msra.mxu1 %v8684_v38  ;;  %v9202_v45 = vrot.slane %v1663_v31, 7  ;;  %v7983_v46 = vpack.c.bf16 %v447_v36, %v446_v33  ;;  %v1660_v56 = vsel %vm9192_vm14, %v7544_v10, %v1659_v49  ;;  %v1520_v58 = vshll.u32 %v1251_v52, 16 }
  0x26   : > { %8139 = vmatprep.subr.bf16.mxu0 %v8685_v48  ;;  %8652 = vmatprep.subr.bf16.mxu1 %v8685_v48  ;;  %v7864_v48 = vunpack.c.h.bf16 %v7862_v29  ;;  %v352_v60 = vmul.f32 %v7863_v47, %v9118_v43  ;;  %1972 = vst [vmem:[#allocation3] sm:$0xf] %v1660_v56  ;;  %v1502_v62 = vrot.slane %v1500_v54, 5  ;;  %v1506_v63 = vrot.slane %v1504_v55, 4 }
  0x27   : > { %v1668_v51 = vor.u32 %v1666_v32, %v9202_v45  ;;  %8106 = vst [vmem:[#allocation2 + $0x68] sm:$0xff] %v7983_v46   ;;  %v7912_v4 = vunpack.c.h.bf16 %v9108_v37  ;;  %v1522_v5 = vrot.slane %v1520_v58, 5  ;;  %v354_v8 = vmul.f32 %v7867_v22, %v9118_v43  ;;  %v8698_v22 = vld [vmem:[%s12208_s3 + $0x138] sm:$0xff]  }
  0x28   : > { %v353_v0 = vmul.f32 %v7864_v48, %v9118_v43  ;;  %v1503_v10 = vsel %vm9133_vm11, %v9151_v1, %v1502_v62  ;;  %v1507_v11 = vor.u32 %v1506_v63, %v1502_v62  ;;  %v391_v12 = vadd.f32 %v9144_v57, %v352_v60  ;;  %v8711_v63 = vld [vmem:[%s12208_s3 + $0x170] sm:$0xff]  }
  0x29   : > { %8140 = vmatpush3.bf16.msra.mxu0 %v8686_v59  ;;  %8660 = vmatpush3.bf16.msra.mxu1 %v8686_v59  ;;  %v1524_v59 = vshrl.u32 %v1251_v52, 16  ;;  %v1669_v61 = vsel %vm9192_vm14, %v1661_v50, %v1668_v51  ;;  %v1523_v16 = vsel %vm9133_vm11, %v9151_v1, %v1522_v5  ;;  %vm9230_vm3 = vcmp.ne.s16.totalorder %v1503_v10, 0  ;;  %v8689_v52 = vld [vmem:[#allocation3 + $0x4] ss:$36 sps:$4 sm:$0xff]  }
  0x2a   : > { %8237 = vmatprep.subr.bf16.mxu1 %v8693_v6  ;;  %8349 = vmatprep.subr.bf16.mxu0 %v8694_v17  ;;  %1973 = vst [vmem:[#allocation3 + $0x24] sm:$0xf] %v1669_v61  ;;  %v392_v14 = vadd.f32 %v9144_v57, %v353_v0  ;;  %v12365_v37 = vmov 0  ;;  %v620_v19 = vadd.s32 32, %v9035_v7  ;;  %v1508_v23 = vrot.slane %v1507_v11, 4 }
  0x2b   : > { %v1526_v6 = vrot.slane %v1524_v59, 4  ;;  %v12366_v37 = vsel %vm9230_vm3, 4294967295, %v12365_v37  ;;  %v1120_v20 = vld [vmem:[#allocation2 + $0x60] sm:$0xf]  ;;  %v1121_v21 = vld [vmem:[#allocation2 + $0x64] sm:$0xf]  ;;  %v393_v25 = vadd.f32 %v9144_v57, %v354_v8  ;;  %v7915_v28 = vunpack.c.l.bf16 %v9218_v3  ;;  %6354 = vmatprep.mubr.bf16.mxu0 %v8689_v52 }
  0x2c   : > { %12367 = vst [vmem:[#allocation8_spill] sm:$0xff] %v12366_v37  ;;  %vm9235_vm4 = vcmp.ne.s16.totalorder %v1523_v16, 0  ;;  %v12368_v24 = vmov 0  ;;  %v9243_v32 = vsel %vm9230_vm3, %v1120_v20, 0  ;;  %v2028_v33 = vld [vmem:[#allocation2 + $0x64] sm:$0xf]  ;;  %v1293_v36 = vsel %vm9133_vm11, %v9162_v9, %v9122_v44 }
  0x2d   : > { %v1527_v17 = vor.u32 %v1526_v6, %v1522_v5  ;;  %v12369_v24 = vsel %vm9235_vm4, 4294967295, %v12368_v24  ;;  %v377_v40 = vmul.f32 %v7912_v4, %v9118_v43  ;;  %v1513_v41 = vsel %vm9133_vm11, %v1508_v23, %v9122_v44  ;;  %2060 = vst [vmem:[#allocation3 + $0x364] sm:$0xf] %v2028_v33 }
  0x2e   : > { %12370 = vst [vmem:[#allocation9_spill] sm:$0xff] %v12369_v24  ;;  %v1122_v29 = vld [vmem:[#allocation2 + $0x68] sm:$0xf]  ;;  %v1861_v46 = vshrl.u32 %v9243_v32, 16  ;;  %vm9257_vm5 = vcmp.ne.s16.totalorder %v1513_v41, 0  ;;  %v12371_v49 = vmov 0  ;;  %v378_v55 = vmul.f32 %v7915_v28, %v9118_v43 }
  0x2f   : > { %v1528_v31 = vrot.slane %v1527_v17, 4  ;;  %v1638_v42 = vsel %vm9235_vm4, %v1122_v29, 0  ;;  %v2029_v48 = vld [vmem:[#allocation2 + $0x68] sm:$0xf]  ;;  %v12372_v49 = vsel %vm9257_vm5, 4294967295, %v12371_v49  ;;  %v423_v15 = vmax.f32 %v391_v12, 0.0 }
  0x30   : > { %12373 = vst [vmem:[#allocation10_spill] sm:$0xff] %v12372_v49  ;;  %v1879_v9 = vshrl.u32 %v1638_v42, 16  ;;  %v1882_v50 = vshll.u32 %v1638_v42, 16  ;;  %2061 = vst [vmem:[#allocation3 + $0x388] sm:$0xf] %v2029_v48  ;;  %v1637_v54 = vsel %vm9257_vm5, %v1121_v21, 0  ;;  %v416_v56 = vadd.f32 %v9144_v57, %v377_v40 }
  0x31   : > { %v8687_v51 = vld [vmem:[#allocation3] ss:$36 sps:$4 sm:$0xff]   ;;  %v7868_v58 = vunpack.c.h.bf16 %v9188_v30  ;;  %v9269_v59 = vrot.slane %v1861_v46, 7  ;;  %v1870_v60 = vshrl.u32 %v1637_v54, 16  ;;  %v1873_v61 = vshll.u32 %v1637_v54, 16  ;;  %v8713_v30 = vld [vmem:[%s12208_s3 + $0x130] sm:$0xff]  }
  0x32   : > { %v9271_v62 = vrot.slane %v1879_v9, 7  ;;  %v424_v0 = vmax.f32 %v392_v14, 0.0  ;;  %v425_v4 = vmax.f32 %v393_v25, 0.0  ;;  %v7797_v5 = vpack.c.bf16 %v423_v15, %v423_v15  ;;  %v2030_v8 = vld [vmem:[#allocation2 + $0x6c] sm:$0xf]  ;;  %6355 = vmatmul.mubr.bf16.vlgmr.msra.gmra.mxu0 %v8687_v51  ;;  %v9291_v29 = vld [vmem:[%s9070_s25 + $0x10] sm:$0xff]  }
  0x33   : > { %v680_v6 = vand.u32 15, %v620_v19  ;;  %v1868_v10 = vrot.slane %v9269_v59, 4  ;;  %v1872_v11 = vrot.slane %v1870_v60, 7  ;;  %v1123_v16 = vld [vmem:[#allocation2 + $0x6c] sm:$0xf]  ;;  %v1533_v14 = vsel %vm9133_vm11, %v1528_v31, %v9122_v44  ;;  %8350 = vmatpush3.bf16.msra.mxu0 %v8698_v22 }
  0x34   : > { %v1884_v12 = vor.u32 %v1882_v50, %v9271_v62  ;;  %2062 = vst [vmem:[#allocation3 + $0x3ac] sm:$0xf] %v2030_v8  ;;  %583 = vst [vmem:[#allocation2 + $0xc] sm:$0xf] %v7797_v5  ;;  %v7928_v17 = vpack.c.bf16 %v425_v4, %v424_v0  ;;  %vm9284_vm7 = vcmp.ne.s16.totalorder %v1293_v36, 0  ;;  %v12374_v19 = vmov 0  ;;  %8351 = vmatprep.subr.bf16.mxu0 %v8711_v63 }
  0x35   : > { %vm1036_vm6 = vcmp.ne.s32.totalorder %v680_v6, 0  ;;  %v12375_v19 = vsel %vm9284_vm7, 4294967295, %v12374_v19  ;;  %v417_v20 = vadd.f32 %v9144_v57, %v378_v55  ;;  %v1875_v21 = vor.u32 %v1873_v61, %v1872_v11  ;;  %v8727_v51 = vld [vmem:[%s12208_s3 + $0x168] sm:$0xff]   ;;  %v9317_v4 = vld [vmem:[%s9070_s25 + $0x70] sm:$0xff]  }
  0x36   : > { %12376 = vst [vmem:[#allocation11_spill] sm:$0xff] %v12375_v19  ;;  %v1877_v23 = vrot.slane %v1872_v11, 4  ;;  %vm1197_vm8 = vmpackc.low %vm1036_vm6, %vm1036_vm6  ;;  %v448_v25 = vmax.f32 %v416_v56, 0.0  ;;  %v644_v28 = vadd.s32 224, %v9035_v7  ;;  %v1670_v33 = vrot.slane %v9202_v45, 4 }
  0x37   : > { %8095 = vst [vmem:[#allocation2 + $0x10] sm:$0xff] %v7928_v17   ;;  %v1229_v31 = vsel %vm1197_vm8, 65537, %v12226_v2  ;;  %v449_v36 = vmax.f32 %v417_v20, 0.0  ;;  %vm9295_vm9 = vcmp.ne.s16.totalorder %v1533_v14, 0  ;;  %v12377_v40 = vmov 0  ;;  %8352 = vmatpush3.bf16.msra.mxu0 %v8713_v30  ;;  %v8732_v14 = vld [vmem:[%s12208_s3 + $0x128] sm:$0xff]  }
  0x38   : > { %v12378_v40 = vsel %vm9295_vm9, 4294967295, %v12377_v40  ;;  %v1876_v41 = vsel %vm9192_vm14, %v1868_v10, %v1875_v21  ;;  %v1885_v42 = vsel %vm9192_vm14, %v1877_v23, %v1884_v12  ;;  %v1300_v46 = vshll.u32 %v1229_v31, 16  ;;  %8353 = vmatprep.subr.bf16.mxu0 %v8727_v51  ;;  %v8692_v51 = vld [vmem:[#allocation3 + $0x364] ss:$36 sps:$4 sm:$0xff]  }
  0x39   : > { %12379 = vst [vmem:[#allocation12_spill] sm:$0xff] %v12378_v40  ;;  %v1304_v48 = vshrl.u32 %v1229_v31, 16  ;;  %1996 = vst [vmem:[#allocation3 + $0x360] sm:$0xf] %v1876_v41  ;;  %v7988_v9 = vpack.c.bf16 %v449_v36, %v448_v25  ;;  %v848_v50 = vand.u32 15, %v644_v28  ;;  %v1639_v15 = vsel %vm9295_vm9, %v1123_v16, 0  ;;  %6450 = vmatprep.mubr.bf16.mxu1 %v8692_v51 }
  0x3a   : > { %1997 = vst [vmem:[#allocation3 + $0x384] sm:$0xf] %v1885_v42  ;;  %v7871_v22 = vunpack.c.l.bf16 %v9291_v29  ;;  %v1302_v52 = vrot.slane %v1300_v46, 5  ;;  %v1888_v54 = vshrl.u32 %v1639_v15, 16  ;;  %v1891_v55 = vshll.u32 %v1639_v15, 16  ;;  %v8697_v36 = vld [vmem:[%s12208_s3 + $0xb8] sm:$0xff]  }
  0x3b   : > { %v355_v56 = vmul.f32 %v7868_v58, %v9118_v43  ;;  %8107 = vst [vmem:[#allocation2 + $0x70] sm:$0xff] %v7988_v9   ;;  %vm9310_vm15 = vcmp.ne.s32.totalorder %v848_v50, 0  ;;  %v1886_v61 = vrot.slane %v9271_v62, 4  ;;  %v1306_v0 = vrot.slane %v1304_v48, 4  ;;  %v1099_v5 = vld [vmem:[#allocation2 + $0xc] sm:$0xf]  ;;  %8354 = vmatpush3.bf16.msra.mxu0 %v8732_v14 }
  0x3c   : > { %v356_v63 = vmul.f32 %v7871_v22, %v9118_v43  ;;  %v1303_v6 = vsel %vm9133_vm11, %v9151_v1, %v1302_v52  ;;  %v2006_v8 = vld [vmem:[#allocation2 + $0xc] sm:$0xf]  ;;  %vm1221_vm0 = vmpackc.low %vm9310_vm15, %vm9310_vm15  ;;  %v9325_v58 = vrot.slane %v1888_v54, 7  ;;  %v622_v30 = vadd.s32 48, %v9035_v7 }
  0x3d   : > { %v394_v62 = vadd.f32 %v9144_v57, %v355_v56  ;;  %vm9329_vm1 = vcmp.ne.s16.totalorder %v1303_v6, 0  ;;  %v12382_v10 = vmov 0  ;;  %v1615_v11 = vsel %vm9284_vm7, %v1099_v5, 0  ;;  %2038 = vst [vmem:[#allocation3 + $0x4c] sm:$0xf] %v2006_v8 }
  0x3e   : > { %v12383_v10 = vsel %vm9329_vm1, 4294967295, %v12382_v10  ;;  %v9336_v12 = vsel %vm1221_vm0, 65537, %v12226_v2  ;;  %v395_v16 = vadd.f32 %v9144_v57, %v356_v63  ;;  %v1100_v17 = vld [vmem:[#allocation2 + $0x10] sm:$0xf]  ;;  %v1672_v20 = vshrl.u32 %v1615_v11, 16 }
  0x3f   : > { %12384 = vst [vmem:[#allocation13_spill] sm:$0xff] %v12383_v10  ;;  %v1675_v21 = vshll.u32 %v1615_v11, 16  ;;  %v2007_v23 = vld [vmem:[#allocation2 + $0x10] sm:$0xf]  ;;  %v1893_v25 = vor.u32 %v1891_v55, %v9325_v58  ;;  %v7916_v28 = vunpack.c.h.bf16 %v9218_v3  ;;  %v1616_v31 = vsel %vm9329_vm1, %v1100_v17, 0 }
  0x40   : > { %2039 = vst [vmem:[#allocation3 + $0x70] sm:$0xf] %v2007_v23  ;;  %v1540_v41 = vshll.u32 %v9336_v12, 16  ;;  %v1544_v42 = vshrl.u32 %v9336_v12, 16  ;;  %v1307_v46 = vor.u32 %v1306_v0, %v1302_v52  ;;  %v1674_v9 = vrot.slane %v1672_v20, 7  ;;  %v8700_v3 = vld [vmem:[%s12208_s3 + $0xf0] sm:$0xff]  }
  0x41   : > { %v8690_v48 = vld [vmem:[#allocation3 + $0x360] ss:$36 sps:$4 sm:$0xff]   ;;  %v1681_v50 = vshrl.u32 %v1616_v31, 16  ;;  %v1894_v15 = vsel %vm9192_vm14, %v1886_v61, %v1893_v25  ;;  %v7919_v22 = vunpack.c.l.bf16 %v9317_v4  ;;  %v1684_v54 = vshll.u32 %v1616_v31, 16  ;;  %v8701_v61 = vld [vmem:[%s12208_s3 + $0xb0] sm:$0xff]  }
  0x42   : > { %v9357_v55 = vrot.slane %v1540_v41, 5  ;;  %1998 = vst [vmem:[#allocation3 + $0x3a8] sm:$0xf] %v1894_v15  ;;  %v426_v56 = vmax.f32 %v394_v62, 0.0  ;;  %v427_v52 = vmax.f32 %v395_v16, 0.0  ;;  %v1677_v60 = vor.u32 %v1675_v21, %v1674_v9  ;;  %6451 = vmatmul.mubr.bf16.vlgmr.msra.gmra.mxu1 %v8690_v48 }
  0x43   : > { %v1679_v63 = vrot.slane %v1674_v9, 4  ;;  %v9359_v0 = vrot.slane %v1681_v50, 7  ;;  %v1124_v5 = vld [vmem:[#allocation2 + $0x70] sm:$0xf]  ;;  %v379_v8 = vmul.f32 %v7916_v28, %v9118_v43  ;;  %v694_v16 = vand.u32 15, %v622_v30  ;;  %8238 = vmatpush3.bf16.msra.mxu1 %v8697_v36  ;;  %v8704_v36 = vld [vmem:[%s12208_s3 + $0xe8] sm:$0xff]  }
  0x44   : > { %v2031_v6 = vld [vmem:[#allocation2 + $0x70] sm:$0xf]  ;;  %v1543_v11 = vsel %vm9133_vm11, %v9151_v1, %v9357_v55  ;;  %v7933_v62 = vpack.c.bf16 %v427_v52, %v426_v56  ;;  %v1101_v14 = vld [vmem:[#allocation2 + $0x14] sm:$0xf]  ;;  %v1308_v17 = vrot.slane %v1307_v46, 4  ;;  %v1678_v21 = vsel %vm9192_vm14, %v1670_v33, %v1677_v60  ;;  %8239 = vmatprep.subr.bf16.mxu1 %v8700_v3  ;;  %v8708_v52 = vld [vmem:[%s12208_s3 + $0xa8] sm:$0xff]  }
  0x45   : > { %2063 = vst [vmem:[#allocation3 + $0x3d0] sm:$0xf] %v2031_v6  ;;  %v2008_v20 = vld [vmem:[#allocation2 + $0x14] sm:$0xf]  ;;  %v1686_v23 = vor.u32 %v1684_v54, %v9359_v0  ;;  %vm9374_vm2 = vcmp.ne.s16.totalorder %v1543_v11, 0  ;;  %v12385_v25 = vmov 0  ;;  %v380_v33 = vmul.f32 %v7919_v22, %v9118_v43 }
  0x46   : > { %v12386_v25 = vsel %vm9374_vm2, 4294967295, %v12385_v25  ;;  %v1895_v28 = vrot.slane %v9325_v58, 4  ;;  %2040 = vst [vmem:[#allocation3 + $0x94] sm:$0xf] %v2008_v20  ;;  %v2032_v31 = vld [vmem:[#allocation2 + $0x74] sm:$0xf]  ;;  %v1313_v45 = vsel %vm9133_vm11, %v1308_v17, %v9122_v44  ;;  %v418_v15 = vadd.f32 %v9144_v57, %v379_v8 }
  0x47   : > { %12387 = vst [vmem:[#allocation14_spill] sm:$0xff] %v12386_v25  ;;  %1974 = vst [vmem:[#allocation3 + $0x48] sm:$0xf] %v1678_v21  ;;  %v1640_v30 = vsel %vm9374_vm2, %v1124_v5, 0  ;;  %vm1038_vm6 = vcmp.ne.s32.totalorder %v694_v16, 0  ;;  %v1687_v41 = vsel %vm9192_vm14, %v1679_v63, %v1686_v23  ;;  %vm9390_vm15 = vcmp.ne.s16.totalorder %v1313_v45, 0  ;;  %8240 = vmatpush3.bf16.msra.mxu1 %v8701_v61 }
  0x48   : > { %8096 = vst [vmem:[#allocation2 + $0x18] sm:$0xff] %v7933_v62   ;;  %2064 = vst [vmem:[#allocation3 + $0x3f4] sm:$0xf] %v2032_v31  ;;  %v1897_v58 = vshrl.u32 %v1640_v30, 16  ;;  %v1900_v46 = vshll.u32 %v1640_v30, 16  ;;  %v12388_v48 = vmov 0  ;;  %v419_v3 = vadd.f32 %v9144_v57, %v380_v33  ;;  %8241 = vmatprep.subr.bf16.mxu1 %v8704_v36 }
  0x49   : > { %vm1199_vm8 = vmpackc.low %vm1038_vm6, %vm1038_vm6  ;;  %v12389_v48 = vsel %vm9390_vm15, 4294967295, %v12388_v48  ;;  %1975 = vst [vmem:[#allocation3 + $0x6c] sm:$0xf] %v1687_v41  ;;  %v1617_v50 = vsel %vm9390_vm15, %v1101_v14, 0  ;;  %v1688_v54 = vrot.slane %v9359_v0, 4  ;;  %v450_v63 = vmax.f32 %v418_v15, 0.0 }
  0x4a   : > { %12390 = vst [vmem:[#allocation15_spill] sm:$0xff] %v12389_v48  ;;  %v1231_v9 = vsel %vm1199_vm8, 65537, %v12226_v2  ;;  %v9399_v22 = vrot.slane %v1897_v58, 7  ;;  %v1690_v56 = vshrl.u32 %v1617_v50, 16  ;;  %v1693_v60 = vshll.u32 %v1617_v50, 16  ;;  %v8710_v0 = vld [vmem:[%s12208_s3 + $0xe0] sm:$0xff]  }
  0x4b   : > { %v1320_v51 = vshll.u32 %v1231_v9, 16  ;;  %v451_v5 = vmax.f32 %v419_v3, 0.0  ;;  %v646_v6 = vadd.s32 240, %v9035_v7  ;;  %v1546_v16 = vrot.slane %v1544_v42, 4  ;;  %v9417_v61 = vld [vmem:[%s9070_s25 + $0x18] sm:$0xff]   ;;  %8242 = vmatpush3.bf16.msra.mxu1 %v8708_v52 }
  0x4c   : > { %v1902_v8 = vor.u32 %v1900_v46, %v9399_v22  ;;  %v9409_v62 = vrot.slane %v1690_v56, 7  ;;  %v1324_v14 = vshrl.u32 %v1231_v9, 16  ;;  %v7872_v21 = vunpack.c.h.bf16 %v9291_v29  ;;  %v8712_v29 = vld [vmem:[%s12208_s3 + $0xa0] sm:$0xff]   ;;  %v8716_v58 = vld [vmem:[%s12208_s3 + $0xd8] sm:$0xff]   ;;  %8243 = vmatprep.subr.bf16.mxu1 %v8710_v0 }
  0x4d   : > { %v9407_v11 = vrot.slane %v1320_v51, 5  ;;  %v7993_v17 = vpack.c.bf16 %v451_v5, %v450_v63  ;;  %v862_v20 = vand.u32 15, %v646_v6  ;;  %v1904_v42 = vrot.slane %v9399_v22, 4  ;;  %v8695_v9 = vld [vmem:[#allocation3 + $0x4c] ss:$36 sps:$4 sm:$0xff]   ;;  %v8720_v0 = vld [vmem:[%s12208_s3 + $0x98] sm:$0xff]  }
  0x4e   : > { %v1903_v23 = vsel %vm9192_vm14, %v1895_v28, %v1902_v8  ;;  %v1695_v45 = vor.u32 %v1693_v60, %v9409_v62  ;;  %v12391_v33 = vmov 0  ;;  %v1547_v41 = vor.u32 %v1546_v16, %v9357_v55  ;;  %6362 = vmatprep.mubr.bf16.mxu0 %v8695_v9  ;;  %v1125_v5 = vld [vmem:[#allocation2 + $0x74] sm:$0xf]  ;;  %v8702_v9 = vld [vmem:[#allocation3 + $0x3ac] ss:$36 sps:$4 sm:$0xff]  }
  0x4f   : > { %v1102_v31 = vld [vmem:[#allocation2 + $0x18] sm:$0xf]  ;;  %v1323_v30 = vsel %vm9133_vm11, %v9151_v1, %v9407_v11  ;;  %1999 = vst [vmem:[#allocation3 + $0x3cc] sm:$0xf] %v1903_v23  ;;  %8108 = vst [vmem:[#allocation2 + $0x78] sm:$0xff] %v7993_v17   ;;  %vm9435_vm6 = vcmp.ne.s32.totalorder %v862_v20, 0  ;;  %v7875_v46 = vunpack.c.l.bf16 %v9417_v61  ;;  %v357_v51 = vmul.f32 %v7872_v21, %v9118_v43  ;;  %8244 = vmatpush3.bf16.msra.mxu1 %v8712_v29 }
  0x50   : > { %v2009_v12 = vld [vmem:[#allocation2 + $0x18] sm:$0xf]  ;;  %vm9428_vm0 = vcmp.ne.s16.totalorder %v1323_v30, 0  ;;  %v2010_v36 = vld [vmem:[#allocation2 + $0x1c] sm:$0xf]  ;;  %v1696_v3 = vsel %vm9192_vm14, %v1688_v54, %v1695_v45  ;;  %v7920_v55 = vunpack.c.h.bf16 %v9317_v4  ;;  %vm1223_vm8 = vmpackc.low %vm9435_vm6, %vm9435_vm6  ;;  %v1548_v60 = vrot.slane %v1547_v41, 4  ;;  %8245 = vmatprep.subr.bf16.mxu1 %v8716_v58  ;;  %6458 = vmatprep.mubr.bf16.mxu1 %v8702_v9 }
  0x51   : > { %v12392_v33 = vsel %vm9428_vm0, 4294967295, %v12391_v33  ;;  %2041 = vst [vmem:[#allocation3 + $0xb8] sm:$0xf] %v2009_v12  ;;  %v8699_v50 = vld [vmem:[#allocation3 + $0x48] ss:$36 sps:$4 sm:$0xff]   ;;  %v1618_v15 = vsel %vm9428_vm0, %v1102_v31, 0  ;;  %v358_v63 = vmul.f32 %v7875_v46, %v9118_v43  ;;  %v396_v6 = vadd.f32 %v9144_v57, %v357_v51 }
  0x52   : > { %12393 = vst [vmem:[#allocation16_spill] sm:$0xff] %v12392_v33  ;;  %2042 = vst [vmem:[#allocation3 + $0xdc] sm:$0xf] %v2010_v36  ;;  %v1699_v56 = vshrl.u32 %v1618_v15, 16  ;;  %v1702_v52 = vshll.u32 %v1618_v15, 16  ;;  %v9455_v54 = vsel %vm1223_vm8, 65537, %v12226_v2  ;;  %6363 = vmatmul.mubr.bf16.gmra.mxu0 %v8699_v50  ;;  %v1553_v20 = vsel %vm9133_vm11, %v1548_v60, %v9122_v44 }
  0x53   : > { %1976 = vst [vmem:[#allocation3 + $0x90] sm:$0xf] %v1696_v3  ;;  %v624_v4 = vadd.s32 64, %v9035_v7  ;;  %v1326_v8 = vrot.slane %v1324_v14, 4  ;;  %v1697_v16 = vrot.slane %v9409_v62, 4  ;;  %v1560_v21 = vshll.u32 %v9455_v54, 16  ;;  %8246 = vmatpush3.bf16.msra.mxu1 %v8720_v0 }
  0x54   : > { %v9463_v17 = vrot.slane %v1699_v56, 7  ;;  %v8722_v14 = vld [vmem:[%s12208_s3 + $0xd0] sm:$0xff]   ;;  %v8094_v23 = vld [vmem:[%s9070_s25 + $0x78] sm:$0xff]   ;;  %v8744_v31 = vld [vmem:[%s12208_s3 + $0x160] sm:$0xff]   ;;  %vm9476_vm6 = vcmp.ne.s16.totalorder %v1553_v20, 0  ;;  %v12396_v62 = vmov 0  ;;  %v397_v30 = vadd.f32 %v9144_v57, %v358_v63 }
  0x55   : > { %v12397_v62 = vsel %vm9476_vm6, 4294967295, %v12396_v62  ;;  %v428_v45 = vmax.f32 %v396_v6, 0.0  ;;  %v708_v12 = vand.u32 15, %v624_v4  ;;  %v8745_v29 = vld [vmem:[%s12208_s3 + $0x120] sm:$0xff]   ;;  %v9485_v41 = vrot.slane %v1560_v21, 5  ;;  %v8723_v58 = vld [vmem:[%s12208_s3 + $0x90] sm:$0xff]   ;;  %8355 = vmatprep.subr.bf16.mxu0 %v8744_v31  ;;  %8247 = vmatprep.subr.bf16.mxu1 %v8722_v14 }
  0x56   : > { %12398 = vst [vmem:[#allocation17_spill] sm:$0xff] %v12397_v62  ;;  %v1704_v28 = vor.u32 %v1702_v52, %v9463_v17  ;;  %v1641_v46 = vsel %vm9476_vm6, %v1125_v5, 0  ;;  %v1327_v36 = vor.u32 %v1326_v8, %v9407_v11  ;;  %v8707_v50 = vld [vmem:[#allocation3 + $0x3a8] ss:$36 sps:$4 sm:$0xff]   ;;  %v7923_v3 = vunpack.c.l.bf16 %v8094_v23  ;;  %8356 = vmatpush3.bf16.msra.mxu0 %v8745_v29  ;;  %v1126_v52 = vld [vmem:[#allocation2 + $0x78] sm:$0xf] }
  0x57   : > { %v1906_v15 = vshrl.u32 %v1641_v46, 16  ;;  %v381_v51 = vmul.f32 %v7920_v55, %v9118_v43  ;;  %v1563_v11 = vsel %vm9133_vm11, %v9151_v1, %v9485_v41  ;;  %v1909_v60 = vshll.u32 %v1641_v46, 16  ;;  %v2033_v63 = vld [vmem:[#allocation2 + $0x78] sm:$0xf]  ;;  %6459 = vmatmul.mubr.bf16.gmra.mxu1 %v8707_v50  ;;  %v1103_v23 = vld [vmem:[#allocation2 + $0x1c] sm:$0xf] }
  0x58   : > { %v1705_v56 = vsel %vm9192_vm14, %v1697_v16, %v1704_v28  ;;  %v429_v5 = vmax.f32 %v397_v30, 0.0  ;;  %vm9500_vm8 = vcmp.ne.s16.totalorder %v1563_v11, 0  ;;  %v12399_v6 = vmov 0  ;;  %2065 = vst [vmem:[#allocation3 + $0x418] sm:$0xf] %v2033_v63  ;;  %v8726_v16 = vld [vmem:[%s12208_s3 + $0xc8] sm:$0xff]   ;;  %8248 = vmatpush3.bf16.msra.mxu1 %v8723_v58 }
  0x59   : > { %1977 = vst [vmem:[#allocation3 + $0xb4] sm:$0xf] %v1705_v56  ;;  %v12400_v6 = vsel %vm9500_vm8, 4294967295, %v12399_v6  ;;  %v1908_v55 = vrot.slane %v1906_v15, 7  ;;  %vm9504_vm10 = vcmp.ne.s32.totalorder %v708_v12, 0  ;;  %v1328_v8 = vrot.slane %v1327_v36, 4  ;;  %8249 = vmatprep.subr.bf16.mxu1 %v8726_v16 }
  0x5a   : > { %12401 = vst [vmem:[#allocation18_spill] sm:$0xff] %v12400_v6  ;;  %v1564_v0 = vshrl.u32 %v9455_v54, 16  ;;  %v1642_v20 = vsel %vm9500_vm8, %v1126_v52, 0  ;;  %v7938_v21 = vpack.c.bf16 %v429_v5, %v428_v45  ;;  %vm1201_vm6 = vmpackc.low %vm9504_vm10, %vm9504_vm10  ;;  %v382_v31 = vmul.f32 %v7923_v3, %v9118_v43  ;;  %v2034_v30 = vld [vmem:[#allocation2 + $0x7c] sm:$0xf]  ;;  %v9520_v46 = vld [vmem:[%s9070_s25 + $0x20] sm:$0xff]  }
  0x5b   : > { %v1911_v12 = vor.u32 %v1909_v60, %v1908_v55  ;;  %v1915_v29 = vshrl.u32 %v1642_v20, 16  ;;  %v1918_v28 = vshll.u32 %v1642_v20, 16  ;;  %2066 = vst [vmem:[#allocation3 + $0x43c] sm:$0xf] %v2034_v30  ;;  %v8731_v54 = vld [vmem:[%s12208_s3 + $0x88] sm:$0xff]   ;;  %v8754_v45 = vld [vmem:[%s12208_s3 + $0x158] sm:$0xff]   ;;  %v1333_v9 = vsel %vm9133_vm11, %v1328_v8, %v9122_v44 }
  0x5c   : > { %8097 = vst [vmem:[#allocation2 + $0x20] sm:$0xff] %v7938_v21   ;;  %v9529_v36 = vsel %vm1201_vm6, 65537, %v12226_v2  ;;  %v1706_v50 = vrot.slane %v9463_v17, 4  ;;  %v420_v15 = vadd.f32 %v9144_v57, %v381_v51  ;;  %v1913_v56 = vrot.slane %v1908_v55, 4  ;;  %v8734_v60 = vld [vmem:[%s12208_s3 + $0xc0] sm:$0xff]   ;;  %8357 = vmatprep.subr.bf16.mxu0 %v8754_v45  ;;  %v8759_v63 = vld [vmem:[%s12208_s3 + $0x118] sm:$0xff]   ;;  %8250 = vmatpush3.bf16.msra.mxu1 %v8731_v54 }
  0x5d   : > { %v1912_v3 = vsel %vm9192_vm14, %v1904_v42, %v1911_v12  ;;  %v9540_v52 = vrot.slane %v1915_v29, 7  ;;  %v1340_v11 = vshll.u32 %v9529_v36, 16  ;;  %v1344_v58 = vshrl.u32 %v9529_v36, 16  ;;  %v8735_v16 = vld [vmem:[%s12208_s3 + $0x80] sm:$0xff]   ;;  %v8705_v20 = vld [vmem:[#allocation3 + $0x94] ss:$36 sps:$4 sm:$0xff]   ;;  %8358 = vmatpush3.bf16.msra.mxu0 %v8759_v63  ;;  %8251 = vmatprep.subr.bf16.mxu1 %v8734_v60 }
  0x5e   : > { %2000 = vst [vmem:[#allocation3 + $0x3f0] sm:$0xf] %v1912_v3  ;;  %vm9547_vm10 = vcmp.ne.s16.totalorder %v1333_v9, 0  ;;  %v12404_v51 = vmov 0  ;;  %v421_v22 = vadd.f32 %v9144_v57, %v382_v31  ;;  %v1566_v42 = vrot.slane %v1564_v0, 4  ;;  %6370 = vmatprep.mubr.bf16.mxu0 %v8705_v20  ;;  %v8768_v17 = vld [vmem:[%s12208_s3 + $0x150] sm:$0xff]  }
  0x5f   : > { %v12405_v51 = vsel %vm9547_vm10, 4294967295, %v12404_v51  ;;  %v1920_v5 = vor.u32 %v1918_v28, %v9540_v52  ;;  %v9556_v55 = vrot.slane %v1340_v11, 5  ;;  %v1619_v4 = vsel %vm9547_vm10, %v1103_v23, 0  ;;  %v1127_v9 = vld [vmem:[#allocation2 + $0x7c] sm:$0xf]  ;;  %8359 = vmatprep.subr.bf16.mxu0 %v8768_v17 }
  0x60   : > { %12406 = vst [vmem:[#allocation19_spill] sm:$0xff] %v12405_v51  ;;  %v452_v8 = vmax.f32 %v420_v15, 0.0  ;;  %v8709_v21 = vld [vmem:[#allocation3 + $0x90] ss:$36 sps:$4 sm:$0xff]   ;;  %v1708_v31 = vshrl.u32 %v1619_v4, 16  ;;  %v1567_v0 = vor.u32 %v1566_v42, %v9485_v41  ;;  %v7876_v30 = vunpack.c.h.bf16 %v9417_v61  ;;  %v8739_v41 = vld [vmem:[%s12208_s3 + $0x1f8] sm:$0xff]   ;;  %8252 = vmatpush3.bf16.msra.mxu1 %v8735_v16 }
  0x61   : > { %v7879_v12 = vunpack.c.l.bf16 %v9520_v46  ;;  %v1921_v29 = vsel %vm9192_vm14, %v1913_v56, %v1920_v5  ;;  %v1343_v23 = vsel %vm9133_vm11, %v9151_v1, %v9556_v55  ;;  %v1711_v28 = vshll.u32 %v1619_v4, 16  ;;  %6371 = vmatmul.mubr.bf16.gmra.mxu0 %v8709_v21  ;;  %8461 = vmatprep.subr.bf16.mxu1 %v8739_v41 }
  0x62   : > { %v453_v45 = vmax.f32 %v421_v22, 0.0  ;;  %2001 = vst [vmem:[#allocation3 + $0x414] sm:$0xf] %v1921_v29  ;;  %vm9575_vm6 = vcmp.ne.s16.totalorder %v1343_v23, 0  ;;  %v12407_v61 = vmov 0  ;;  %v1710_v54 = vrot.slane %v1708_v31, 7 }
  0x63   : > { %v12408_v61 = vsel %vm9575_vm6, 4294967295, %v12407_v61  ;;  %v1568_v15 = vrot.slane %v1567_v0, 4  ;;  %v1922_v3 = vrot.slane %v9540_v52, 4  ;;  %v1104_v56 = vld [vmem:[#allocation2 + $0x20] sm:$0xf]  ;;  %v359_v22 = vmul.f32 %v7876_v30, %v9118_v43 }
  0x64   : > { %12409 = vst [vmem:[#allocation20_spill] sm:$0xff] %v12408_v61  ;;  %v2011_v11 = vld [vmem:[#allocation2 + $0x20] sm:$0xf]  ;;  %v7998_v60 = vpack.c.bf16 %v453_v45, %v452_v8  ;;  %v360_v42 = vmul.f32 %v7879_v12, %v9118_v43  ;;  %v626_v63 = vadd.s32 80, %v9035_v7  ;;  %v1620_v5 = vsel %vm9575_vm6, %v1104_v56, 0 }
  0x65   : > { %v1713_v4 = vor.u32 %v1711_v28, %v1710_v54  ;;  %v1715_v20 = vrot.slane %v1710_v54, 4  ;;  %2043 = vst [vmem:[#allocation3 + $0x100] sm:$0xf] %v2011_v11  ;;  %v1573_v21 = vsel %vm9133_vm11, %v1568_v15, %v9122_v44  ;;  %v2012_v31 = vld [vmem:[#allocation2 + $0x24] sm:$0xf]  ;;  %v1717_v8 = vshrl.u32 %v1620_v5, 16 }
  0x66   : > { %v1720_v0 = vshll.u32 %v1620_v5, 16  ;;  %8109 = vst [vmem:[#allocation2 + $0x80] sm:$0xff] %v7998_v60   ;;  %vm9589_vm8 = vcmp.ne.s16.totalorder %v1573_v21, 0  ;;  %v12410_v43 = vmov 0  ;;  %v398_v30 = vadd.f32 %v9144_v57, %v359_v22  ;;  %2044 = vst [vmem:[#allocation3 + $0x124] sm:$0xf] %v2012_v31 }
  0x67   : > { %v12411_v43 = vsel %vm9589_vm8, 4294967295, %v12410_v43  ;;  %v1714_v12 = vsel %vm9192_vm14, %v1706_v50, %v1713_v4  ;;  %v1643_v29 = vsel %vm9589_vm8, %v1127_v9, 0  ;;  %v399_v16 = vadd.f32 %v9144_v57, %v360_v42  ;;  %v9602_v28 = vld [vmem:[%s9070_s25 + $0x28] sm:$0xff]  }
  0x68   : > { %12412 = vst [vmem:[#allocation21_spill] sm:$0xff] %v12411_v43  ;;  %v722_v23 = vand.u32 15, %v626_v63  ;;  %v9604_v45 = vrot.slane %v1717_v8, 7  ;;  %1978 = vst [vmem:[#allocation3 + $0xd8] sm:$0xf] %v1714_v12  ;;  %v1924_v54 = vshrl.u32 %v1643_v29, 16  ;;  %v7880_v42 = vunpack.c.h.bf16 %v9520_v46 }
  0x69   : > { %v1927_v15 = vshll.u32 %v1643_v29, 16  ;;  %v430_v56 = vmax.f32 %v398_v30, 0.0  ;;  %v431_v41 = vmax.f32 %v399_v16, 0.0  ;;  %v1346_v50 = vrot.slane %v1344_v58, 4  ;;  %v8714_v57 = vld [vmem:[#allocation3 + $0x3f4] ss:$36 sps:$4 sm:$0xff]  }
  0x6a   : > { %vm9606_vm2 = vcmp.ne.s32.totalorder %v722_v23, 0  ;;  %v617_v9 = vadd.s32 8, %v9035_v7  ;;  %v1722_v11 = vor.u32 %v1720_v0, %v9604_v45  ;;  %v8719_v60 = vld [vmem:[#allocation3 + $0x3f0] ss:$36 sps:$4 sm:$0xff]   ;;  %v9614_v22 = vrot.slane %v1924_v54, 7  ;;  %6466 = vmatprep.mubr.bf16.mxu1 %v8714_v57 }
  0x6b   : > { %v7883_v63 = vunpack.c.l.bf16 %v9602_v28  ;;  %v7943_v5 = vpack.c.bf16 %v431_v41, %v430_v56  ;;  %vm1203_vm8 = vmpackc.low %vm9606_vm2, %vm9606_vm2  ;;  %v1347_v36 = vor.u32 %v1346_v50, %v9556_v55  ;;  %v1724_v58 = vrot.slane %v9604_v45, 4  ;;  %v2970_v21 = vld [vmem:[#allocation2 + $0x8] sm:$0x8]  ;;  %v1105_v0 = vld [vmem:[#allocation2 + $0x24] sm:$0xf]  ;;  %6467 = vmatmul.mubr.bf16.gmra.mxu1 %v8719_v60 }
  0x6c   : > { %v659_v4 = vand.u32 15, %v617_v9  ;;  %v1723_v31 = vsel %vm9192_vm14, %v1715_v20, %v1722_v11  ;;  %v1929_v8 = vor.u32 %v1927_v15, %v9614_v22  ;;  %v1931_v46 = vrot.slane %v9614_v22, 4  ;;  %v9634_v20 = vld [vmem:[%s12206_s1] ss:$0 sm:$0xff] }
  0x6d   : > { %v9628_v30 = vsel %vm1203_vm8, 65537, %v12226_v2  ;;  %1979 = vst [vmem:[#allocation3 + $0xfc] sm:$0xf] %v1723_v31  ;;  %v1128_v12 = vld [vmem:[#allocation2 + $0x80] sm:$0xf]  ;;  %8098 = vst [vmem:[#allocation2 + $0x28] sm:$0xff] %v7943_v5   ;;  %v361_v23 = vmul.f32 %v9634_v20, %v7880_v42  ;;  %v362_v54 = vmul.f32 %v9634_v20, %v7883_v63 }
  0x6e   : > { %v2035_v55 = vld [vmem:[#allocation2 + $0x80] sm:$0xf]  ;;  %v1348_v29 = vrot.slane %v1347_v36, 4  ;;  %v1360_v16 = vshll.u32 %v9628_v30, 16  ;;  %vm12415_vm2 = vcmp.ne.s16.totalorder %v9151_v1, 0  ;;  %v1930_v56 = vsel %vm9192_vm14, %v1922_v3, %v1929_v8 }
  0x6f   : > { %v1644_v15 = vsel %vm12415_vm2, %v1128_v12, 0  ;;  %2067 = vst [vmem:[#allocation3 + $0x460] sm:$0xf] %v2035_v55  ;;  %vm1065_vm8 = vcmp.ne.s32.totalorder %v659_v4, 15  ;;  %2002 = vst [vmem:[#allocation3 + $0x438] sm:$0xf] %v1930_v56 }
  0x70   : > { %v1933_v50 = vshrl.u32 %v1644_v15, 16  ;;  %v1936_v9 = vshll.u32 %v1644_v15, 16  ;;  %v1353_v57 = vsel %vm9133_vm11, %v1348_v29, %v9122_v44  ;;  %v9651_v11 = vrot.slane %v1360_v16, 5  ;;  %vm2166_vm2 = vmpackc.low %vm1065_vm8, %vm1065_vm8  ;;  %v8769_v4 = vld [vmem:[%s12208_s3 + $0x110] sm:$0xff]   ;;  %v2068_v55 = vld [vmem:[#allocation2 + $0x4] sm:$0xf] }
  0x71   : > { %vm9653_vm9 = vcmp.ne.s16.totalorder %v1353_v57, 0  ;;  %v12416_v52 = vmov 0  ;;  %v2198_v3 = vsel %vm2166_vm2, 65537, %v12226_v2  ;;  %v2232_v60 = vrot.slane %v1274_v35, 7  ;;  %8360 = vmatpush3.bf16.msra.mxu0 %v8769_v4  ;;  %v8717_v15 = vld [vmem:[#allocation3 + $0xdc] ss:$36 sps:$4 sm:$0xff]  }
  0x72   : > { %v12417_v52 = vsel %vm9653_vm9, 4294967295, %v12416_v52  ;;  %vm12419_vm4 = vcmp.ne.s16.totalorder %v9113_v39, 0  ;;  %v1935_v42 = vrot.slane %v1933_v50, 7  ;;  %v1363_v63 = vsel %vm9133_vm11, %v9151_v1, %v9651_v11  ;;  %v2069_v50 = vld [vmem:[#allocation2 + $0x8] sm:$0xf]  ;;  %6378 = vmatprep.mubr.bf16.mxu0 %v8717_v15 }
  0x73   : > { %12418 = vst [vmem:[#allocation22_spill] sm:$0xff] %v12417_v52  ;;  %v9662_v22 = vsel %vm12419_vm4, %v2970_v21, 0  ;;  %v1621_v5 = vsel %vm9653_vm9, %v1105_v0, 0  ;;  %v2238_v36 = vshrl.u32 %v2198_v3, 16  ;;  %vm9673_vm8 = vcmp.ne.s16.totalorder %v1363_v63, 0 }
  0x74   : > { %v12420_v35 = vmov 0  ;;  %v1726_v21 = vshrl.u32 %v1621_v5, 16  ;;  %v1729_v31 = vshll.u32 %v1621_v5, 16  ;;  %v9679_v8 = vor.u32 %v2232_v60, %v1270_v34  ;;  %v8721_v56 = vld [vmem:[#allocation3 + $0xd8] ss:$36 sps:$4 sm:$0xff]  }
  0x75   : > { %v12421_v35 = vsel %vm9673_vm8, 4294967295, %v12420_v35  ;;  %v1938_v12 = vor.u32 %v1936_v9, %v1935_v42  ;;  %v9681_v29 = vrot.slane %v2232_v60, 4  ;;  %v2240_v0 = vrot.slane %v2238_v36, 7  ;;  %v9686_v57 = vld [vmem:[%s12207_s2] ss:$0 sm:$0xff]  ;;  %6379 = vmatmul.mubr.bf16.gmra.mxu0 %v8721_v56 }
  0x76   : > { %12422 = vst [vmem:[#allocation23_spill] sm:$0xff] %v12421_v35  ;;  %12423 = vst [vmem:[#allocation24_spill] sm:$0xff] %v9679_v8  ;;  %v2241_v16 = vshll.u32 %v2198_v3, 16  ;;  %v1728_v17 = vrot.slane %v1726_v21, 7  ;;  %v9689_v27 = vadd.f32 %v9686_v57, %v361_v23  ;;  %v9692_v34 = vadd.f32 %v9686_v57, %v362_v54  ;;  %v1106_v60 = vld [vmem:[#allocation2 + $0x28] sm:$0xf] }
  0x77   : > { %v1939_v3 = vsel %vm9192_vm14, %v1931_v46, %v1938_v12  ;;  %v2013_v42 = vld [vmem:[#allocation2 + $0x28] sm:$0xf]  ;;  %v2245_v5 = vrot.slane %v2240_v0, 4  ;;  %vm12225_vm4 = vcmp.ne.s16.totalorder %v9679_v8, 0  ;;  %v1622_v23 = vsel %vm9673_vm8, %v1106_v60, 0 }
  0x78   : > { %v2243_v63 = vor.u32 %v2241_v16, %v2240_v0  ;;  %2003 = vst [vmem:[#allocation3 + $0x45c] sm:$0xf] %v1939_v3  ;;  %v1731_v36 = vor.u32 %v1729_v31, %v1728_v17  ;;  %v1733_v4 = vrot.slane %v1728_v17, 4  ;;  %2045 = vst [vmem:[#allocation3 + $0x148] sm:$0xf] %v2013_v42  ;;  %v2549_v21 = vsel %vm12225_vm4, %v2068_v55, 0 }
  0x79   : > { %v2070_v54 = vld [vmem:[#allocation2 + $0xc] sm:$0xf]  ;;  %v1735_v46 = vshrl.u32 %v1622_v23, 16  ;;  %v1738_v12 = vshll.u32 %v1622_v23, 16  ;;  %v9708_v16 = vsel %vm9192_vm14, %v2245_v5, %v9679_v8  ;;  %v12425_v56 = vmov 0 }
  0x7a   : > { %v2244_v0 = vsel %vm9192_vm14, %v9681_v29, %v2243_v63  ;;  %12424 = vst [vmem:[#allocation25_spill] sm:$0xff] %v9708_v16  ;;  %v2971_v31 = vld [vmem:[#allocation2 + $0xc] sm:$0xf]  ;;  %v1732_v55 = vsel %vm9192_vm14, %v1724_v58, %v1731_v36  ;;  %vm12230_vm4 = vcmp.ne.s16.totalorder %v9708_v16, 0  ;;  %v2583_v17 = vshrl.u32 %v2549_v21, 16  ;;  %v9726_v58 = vld [vmem:[%s9070_s25 + $0x30] sm:$0xff]  }
  0x7b   : > { %v2014_v15 = vld [vmem:[#allocation2 + $0x2c] sm:$0xf]  ;;  %vm9714_vm2 = vcmp.ne.s16.totalorder %v2244_v0, 0  ;;  %v2972_v3 = vld [vmem:[#allocation2 + $0x10] sm:$0xf]  ;;  %v9719_v60 = vrot.slane %v1735_v46, 7 }
  0x7c   : > { %v12426_v56 = vsel %vm9714_vm2, 4294967295, %v12425_v56  ;;  %2046 = vst [vmem:[#allocation3 + $0x16c] sm:$0xf] %v2014_v15  ;;  %1980 = vst [vmem:[#allocation3 + $0x120] sm:$0xf] %v1732_v55  ;;  %v2550_v42 = vsel %vm9714_vm2, %v2069_v50, 0 }
  0x7d   : > { %12427 = vst [vmem:[#allocation26_spill] sm:$0xff] %v12426_v56  ;;  %v2551_v45 = vsel %vm12230_vm4, %v2070_v54, 0  ;;  %v2586_v63 = vshll.u32 %v2549_v21, 16  ;;  %v2585_v5 = vrot.slane %v2583_v17, 4  ;;  %v2592_v23 = vshll.u32 %v2550_v42, 16  ;;  %v8780_v50 = vld [vmem:[%s12208_s3 + $0x148] sm:$0xff]  }
  0x7e   : > { %v2596_v36 = vshrl.u32 %v2550_v42, 16  ;;  %v2602_v0 = vshll.u32 %v2551_v45, 16  ;;  %v1740_v47 = vor.u32 %v1738_v12, %v9719_v60  ;;  %v2606_v15 = vshrl.u32 %v2551_v45, 16  ;;  %v8724_v42 = vld [vmem:[#allocation3 + $0x43c] ss:$36 sps:$4 sm:$0xff]   ;;  %8361 = vmatprep.subr.bf16.mxu0 %v8780_v50 }
  0x7f   : > { %v2588_v14 = vrot.slane %v2586_v63, 5  ;;  %v3004_v46 = vsel %vm9168_vm12, %v2971_v31, 0  ;;  %v2594_v55 = vrot.slane %v2592_v23, 5  ;;  %v3005_v17 = vsel %vm9177_vm13, %v2972_v3, 0  ;;  %v8730_v63 = vld [vmem:[#allocation3 + $0x438] ss:$36 sps:$4 sm:$0xff]   ;;  %6474 = vmatprep.mubr.bf16.mxu1 %v8724_v42 }
  0x80   : > { %v2598_v54 = vrot.slane %v2596_v36, 4  ;;  %v9734_v21 = vrot.slane %v2602_v0, 5  ;;  %v1741_v12 = vsel %vm9192_vm14, %v1733_v4, %v1740_v47  ;;  %v3037_v2 = vshrl.u32 %v9662_v22, 16  ;;  %6475 = vmatmul.mubr.bf16.gmra.mxu1 %v8730_v63 }
  0x81   : > { %v2589_v45 = vor.u32 %v2588_v14, %v2585_v5  ;;  %v7887_v31 = vunpack.c.l.bf16 %v9726_v58  ;;  %1981 = vst [vmem:[#allocation3 + $0x144] sm:$0xf] %v1741_v12  ;;  %v3042_v23 = vshrl.u32 %v3004_v46, 16  ;;  %v3045_v36 = vshll.u32 %v3004_v46, 16  ;;  %v2974_v12 = vld [vmem:[#allocation2 + $0x18] sm:$0xf] }
  0x82   : > { %v2599_v9 = vor.u32 %v2598_v54, %v2594_v55  ;;  %v3051_v0 = vshrl.u32 %v3005_v17, 16  ;;  %v7545_v18 = vrot.slane %v3037_v2, 11  ;;  %v3054_v3 = vshll.u32 %v3005_v17, 16  ;;  %v2973_v17 = vld [vmem:[#allocation2 + $0x14] sm:$0xf] }
  0x83   : > { %v2590_v41 = vrot.slane %v2589_v45, 4  ;;  %v432_v13 = vmax.f32 %v9689_v27, 0.0  ;;  %v3044_v4 = vrot.slane %v3042_v23, 7  ;;  %v433_v22 = vmax.f32 %v9692_v34, 0.0 }
  0x84   : > { %v2600_v47 = vrot.slane %v2599_v9, 4  ;;  %v9743_v14 = vrot.slane %v3051_v0, 7  ;;  %v628_v50 = vadd.s32 96, %v9035_v7  ;;  %v12428_v46 = vshrl.u32 %v9628_v30, 16 }
  0x85   : > { %v2595_v5 = vsel %vm9133_vm11, %v2590_v41, %v2594_v55  ;;  %v3047_v9 = vor.u32 %v3045_v36, %v3044_v4  ;;  %v3049_v42 = vrot.slane %v3044_v4, 4  ;;  %v8784_v41 = vld [vmem:[%s12208_s3 + $0x108] sm:$0xff]   ;;  %v7948_v30 = vpack.c.bf16 %v433_v22, %v432_v13 }
  0x86   : > { %v1366_v54 = vrot.slane %v12428_v46, 4  ;;  %v2605_v27 = vsel %vm9133_vm11, %v2600_v47, %v9734_v21  ;;  %2938 = vst [vmem:[#allocation3 + $0x8] sm:$0xf] %v2595_v5  ;;  %v3056_v34 = vor.u32 %v3054_v3, %v9743_v14  ;;  %v736_v55 = vand.u32 15, %v628_v50  ;;  %8362 = vmatpush3.bf16.msra.mxu0 %v8784_v41  ;;  %v8728_v47 = vld [vmem:[#allocation3 + $0x124] ss:$36 sps:$4 sm:$0xff]  }
  0x87   : > { %2939 = vst [vmem:[#allocation3 + $0x2c] sm:$0xf] %v2605_v27  ;;  %v619_v45 = vadd.s32 24, %v9035_v7  ;;  %v3048_v23 = vsel %vm9192_vm14, %v7545_v18, %v3047_v9  ;;  %v2608_v0 = vrot.slane %v2606_v15, 4  ;;  %v3006_v3 = vsel %vm9284_vm7, %v2973_v17, 0  ;;  %8099 = vst [vmem:[#allocation2 + $0x30] sm:$0xff] %v7948_v30   ;;  %6386 = vmatprep.mubr.bf16.mxu0 %v8728_v47 }
  0x88   : > { %v1367_v63 = vor.u32 %v1366_v54, %v9651_v11  ;;  %v3057_v36 = vsel %vm9192_vm14, %v3049_v42, %v3056_v34  ;;  %v8733_v4 = vld [vmem:[#allocation3 + $0x120] ss:$36 sps:$4 sm:$0xff]   ;;  %3360 = vst [vmem:[#allocation3 + $0xc] sm:$0xf] %v3048_v23  ;;  %vm1044_vm4 = vcmp.ne.s32.totalorder %v736_v55, 0  ;;  %v12429_v11 = vunpack.c.h.bf16 %v9602_v28 }
  0x89   : > { %3361 = vst [vmem:[#allocation3 + $0x30] sm:$0xf] %v3057_v36  ;;  %v1107_v13 = vld [vmem:[#allocation2 + $0x2c] sm:$0xf]  ;;  %v364_v18 = vmul.f32 %v9634_v20, %v7887_v31  ;;  %vm1205_vm13 = vmpackc.low %vm1044_vm4, %vm1044_vm4  ;;  %v673_v50 = vand.u32 15, %v619_v45  ;;  %v2609_v46 = vor.u32 %v2608_v0, %v9734_v21  ;;  %v3007_v54 = vsel %vm9329_vm1, %v2974_v12, 0  ;;  %6387 = vmatmul.mubr.bf16.gmra.mxu0 %v8733_v4 }
  0x8a   : > { %v363_v22 = vmul.f32 %v9634_v20, %v12429_v11  ;;  %v1368_v15 = vrot.slane %v1367_v63, 4  ;;  %v12430_v17 = vmov 0   ;;  %v3058_v28 = vrot.slane %v9743_v14, 4  ;;  %v2027_v11 = vld [vmem:[#allocation2 + $0x60] sm:$0xf] }
  0x8b   : > { %v9776_v27 = vsel %vm1205_vm13, 65537, %v12430_v17  ;;  %v3060_v9 = vshrl.u32 %v3006_v3, 16  ;;  %v3063_v42 = vshll.u32 %v3006_v3, 16  ;;  %vm1067_vm4 = vcmp.ne.s32.totalorder %v673_v50, 15  ;;  %v8742_v3 = vld [vmem:[%s12208_s3 + $0x1b8] sm:$0xff]  }
  0x8c   : > { %v1373_v31 = vsel %vm9133_vm11, %v1368_v15, %v9122_v44  ;;  %v1380_v34 = vshll.u32 %v9776_v27, 16  ;;  %v12431_v12 = vmov 0  ;;  %vm2168_vm13 = vmpackc.low %vm1067_vm4, %vm1067_vm4  ;;  %v9788_v41 = vrot.slane %v2609_v46, 4  ;;  %2059 = vst [vmem:[#allocation3 + $0x340] sm:$0xf] %v2027_v11  ;;  %v8755_v11 = vld [vmem:[%s12208_s3 + $0x1f0] sm:$0xff]  }
  0x8d   : > { %vm9784_vm7 = vcmp.ne.s16.totalorder %v1373_v31, 0  ;;  %v3062_v14 = vrot.slane %v3060_v9, 7  ;;  %v3069_v30 = vshrl.u32 %v3007_v54, 16  ;;  %v2200_v45 = vsel %vm2168_vm13, 65537, %v12430_v17 }
  0x8e   : > { %v12432_v12 = vsel %vm9784_vm7, 4294967295, %v12431_v12  ;;  %v9790_v55 = vrot.slane %v1380_v34, 5  ;;  %v1623_v63 = vsel %vm9784_vm7, %v1107_v13, 0  ;;  %v3072_v23 = vshll.u32 %v3007_v54, 16  ;;  %v8736_v15 = vld [vmem:[#allocation3 + $0x8] ss:$36 sps:$4 sm:$0xff]  }
  0x8f   : > { %12433 = vst [vmem:[#allocation27_spill] sm:$0xff] %v12432_v12  ;;  %v1744_v36 = vshrl.u32 %v1623_v63, 16  ;;  %v1747_v0 = vshll.u32 %v1623_v63, 16  ;;  %v2256_v47 = vshrl.u32 %v2200_v45, 16  ;;  %v2259_v4 = vshll.u32 %v2200_v45, 16 }
  0x90   : > { %v1383_v50 = vsel %vm9133_vm11, %v9151_v1, %v9790_v55  ;;  %v3065_v46 = vor.u32 %v3063_v42, %v3062_v14  ;;  %v3067_v13 = vrot.slane %v3062_v14, 4  ;;  %v9802_v9 = vrot.slane %v3069_v30, 7  ;;  %v8738_v54 = vld [vmem:[#allocation3 + $0xc] ss:$36 sps:$4 sm:$0xff]   ;;  %v1108_v31 = vld [vmem:[#allocation2 + $0x30] sm:$0xf] }
  0x91   : > { %vm9804_vm4 = vcmp.ne.s16.totalorder %v1383_v50, 0  ;;  %v12434_v34 = vmov 0  ;;  %v1746_v63 = vrot.slane %v1744_v36, 7  ;;  %v402_v45 = vadd.f32 %v9686_v57, %v363_v22  ;;  %v2015_v2 = vld [vmem:[#allocation2 + $0x30] sm:$0xf]  ;;  %6515 = vmatprep.mubr.bf16.mxu1 %v8738_v54 }
  0x92   : > { %v12435_v34 = vsel %vm9804_vm4, 4294967295, %v12434_v34  ;;  %v403_v5 = vadd.f32 %v9686_v57, %v364_v18  ;;  %v1624_v21 = vsel %vm9804_vm4, %v1108_v31, 0  ;;  %v2258_v42 = vrot.slane %v2256_v47, 7  ;;  %2047 = vst [vmem:[#allocation3 + $0x190] sm:$0xf] %v2015_v2  ;;  %6516 = vmatmul.mubr.bf16.vlgmr.msra.gmra.mxu1 %v8736_v15 }
  0x93   : > { %12436 = vst [vmem:[#allocation28_spill] sm:$0xff] %v12435_v34  ;;  %v3066_v14 = vsel %vm9192_vm14, %v3058_v28, %v3065_v46  ;;  %v3074_v30 = vor.u32 %v3072_v23, %v9802_v9  ;;  %v1749_v36 = vor.u32 %v1747_v0, %v1746_v63  ;;  %v1751_v50 = vrot.slane %v1746_v63, 4  ;;  %v2071_v18 = vld [vmem:[#allocation2 + $0x10] sm:$0xf]  ;;  %v2016_v31 = vld [vmem:[#allocation2 + $0x34] sm:$0xf]  ;;  %8462 = vmatpush3.bf16.msra.mxu1 %v8742_v3 }
  0x94   : > { %v1753_v22 = vshrl.u32 %v1624_v21, 16  ;;  %v1756_v10 = vshll.u32 %v1624_v21, 16  ;;  %3362 = vst [vmem:[#allocation3 + $0x54] sm:$0xf] %v3066_v14  ;;  %v2072_v47 = vld [vmem:[#allocation2 + $0x14] sm:$0xf]  ;;  %v2261_v19 = vor.u32 %v2259_v4, %v2258_v42  ;;  %8463 = vmatprep.subr.bf16.mxu1 %v8755_v11 }
  0x95   : > { %v2263_v39 = vrot.slane %v2258_v42, 4  ;;  %v3075_v28 = vsel %vm9192_vm14, %v3067_v13, %v3074_v30  ;;  %v4399_v23 = vld [vmem:[#allocation2 + $0x20] sm:$0xf]  ;;  %v434_v46 = vmax.f32 %v402_v45, 0.0  ;;  %2048 = vst [vmem:[#allocation3 + $0x1b4] sm:$0xf] %v2016_v31 }
  0x96   : > { %v12437_v54 = vrot.slane %v9719_v60, 4  ;;  %v9824_v21 = vrot.slane %v1753_v22, 7  ;;  %3363 = vst [vmem:[#allocation3 + $0x78] sm:$0xf] %v3075_v28  ;;  %v4400_v2 = vld [vmem:[#allocation2 + $0x24] sm:$0xf]  ;;  %v2262_v60 = vsel %vm9192_vm14, %v9681_v29, %v2261_v19 }
  0x97   : > { %v435_v15 = vmax.f32 %v403_v5, 0.0  ;;  %v630_v4 = vadd.s32 112, %v9035_v7  ;;  %v8760_v13 = vld [vmem:[%s12208_s3 + $0x1b0] sm:$0xff]   ;;  %v9836_v63 = vsel %vm9192_vm14, %v2263_v39, %v9679_v8  ;;  %v12438_v3 = vshrl.u32 %v9776_v27, 16  ;;  %v8772_v42 = vld [vmem:[%s12208_s3 + $0x1e8] sm:$0xff]   ;;  %v8788_v22 = vld [vmem:[%s12208_s3 + $0x1e0] sm:$0xff]  }
  0x98   : > { %v1750_v0 = vsel %vm9192_vm14, %v12437_v54, %v1749_v36  ;;  %v9841_v5 = vadd.s32 40, %v9035_v7  ;;  %v1758_v14 = vor.u32 %v1756_v10, %v9824_v21  ;;  %vm9847_vm13 = vcmp.ne.s16.totalorder %v2262_v60, 0  ;;  %v8776_v27 = vld [vmem:[%s12208_s3 + $0x1a8] sm:$0xff]   ;;  %8464 = vmatpush3.bf16.msra.mxu1 %v8760_v13  ;;  %v2976_v60 = vld [vmem:[#allocation2 + $0x20] sm:$0xf] }
  0x99   : > { %1982 = vst [vmem:[#allocation3 + $0x168] sm:$0xf] %v1750_v0  ;;  %v1386_v45 = vrot.slane %v12438_v3, 4  ;;  %vm12238_vm1 = vcmp.ne.s16.totalorder %v9836_v63, 0  ;;  %v7953_v39 = vpack.c.bf16 %v435_v15, %v434_v46  ;;  %v2552_v30 = vsel %vm9847_vm13, %v2071_v18, 0  ;;  %8465 = vmatprep.subr.bf16.mxu1 %v8772_v42  ;;  %v8795_v13 = vld [vmem:[%s12208_s3 + $0x100] sm:$0xff]  }
  0x9a   : > { %v2553_v11 = vsel %vm12238_vm1, %v2072_v47, 0  ;;  %v4432_v10 = vsel %vm9847_vm13, %v4399_v23, 0  ;;  %v9863_v36 = vsel %vm12238_vm1, %v4400_v2, 0  ;;  %v1759_v31 = vsel %vm9192_vm14, %v1751_v50, %v1758_v14  ;;  %v8794_v47 = vld [vmem:[%s12208_s3 + $0x140] sm:$0xff]   ;;  %v2975_v15 = vld [vmem:[#allocation2 + $0x1c] sm:$0xf] }
  0x9b   : > { %12441 = vst [vmem:[#allocation29_spill] sm:$0xff] %v9863_v36  ;;  %v2612_v28 = vshll.u32 %v2552_v30, 16  ;;  %v2616_v46 = vshrl.u32 %v2552_v30, 16  ;;  %v2622_v18 = vshll.u32 %v2553_v11, 16  ;;  %8100 = vst [vmem:[#allocation2 + $0x38] sm:$0xff] %v7953_v39   ;;  %v2626_v23 = vshrl.u32 %v2553_v11, 16  ;;  %8363 = vmatprep.subr.bf16.mxu0 %v8794_v47 }
  0x9c   : > { %1983 = vst [vmem:[#allocation3 + $0x18c] sm:$0xf] %v1759_v31  ;;  %v4492_v54 = vshll.u32 %v4432_v10, 16  ;;  %v4496_v0 = vshrl.u32 %v4432_v10, 16  ;;  %v4502_v2 = vshll.u32 %v9863_v36, 16  ;;  %v750_v30 = vand.u32 15, %v630_v4  ;;  %8466 = vmatpush3.bf16.msra.mxu1 %v8776_v27  ;;  %8364 = vmatpush3.bf16.msra.mxu0 %v8795_v13 }
  0x9d   : > { %v2614_v3 = vrot.slane %v2612_v28, 5  ;;  %v2618_v50 = vrot.slane %v2616_v46, 4  ;;  %v2624_v14 = vrot.slane %v2622_v18, 5  ;;  %v1387_v10 = vor.u32 %v1386_v45, %v9790_v55  ;;  %v3392_v36 = vld [vmem:[#allocation2 + $0xc] sm:$0xf]  ;;  %v8792_v18 = vld [vmem:[%s12208_s3 + $0x1a0] sm:$0xff]   ;;  %8467 = vmatprep.subr.bf16.mxu1 %v8788_v22 }
  0x9e   : > { %v9877_v39 = vrot.slane %v4492_v54, 5  ;;  %v4498_v31 = vrot.slane %v4496_v0, 4  ;;  %v9879_v11 = vrot.slane %v4502_v2, 5  ;;  %vm9885_vm1 = vcmp.ne.s32.totalorder %v750_v30, 0  ;;  %v3393_v55 = vld [vmem:[#allocation2 + $0x10] sm:$0xf] }
  0x9f   : > { %v2615_v42 = vsel %vm9133_vm11, %v9788_v41, %v2614_v3  ;;  %v2619_v28 = vor.u32 %v2618_v50, %v2614_v3  ;;  %3424 = vst [vmem:[#allocation3 + $0x10] sm:$0xf] %v3392_v36  ;;  %vm1207_vm12 = vmpackc.low %vm9885_vm1, %vm9885_vm1  ;;  %v1388_v41 = vrot.slane %v1387_v10, 4  ;;  %v687_v47 = vand.u32 15, %v9841_v5  ;;  %v9899_v0 = vld [vmem:[%s9070_s25 + $0x38] sm:$0xff]  }
  0xa0   : > { %12442 = vst [vmem:[#allocation30_spill] sm:$0xff] %v9877_v39  ;;  %12443 = vst [vmem:[#allocation31_spill] sm:$0xff] %v9879_v11  ;;  %v4499_v45 = vor.u32 %v4498_v31, %v9877_v39  ;;  %v2628_v54 = vrot.slane %v2626_v23, 4  ;;  %v1109_v2 = vld [vmem:[#allocation2 + $0x34] sm:$0xf]  ;;  %v9902_v3 = vsel %vm1207_vm12, 65537, %v12430_v17  ;;  %8468 = vmatpush3.bf16.msra.mxu1 %v8792_v18 }
  0xa1   : > { %2940 = vst [vmem:[#allocation3 + $0x50] sm:$0xf] %v2615_v42  ;;  %3425 = vst [vmem:[#allocation3 + $0x34] sm:$0xf] %v3393_v55  ;;  %v2620_v27 = vrot.slane %v2619_v28, 4  ;;  %v3008_v36 = vsel %vm9390_vm15, %v2975_v15, 0  ;;  %v1393_v5 = vsel %vm9133_vm11, %v1388_v41, %v9122_v44  ;;  %v7891_v42 = vunpack.c.l.bf16 %v9899_v0 }
  0xa2   : > { %v3009_v50 = vsel %vm9428_vm0, %v2976_v60, 0  ;;  %v9908_v30 = vrot.slane %v4499_v45, 4  ;;  %v1400_v22 = vshll.u32 %v9902_v3, 16  ;;  %v8740_v13 = vld [vmem:[#allocation3 + $0x16c] ss:$36 sps:$4 sm:$0xff]   ;;  %vm9917_vm12 = vcmp.ne.s16.totalorder %v1393_v5, 0 }
  0xa3   : > { %v8743_v31 = vld [vmem:[#allocation3 + $0x168] ss:$36 sps:$4 sm:$0xff]   ;;  %v2625_v10 = vsel %vm9133_vm11, %v2620_v27, %v2624_v14  ;;  %v12447_v15 = vmov 0  ;;  %v2629_v60 = vor.u32 %v2628_v54, %v2624_v14  ;;  %v1625_v4 = vsel %vm9917_vm12, %v1109_v2, 0  ;;  %v2017_v55 = vld [vmem:[#allocation2 + $0x38] sm:$0xf]  ;;  %6394 = vmatprep.mubr.bf16.mxu0 %v8740_v13 }
  0xa4   : > { %12446 = vst [vmem:[#allocation32_spill] sm:$0xff] %v9908_v30  ;;  %v12448_v15 = vsel %vm9917_vm12, 4294967295, %v12447_v15  ;;  %2941 = vst [vmem:[#allocation3 + $0x74] sm:$0xf] %v2625_v10  ;;  %v9922_v28 = vrot.slane %v1400_v22, 5  ;;  %vm1069_vm1 = vcmp.ne.s32.totalorder %v687_v47, 15  ;;  %6395 = vmatmul.mubr.bf16.gmra.mxu0 %v8743_v31 }
  0xa5   : > { %12449 = vst [vmem:[#allocation33_spill] sm:$0xff] %v12448_v15  ;;  %v3076_v45 = vrot.slane %v9802_v9, 4  ;;  %v1110_v41 = vld [vmem:[#allocation2 + $0x38] sm:$0xf]  ;;  %v1762_v27 = vshrl.u32 %v1625_v4, 16  ;;  %v1765_v5 = vshll.u32 %v1625_v4, 16  ;;  %vm2170_vm0 = vmpackc.low %vm1069_vm1, %vm1069_vm1 }
  0xa6   : > { %2049 = vst [vmem:[#allocation3 + $0x1d8] sm:$0xf] %v2017_v55  ;;  %v9927_v14 = vrot.slane %v2629_v60, 4  ;;  %v3078_v54 = vshrl.u32 %v3008_v36, 16  ;;  %v1403_v18 = vsel %vm9133_vm11, %v9151_v1, %v9922_v28  ;;  %v2202_v2 = vsel %vm2170_vm0, 65537, %v12430_v17 }
  0xa7   : > { %v3081_v47 = vshll.u32 %v3008_v36, 16  ;;  %v3087_v22 = vshrl.u32 %v3009_v50, 16  ;;  %v2018_v9 = vld [vmem:[#allocation2 + $0x3c] sm:$0xf]  ;;  %vm9934_vm15 = vcmp.ne.s16.totalorder %v1403_v18, 0  ;;  %v12450_v13 = vmov 0 }
  0xa8   : > { %v12451_v13 = vsel %vm9934_vm15, 4294967295, %v12450_v13  ;;  %v1764_v10 = vrot.slane %v1762_v27, 7  ;;  %v2274_v4 = vshrl.u32 %v2202_v2, 16  ;;  %v2277_v60 = vshll.u32 %v2202_v2, 16  ;;  %2050 = vst [vmem:[#allocation3 + $0x1fc] sm:$0xf] %v2018_v9 }
  0xa9   : > { %12452 = vst [vmem:[#allocation34_spill] sm:$0xff] %v12451_v13  ;;  %v1626_v31 = vsel %vm9934_vm15, %v1110_v41, 0  ;;  %v3080_v55 = vrot.slane %v3078_v54, 7  ;;  %v9940_v23 = vrot.slane %v3087_v22, 7  ;;  %v3090_v46 = vshll.u32 %v3009_v50, 16 }
  0xaa   : > { %v1767_v39 = vor.u32 %v1765_v5, %v1764_v10  ;;  %v1769_v33 = vrot.slane %v1764_v10, 4  ;;  %v1771_v36 = vshrl.u32 %v1626_v31, 16  ;;  %v1774_v48 = vshll.u32 %v1626_v31, 16  ;;  %v8746_v27 = vld [vmem:[#allocation3 + $0x54] ss:$36 sps:$4 sm:$0xff]  }
  0xab   : > { %v2276_v30 = vrot.slane %v2274_v4, 7  ;;  %v3083_v18 = vor.u32 %v3081_v47, %v3080_v55  ;;  %v3085_v11 = vrot.slane %v3080_v55, 4  ;;  %v3092_v43 = vor.u32 %v3090_v46, %v9940_v23  ;;  %v8750_v54 = vld [vmem:[#allocation3 + $0x50] ss:$36 sps:$4 sm:$0xff]   ;;  %v2073_v22 = vld [vmem:[#allocation2 + $0x18] sm:$0xf]  ;;  %6523 = vmatprep.mubr.bf16.mxu1 %v8746_v27 }
  0xac   : > { %v12453_v2 = vrot.slane %v9824_v21, 4  ;;  %v9947_v41 = vrot.slane %v1771_v36, 7  ;;  %v12454_v50 = vunpack.c.h.bf16 %v9726_v58  ;;  %v366_v10 = vmul.f32 %v9634_v20, %v7891_v42  ;;  %v2074_v47 = vld [vmem:[#allocation2 + $0x1c] sm:$0xf]  ;;  %6524 = vmatmul.mubr.bf16.gmra.mxu1 %v8750_v54 }
  0xad   : > { %v2279_v4 = vor.u32 %v2277_v60, %v2276_v30  ;;  %v2281_v46 = vrot.slane %v2276_v30, 4  ;;  %v3084_v21 = vsel %vm9192_vm14, %v3076_v45, %v3083_v18  ;;  %v632_v42 = vadd.s32 128, %v9035_v7  ;;  %v3394_v60 = vld [vmem:[#allocation2 + $0x14] sm:$0xf] }
  0xae   : > { %v1768_v9 = vsel %vm9192_vm14, %v12453_v2, %v1767_v39  ;;  %v365_v5 = vmul.f32 %v9634_v20, %v12454_v50  ;;  %v3093_v39 = vsel %vm9192_vm14, %v3085_v11, %v3092_v43  ;;  %v1776_v31 = vor.u32 %v1774_v48, %v9947_v41  ;;  %3364 = vst [vmem:[#allocation3 + $0x9c] sm:$0xf] %v3084_v21  ;;  %v3395_v2 = vld [vmem:[#allocation2 + $0x18] sm:$0xf]  ;;  %v2978_v21 = vld [vmem:[#allocation2 + $0x28] sm:$0xf] }
  0xaf   : > { %1984 = vst [vmem:[#allocation3 + $0x1b0] sm:$0xf] %v1768_v9  ;;  %3365 = vst [vmem:[#allocation3 + $0xc0] sm:$0xf] %v3093_v39  ;;  %v405_v55 = vadd.f32 %v9686_v57, %v366_v10  ;;  %v2280_v30 = vsel %vm9192_vm14, %v9681_v29, %v2279_v4  ;;  %v9967_v43 = vsel %vm9192_vm14, %v2281_v46, %v9679_v8  ;;  %v12456_v48 = vshrl.u32 %v9902_v3, 16 }
  0xb0   : > { %v404_v58 = vadd.f32 %v9686_v57, %v365_v5  ;;  %12455 = vst [vmem:[#allocation35_spill] sm:$0xff] %v9967_v43  ;;  %v1777_v36 = vsel %vm9192_vm14, %v1769_v33, %v1776_v31  ;;  %vm9974_vm0 = vcmp.ne.s16.totalorder %v2280_v30, 0  ;;  %v12457_v18 = vmov 0  ;;  %3426 = vst [vmem:[#allocation3 + $0x58] sm:$0xf] %v3394_v60 }
  0xb1   : > { %v1406_v11 = vrot.slane %v12456_v48, 4  ;;  %v12458_v18 = vsel %vm9974_vm0, 4294967295, %v12457_v18  ;;  %vm12250_vm1 = vcmp.ne.s16.totalorder %v9967_v43, 0  ;;  %1985 = vst [vmem:[#allocation3 + $0x1d4] sm:$0xf] %v1777_v36  ;;  %v2554_v3 = vsel %vm9974_vm0, %v2073_v22, 0 }
  0xb2   : > { %12459 = vst [vmem:[#allocation36_spill] sm:$0xff] %v12458_v18  ;;  %v436_v27 = vmax.f32 %v404_v58, 0.0  ;;  %v2555_v9 = vsel %vm12250_vm1, %v2074_v47, 0  ;;  %v437_v54 = vmax.f32 %v405_v55, 0.0  ;;  %v764_v50 = vand.u32 15, %v632_v42 }
  0xb3   : > { %v2977_v5 = vld [vmem:[#allocation2 + $0x24] sm:$0xf]  ;;  %3427 = vst [vmem:[#allocation3 + $0x7c] sm:$0xf] %v3395_v2  ;;  %v2632_v33 = vshll.u32 %v2554_v3, 16  ;;  %v2636_v10 = vshrl.u32 %v2554_v3, 16  ;;  %v1407_v31 = vor.u32 %v1406_v11, %v9922_v28 }
  0xb4   : > { %v2642_v4 = vshll.u32 %v2555_v9, 16  ;;  %v2646_v46 = vshrl.u32 %v2555_v9, 16  ;;  %v7958_v39 = vpack.c.bf16 %v437_v54, %v436_v27  ;;  %vm1048_vm5 = vcmp.ne.s32.totalorder %v764_v50, 0  ;;  %v9993_v27 = vld [vmem:[%s9070_s25 + $0x40] sm:$0xff]   ;;  %v1111_v9 = vld [vmem:[#allocation2 + $0x3c] sm:$0xf] }
  0xb5   : > { %v623_v58 = vadd.s32 56, %v9035_v7  ;;  %v2634_v22 = vrot.slane %v2632_v33, 5  ;;  %v2638_v30 = vrot.slane %v2636_v10, 4  ;;  %vm1209_vm1 = vmpackc.low %vm1048_vm5, %vm1048_vm5  ;;  %v1408_v42 = vrot.slane %v1407_v31, 4  ;;  %v8805_v10 = vld [vmem:[%s12208_s3 + $0x238] sm:$0xff]  }
  0xb6   : > { %v2644_v48 = vrot.slane %v2642_v4, 5  ;;  %v2648_v47 = vrot.slane %v2646_v46, 4  ;;  %8101 = vst [vmem:[#allocation2 + $0x40] sm:$0xff] %v7958_v39   ;;  %v9986_v55 = vsel %vm1209_vm1, 65537, %v12430_v17  ;;  %v9990_v36 = vsel %vm9547_vm10, %v2977_v5, 0  ;;  %8597 = vmatprep.subr.bf16.mxu0 %v8805_v10 }
  0xb7   : > { %v701_v60 = vand.u32 15, %v623_v58  ;;  %v2635_v28 = vsel %vm9133_vm11, %v9927_v14, %v2634_v22  ;;  %v2639_v11 = vor.u32 %v2638_v30, %v2634_v22  ;;  %v1420_v2 = vshll.u32 %v9986_v55, 16  ;;  %v8804_v14 = vld [vmem:[%s12208_s3 + $0x1d8] sm:$0xff]   ;;  %v8748_v4 = vld [vmem:[#allocation3 + $0x1b4] ss:$36 sps:$4 sm:$0xff]  }
  0xb8   : > { %2942 = vst [vmem:[#allocation3 + $0x98] sm:$0xf] %v2635_v28  ;;  %v1413_v54 = vsel %vm9133_vm11, %v1408_v42, %v9122_v44  ;;  %v2649_v5 = vor.u32 %v2648_v47, %v2644_v48  ;;  %v10009_v33 = vsel %vm9575_vm6, %v2978_v21, 0  ;;  %v8751_v46 = vld [vmem:[#allocation3 + $0x1b0] ss:$36 sps:$4 sm:$0xff]   ;;  %v7892_v31 = vunpack.c.h.bf16 %v9899_v0  ;;  %8469 = vmatprep.subr.bf16.mxu1 %v8804_v14  ;;  %v8809_v0 = vld [vmem:[%s12208_s3 + $0x198] sm:$0xff]   ;;  %6402 = vmatprep.mubr.bf16.mxu0 %v8748_v4 }
  0xb9   : > { %vm10003_vm5 = vcmp.ne.s32.totalorder %v701_v60, 15  ;;  %v2640_v39 = vrot.slane %v2639_v11, 4  ;;  %v7895_v58 = vunpack.c.l.bf16 %v9993_v27  ;;  %v10020_v30 = vrot.slane %v1420_v2, 5  ;;  %6403 = vmatmul.mubr.bf16.gmra.mxu0 %v8751_v46  ;;  %8470 = vmatpush3.bf16.msra.mxu1 %v8809_v0 }
  0xba   : > { %vm10022_vm1 = vcmp.ne.s16.totalorder %v1413_v54, 0  ;;  %v12462_v21 = vmov 0  ;;  %vm2172_vm6 = vmpackc.low %vm10003_vm5, %vm10003_vm5  ;;  %v10029_v47 = vrot.slane %v2649_v5, 4  ;;  %v3094_v42 = vrot.slane %v9940_v23, 4 }
  0xbb   : > { %v12463_v21 = vsel %vm10022_vm1, 4294967295, %v12462_v21  ;;  %v2645_v60 = vsel %vm9133_vm11, %v2640_v39, %v2644_v48  ;;  %v1627_v28 = vsel %vm10022_vm1, %v1111_v9, 0  ;;  %v2204_v11 = vsel %vm2172_vm6, 65537, %v12430_v17 }
  0xbc   : > { %12464 = vst [vmem:[#allocation37_spill] sm:$0xff] %v12463_v21  ;;  %v3096_v2 = vshrl.u32 %v9990_v36, 16  ;;  %2943 = vst [vmem:[#allocation3 + $0xbc] sm:$0xf] %v2645_v60  ;;  %v1423_v23 = vsel %vm9133_vm11, %v9151_v1, %v10020_v30  ;;  %v1780_v54 = vshrl.u32 %v1627_v28, 16  ;;  %v1783_v50 = vshll.u32 %v1627_v28, 16 }
  0xbd   : > { %v2292_v5 = vshrl.u32 %v2204_v11, 16  ;;  %v1112_v14 = vld [vmem:[#allocation2 + $0x40] sm:$0xf]  ;;  %vm10045_vm5 = vcmp.ne.s16.totalorder %v1423_v23, 0  ;;  %v12465_v48 = vmov 0  ;;  %v2295_v10 = vshll.u32 %v2204_v11, 16 }
  0xbe   : > { %v12466_v48 = vsel %vm10045_vm5, 4294967295, %v12465_v48  ;;  %v2019_v9 = vld [vmem:[#allocation2 + $0x40] sm:$0xf]  ;;  %v367_v4 = vmul.f32 %v9634_v20, %v7892_v31  ;;  %v368_v46 = vmul.f32 %v9634_v20, %v7895_v58  ;;  %v1628_v39 = vsel %vm10045_vm5, %v1112_v14, 0  ;;  %v2020_v31 = vld [vmem:[#allocation2 + $0x44] sm:$0xf] }
  0xbf   : > { %12467 = vst [vmem:[#allocation38_spill] sm:$0xff] %v12466_v48  ;;  %v1782_v60 = vrot.slane %v1780_v54, 7  ;;  %2051 = vst [vmem:[#allocation3 + $0x220] sm:$0xf] %v2019_v9  ;;  %v2294_v22 = vrot.slane %v2292_v5, 7  ;;  %v3098_v28 = vrot.slane %v3096_v2, 7 }
  0xc0   : > { %v1789_v3 = vshrl.u32 %v1628_v39, 16  ;;  %v1792_v0 = vshll.u32 %v1628_v39, 16  ;;  %v3099_v23 = vshll.u32 %v9990_v36, 16  ;;  %v3105_v45 = vshrl.u32 %v10009_v33, 16  ;;  %v2075_v20 = vld [vmem:[#allocation2 + $0x20] sm:$0xf] }
  0xc1   : > { %v1785_v61 = vor.u32 %v1783_v50, %v1782_v60  ;;  %v1787_v51 = vrot.slane %v1782_v60, 4  ;;  %v2297_v11 = vor.u32 %v2295_v10, %v2294_v22  ;;  %v2299_v6 = vrot.slane %v2294_v22, 4  ;;  %2052 = vst [vmem:[#allocation3 + $0x244] sm:$0xf] %v2020_v31  ;;  %v2076_v5 = vld [vmem:[#allocation2 + $0x24] sm:$0xf] }
  0xc2   : > { %v10055_v62 = vrot.slane %v1789_v3, 7  ;;  %v3101_v58 = vor.u32 %v3099_v23, %v3098_v28  ;;  %v3103_v14 = vrot.slane %v3098_v28, 4  ;;  %v10057_v54 = vrot.slane %v3105_v45, 7  ;;  %v8752_v45 = vld [vmem:[#allocation3 + $0x9c] ss:$36 sps:$4 sm:$0xff]  }
  0xc3   : > { %v12468_v2 = vrot.slane %v9947_v41, 4  ;;  %v2298_v50 = vsel %vm9192_vm14, %v9681_v29, %v2297_v11  ;;  %v10069_v3 = vsel %vm9192_vm14, %v2299_v6, %v9679_v8  ;;  %v3108_v22 = vshll.u32 %v10009_v33, 16  ;;  %v8758_v41 = vld [vmem:[#allocation3 + $0x98] ss:$36 sps:$4 sm:$0xff]   ;;  %v3396_v28 = vld [vmem:[#allocation2 + $0x1c] sm:$0xf]  ;;  %6531 = vmatprep.mubr.bf16.mxu1 %v8752_v45 }
  0xc4   : > { %12469 = vst [vmem:[#allocation39_spill] sm:$0xff] %v10069_v3  ;;  %v1794_v9 = vor.u32 %v1792_v0, %v10055_v62  ;;  %vm10073_vm6 = vcmp.ne.s16.totalorder %v2298_v50, 0  ;;  %v12470_v10 = vmov 0  ;;  %v406_v39 = vadd.f32 %v9686_v57, %v367_v4  ;;  %v3397_v0 = vld [vmem:[#allocation2 + $0x20] sm:$0xf]  ;;  %6532 = vmatmul.mubr.bf16.gmra.mxu1 %v8758_v41 }
  0xc5   : > { %v1786_v36 = vsel %vm9192_vm14, %v12468_v2, %v1785_v61  ;;  %v12471_v10 = vsel %vm10073_vm6, 4294967295, %v12470_v10  ;;  %v3102_v61 = vsel %vm9192_vm14, %v3094_v42, %v3101_v58  ;;  %vm12259_vm10 = vcmp.ne.s16.totalorder %v10069_v3, 0  ;;  %3428 = vst [vmem:[#allocation3 + $0xa0] sm:$0xf] %v3396_v28  ;;  %3429 = vst [vmem:[#allocation3 + $0xc4] sm:$0xf] %v3397_v0 }
  0xc6   : > { %1986 = vst [vmem:[#allocation3 + $0x1f8] sm:$0xf] %v1786_v36  ;;  %12472 = vst [vmem:[#allocation40_spill] sm:$0xff] %v12471_v10  ;;  %v2556_v6 = vsel %vm10073_vm6, %v2075_v20, 0  ;;  %v3110_v33 = vor.u32 %v3108_v22, %v10057_v54  ;;  %v407_v60 = vadd.f32 %v9686_v57, %v368_v46  ;;  %v1795_v23 = vsel %vm9192_vm14, %v1787_v51, %v1794_v9  ;;  %v2979_v58 = vld [vmem:[#allocation2 + $0x2c] sm:$0xf] }
  0xc7   : > { %3366 = vst [vmem:[#allocation3 + $0xe4] sm:$0xf] %v3102_v61  ;;  %v2557_v42 = vsel %vm12259_vm10, %v2076_v5, 0  ;;  %v2652_v4 = vshll.u32 %v2556_v6, 16  ;;  %v2656_v11 = vshrl.u32 %v2556_v6, 16  ;;  %v438_v46 = vmax.f32 %v406_v39, 0.0 }
  0xc8   : > { %1987 = vst [vmem:[#allocation3 + $0x21c] sm:$0xf] %v1795_v23  ;;  %v2662_v31 = vshll.u32 %v2557_v42, 16  ;;  %v2666_v20 = vshrl.u32 %v2557_v42, 16  ;;  %v3111_v57 = vsel %vm9192_vm14, %v3103_v14, %v3110_v33  ;;  %v439_v51 = vmax.f32 %v407_v60, 0.0  ;;  %v10100_v28 = vld [vmem:[%s9070_s25 + $0x48] sm:$0xff]  }
  0xc9   : > { %v2654_v2 = vrot.slane %v2652_v4, 5  ;;  %v2658_v36 = vrot.slane %v2656_v11, 4  ;;  %3367 = vst [vmem:[#allocation3 + $0x108] sm:$0xf] %v3111_v57  ;;  %v634_v5 = vadd.s32 144, %v9035_v7  ;;  %v12473_v45 = vshrl.u32 %v9986_v55, 16 }
  0xca   : > { %v2980_v50 = vld [vmem:[#allocation2 + $0x30] sm:$0xf]  ;;  %v2664_v22 = vrot.slane %v2662_v31, 5  ;;  %v625_v61 = vadd.s32 72, %v9035_v7  ;;  %v7963_v6 = vpack.c.bf16 %v439_v51, %v438_v46  ;;  %v2668_v23 = vrot.slane %v2666_v20, 4 }
  0xcb   : > { %v1426_v9 = vrot.slane %v12473_v45, 4  ;;  %v2655_v14 = vsel %vm9133_vm11, %v10029_v47, %v2654_v2  ;;  %v2659_v39 = vor.u32 %v2658_v36, %v2654_v2  ;;  %v778_v33 = vand.u32 15, %v634_v5  ;;  %v1113_v4 = vld [vmem:[#allocation2 + $0x44] sm:$0xf]  ;;  %v8756_v46 = vld [vmem:[#allocation3 + $0x1fc] ss:$36 sps:$4 sm:$0xff]  }
  0xcc   : > { %2944 = vst [vmem:[#allocation3 + $0xe0] sm:$0xf] %v2655_v14  ;;  %v715_v0 = vand.u32 15, %v625_v61  ;;  %v3012_v55 = vsel %vm9653_vm9, %v2979_v58, 0  ;;  %8102 = vst [vmem:[#allocation2 + $0x48] sm:$0xff] %v7963_v6   ;;  %v10107_v47 = vsel %vm9673_vm8, %v2980_v50, 0  ;;  %v7899_v51 = vunpack.c.l.bf16 %v10100_v28  ;;  %6410 = vmatprep.mubr.bf16.mxu0 %v8756_v46 }
  0xcd   : > { %v1427_v60 = vor.u32 %v1426_v9, %v10020_v30  ;;  %v2660_v42 = vrot.slane %v2659_v39, 4  ;;  %vm1050_vm10 = vcmp.ne.s32.totalorder %v778_v33, 0  ;;  %v3112_v11 = vrot.slane %v10057_v54, 4  ;;  %v10123_v54 = vld [vmem:[%s12206_s1] ss:$0 sm:$0xff] }
  0xce   : > { %vm1211_vm3 = vmpackc.low %vm1050_vm10, %vm1050_vm10  ;;  %vm10110_vm6 = vcmp.ne.s32.totalorder %v715_v0, 15  ;;  %v2669_v30 = vor.u32 %v2668_v23, %v2664_v22  ;;  %v3114_v20 = vshrl.u32 %v3012_v55, 16  ;;  %v12476_v5 = vunpack.c.h.bf16 %v9993_v27  ;;  %v3398_v14 = vld [vmem:[#allocation2 + $0x24] sm:$0xf]  ;;  %v3458_v48 = vld [vmem:[#allocation2 + $0x14] sm:$0xf] }
  0xcf   : > { %v1428_v31 = vrot.slane %v1427_v60, 4  ;;  %v8761_v58 = vld [vmem:[#allocation3 + $0x1f8] ss:$36 sps:$4 sm:$0xff]   ;;  %v2665_v2 = vsel %vm9133_vm11, %v2660_v42, %v2664_v22  ;;  %v10117_v36 = vsel %vm1211_vm3, 65537, %v12430_v17  ;;  %vm2174_vm3 = vmpackc.low %vm10110_vm6, %vm10110_vm6  ;;  %v12477_v27 = vmov 0 }
  0xd0   : > { %v369_v50 = vmul.f32 %v10123_v54, %v12476_v5  ;;  %2945 = vst [vmem:[#allocation3 + $0x104] sm:$0xf] %v2665_v2  ;;  %v1440_v22 = vshll.u32 %v10117_v36, 16  ;;  %v10136_v61 = vrot.slane %v2669_v30, 4  ;;  %v2206_v39 = vsel %vm2174_vm3, 65537, %v12430_v17  ;;  %6411 = vmatmul.mubr.bf16.gmra.mxu0 %v8761_v58 }
  0xd1   : > { %v1433_v45 = vsel %vm9133_vm11, %v1428_v31, %v9122_v44  ;;  %v3116_v6 = vrot.slane %v3114_v20, 7  ;;  %v3117_v33 = vshll.u32 %v3012_v55, 16  ;;  %v3399_v60 = vld [vmem:[#allocation2 + $0x28] sm:$0xf]  ;;  %3430 = vst [vmem:[#allocation3 + $0xe8] sm:$0xf] %v3398_v14 }
  0xd2   : > { %vm10138_vm10 = vcmp.ne.s16.totalorder %v1433_v45, 0  ;;  %v10143_v0 = vrot.slane %v1440_v22, 5  ;;  %v2310_v42 = vshrl.u32 %v2206_v39, 16  ;;  %v2313_v31 = vshll.u32 %v2206_v39, 16  ;;  %3431 = vst [vmem:[#allocation3 + $0x10c] sm:$0xf] %v3399_v60 }
  0xd3   : > { %v12478_v27 = vsel %vm10138_vm10, 4294967295, %v12477_v27  ;;  %v1629_v23 = vsel %vm10138_vm10, %v1113_v4, 0  ;;  %v3119_v46 = vor.u32 %v3117_v33, %v3116_v6  ;;  %v3121_v2 = vrot.slane %v3116_v6, 4  ;;  %v1114_v5 = vld [vmem:[#allocation2 + $0x48] sm:$0xf] }
  0xd4   : > { %12479 = vst [vmem:[#allocation41_spill] sm:$0xff] %v12478_v27  ;;  %v1798_v57 = vshrl.u32 %v1629_v23, 16  ;;  %v1801_v30 = vshll.u32 %v1629_v23, 16  ;;  %v1443_v55 = vsel %vm9133_vm11, %v9151_v1, %v10143_v0  ;;  %v2021_v20 = vld [vmem:[#allocation2 + $0x48] sm:$0xf]  ;;  %v2312_v58 = vrot.slane %v2310_v42, 7 }
  0xd5   : > { %v3123_v45 = vshrl.u32 %v10107_v47, 16  ;;  %v370_v22 = vmul.f32 %v10123_v54, %v7899_v51  ;;  %vm10153_vm6 = vcmp.ne.s16.totalorder %v1443_v55, 0  ;;  %v12480_v4 = vmov 0  ;;  %2053 = vst [vmem:[#allocation3 + $0x268] sm:$0xf] %v2021_v20 }
  0xd6   : > { %v12481_v4 = vsel %vm10153_vm6, 4294967295, %v12480_v4  ;;  %v1800_v14 = vrot.slane %v1798_v57, 7  ;;  %v2077_v39 = vld [vmem:[#allocation2 + $0x28] sm:$0xf]  ;;  %v2078_v6 = vld [vmem:[#allocation2 + $0x2c] sm:$0xf]  ;;  %v3120_v33 = vsel %vm9192_vm14, %v3112_v11, %v3119_v46  ;;  %v2315_v42 = vor.u32 %v2313_v31, %v2312_v58 }
  0xd7   : > { %12482 = vst [vmem:[#allocation42_spill] sm:$0xff] %v12481_v4  ;;  %v3126_v60 = vshll.u32 %v10107_v47, 16  ;;  %v1630_v23 = vsel %vm10153_vm6, %v1114_v5, 0  ;;  %v2317_v9 = vrot.slane %v2312_v58, 4  ;;  %v10162_v41 = vrot.slane %v3123_v45, 7 }
  0xd8   : > { %3368 = vst [vmem:[#allocation3 + $0x12c] sm:$0xf] %v3120_v33  ;;  %v2022_v51 = vld [vmem:[#allocation2 + $0x4c] sm:$0xf]  ;;  %v8762_v55 = vld [vmem:[#allocation3 + $0xe4] ss:$36 sps:$4 sm:$0xff]   ;;  %v1803_v35 = vor.u32 %v1801_v30, %v1800_v14  ;;  %v2316_v47 = vsel %vm9192_vm14, %v9681_v29, %v2315_v42 }
  0xd9   : > { %v1805_v57 = vrot.slane %v1800_v14, 4  ;;  %v1807_v20 = vshrl.u32 %v1630_v23, 16  ;;  %v1810_v52 = vshll.u32 %v1630_v23, 16  ;;  %2054 = vst [vmem:[#allocation3 + $0x28c] sm:$0xf] %v2022_v51  ;;  %v10170_v11 = vsel %vm9192_vm14, %v2317_v9, %v9679_v8  ;;  %6539 = vmatprep.mubr.bf16.mxu1 %v8762_v55  ;;  %v8819_v14 = vld [vmem:[%s12208_s3 + $0x1d0] sm:$0xff]  }
  0xda   : > { %v8766_v25 = vld [vmem:[#allocation3 + $0xe0] ss:$36 sps:$4 sm:$0xff]   ;;  %12483 = vst [vmem:[#allocation43_spill] sm:$0xff] %v10170_v11  ;;  %v3128_v31 = vor.u32 %v3126_v60, %v10162_v41  ;;  %v10176_v30 = vld [vmem:[%s12207_s2] ss:$0 sm:$0xff]  ;;  %v12484_v5 = vrot.slane %v10055_v62, 4  ;;  %8471 = vmatprep.subr.bf16.mxu1 %v8819_v14 }
  0xdb   : > { %v408_v46 = vadd.f32 %v10176_v30, %v369_v50  ;;  %v10183_v45 = vrot.slane %v1807_v20, 7  ;;  %vm10185_vm3 = vcmp.ne.s16.totalorder %v2316_v47, 0  ;;  %v12485_v9 = vmov 0  ;;  %6540 = vmatmul.mubr.bf16.gmra.mxu1 %v8766_v25  ;;  %v8824_v60 = vld [vmem:[%s12208_s3 + $0x190] sm:$0xff]  }
  0xdc   : > { %v1804_v58 = vsel %vm9192_vm14, %v12484_v5, %v1803_v35  ;;  %v12486_v9 = vsel %vm10185_vm3, 4294967295, %v12485_v9  ;;  %vm12269_vm8 = vcmp.ne.s16.totalorder %v10170_v11, 0  ;;  %v2558_v62 = vsel %vm10185_vm3, %v2077_v39, 0  ;;  %v2981_v47 = vld [vmem:[#allocation2 + $0x34] sm:$0xf]  ;;  %8472 = vmatpush3.bf16.msra.mxu1 %v8824_v60 }
  0xdd   : > { %12487 = vst [vmem:[#allocation44_spill] sm:$0xff] %v12486_v9  ;;  %1988 = vst [vmem:[#allocation3 + $0x240] sm:$0xf] %v1804_v58  ;;  %v2559_v35 = vsel %vm12269_vm8, %v2078_v6, 0  ;;  %v3129_v50 = vsel %vm9192_vm14, %v3121_v2, %v3128_v31  ;;  %v409_v33 = vadd.f32 %v10176_v30, %v370_v22  ;;  %v1812_v23 = vor.u32 %v1810_v52, %v10183_v45  ;;  %v2982_v58 = vld [vmem:[#allocation2 + $0x38] sm:$0xf] }
  0xde   : > { %v2672_v42 = vshll.u32 %v2558_v62, 16  ;;  %v2676_v51 = vshrl.u32 %v2558_v62, 16  ;;  %v2682_v25 = vshll.u32 %v2559_v35, 16  ;;  %3369 = vst [vmem:[#allocation3 + $0x150] sm:$0xf] %v3129_v50  ;;  %v2686_v39 = vshrl.u32 %v2559_v35, 16 }
  0xdf   : > { %v440_v55 = vmax.f32 %v408_v46, 0.0  ;;  %v441_v20 = vmax.f32 %v409_v33, 0.0  ;;  %v636_v6 = vadd.s32 160, %v9035_v7  ;;  %v1813_v2 = vsel %vm9192_vm14, %v1805_v57, %v1812_v23 }
  0xe0   : > { %v2674_v22 = vrot.slane %v2672_v42, 5  ;;  %v2678_v31 = vrot.slane %v2676_v51, 4  ;;  %v2684_v5 = vrot.slane %v2682_v25, 5  ;;  %1989 = vst [vmem:[#allocation3 + $0x264] sm:$0xf] %v1813_v2  ;;  %v12488_v50 = vshrl.u32 %v10117_v36, 16 }
  0xe1   : > { %v7968_v52 = vpack.c.bf16 %v441_v20, %v440_v55  ;;  %v792_v62 = vand.u32 15, %v636_v6  ;;  %v627_v60 = vadd.s32 88, %v9035_v7  ;;  %v2688_v57 = vrot.slane %v2686_v39, 4  ;;  %v3400_v20 = vld [vmem:[#allocation2 + $0x2c] sm:$0xf] }
  0xe2   : > { %v1446_v14 = vrot.slane %v12488_v50, 4  ;;  %v2675_v35 = vsel %vm9133_vm11, %v10136_v61, %v2674_v22  ;;  %v2679_v33 = vor.u32 %v2678_v31, %v2674_v22  ;;  %v3014_v42 = vsel %vm9784_vm7, %v2981_v47, 0  ;;  %v3401_v22 = vld [vmem:[#allocation2 + $0x30] sm:$0xf]  ;;  %3432 = vst [vmem:[#allocation3 + $0x130] sm:$0xf] %v3400_v20 }
  0xe3   : > { %2946 = vst [vmem:[#allocation3 + $0x128] sm:$0xf] %v2675_v35  ;;  %8103 = vst [vmem:[#allocation2 + $0x50] sm:$0xff] %v7968_v52   ;;  %vm1052_vm8 = vcmp.ne.s32.totalorder %v792_v62, 0  ;;  %v10219_v36 = vsel %vm9804_vm4, %v2982_v58, 0  ;;  %v729_v25 = vand.u32 15, %v627_v60  ;;  %v2689_v61 = vor.u32 %v2688_v57, %v2684_v5 }
  0xe4   : > { %v1447_v23 = vor.u32 %v1446_v14, %v10143_v0  ;;  %v2680_v51 = vrot.slane %v2679_v33, 4  ;;  %vm1213_vm9 = vmpackc.low %vm1052_vm8, %vm1052_vm8  ;;  %v3130_v55 = vrot.slane %v10162_v41, 4  ;;  %v3132_v2 = vshrl.u32 %v3014_v42, 16  ;;  %3433 = vst [vmem:[#allocation3 + $0x154] sm:$0xf] %v3401_v22 }
  0xe5   : > { %v10223_v39 = vsel %vm1213_vm9, 65537, %v12430_v17  ;;  %v3135_v0 = vshll.u32 %v3014_v42, 16  ;;  %vm10229_vm8 = vcmp.ne.s32.totalorder %v729_v25, 15  ;;  %v1115_v41 = vld [vmem:[#allocation2 + $0x4c] sm:$0xf]  ;;  %v3141_v14 = vshrl.u32 %v10219_v36, 16 }
  0xe6   : > { %v1448_v6 = vrot.slane %v1447_v23, 4  ;;  %v2685_v47 = vsel %vm9133_vm11, %v2680_v51, %v2684_v5  ;;  %v1460_v31 = vshll.u32 %v10223_v39, 16  ;;  %vm2176_vm9 = vmpackc.low %vm10229_vm8, %vm10229_vm8  ;;  %v10239_v5 = vrot.slane %v2689_v61, 4  ;;  %v8764_v35 = vld [vmem:[#allocation3 + $0x244] ss:$36 sps:$4 sm:$0xff]  }
  0xe7   : > { %2947 = vst [vmem:[#allocation3 + $0x14c] sm:$0xf] %v2685_v47  ;;  %v3134_v50 = vrot.slane %v3132_v2, 7  ;;  %v8767_v33 = vld [vmem:[#allocation3 + $0x240] ss:$36 sps:$4 sm:$0xff]   ;;  %v7900_v57 = vunpack.c.h.bf16 %v10100_v28  ;;  %v12491_v23 = vunpack.c.l.bf16 %v9094_v26  ;;  %v12492_v51 = vmov 0  ;;  %6418 = vmatprep.mubr.bf16.mxu0 %v8764_v35 }
  0xe8   : > { %v1453_v62 = vsel %vm9133_vm11, %v1448_v6, %v9122_v44  ;;  %v10242_v60 = vrot.slane %v1460_v31, 5  ;;  %v2208_v25 = vsel %vm2176_vm9, 65537, %v12430_v17  ;;  %6419 = vmatmul.mubr.bf16.gmra.mxu0 %v8767_v33  ;;  %v12495_v31 = vmov 0  ;;  %v8770_v58 = vld [vmem:[#allocation3 + $0x12c] ss:$36 sps:$4 sm:$0xff]  }
  0xe9   : > { %v372_v42 = vmul.f32 %v10123_v54, %v12491_v23  ;;  %vm10248_vm4 = vcmp.ne.s16.totalorder %v1453_v62, 0  ;;  %v3137_v61 = vor.u32 %v3135_v0, %v3134_v50  ;;  %v3139_v20 = vrot.slane %v3134_v50, 4  ;;  %6547 = vmatprep.mubr.bf16.mxu1 %v8770_v58 }
  0xea   : > { %v12493_v51 = vsel %vm10248_vm4, 4294967295, %v12492_v51  ;;  %v1116_v6 = vld [vmem:[#allocation2 + $0x50] sm:$0xf]  ;;  %v1463_v2 = vsel %vm9133_vm11, %v9151_v1, %v10242_v60  ;;  %v1631_v26 = vsel %vm10248_vm4, %v1115_v41, 0  ;;  %v371_v22 = vmul.f32 %v10123_v54, %v7900_v57  ;;  %v2024_v54 = vld [vmem:[#allocation2 + $0x54] sm:$0xf] }
  0xeb   : > { %12494 = vst [vmem:[#allocation45_spill] sm:$0xff] %v12493_v51  ;;  %v2023_v28 = vld [vmem:[#allocation2 + $0x50] sm:$0xf]  ;;  %v411_v47 = vadd.f32 %v10176_v30, %v372_v42  ;;  %vm10261_vm8 = vcmp.ne.s16.totalorder %v1463_v2, 0  ;;  %v1816_v0 = vshrl.u32 %v1631_v26, 16  ;;  %v1819_v52 = vshll.u32 %v1631_v26, 16 }
  0xec   : > { %v12496_v31 = vsel %vm10261_vm8, 4294967295, %v12495_v31  ;;  %2055 = vst [vmem:[#allocation3 + $0x2b0] sm:$0xf] %v2023_v28  ;;  %v2328_v62 = vshrl.u32 %v2208_v25, 16  ;;  %v1632_v50 = vsel %vm10261_vm8, %v1116_v6, 0  ;;  %v2331_v35 = vshll.u32 %v2208_v25, 16 }
  0xed   : > { %12497 = vst [vmem:[#allocation46_spill] sm:$0xff] %v12496_v31  ;;  %v3138_v41 = vsel %vm9192_vm14, %v3130_v55, %v3137_v61  ;;  %v10269_v23 = vrot.slane %v3141_v14, 7  ;;  %v1818_v57 = vrot.slane %v1816_v0, 7  ;;  %v1825_v33 = vshrl.u32 %v1632_v50, 16  ;;  %2056 = vst [vmem:[#allocation3 + $0x2d4] sm:$0xf] %v2024_v54 }
  0xee   : > { %v1828_v42 = vshll.u32 %v1632_v50, 16  ;;  %v2330_v2 = vrot.slane %v2328_v62, 7  ;;  %3370 = vst [vmem:[#allocation3 + $0x174] sm:$0xf] %v3138_v41  ;;  %v8775_v26 = vld [vmem:[#allocation3 + $0x128] ss:$36 sps:$4 sm:$0xff]   ;;  %v410_v46 = vadd.f32 %v10176_v30, %v371_v22 }
  0xef   : > { %v3144_v28 = vshll.u32 %v10219_v36, 16  ;;  %v1821_v6 = vor.u32 %v1819_v52, %v1818_v57  ;;  %v1823_v25 = vrot.slane %v1818_v57, 4  ;;  %v10273_v34 = vrot.slane %v1825_v33, 7  ;;  %v2079_v14 = vld [vmem:[#allocation2 + $0x30] sm:$0xf]  ;;  %6548 = vmatmul.mubr.bf16.gmra.mxu1 %v8775_v26 }
  0xf0   : > { %v2333_v55 = vor.u32 %v2331_v35, %v2330_v2  ;;  %v2335_v61 = vrot.slane %v2330_v2, 4  ;;  %v442_v50 = vmax.f32 %v410_v46, 0.0  ;;  %v443_v62 = vmax.f32 %v411_v47, 0.0  ;;  %v2080_v30 = vld [vmem:[#allocation2 + $0x34] sm:$0xf] }
  0xf1   : > { %v3146_v0 = vor.u32 %v3144_v28, %v10269_v23  ;;  %v12498_v41 = vrot.slane %v10183_v45, 4  ;;  %v1830_v36 = vor.u32 %v1828_v42, %v10273_v34  ;;  %v638_v58 = vadd.s32 176, %v9035_v7  ;;  %v3402_v35 = vld [vmem:[#allocation2 + $0x34] sm:$0xf]  ;;  %v3403_v57 = vld [vmem:[#allocation2 + $0x38] sm:$0xf] }
  0xf2   : > { %v2334_v22 = vsel %vm9192_vm14, %v9681_v29, %v2333_v55  ;;  %v10288_v46 = vsel %vm9192_vm14, %v2335_v61, %v9679_v8  ;;  %v12500_v45 = vmov 0  ;;  %v7973_v52 = vpack.c.bf16 %v443_v62, %v442_v50  ;;  %v2983_v26 = vld [vmem:[#allocation2 + $0x3c] sm:$0xf]  ;;  %3434 = vst [vmem:[#allocation3 + $0x178] sm:$0xf] %v3402_v35 }
  0xf3   : > { %v1822_v54 = vsel %vm9192_vm14, %v12498_v41, %v1821_v6  ;;  %12499 = vst [vmem:[#allocation47_spill] sm:$0xff] %v10288_v46  ;;  %vm10290_vm9 = vcmp.ne.s16.totalorder %v2334_v22, 0  ;;  %v3147_v47 = vsel %vm9192_vm14, %v3139_v20, %v3146_v0  ;;  %v1831_v33 = vsel %vm9192_vm14, %v1823_v25, %v1830_v36  ;;  %3435 = vst [vmem:[#allocation3 + $0x19c] sm:$0xf] %v3403_v57  ;;  %v2984_v61 = vld [vmem:[#allocation2 + $0x40] sm:$0xf] }
  0xf4   : > { %1990 = vst [vmem:[#allocation3 + $0x288] sm:$0xf] %v1822_v54  ;;  %v12501_v45 = vsel %vm10290_vm9, 4294967295, %v12500_v45  ;;  %vm12278_vm7 = vcmp.ne.s16.totalorder %v10288_v46, 0  ;;  %v2560_v42 = vsel %vm10290_vm9, %v2079_v14, 0  ;;  %v806_v2 = vand.u32 15, %v638_v58 }
  0xf5   : > { %12502 = vst [vmem:[#allocation48_spill] sm:$0xff] %v12501_v45  ;;  %3371 = vst [vmem:[#allocation3 + $0x198] sm:$0xf] %v3147_v47  ;;  %v2561_v20 = vsel %vm12278_vm7, %v2080_v30, 0  ;;  %v2692_v28 = vshll.u32 %v2560_v42, 16  ;;  %v2696_v6 = vshrl.u32 %v2560_v42, 16 }
  0xf6   : > { %1991 = vst [vmem:[#allocation3 + $0x2ac] sm:$0xf] %v1831_v33  ;;  %8104 = vst [vmem:[#allocation2 + $0x58] sm:$0xff] %v7973_v52   ;;  %v12503_v55 = vshrl.u32 %v10223_v39, 16  ;;  %v2702_v0 = vshll.u32 %v2561_v20, 16  ;;  %v2706_v50 = vshrl.u32 %v2561_v20, 16 }
  0xf7   : > { %vm1054_vm3 = vcmp.ne.s32.totalorder %v806_v2, 0  ;;  %v2694_v62 = vrot.slane %v2692_v28, 5  ;;  %v2698_v41 = vrot.slane %v2696_v6, 4  ;;  %v629_v36 = vadd.s32 104, %v9035_v7  ;;  %v1117_v33 = vld [vmem:[#allocation2 + $0x54] sm:$0xf] }
  0xf8   : > { %v1466_v25 = vrot.slane %v12503_v55, 4  ;;  %vm1215_vm9 = vmpackc.low %vm1054_vm3, %vm1054_vm3  ;;  %v2704_v30 = vrot.slane %v2702_v0, 5  ;;  %v2708_v58 = vrot.slane %v2706_v50, 4  ;;  %v3016_v39 = vsel %vm9917_vm12, %v2983_v26, 0  ;;  %v8834_v55 = vld [vmem:[%s12208_s3 + $0x1c8] sm:$0xff]  }
  0xf9   : > { %v1247_v22 = vsel %vm1215_vm9, 65537, %v12430_v17  ;;  %v2695_v47 = vsel %vm9133_vm11, %v10239_v5, %v2694_v62  ;;  %v2699_v52 = vor.u32 %v2698_v41, %v2694_v62  ;;  %v3017_v20 = vsel %vm9934_vm15, %v2984_v61, 0  ;;  %8473 = vmatprep.subr.bf16.mxu1 %v8834_v55 }
  0xfa   : > { %v1467_v54 = vor.u32 %v1466_v25, %v10242_v60  ;;  %v1480_v57 = vshll.u32 %v1247_v22, 16  ;;  %2948 = vst [vmem:[#allocation3 + $0x170] sm:$0xf] %v2695_v47  ;;  %v1484_v42 = vshrl.u32 %v1247_v22, 16  ;;  %v743_v60 = vand.u32 15, %v629_v36 }
  0xfb   : > { %v2709_v2 = vor.u32 %v2708_v58, %v2704_v30  ;;  %v2700_v28 = vrot.slane %v2699_v52, 4  ;;  %v3148_v5 = vrot.slane %v10269_v23, 4  ;;  %v8773_v25 = vld [vmem:[#allocation3 + $0x28c] ss:$36 sps:$4 sm:$0xff]   ;;  %v12504_v50 = vmov 0 }
  0xfc   : > { %v1468_v35 = vrot.slane %v1467_v54, 4  ;;  %v10319_v6 = vrot.slane %v1480_v57, 5  ;;  %vm1077_vm9 = vcmp.ne.s32.totalorder %v743_v60, 15  ;;  %6426 = vmatprep.mubr.bf16.mxu0 %v8773_v25  ;;  %v12507_v36 = vmov 0  ;;  %v8778_v12 = vld [vmem:[#allocation3 + $0x174] ss:$36 sps:$4 sm:$0xff]  }
  0xfd   : > { %v8777_v0 = vld [vmem:[#allocation3 + $0x288] ss:$36 sps:$4 sm:$0xff]   ;;  %v2705_v61 = vsel %vm9133_vm11, %v2700_v28, %v2704_v30  ;;  %v1118_v62 = vld [vmem:[#allocation2 + $0x58] sm:$0xf]  ;;  %vm2178_vm15 = vmpackc.low %vm1077_vm9, %vm1077_vm9  ;;  %v10341_v58 = vrot.slane %v2709_v2, 4  ;;  %v3153_v57 = vshll.u32 %v3016_v39, 16  ;;  %6555 = vmatprep.mubr.bf16.mxu1 %v8778_v12 }
  0xfe   : > { %v1473_v26 = vsel %vm9133_vm11, %v1468_v35, %v9122_v44  ;;  %v1483_v41 = vsel %vm9133_vm11, %v9151_v1, %v10319_v6  ;;  %v2025_v54 = vld [vmem:[#allocation2 + $0x58] sm:$0xf]  ;;  %2949 = vst [vmem:[#allocation3 + $0x194] sm:$0xf] %v2705_v61  ;;  %6427 = vmatmul.mubr.bf16.gmra.mxu0 %v8777_v0  ;;  %v2210_v52 = vsel %vm2178_vm15, 65537, %v12430_v17  ;;  %v3150_v35 = vshrl.u32 %v3016_v39, 16 }
  0xff   : > { %vm10325_vm3 = vcmp.ne.s16.totalorder %v1473_v26, 0  ;;  %vm10337_vm7 = vcmp.ne.s16.totalorder %v1483_v41, 0  ;;  %2057 = vst [vmem:[#allocation3 + $0x2f8] sm:$0xf] %v2025_v54  ;;  %v2346_v55 = vshrl.u32 %v2210_v52, 16  ;;  %v2349_v25 = vshll.u32 %v2210_v52, 16 }
 0x100   : > { %v12505_v50 = vsel %vm10325_vm3, 4294967295, %v12504_v50  ;;  %v1633_v23 = vsel %vm10325_vm3, %v1117_v33, 0  ;;  %v12508_v36 = vsel %vm10337_vm7, 4294967295, %v12507_v36  ;;  %v1634_v47 = vsel %vm10337_vm7, %v1118_v62, 0  ;;  %v2026_v33 = vld [vmem:[#allocation2 + $0x5c] sm:$0xf] }
 0x101   : > { %12506 = vst [vmem:[#allocation49_spill] sm:$0xff] %v12505_v50  ;;  %12509 = vst [vmem:[#allocation50_spill] sm:$0xff] %v12508_v36  ;;  %v1834_v22 = vshrl.u32 %v1633_v23, 16  ;;  %v1837_v30 = vshll.u32 %v1633_v23, 16  ;;  %v1843_v28 = vshrl.u32 %v1634_v47, 16  ;;  %v1846_v26 = vshll.u32 %v1634_v47, 16 }
 0x102   : > { %2058 = vst [vmem:[#allocation3 + $0x31c] sm:$0xf] %v2026_v33  ;;  %v3152_v61 = vrot.slane %v3150_v35, 7  ;;  %v3159_v41 = vshrl.u32 %v3017_v20, 16  ;;  %v3162_v23 = vshll.u32 %v3017_v20, 16  ;;  %v8839_v2 = vld [vmem:[%s12208_s3 + $0x188] sm:$0xff]  }
 0x103   : > { %v1836_v60 = vrot.slane %v1834_v22, 7  ;;  %v10349_v54 = vrot.slane %v1843_v28, 7  ;;  %v2348_v14 = vrot.slane %v2346_v55, 7  ;;  %v2081_v39 = vld [vmem:[#allocation2 + $0x38] sm:$0xf]  ;;  %v1486_v47 = vrot.slane %v1484_v42, 4  ;;  %8474 = vmatpush3.bf16.msra.mxu1 %v8839_v2 }
 0x104   : > { %v3155_v13 = vor.u32 %v3153_v57, %v3152_v61  ;;  %v3157_v22 = vrot.slane %v3152_v61, 4  ;;  %v10351_v15 = vrot.slane %v3159_v41, 7  ;;  %v12510_v52 = vrot.slane %v10273_v34, 4  ;;  %v2082_v33 = vld [vmem:[#allocation2 + $0x3c] sm:$0xf] }
 0x105   : > { %v1839_v0 = vor.u32 %v1837_v30, %v1836_v60  ;;  %v1841_v62 = vrot.slane %v1836_v60, 4  ;;  %v1848_v35 = vor.u32 %v1846_v26, %v10349_v54  ;;  %v2351_v30 = vor.u32 %v2349_v25, %v2348_v14  ;;  %v2985_v28 = vld [vmem:[#allocation2 + $0x44] sm:$0xf]  ;;  %v8783_v55 = vld [vmem:[#allocation3 + $0x170] ss:$36 sps:$4 sm:$0xff]  }
 0x106   : > { %v2353_v60 = vrot.slane %v2348_v14, 4  ;;  %v3156_v57 = vsel %vm9192_vm14, %v3148_v5, %v3155_v13  ;;  %v3164_v42 = vor.u32 %v3162_v23, %v10351_v15  ;;  %v1487_v61 = vor.u32 %v1486_v47, %v10319_v6  ;;  %v2986_v5 = vld [vmem:[#allocation2 + $0x48] sm:$0xf]  ;;  %v3404_v2 = vld [vmem:[#allocation2 + $0x3c] sm:$0xf]  ;;  %6556 = vmatmul.mubr.bf16.gmra.mxu1 %v8783_v55 }
 0x107   : > { %v1840_v20 = vsel %vm9192_vm14, %v12510_v52, %v1839_v0  ;;  %v1849_v41 = vsel %vm9192_vm14, %v1841_v62, %v1848_v35  ;;  %v2352_v14 = vsel %vm9192_vm14, %v9681_v29, %v2351_v30  ;;  %3372 = vst [vmem:[#allocation3 + $0x1bc] sm:$0xf] %v3156_v57  ;;  %v631_v13 = vadd.s32 120, %v9035_v7  ;;  %v3405_v52 = vld [vmem:[#allocation2 + $0x40] sm:$0xf] }
 0x108   : > { %1992 = vst [vmem:[#allocation3 + $0x2d0] sm:$0xf] %v1840_v20  ;;  %v10371_v26 = vsel %vm9192_vm14, %v2353_v60, %v9679_v8  ;;  %1993 = vst [vmem:[#allocation3 + $0x2f4] sm:$0xf] %v1849_v41  ;;  %vm10374_vm15 = vcmp.ne.s16.totalorder %v2352_v14, 0  ;;  %v12512_v6 = vmov 0  ;;  %v3165_v25 = vsel %vm9192_vm14, %v3157_v22, %v3164_v42 }
 0x109   : > { %12511 = vst [vmem:[#allocation51_spill] sm:$0xff] %v10371_v26  ;;  %v12513_v6 = vsel %vm10374_vm15, 4294967295, %v12512_v6  ;;  %vm12284_vm9 = vcmp.ne.s16.totalorder %v10371_v26, 0  ;;  %v1488_v23 = vrot.slane %v1487_v61, 4  ;;  %v2562_v0 = vsel %vm10374_vm15, %v2081_v39, 0 }
 0x10a   : > { %12514 = vst [vmem:[#allocation52_spill] sm:$0xff] %v12513_v6  ;;  %v2563_v62 = vsel %vm12284_vm9, %v2082_v33, 0  ;;  %3373 = vst [vmem:[#allocation3 + $0x1e0] sm:$0xf] %v3165_v25  ;;  %v757_v12 = vand.u32 15, %v631_v13  ;;  %v3018_v47 = vsel %vm10022_vm1, %v2985_v28, 0 }
 0x10b   : > { %3436 = vst [vmem:[#allocation3 + $0x1c0] sm:$0xf] %v3404_v2  ;;  %v2712_v20 = vshll.u32 %v2562_v0, 16  ;;  %v2716_v35 = vshrl.u32 %v2562_v0, 16  ;;  %v2722_v30 = vshll.u32 %v2563_v62, 16  ;;  %v2726_v22 = vshrl.u32 %v2563_v62, 16 }
 0x10c   : > { %v1119_v60 = vld [vmem:[#allocation2 + $0x5c] sm:$0xf]  ;;  %3437 = vst [vmem:[#allocation3 + $0x1e4] sm:$0xf] %v3405_v52  ;;  %v1493_v39 = vsel %vm9133_vm11, %v1488_v23, %v9122_v44  ;;  %vm1079_vm12 = vcmp.ne.s32.totalorder %v757_v12, 15  ;;  %v3019_v33 = vsel %vm10045_vm5, %v2986_v5, 0 }
 0x10d   : > { %v3166_v55 = vrot.slane %v10351_v15, 4  ;;  %v2714_v57 = vrot.slane %v2712_v20, 5  ;;  %v2718_v28 = vrot.slane %v2716_v35, 4  ;;  %v2724_v42 = vrot.slane %v2722_v30, 5  ;;  %vm2180_vm1 = vmpackc.low %vm1079_vm12, %vm1079_vm12  ;;  %v8781_v2 = vld [vmem:[#allocation3 + $0x2d4] ss:$36 sps:$4 sm:$0xff]  }
 0x10e   : > { %vm10393_vm9 = vcmp.ne.s16.totalorder %v1493_v39, 0  ;;  %v12515_v61 = vmov 0  ;;  %v2212_v14 = vsel %vm2180_vm1, 65537, %v12430_v17  ;;  %v2728_v44 = vrot.slane %v2726_v22, 4  ;;  %v3456_v35 = vld [vmem:[#allocation2 + $0xc] sm:$0xf]  ;;  %6434 = vmatprep.mubr.bf16.mxu0 %v8781_v2 }
 0x10f   : > { %v12516_v61 = vsel %vm10393_vm9, 4294967295, %v12515_v61  ;;  %v1635_v41 = vsel %vm10393_vm9, %v1119_v60, 0  ;;  %v3168_v13 = vshrl.u32 %v3018_v47, 16  ;;  %v2715_v5 = vsel %vm9133_vm11, %v10341_v58, %v2714_v57  ;;  %v8785_v0 = vld [vmem:[#allocation3 + $0x2d0] ss:$36 sps:$4 sm:$0xff]  }
 0x110   : > { %12517 = vst [vmem:[#allocation53_spill] sm:$0xff] %v12516_v61  ;;  %v2719_v15 = vor.u32 %v2718_v28, %v2714_v57  ;;  %v1852_v25 = vshrl.u32 %v1635_v41, 16  ;;  %v1855_v23 = vshll.u32 %v1635_v41, 16  ;;  %2950 = vst [vmem:[#allocation3 + $0x1b8] sm:$0xf] %v2715_v5  ;;  %v12518_v62 = vshll.u32 %v9243_v32, 16  ;;  %6435 = vmatmul.mubr.bf16.gmra.mxu0 %v8785_v0 }
 0x111   : > { %v2364_v52 = vshrl.u32 %v2212_v14, 16  ;;  %v2729_v20 = vor.u32 %v2728_v44, %v2724_v42  ;;  %v2367_v60 = vshll.u32 %v2212_v14, 16  ;;  %v3170_v39 = vrot.slane %v3168_v13, 7  ;;  %v3457_v34 = vld [vmem:[#allocation2 + $0x10] sm:$0xf] }
 0x112   : > { %v1866_v12 = vor.u32 %v12518_v62, %v9269_v59  ;;  %v2720_v30 = vrot.slane %v2719_v15, 4  ;;  %v1854_v22 = vrot.slane %v1852_v25, 7  ;;  %v3171_v28 = vshll.u32 %v3018_v47, 16  ;;  %v2083_v44 = vld [vmem:[#allocation2 + $0x40] sm:$0xf] }
 0x113   : > { %v2366_v58 = vrot.slane %v2364_v52, 7  ;;  %v10406_v57 = vrot.slane %v2729_v20, 4  ;;  %v3177_v41 = vshrl.u32 %v3019_v33, 16  ;;  %v2084_v62 = vld [vmem:[#allocation2 + $0x44] sm:$0xf]  ;;  %v3175_v15 = vrot.slane %v3170_v39, 4 }
 0x114   : > { %v2725_v32 = vsel %vm9133_vm11, %v2720_v30, %v2724_v42  ;;  %v1857_v59 = vor.u32 %v1855_v23, %v1854_v22  ;;  %v1859_v5 = vrot.slane %v1854_v22, 4  ;;  %v3406_v25 = vld [vmem:[#allocation2 + $0x44] sm:$0xf]  ;;  %v3407_v14 = vld [vmem:[#allocation2 + $0x48] sm:$0xf]  ;;  %v3173_v52 = vor.u32 %v3171_v28, %v3170_v39 }
 0x115   : > { %2951 = vst [vmem:[#allocation3 + $0x1dc] sm:$0xf] %v2725_v32  ;;  %v2369_v13 = vor.u32 %v2367_v60, %v2366_v58  ;;  %v2371_v2 = vrot.slane %v2366_v58, 4  ;;  %v10410_v20 = vrot.slane %v3177_v41, 7  ;;  %3438 = vst [vmem:[#allocation3 + $0x208] sm:$0xf] %v3406_v25 }
 0x116   : > { %3439 = vst [vmem:[#allocation3 + $0x22c] sm:$0xf] %v3407_v14  ;;  %v12519_v47 = vrot.slane %v10349_v54, 4  ;;  %v1867_v23 = vsel %vm9192_vm14, %v1859_v5, %v1866_v12  ;;  %v3180_v0 = vshll.u32 %v3019_v33, 16  ;;  %vm12520_vm12 = vcmp.ne.s16.totalorder %v9679_v8, 0 }
 0x117   : > { %v3489_v30 = vsel %vm12520_vm12, %v3456_v35, 0  ;;  %1995 = vst [vmem:[#allocation3 + $0x33c] sm:$0xf] %v1867_v23  ;;  %v2370_v22 = vsel %vm9192_vm14, %v9681_v29, %v2369_v13  ;;  %v10426_v54 = vsel %vm9192_vm14, %v2371_v2, %v9679_v8  ;;  %v3174_v60 = vsel %vm9192_vm14, %v3166_v55, %v3173_v52  ;;  %v8786_v52 = vld [vmem:[#allocation3 + $0x1bc] ss:$36 sps:$4 sm:$0xff]  }
 0x118   : > { %v1858_v42 = vsel %vm9192_vm14, %v12519_v47, %v1857_v59  ;;  %12521 = vst [vmem:[#allocation54_spill] sm:$0xff] %v10426_v54  ;;  %v3490_v33 = vsel %vm9714_vm2, %v3457_v34, 0  ;;  %vm10432_vm1 = vcmp.ne.s16.totalorder %v2370_v22, 0  ;;  %v12522_v12 = vmov 0  ;;  %3374 = vst [vmem:[#allocation3 + $0x204] sm:$0xf] %v3174_v60  ;;  %6563 = vmatprep.mubr.bf16.mxu1 %v8786_v52 }
 0x119   : > { %1994 = vst [vmem:[#allocation3 + $0x318] sm:$0xf] %v1858_v42  ;;  %v12523_v12 = vsel %vm10432_vm1, 4294967295, %v12522_v12  ;;  %vm12288_vm12 = vcmp.ne.s16.totalorder %v10426_v54, 0  ;;  %v3182_v35 = vor.u32 %v3180_v0, %v10410_v20  ;;  %vm12525_vm5 = vcmp.ne.s16.totalorder %v9708_v16, 0  ;;  %v8849_v22 = vld [vmem:[%s12208_s3 + $0x1c0] sm:$0xff]  }
 0x11a   : > { %12524 = vst [vmem:[#allocation55_spill] sm:$0xff] %v12523_v12  ;;  %v10440_v39 = vsel %vm12525_vm5, %v3458_v48, 0  ;;  %v2564_v58 = vsel %vm10432_vm1, %v2083_v44, 0  ;;  %v2565_v55 = vsel %vm12288_vm12, %v2084_v62, 0  ;;  %v3523_v34 = vshrl.u32 %v3489_v30, 16  ;;  %8475 = vmatprep.subr.bf16.mxu1 %v8849_v22 }
 0x11b   : > { %v3526_v28 = vshll.u32 %v3489_v30, 16  ;;  %v2732_v41 = vshll.u32 %v2564_v58, 16  ;;  %v2736_v32 = vshrl.u32 %v2564_v58, 16  ;;  %v2742_v59 = vshll.u32 %v2565_v55, 16  ;;  %v2987_v48 = vld [vmem:[#allocation2 + $0x4c] sm:$0xf] }
 0x11c   : > { %v2746_v5 = vshrl.u32 %v2565_v55, 16  ;;  %v3183_v25 = vsel %vm9192_vm14, %v3175_v15, %v3182_v35  ;;  %v3525_v14 = vrot.slane %v3523_v34, 4  ;;  %v3532_v2 = vshll.u32 %v3490_v33, 16  ;;  %v8791_v47 = vld [vmem:[#allocation3 + $0x1b8] ss:$36 sps:$4 sm:$0xff]  }
 0x11d   : > { %v3528_v13 = vrot.slane %v3526_v28, 5  ;;  %v2734_v42 = vrot.slane %v2732_v41, 5  ;;  %3375 = vst [vmem:[#allocation3 + $0x228] sm:$0xf] %v3183_v25  ;;  %v2738_v44 = vrot.slane %v2736_v32, 4  ;;  %v2744_v23 = vrot.slane %v2742_v59, 5  ;;  %6564 = vmatmul.mubr.bf16.gmra.mxu1 %v8791_v47 }
 0x11e   : > { %v3534_v0 = vrot.slane %v3532_v2, 5  ;;  %v2988_v30 = vld [vmem:[#allocation2 + $0x50] sm:$0xf]  ;;  %v8789_v60 = vld [vmem:[#allocation3 + $0x31c] ss:$36 sps:$4 sm:$0xff]   ;;  %v3536_v35 = vshrl.u32 %v3490_v33, 16 }
 0x11f   : > { %v3529_v62 = vor.u32 %v3528_v13, %v3525_v14  ;;  %v2735_v15 = vsel %vm9133_vm11, %v10406_v57, %v2734_v42  ;;  %v3542_v58 = vshll.u32 %v10440_v39, 16  ;;  %v2739_v34 = vor.u32 %v2738_v44, %v2734_v42  ;;  %v8854_v59 = vld [vmem:[%s12208_s3 + $0x180] sm:$0xff]   ;;  %6442 = vmatprep.mubr.bf16.mxu0 %v8789_v60  ;;  %v3460_v22 = vld [vmem:[#allocation2 + $0x1c] sm:$0xf]  ;;  %v3417_v50 = vld [vmem:[#allocation2 + $0x70] sm:$0xf] }
 0x120   : > { %v8793_v55 = vld [vmem:[#allocation3 + $0x318] ss:$36 sps:$4 sm:$0xff]   ;;  %2952 = vst [vmem:[#allocation3 + $0x200] sm:$0xf] %v2735_v15  ;;  %v3546_v41 = vshrl.u32 %v10440_v39, 16  ;;  %v633_v32 = vadd.s32 136, %v9035_v7  ;;  %8476 = vmatpush3.bf16.msra.mxu1 %v8854_v59 }
 0x121   : > { %v3530_v28 = vrot.slane %v3529_v62, 4  ;;  %v3538_v25 = vrot.slane %v3536_v35, 4  ;;  %v3544_v57 = vrot.slane %v3542_v58, 5  ;;  %v2748_v33 = vrot.slane %v2746_v5, 4  ;;  %6443 = vmatmul.mubr.bf16.gmra.mxu0 %v8793_v55  ;;  %v3459_v5 = vld [vmem:[#allocation2 + $0x18] sm:$0xf] }
 0x122   : > { %v3020_v14 = vsel %vm10138_vm10, %v2987_v48, 0  ;;  %v2740_v13 = vrot.slane %v2739_v34, 4  ;;  %v771_v39 = vand.u32 15, %v633_v32  ;;  %v3021_v52 = vsel %vm10153_vm6, %v2988_v30, 0  ;;  %3449 = vst [vmem:[#allocation3 + $0x394] sm:$0xf] %v3417_v50 }
 0x123   : > { %v3535_v2 = vsel %vm9133_vm11, %v3530_v28, %v3534_v0  ;;  %v3539_v47 = vor.u32 %v3538_v25, %v3534_v0  ;;  %v2749_v42 = vor.u32 %v2748_v33, %v2744_v23  ;;  %v3184_v44 = vrot.slane %v10410_v20, 4  ;;  %v3408_v33 = vld [vmem:[#allocation2 + $0x4c] sm:$0xf]  ;;  %v8846_v12 = vld [vmem:[#allocation3 + $0x1c0] ss:$36 sps:$4 sm:$0xff]  }
 0x124   : > { %3878 = vst [vmem:[#allocation3 + $0x14] sm:$0xf] %v3535_v2  ;;  %v3186_v62 = vshrl.u32 %v3020_v14, 16  ;;  %v2745_v48 = vsel %vm9133_vm11, %v2740_v13, %v2744_v23  ;;  %vm1081_vm5 = vcmp.ne.s32.totalorder %v771_v39, 15  ;;  %v3189_v60 = vshll.u32 %v3020_v14, 16 }
 0x125   : > { %v3195_v15 = vshrl.u32 %v3021_v52, 16  ;;  %2953 = vst [vmem:[#allocation3 + $0x224] sm:$0xf] %v2745_v48  ;;  %v3540_v35 = vrot.slane %v3539_v47, 4  ;;  %vm2182_vm12 = vmpackc.low %vm1081_vm5, %vm1081_vm5  ;;  %v10469_v58 = vrot.slane %v2749_v42, 4  ;;  %v3198_v0 = vshll.u32 %v3021_v52, 16 }
 0x126   : > { %v3188_v30 = vrot.slane %v3186_v62, 7  ;;  %v2214_v55 = vsel %vm2182_vm12, 65537, %v12430_v17  ;;  %v3492_v20 = vsel %vm9847_vm13, %v3459_v5, 0  ;;  %vm12526_vm6 = vcmp.ne.s16.totalorder %v9836_v63, 0  ;;  %v3409_v52 = vld [vmem:[#allocation2 + $0x50] sm:$0xf] }
 0x127   : > { %v10472_v34 = vrot.slane %v3195_v15, 7  ;;  %v10478_v23 = vsel %vm12526_vm6, %v3460_v22, 0  ;;  %v3545_v28 = vsel %vm9133_vm11, %v3540_v35, %v3544_v57  ;;  %v2382_v32 = vshrl.u32 %v2214_v55, 16  ;;  %3440 = vst [vmem:[#allocation3 + $0x250] sm:$0xf] %v3408_v33 }
 0x128   : > { %v2385_v59 = vshll.u32 %v2214_v55, 16  ;;  %v3191_v25 = vor.u32 %v3189_v60, %v3188_v30  ;;  %3879 = vst [vmem:[#allocation3 + $0x38] sm:$0xf] %v3545_v28  ;;  %v3193_v14 = vrot.slane %v3188_v30, 4  ;;  %v3548_v2 = vrot.slane %v3546_v41, 4 }
 0x129   : > { %v3200_v13 = vor.u32 %v3198_v0, %v10472_v34  ;;  %v3552_v39 = vshll.u32 %v3492_v20, 16  ;;  %v2384_v19 = vrot.slane %v2382_v32, 7  ;;  %v3556_v47 = vshrl.u32 %v3492_v20, 16  ;;  %3441 = vst [vmem:[#allocation3 + $0x274] sm:$0xf] %v3409_v52 }
 0x12a   : > { %v3192_v63 = vsel %vm9192_vm14, %v3184_v44, %v3191_v25  ;;  %v3562_v42 = vshll.u32 %v10478_v23, 16  ;;  %v2085_v62 = vld [vmem:[#allocation2 + $0x48] sm:$0xf]  ;;  %v3549_v22 = vor.u32 %v3548_v2, %v3544_v57  ;;  %v3566_v41 = vshrl.u32 %v10478_v23, 16  ;;  %v2989_v44 = vld [vmem:[#allocation2 + $0x54] sm:$0xf] }
 0x12b   : > { %v3201_v5 = vsel %vm9192_vm14, %v3193_v14, %v3200_v13  ;;  %3376 = vst [vmem:[#allocation3 + $0x24c] sm:$0xf] %v3192_v63  ;;  %v3554_v48 = vrot.slane %v3552_v39, 5  ;;  %v2387_v60 = vor.u32 %v2385_v59, %v2384_v19  ;;  %v2389_v15 = vrot.slane %v2384_v19, 4  ;;  %v8796_v0 = vld [vmem:[#allocation3 + $0x204] ss:$36 sps:$4 sm:$0xff]  }
 0x12c   : > { %3377 = vst [vmem:[#allocation3 + $0x270] sm:$0xf] %v3201_v5  ;;  %v3558_v35 = vrot.slane %v3556_v47, 4  ;;  %v10489_v30 = vrot.slane %v3562_v42, 5  ;;  %v8798_v55 = vld [vmem:[#allocation3 + $0x200] ss:$36 sps:$4 sm:$0xff]   ;;  %6571 = vmatprep.mubr.bf16.mxu1 %v8796_v0 }
 0x12d   : > { %v3550_v20 = vrot.slane %v3549_v22, 4  ;;  %v2086_v28 = vld [vmem:[#allocation2 + $0x4c] sm:$0xf]  ;;  %v2388_v32 = vsel %vm9192_vm14, %v9681_v29, %v2387_v60  ;;  %v10497_v57 = vsel %vm9192_vm14, %v2389_v15, %v9679_v8  ;;  %v635_v25 = vadd.s32 152, %v9035_v7  ;;  %v2990_v33 = vld [vmem:[#allocation2 + $0x58] sm:$0xf]  ;;  %6572 = vmatmul.mubr.bf16.gmra.mxu1 %v8798_v55 }
 0x12e   : > { %12527 = vst [vmem:[#allocation56_spill] sm:$0xff] %v10497_v57  ;;  %v3559_v59 = vor.u32 %v3558_v35, %v3554_v48  ;;  %vm10500_vm13 = vcmp.ne.s16.totalorder %v2388_v32, 0  ;;  %v12528_v14 = vmov 0  ;;  %vm12292_vm6 = vcmp.ne.s16.totalorder %v10497_v57, 0  ;;  %v8820_v39 = vld [vmem:[%s12208_s3 + $0x230] sm:$0xff]  }
 0x12f   : > { %v12529_v14 = vsel %vm10500_vm13, 4294967295, %v12528_v14  ;;  %v3555_v13 = vsel %vm9133_vm11, %v3550_v20, %v3554_v48  ;;  %v3022_v2 = vsel %vm10248_vm4, %v2989_v44, 0  ;;  %v4332_v52 = vld [vmem:[#allocation2 + $0x14] sm:$0xf]  ;;  %v8799_v19 = vld [vmem:[#allocation3 + $0x10] ss:$36 sps:$4 sm:$0xff]  }
 0x130   : > { %12530 = vst [vmem:[#allocation57_spill] sm:$0xff] %v12529_v14  ;;  %v8801_v63 = vld [vmem:[#allocation3 + $0x14] ss:$36 sps:$4 sm:$0xff]   ;;  %v2566_v47 = vsel %vm10500_vm13, %v2085_v62, 0  ;;  %3880 = vst [vmem:[#allocation3 + $0x5c] sm:$0xf] %v3555_v13 }
 0x131   : > { %4364 = vst [vmem:[#allocation3 + $0x1c] sm:$0xf] %v4332_v52  ;;  %v2567_v42 = vsel %vm12292_vm6, %v2086_v28, 0  ;;  %v2752_v5 = vshll.u32 %v2566_v47, 16  ;;  %v2756_v22 = vshrl.u32 %v2566_v47, 16  ;;  %v3560_v48 = vrot.slane %v3559_v59, 4  ;;  %6676 = vmatprep.mubr.bf16.mxu0 %v8801_v63 }
 0x132   : > { %v4333_v60 = vld [vmem:[#allocation2 + $0x18] sm:$0xf]  ;;  %v2762_v15 = vshll.u32 %v2567_v42, 16  ;;  %v2766_v35 = vshrl.u32 %v2567_v42, 16  ;;  %v785_v44 = vand.u32 15, %v635_v25  ;;  %v3023_v0 = vsel %vm10261_vm8, %v2990_v33, 0  ;;  %6677 = vmatmul.mubr.bf16.vlgmr.msra.gmra.mxu0 %v8799_v19 }
 0x133   : > { %4365 = vst [vmem:[#allocation3 + $0x40] sm:$0xf] %v4333_v60  ;;  %v3410_v55 = vld [vmem:[#allocation2 + $0x54] sm:$0xf]  ;;  %v2754_v62 = vrot.slane %v2752_v5, 5  ;;  %v2758_v20 = vrot.slane %v2756_v22, 4  ;;  %v3565_v28 = vsel %vm9133_vm11, %v3560_v48, %v10489_v30 }
 0x134   : > { %v3202_v32 = vrot.slane %v10472_v34, 4  ;;  %v3411_v59 = vld [vmem:[#allocation2 + $0x58] sm:$0xf]  ;;  %3442 = vst [vmem:[#allocation3 + $0x298] sm:$0xf] %v3410_v55  ;;  %v2764_v13 = vrot.slane %v2762_v15, 5 }
 0x135   : > { %3881 = vst [vmem:[#allocation3 + $0x80] sm:$0xf] %v3565_v28  ;;  %v8955_v25 = vld [vmem:[%s12208_s3 + $0x238] sm:$0xff]   ;;  %vm1083_vm12 = vcmp.ne.s32.totalorder %v785_v44, 15  ;;  %v2768_v33 = vrot.slane %v2766_v35, 4  ;;  %v3204_v52 = vshrl.u32 %v3022_v2, 16  ;;  %v2755_v19 = vsel %vm9133_vm11, %v10469_v58, %v2754_v62 }
 0x136   : > { %8598 = vmatpush3.bf16.msra.mxu0 %v8955_v25  ;;  %3443 = vst [vmem:[#allocation3 + $0x2bc] sm:$0xf] %v3411_v59  ;;  %v2759_v63 = vor.u32 %v2758_v20, %v2754_v62  ;;  %vm2184_vm5 = vmpackc.low %vm1083_vm12, %vm1083_vm12  ;;  %v3207_v34 = vshll.u32 %v3022_v2, 16  ;;  %v3213_v47 = vshrl.u32 %v3023_v0, 16  ;;  %v3461_v42 = vld [vmem:[#allocation2 + $0x20] sm:$0xf] }
 0x137   : > { %8599 = vmatprep.subr.bf16.mxu0 %v8820_v39  ;;  %v8835_v5 = vld [vmem:[%s12208_s3 + $0x228] sm:$0xff]   ;;  %2954 = vst [vmem:[#allocation3 + $0x248] sm:$0xf] %v2755_v19  ;;  %v2216_v22 = vsel %vm2184_vm5, 65537, %v12430_v17  ;;  %v2769_v48 = vor.u32 %v2768_v33, %v2764_v13  ;;  %v3206_v60 = vrot.slane %v3204_v52, 7  ;;  %v3216_v15 = vshll.u32 %v3023_v0, 16 }
 0x138   : > { %v3462_v35 = vld [vmem:[#allocation2 + $0x24] sm:$0xf]  ;;  %v2760_v44 = vrot.slane %v2759_v63, 4  ;;  %v2400_v55 = vshrl.u32 %v2216_v22, 16  ;;  %v2403_v58 = vshll.u32 %v2216_v22, 16  ;;  %v10532_v62 = vrot.slane %v3213_v47, 7 }
 0x139   : > { %v10534_v2 = vrot.slane %v2769_v48, 4  ;;  %v3209_v20 = vor.u32 %v3207_v34, %v3206_v60  ;;  %v3211_v28 = vrot.slane %v3206_v60, 4  ;;  %v3494_v59 = vsel %vm9974_vm0, %v3461_v42, 0  ;;  %v8850_v25 = vld [vmem:[%s12208_s3 + $0x220] sm:$0xff]   ;;  %v4334_v33 = vld [vmem:[#allocation2 + $0x1c] sm:$0xf] }
 0x13a   : > { %8600 = vmatpush3.bf16.msra.mxu0 %v8820_v39  ;;  %v2765_v0 = vsel %vm9133_vm11, %v2760_v44, %v2764_v13  ;;  %v2402_v52 = vrot.slane %v2400_v55, 7  ;;  %v3218_v19 = vor.u32 %v3216_v15, %v10532_v62  ;;  %vm12531_vm12 = vcmp.ne.s16.totalorder %v9967_v43, 0  ;;  %v4335_v34 = vld [vmem:[#allocation2 + $0x20] sm:$0xf]  ;;  %4366 = vst [vmem:[#allocation3 + $0x64] sm:$0xf] %v4334_v33 }
 0x13b   : > { %v10546_v63 = vsel %vm12531_vm12, %v3462_v35, 0  ;;  %8601 = vmatprep.subr.bf16.mxu0 %v8835_v5  ;;  %v3412_v47 = vld [vmem:[#allocation2 + $0x5c] sm:$0xf]  ;;  %2955 = vst [vmem:[#allocation3 + $0x26c] sm:$0xf] %v2765_v0  ;;  %v3210_v42 = vsel %vm9192_vm14, %v3202_v32, %v3209_v20  ;;  %v3568_v22 = vrot.slane %v3566_v41, 4 }
 0x13c   : > { %v2087_v39 = vld [vmem:[#allocation2 + $0x50] sm:$0xf]  ;;  %v3572_v13 = vshll.u32 %v3494_v59, 16  ;;  %v3576_v48 = vshrl.u32 %v3494_v59, 16  ;;  %4367 = vst [vmem:[#allocation3 + $0x88] sm:$0xf] %v4335_v34  ;;  %v2405_v44 = vor.u32 %v2403_v58, %v2402_v52  ;;  %v3219_v33 = vsel %vm9192_vm14, %v3211_v28, %v3218_v19 }
 0x13d   : > { %v3413_v60 = vld [vmem:[#allocation2 + $0x60] sm:$0xf]  ;;  %3444 = vst [vmem:[#allocation3 + $0x2e0] sm:$0xf] %v3412_v47  ;;  %v8807_v15 = vld [vmem:[#allocation3 + $0x5c] ss:$36 sps:$4 sm:$0xff]   ;;  %v3569_v32 = vor.u32 %v3568_v22, %v10489_v30 }
 0x13e   : > { %v8810_v35 = vld [vmem:[#allocation3 + $0x58] ss:$36 sps:$4 sm:$0xff]   ;;  %v2407_v55 = vrot.slane %v2402_v52, 4  ;;  %3378 = vst [vmem:[#allocation3 + $0x294] sm:$0xf] %v3210_v42  ;;  %v3574_v23 = vrot.slane %v3572_v13, 5  ;;  %8602 = vmatpush3.bf16.msra.mxu0 %v8835_v5  ;;  %6684 = vmatprep.mubr.bf16.mxu0 %v8807_v15  ;;  %v2406_v58 = vsel %vm9192_vm14, %v9681_v29, %v2405_v44 }
 0x13f   : > { %3445 = vst [vmem:[#allocation3 + $0x304] sm:$0xf] %v3413_v60  ;;  %v2088_v0 = vld [vmem:[#allocation2 + $0x54] sm:$0xf]  ;;  %3379 = vst [vmem:[#allocation3 + $0x2b8] sm:$0xf] %v3219_v33  ;;  %8603 = vmatprep.subr.bf16.mxu0 %v8850_v25  ;;  %6685 = vmatmul.mubr.bf16.gmra.mxu0 %v8810_v35 }
 0x140   : > { %v3578_v41 = vrot.slane %v3576_v48, 4  ;;  %v3582_v20 = vshll.u32 %v10546_v63, 16  ;;  %v10562_v28 = vsel %vm9192_vm14, %v2407_v55, %v9679_v8  ;;  %v637_v52 = vadd.s32 168, %v9035_v7  ;;  %v8865_v30 = vld [vmem:[%s12208_s3 + $0x218] sm:$0xff]   ;;  %v2992_v42 = vld [vmem:[#allocation2 + $0x60] sm:$0xf] }
 0x141   : > { %vm10569_vm5 = vcmp.ne.s16.totalorder %v2406_v58, 0  ;;  %vm12291_vm12 = vcmp.ne.s16.totalorder %v10562_v28, 0  ;;  %v3570_v19 = vrot.slane %v3569_v32, 4  ;;  %v2991_v47 = vld [vmem:[#allocation2 + $0x5c] sm:$0xf]  ;;  %vm12543_vm8 = vcmp.ne.s16.totalorder %v10170_v11, 0 }
 0x142   : > { %v3579_v34 = vor.u32 %v3578_v41, %v3574_v23  ;;  %v2568_v22 = vsel %vm10569_vm5, %v2087_v39, 0  ;;  %v2569_v13 = vsel %vm12291_vm12, %v2088_v0, 0  ;;  %v10578_v48 = vrot.slane %v3582_v20, 5  ;;  %v4336_v15 = vld [vmem:[#allocation2 + $0x24] sm:$0xf]  ;;  %8604 = vmatpush3.bf16.msra.mxu0 %v8850_v25 }
 0x143   : > { %v799_v60 = vand.u32 15, %v637_v52  ;;  %v2772_v35 = vshll.u32 %v2568_v22, 16  ;;  %v2776_v44 = vshrl.u32 %v2568_v22, 16  ;;  %v2782_v55 = vshll.u32 %v2569_v13, 16  ;;  %v4337_v58 = vld [vmem:[#allocation2 + $0x28] sm:$0xf]  ;;  %8605 = vmatprep.subr.bf16.mxu0 %v8865_v30 }
 0x144   : > { %v2786_v33 = vshrl.u32 %v2569_v13, 16  ;;  %4368 = vst [vmem:[#allocation3 + $0xac] sm:$0xf] %v4336_v15  ;;  %v8802_v32 = vld [vmem:[#allocation3 + $0x24c] ss:$36 sps:$4 sm:$0xff]   ;;  %v3575_v59 = vsel %vm9133_vm11, %v3570_v19, %v3574_v23  ;;  %v3580_v39 = vrot.slane %v3579_v34, 4 }
 0x145   : > { %v8806_v41 = vld [vmem:[#allocation3 + $0x248] ss:$36 sps:$4 sm:$0xff]   ;;  %4369 = vst [vmem:[#allocation3 + $0xd0] sm:$0xf] %v4337_v58  ;;  %v2774_v0 = vrot.slane %v2772_v35, 5  ;;  %v2778_v20 = vrot.slane %v2776_v44, 4  ;;  %6579 = vmatprep.mubr.bf16.mxu1 %v8802_v32 }
 0x146   : > { %v2784_v31 = vrot.slane %v2782_v55, 5  ;;  %3882 = vst [vmem:[#allocation3 + $0xa4] sm:$0xf] %v3575_v59  ;;  %vm1085_vm12 = vcmp.ne.s32.totalorder %v799_v60, 15  ;;  %v3414_v52 = vld [vmem:[#allocation2 + $0x64] sm:$0xf]  ;;  %v3585_v25 = vsel %vm9133_vm11, %v3580_v39, %v10578_v48  ;;  %6580 = vmatmul.mubr.bf16.gmra.mxu1 %v8806_v41  ;;  %8606 = vmatpush3.bf16.msra.mxu0 %v8865_v30 }
 0x147   : > { %vm2186_vm6 = vmpackc.low %vm1085_vm12, %vm1085_vm12  ;;  %v2788_v22 = vrot.slane %v2786_v33, 4  ;;  %v3024_v13 = vsel %vm10325_vm3, %v2991_v47, 0  ;;  %v3025_v23 = vsel %vm10337_vm7, %v2992_v42, 0  ;;  %v3415_v19 = vld [vmem:[#allocation2 + $0x68] sm:$0xf]  ;;  %v2775_v59 = vsel %vm9133_vm11, %v10534_v2, %v2774_v0  ;;  %v8877_v47 = vld [vmem:[%s12208_s3 + $0x210] sm:$0xff]  }
 0x148   : > { %3446 = vst [vmem:[#allocation3 + $0x328] sm:$0xf] %v3414_v52  ;;  %v2779_v34 = vor.u32 %v2778_v20, %v2774_v0  ;;  %3883 = vst [vmem:[#allocation3 + $0xc8] sm:$0xf] %v3585_v25  ;;  %v2218_v60 = vsel %vm2186_vm6, 65537, %v12430_v17  ;;  %v3220_v15 = vrot.slane %v10532_v62, 4  ;;  %8607 = vmatprep.subr.bf16.mxu0 %v8877_v47  ;;  %vm12534_vm6 = vnez %v12471_v10 }
 0x149   : > { %v3463_v35 = vld [vmem:[#allocation2 + $0x28] sm:$0xf]  ;;  %3447 = vst [vmem:[#allocation3 + $0x34c] sm:$0xf] %v3415_v19  ;;  %2956 = vst [vmem:[#allocation3 + $0x290] sm:$0xf] %v2775_v59  ;;  %v2789_v55 = vor.u32 %v2788_v22, %v2784_v31 }
 0x14a   : > { %v2418_v42 = vshrl.u32 %v2218_v60, 16  ;;  %v2421_v44 = vshll.u32 %v2218_v60, 16  ;;  %v3222_v33 = vshrl.u32 %v3024_v13, 16  ;;  %v3464_v58 = vld [vmem:[#allocation2 + $0x2c] sm:$0xf]  ;;  %v2780_v2 = vrot.slane %v2779_v34, 4  ;;  %8608 = vmatpush3.bf16.msra.mxu0 %v8877_v47 }
 0x14b   : > { %v3225_v32 = vshll.u32 %v3024_v13, 16  ;;  %v3231_v41 = vshrl.u32 %v3025_v23, 16  ;;  %v3234_v39 = vshll.u32 %v3025_v23, 16  ;;  %v10597_v62 = vrot.slane %v2789_v55, 4  ;;  %v4338_v52 = vld [vmem:[#allocation2 + $0x2c] sm:$0xf] }
 0x14c   : > { %v2420_v0 = vrot.slane %v2418_v42, 7  ;;  %v3224_v30 = vrot.slane %v3222_v33, 7  ;;  %v3496_v20 = vsel %vm12534_vm6, %v3463_v35, 0  ;;  %v2785_v25 = vsel %vm9133_vm11, %v2780_v2, %v2784_v31  ;;  %v2089_v19 = vld [vmem:[#allocation2 + $0x58] sm:$0xf] }
 0x14d   : > { %v10603_v22 = vrot.slane %v3231_v41, 7  ;;  %vm12535_vm12 = vcmp.ne.s16.totalorder %v10069_v3, 0  ;;  %v12536_v23 = vshrl.u32 %v10546_v63, 16  ;;  %v4339_v34 = vld [vmem:[#allocation2 + $0x30] sm:$0xf]  ;;  %v3596_v36 = vshrl.u32 %v3496_v20, 16 }
 0x14e   : > { %v10607_v13 = vsel %vm12535_vm12, %v3464_v58, 0  ;;  %4370 = vst [vmem:[#allocation3 + $0xf4] sm:$0xf] %v4338_v52  ;;  %2957 = vst [vmem:[#allocation3 + $0x2b4] sm:$0xf] %v2785_v25  ;;  %v2423_v60 = vor.u32 %v2421_v44, %v2420_v0  ;;  %v2425_v35 = vrot.slane %v2420_v0, 4  ;;  %v3227_v42 = vor.u32 %v3225_v32, %v3224_v30 }
 0x14f   : > { %v3588_v59 = vrot.slane %v12536_v23, 4  ;;  %v3229_v55 = vrot.slane %v3224_v30, 4  ;;  %4371 = vst [vmem:[#allocation3 + $0x118] sm:$0xf] %v4339_v34  ;;  %v3416_v31 = vld [vmem:[#allocation2 + $0x6c] sm:$0xf]  ;;  %v3236_v2 = vor.u32 %v3234_v39, %v10603_v22 }
 0x150   : > { %v2090_v33 = vld [vmem:[#allocation2 + $0x5c] sm:$0xf]  ;;  %v3592_v58 = vshll.u32 %v3496_v20, 16  ;;  %3448 = vst [vmem:[#allocation3 + $0x370] sm:$0xf] %v3416_v31  ;;  %v2424_v44 = vsel %vm9192_vm14, %v9681_v29, %v2423_v60  ;;  %v10619_v32 = vsel %vm9192_vm14, %v2425_v35, %v9679_v8  ;;  %v3228_v39 = vsel %vm9192_vm14, %v3220_v15, %v3227_v42 }
 0x151   : > { %v3589_v41 = vor.u32 %v3588_v59, %v10578_v48  ;;  %v8814_v63 = vld [vmem:[#allocation3 + $0xa4] ss:$36 sps:$4 sm:$0xff]   ;;  %12537 = vst [vmem:[#allocation58_spill] sm:$0xff] %v10619_v32  ;;  %v3602_v48 = vshll.u32 %v10607_v13, 16  ;;  %vm10624_vm12 = vcmp.ne.s16.totalorder %v2424_v44, 0  ;;  %v12538_v0 = vmov 0 }
 0x152   : > { %v8816_v47 = vld [vmem:[#allocation3 + $0xa0] ss:$36 sps:$4 sm:$0xff]   ;;  %v12539_v0 = vsel %vm10624_vm12, 4294967295, %v12538_v0  ;;  %vm12296_vm7 = vcmp.ne.s16.totalorder %v10619_v32, 0  ;;  %v3237_v30 = vsel %vm9192_vm14, %v3229_v55, %v3236_v2  ;;  %3380 = vst [vmem:[#allocation3 + $0x2dc] sm:$0xf] %v3228_v39  ;;  %6692 = vmatprep.mubr.bf16.mxu0 %v8814_v63 }
 0x153   : > { %12540 = vst [vmem:[#allocation59_spill] sm:$0xff] %v12539_v0  ;;  %v3590_v20 = vrot.slane %v3589_v41, 4  ;;  %v2570_v52 = vsel %vm10624_vm12, %v2089_v19, 0  ;;  %v2571_v15 = vsel %vm12296_vm7, %v2090_v33, 0  ;;  %3381 = vst [vmem:[#allocation3 + $0x300] sm:$0xf] %v3237_v30  ;;  %6693 = vmatmul.mubr.bf16.gmra.mxu0 %v8816_v47  ;;  %vm12541_vm7 = vnez %v12366_v37 }
 0x154   : > { %v3594_v50 = vrot.slane %v3592_v58, 5  ;;  %v3598_v25 = vrot.slane %v3596_v36, 4  ;;  %v2993_v23 = vld [vmem:[#allocation2 + $0x64] sm:$0xf]  ;;  %v2792_v59 = vshll.u32 %v2570_v52, 16  ;;  %v2796_v34 = vshrl.u32 %v2570_v52, 16 }
 0x155   : > { %v2802_v60 = vshll.u32 %v2571_v15, 16  ;;  %v2806_v35 = vshrl.u32 %v2571_v15, 16  ;;  %v2994_v42 = vld [vmem:[#allocation2 + $0x68] sm:$0xf]  ;;  %v10637_v2 = vrot.slane %v3602_v48, 5  ;;  %v3606_v19 = vshrl.u32 %v10607_v13, 16 }
 0x156   : > { %v3595_v55 = vsel %vm9133_vm11, %v3590_v20, %v3594_v50  ;;  %v3599_v31 = vor.u32 %v3598_v25, %v3594_v50  ;;  %v4340_v41 = vld [vmem:[#allocation2 + $0x34] sm:$0xf]  ;;  %v4341_v33 = vld [vmem:[#allocation2 + $0x38] sm:$0xf]  ;;  %v8811_v63 = vld [vmem:[#allocation3 + $0x294] ss:$36 sps:$4 sm:$0xff]   ;;  %v10648_v25 = vpop.f32.mrf.mxu0 }
 0x157   : > { %v8813_v58 = vld [vmem:[#allocation3 + $0x290] ss:$36 sps:$4 sm:$0xff]   ;;  %v2794_v36 = vrot.slane %v2792_v59, 5  ;;  %3884 = vst [vmem:[#allocation3 + $0xec] sm:$0xf] %v3595_v55  ;;  %v2798_v44 = vrot.slane %v2796_v34, 4  ;;  %6587 = vmatprep.mubr.bf16.mxu1 %v8811_v63 }
 0x158   : > { %v3465_v47 = vld [vmem:[#allocation2 + $0x30] sm:$0xf]  ;;  %4372 = vst [vmem:[#allocation3 + $0x13c] sm:$0xf] %v4340_v41  ;;  %4373 = vst [vmem:[#allocation3 + $0x160] sm:$0xf] %v4341_v33  ;;  %6588 = vmatmul.mubr.bf16.gmra.mxu1 %v8813_v58  ;;  %v8142_v63 = vpop.f32.mrf.mxu0 }
 0x159   : > { %v2804_v39 = vrot.slane %v2802_v60, 5  ;;  %v3600_v30 = vrot.slane %v3599_v31, 4  ;;  %v639_v52 = vadd.s32 184, %v9035_v7  ;;  %v3418_v20 = vld [vmem:[#allocation2 + $0x74] sm:$0xf]  ;;  %v2795_v13 = vsel %vm9133_vm11, %v10597_v62, %v2794_v36 }
 0x15a   : > { %v2808_v48 = vrot.slane %v2806_v35, 4  ;;  %v3026_v15 = vsel %vm10393_vm9, %v2993_v23, 0  ;;  %v3027_v50 = vsel %vm12541_vm7, %v2994_v42, 0  ;;  %v3419_v59 = vld [vmem:[#allocation2 + $0x78] sm:$0xf]  ;;  %v2799_v34 = vor.u32 %v2798_v44, %v2794_v36  ;;  %v8890_v23 = vld [vmem:[%s12208_s3 + $0x208] sm:$0xff]  }
 0x15b   : > { %3450 = vst [vmem:[#allocation3 + $0x3b8] sm:$0xf] %v3418_v20  ;;  %2958 = vst [vmem:[#allocation3 + $0x2d8] sm:$0xf] %v2795_v13  ;;  %v3605_v60 = vsel %vm9133_vm11, %v3600_v30, %v10637_v2  ;;  %v813_v55 = vand.u32 15, %v639_v52  ;;  %v3238_v62 = vrot.slane %v10603_v22, 4  ;;  %vm12542_vm9 = vnez %v12486_v9  ;;  %8609 = vmatprep.subr.bf16.mxu0 %v8890_v23  ;;  %v10667_v13 = vpop.f32.mrf.mxu0 }
 0x15c   : > { %v3466_v35 = vld [vmem:[#allocation2 + $0x34] sm:$0xf]  ;;  %3451 = vst [vmem:[#allocation3 + $0x3dc] sm:$0xf] %v3419_v59  ;;  %3885 = vst [vmem:[#allocation3 + $0x110] sm:$0xf] %v3605_v60  ;;  %v2809_v42 = vor.u32 %v2808_v48, %v2804_v39  ;;  %v10669_v48 = vpop.f32.mrf.mxu1  ;;  %8610 = vmatpush3.bf16.msra.mxu0 %v8890_v23 }
 0x15d   : > { %v3240_v31 = vshrl.u32 %v3026_v15, 16  ;;  %v3243_v41 = vshll.u32 %v3026_v15, 16  ;;  %v3249_v33 = vshrl.u32 %v3027_v50, 16  ;;  %v2800_v58 = vrot.slane %v2799_v34, 4  ;;  %v4342_v34 = vld [vmem:[#allocation2 + $0x3c] sm:$0xf] }
 0x15e   : > { %vm1087_vm7 = vcmp.ne.s32.totalorder %v813_v55, 15  ;;  %v3252_v36 = vshll.u32 %v3027_v50, 16  ;;  %v3498_v44 = vsel %vm12542_vm9, %v3465_v47, 0  ;;  %v10659_v22 = vrot.slane %v2809_v42, 4  ;;  %v4343_v37 = vld [vmem:[#allocation2 + $0x40] sm:$0xf] }
 0x15f   : > { %vm2188_vm3 = vmpackc.low %vm1087_vm7, %vm1087_vm7  ;;  %v3242_v30 = vrot.slane %v3240_v31, 7  ;;  %v10661_v52 = vrot.slane %v3249_v33, 7  ;;  %v10665_v20 = vsel %vm12543_vm8, %v3466_v35, 0  ;;  %v2805_v15 = vsel %vm9133_vm11, %v2800_v58, %v2804_v39  ;;  %v2995_v35 = vld [vmem:[#allocation2 + $0x6c] sm:$0xf]  ;;  %v10674_v33 = vpop.f32.mrf.mxu0 }
 0x160   : > { %v2220_v47 = vsel %vm2188_vm3, 65537, %v12430_v17  ;;  %v3608_v50 = vrot.slane %v3606_v19, 4  ;;  %v3612_v59 = vshll.u32 %v3498_v44, 16  ;;  %2959 = vst [vmem:[#allocation3 + $0x2fc] sm:$0xf] %v2805_v15  ;;  %v3616_v58 = vshrl.u32 %v3498_v44, 16 }
 0x161   : > { %v2436_v60 = vshrl.u32 %v2220_v47, 16  ;;  %v2439_v55 = vshll.u32 %v2220_v47, 16  ;;  %v3245_v42 = vor.u32 %v3243_v41, %v3242_v30  ;;  %v3247_v31 = vrot.slane %v3242_v30, 4  ;;  %4374 = vst [vmem:[#allocation3 + $0x184] sm:$0xf] %v4342_v34  ;;  %v8147_v51 = vpop.f32.mrf.mxu0  ;;  %v8214_v34 = vpop.f32.mrf.mxu1 }
 0x162   : > { %v3254_v23 = vor.u32 %v3252_v36, %v10661_v52  ;;  %v3609_v61 = vor.u32 %v3608_v50, %v10637_v2  ;;  %v3614_v39 = vrot.slane %v3612_v59, 5  ;;  %4375 = vst [vmem:[#allocation3 + $0x1a8] sm:$0xf] %v4343_v37  ;;  %v3420_v19 = vld [vmem:[#allocation2 + $0x7c] sm:$0xf]  ;;  %v3622_v41 = vshll.u32 %v10665_v20, 16 }
 0x163   : > { %v3421_v11 = vld [vmem:[#allocation2 + $0x80] sm:$0xf]  ;;  %v2438_v9 = vrot.slane %v2436_v60, 7  ;;  %v3246_v15 = vsel %vm9192_vm14, %v3238_v62, %v3245_v42  ;;  %v2996_v47 = vld [vmem:[#allocation2 + $0x70] sm:$0xf]  ;;  %v10685_v50 = vadd.f32 %v8142_v63, %v10648_v25  ;;  %v3618_v60 = vrot.slane %v3616_v58, 4  ;;  %v8148_v30 = vpop.f32.mrf.mxu0  ;;  %v10689_v3 = vpop.f32.mrf.mxu1 }
 0x164   : > { %3452 = vst [vmem:[#allocation3 + $0x400] sm:$0xf] %v3420_v19  ;;  %3453 = vst [vmem:[#allocation3 + $0x424] sm:$0xf] %v3421_v11  ;;  %v8822_v36 = vld [vmem:[#allocation3 + $0xec] ss:$36 sps:$4 sm:$0xff]   ;;  %v3255_v37 = vsel %vm9192_vm14, %v3247_v31, %v3254_v23  ;;  %vm12545_vm7 = vnez %v12372_v49  ;;  %vm12546_vm8 = vnez %v12369_v24 }
 0x165   : > { %v8825_v2 = vld [vmem:[#allocation3 + $0xe8] ss:$36 sps:$4 sm:$0xff]   ;;  %3382 = vst [vmem:[#allocation3 + $0x324] sm:$0xf] %v3246_v15  ;;  %v3610_v44 = vrot.slane %v3609_v61, 4  ;;  %v2441_v62 = vor.u32 %v2439_v55, %v2438_v9  ;;  %v2443_v59 = vrot.slane %v2438_v9, 4  ;;  %6700 = vmatprep.mubr.bf16.mxu0 %v8822_v36  ;;  %v3619_v58 = vor.u32 %v3618_v60, %v3614_v39  ;;  %v10711_v19 = vpop.f32.mrf.mxu0  ;;  %v10713_v15 = vpop.f32.mrf.mxu1 }
 0x166   : > { %3383 = vst [vmem:[#allocation3 + $0x348] sm:$0xf] %v3255_v37  ;;  %v10687_v42 = vrot.slane %v3622_v41, 5  ;;  %12544 = vst [vmem:[#allocation60_spill] sm:$0xff] %v10689_v3  ;;  %v2091_v11 = vld [vmem:[#allocation2 + $0x60] sm:$0xf]  ;;  %6701 = vmatmul.mubr.bf16.gmra.mxu0 %v8825_v2 }
 0x167   : > { %v3615_v31 = vsel %vm9133_vm11, %v3610_v44, %v3614_v39  ;;  %v641_v61 = vadd.s32 200, %v9035_v7  ;;  %v10696_v25 = vsel %vm12545_vm7, %v2995_v35, 0  ;;  %v10700_v9 = vsel %vm12546_vm8, %v2996_v47, 0  ;;  %v2092_v63 = vld [vmem:[#allocation2 + $0x64] sm:$0xf]  ;;  %12547 = vst [vmem:[#allocation61_spill] sm:$0xff] %v10713_v15  ;;  %v10733_v47 = vpop.f32.mrf.mxu1 }
 0x168   : > { %v2442_v55 = vsel %vm9192_vm14, %v9681_v29, %v2441_v62  ;;  %v10708_v23 = vsel %vm9192_vm14, %v2443_v59, %v9679_v8  ;;  %3886 = vst [vmem:[#allocation3 + $0x134] sm:$0xf] %v3615_v31  ;;  %v10716_v41 = vld [vmem:[%s9070_s25 + $0x78] sm:$0xff]   ;;  %v8821_v2 = vld [vmem:[#allocation3 + $0x2d8] ss:$36 sps:$4 sm:$0xff]   ;;  %v10724_v44 = vadd.f32 %v8214_v34, %v10669_v48  ;;  %v10726_v39 = vadd.f32 %v8148_v30, %v8147_v51  ;;  %v10731_v31 = vpop.f32.mrf.mxu0 }
 0x169   : > { %v8817_v36 = vld [vmem:[#allocation3 + $0x2dc] ss:$36 sps:$4 sm:$0xff]   ;;  %vm10719_vm3 = vcmp.ne.s16.totalorder %v2442_v55, 0  ;;  %vm12306_vm8 = vcmp.ne.s16.totalorder %v10708_v23, 0  ;;  %v3620_v59 = vrot.slane %v3619_v58, 4  ;;  %v827_v60 = vand.u32 15, %v641_v61 }
 0x16a   : > { %12550 = vst [vmem:[#allocation62_spill] sm:$0xff] %v10724_v44  ;;  %v2572_v62 = vsel %vm10719_vm3, %v2091_v11, 0  ;;  %v4344_v55 = vld [vmem:[#allocation2 + $0x44] sm:$0xf]  ;;  %6595 = vmatprep.mubr.bf16.mxu1 %v8817_v36  ;;  %v2573_v35 = vsel %vm12306_vm8, %v2092_v63, 0  ;;  %v3258_v51 = vshrl.u32 %v10696_v25, 16  ;;  %v10741_v58 = vpop.f32.mrf.mxu0  ;;  %v8220_v36 = vpop.f32.mrf.mxu1 }
 0x16b   : > { %v2812_v48 = vshll.u32 %v2572_v62, 16  ;;  %v2816_v34 = vshrl.u32 %v2572_v62, 16  ;;  %v4345_v30 = vld [vmem:[#allocation2 + $0x48] sm:$0xf]  ;;  %4376 = vst [vmem:[#allocation3 + $0x1cc] sm:$0xf] %v4344_v55  ;;  %6596 = vmatmul.mubr.bf16.gmra.mxu1 %v8821_v2  ;;  %v3625_v61 = vsel %vm9133_vm11, %v3620_v59, %v10687_v42 }
 0x16c   : > { %v2822_v15 = vshll.u32 %v2573_v35, 16  ;;  %v2826_v11 = vshrl.u32 %v2573_v35, 16  ;;  %vm1089_vm7 = vcmp.ne.s32.totalorder %v827_v60, 15  ;;  %4377 = vst [vmem:[#allocation3 + $0x1f0] sm:$0xf] %v4345_v30  ;;  %v3260_v62 = vrot.slane %v3258_v51, 7  ;;  %v10746_v60 = vpop.f32.mrf.mxu0  ;;  %v10748_v10 = vpop.f32.mrf.mxu1 }
 0x16d   : > { %v3422_v3 = vld [vmem:[#allocation2 + $0x84] sm:$0xf]  ;;  %v2814_v63 = vrot.slane %v2812_v48, 5  ;;  %v2818_v44 = vrot.slane %v2816_v34, 4  ;;  %3887 = vst [vmem:[#allocation3 + $0x158] sm:$0xf] %v3625_v61  ;;  %vm2190_vm8 = vmpackc.low %vm1089_vm7, %vm1089_vm7  ;;  %vm12553_vm7 = vnez %v12501_v45 }
 0x16e   : > { %v3261_v55 = vshll.u32 %v10696_v25, 16  ;;  %v3467_v2 = vld [vmem:[#allocation2 + $0x38] sm:$0xf]  ;;  %3454 = vst [vmem:[#allocation3 + $0x448] sm:$0xf] %v3422_v3  ;;  %v2824_v35 = vrot.slane %v2822_v15, 5  ;;  %v10758_v18 = vpop.f32.mrf.mxu0 }
 0x16f   : > { %v2222_v24 = vsel %vm2190_vm8, 65537, %v12430_v17  ;;  %v2828_v49 = vrot.slane %v2826_v11, 4  ;;  %v3267_v59 = vshrl.u32 %v10700_v9, 16  ;;  %12551 = vst [vmem:[#allocation63_spill] sm:$0xff] %v10748_v10  ;;  %v8903_v48 = vld [vmem:[%s12208_s3 + $0x200] sm:$0xff]   ;;  %v2815_v25 = vsel %vm9133_vm11, %v10659_v22, %v2814_v63  ;;  %v10760_v10 = vpop.f32.mrf.mxu1 }
 0x170   : > { %v2819_v34 = vor.u32 %v2818_v44, %v2814_v63  ;;  %v2454_v3 = vshrl.u32 %v2222_v24, 16  ;;  %v2457_v15 = vshll.u32 %v2222_v24, 16  ;;  %v3468_v51 = vld [vmem:[#allocation2 + $0x3c] sm:$0xf]  ;;  %2960 = vst [vmem:[#allocation3 + $0x320] sm:$0xf] %v2815_v25  ;;  %v3263_v11 = vor.u32 %v3261_v55, %v3260_v62  ;;  %8611 = vmatprep.subr.bf16.mxu0 %v8903_v48 }
 0x171   : > { %v2829_v30 = vor.u32 %v2828_v49, %v2824_v35  ;;  %v3265_v61 = vrot.slane %v3260_v62, 4  ;;  %v10756_v43 = vrot.slane %v3267_v59, 7  ;;  %12552 = vst [vmem:[#allocation64_spill] sm:$0xff] %v10760_v10  ;;  %v3270_v16 = vshll.u32 %v10700_v9, 16  ;;  %8612 = vmatpush3.bf16.msra.mxu0 %v8903_v48  ;;  %v4346_v24 = vld [vmem:[#allocation2 + $0x4c] sm:$0xf]  ;;  %v10777_v9 = vpop.f32.mrf.mxu0  ;;  %v10779_v25 = vpop.f32.mrf.mxu1 }
 0x172   : > { %v2820_v4 = vrot.slane %v2819_v34, 4  ;;  %v2456_v27 = vrot.slane %v2454_v3, 7  ;;  %v3500_v22 = vsel %vm12553_vm7, %v3467_v2, 0  ;;  %v12554_v49 = vrot.slane %v10661_v52, 4  ;;  %v4347_v2 = vld [vmem:[#allocation2 + $0x50] sm:$0xf] }
 0x173   : > { %v10765_v44 = vrot.slane %v2829_v30, 4  ;;  %vm12555_vm8 = vcmp.ne.s16.totalorder %v10288_v46, 0  ;;  %v12556_v55 = vshrl.u32 %v10665_v20, 16  ;;  %4378 = vst [vmem:[#allocation3 + $0x214] sm:$0xf] %v4346_v24 }
 0x174   : > { %v3264_v63 = vsel %vm9192_vm14, %v12554_v49, %v3263_v11  ;;  %v10773_v62 = vsel %vm12555_vm8, %v3468_v51, 0  ;;  %v2825_v48 = vsel %vm9133_vm11, %v2820_v4, %v2824_v35  ;;  %v2093_v52 = vld [vmem:[#allocation2 + $0x68] sm:$0xf]  ;;  %v2094_v34 = vld [vmem:[#allocation2 + $0x6c] sm:$0xf]  ;;  %v2459_v3 = vor.u32 %v2457_v15, %v2456_v27 }
 0x175   : > { %v3628_v59 = vrot.slane %v12556_v55, 4  ;;  %v2461_v30 = vrot.slane %v2456_v27, 4  ;;  %v3272_v11 = vor.u32 %v3270_v16, %v10756_v43  ;;  %3384 = vst [vmem:[#allocation3 + $0x36c] sm:$0xf] %v3264_v63  ;;  %4379 = vst [vmem:[#allocation3 + $0x238] sm:$0xf] %v4347_v2  ;;  %v12557_v51 = vunpack.c.h.bf16 %v10716_v41  ;;  %v10793_v27 = vpop.f32.mrf.mxu0 }
 0x176   : > { %v8957_v20 = vld [vmem:[%s12206_s1] ss:$0 sm:$0xff]  ;;  %2961 = vst [vmem:[#allocation3 + $0x344] sm:$0xf] %v2825_v48  ;;  %v8829_v24 = vld [vmem:[#allocation3 + $0x134] ss:$36 sps:$4 sm:$0xff]   ;;  %v10791_v15 = vadd.f32 %v8220_v36, %v10733_v47  ;;  %v2460_v16 = vsel %vm9192_vm14, %v9681_v29, %v2459_v3 }
 0x177   : > { %v383_v49 = vmul.f32 %v8957_v20, %v12557_v51  ;;  %v8831_v55 = vld [vmem:[#allocation3 + $0x130] ss:$36 sps:$4 sm:$0xff]   ;;  %v3629_v4 = vor.u32 %v3628_v59, %v10687_v42  ;;  %v3632_v35 = vshll.u32 %v3500_v22, 16  ;;  %v10801_v41 = vsel %vm9192_vm14, %v2461_v30, %v9679_v8  ;;  %v10805_v42 = vpop.f32.mrf.mxu1  ;;  %6708 = vmatprep.mubr.bf16.mxu0 %v8829_v24  ;;  %v10812_v48 = vpop.f32.mrf.mxu0  ;;  %v8826_v45 = vld [vmem:[#allocation3 + $0x324] ss:$36 sps:$4 sm:$0xff]  }
 0x178   : > { %12558 = vst [vmem:[#allocation65_spill] sm:$0xff] %v10791_v15  ;;  %12559 = vst [vmem:[#allocation66_spill] sm:$0xff] %v10801_v41  ;;  %v3273_v63 = vsel %vm9192_vm14, %v3265_v61, %v3272_v11  ;;  %v3636_v2 = vshrl.u32 %v3500_v22, 16  ;;  %vm10807_vm8 = vcmp.ne.s16.totalorder %v2460_v16, 0  ;;  %v12560_v47 = vmov 0  ;;  %6709 = vmatmul.mubr.bf16.gmra.mxu0 %v8831_v55  ;;  %6603 = vmatprep.mubr.bf16.mxu1 %v8826_v45 }
 0x179   : > { %v12561_v47 = vsel %vm10807_vm8, 4294967295, %v12560_v47  ;;  %vm12319_vm7 = vcmp.ne.s16.totalorder %v10801_v41, 0  ;;  %3385 = vst [vmem:[#allocation3 + $0x390] sm:$0xf] %v3273_v63  ;;  %v3630_v36 = vrot.slane %v3629_v4, 4  ;;  %v3634_v59 = vrot.slane %v3632_v35, 5  ;;  %v10819_v11 = vpop.f32.mrf.mxu1  ;;  %v10821_v4 = vpop.f32.mrf.mxu0 }
 0x17a   : > { %12562 = vst [vmem:[#allocation67_spill] sm:$0xff] %v12561_v47  ;;  %v2574_v3 = vsel %vm10807_vm8, %v2093_v52, 0  ;;  %v2575_v61 = vsel %vm12319_vm7, %v2094_v34, 0  ;;  %v3638_v22 = vrot.slane %v3636_v2, 4  ;;  %v3642_v30 = vshll.u32 %v10773_v62, 16  ;;  %12563 = vst [vmem:[#allocation68_spill] sm:$0xff] %v10819_v11 }
 0x17b   : > { %v2832_v20 = vshll.u32 %v2574_v3, 16  ;;  %v2836_v51 = vshrl.u32 %v2574_v3, 16  ;;  %v2842_v24 = vshll.u32 %v2575_v61, 16  ;;  %v2846_v16 = vshrl.u32 %v2575_v61, 16  ;;  %v2997_v34 = vld [vmem:[#allocation2 + $0x74] sm:$0xf]  ;;  %v10829_v11 = vpop.f32.mrf.mxu1 }
 0x17c   : > { %v3635_v55 = vsel %vm9133_vm11, %v3630_v36, %v3634_v59  ;;  %v3639_v35 = vor.u32 %v3638_v22, %v3634_v59  ;;  %v10825_v63 = vrot.slane %v3642_v30, 5  ;;  %v3646_v52 = vshrl.u32 %v10773_v62, 16  ;;  %v2998_v2 = vld [vmem:[#allocation2 + $0x78] sm:$0xf]  ;;  %12564 = vst [vmem:[#allocation69_spill] sm:$0xff] %v10829_v11 }
 0x17d   : > { %v2834_v10 = vrot.slane %v2832_v20, 5  ;;  %v2838_v15 = vrot.slane %v2836_v51, 4  ;;  %v2844_v46 = vrot.slane %v2842_v24, 5  ;;  %3888 = vst [vmem:[#allocation3 + $0x17c] sm:$0xf] %v3635_v55  ;;  %v643_v3 = vadd.s32 216, %v9035_v7 }
 0x17e   : > { %v4348_v61 = vld [vmem:[#allocation2 + $0x54] sm:$0xf]  ;;  %v8828_v56 = vld [vmem:[#allocation3 + $0x320] ss:$36 sps:$4 sm:$0xff]   ;;  %v3640_v21 = vrot.slane %v3639_v35, 4  ;;  %v10838_v62 = vadd.f32 %v10674_v33, %v10667_v13  ;;  %v10842_v22 = vadd.f32 %v10746_v60, %v10741_v58  ;;  %v2848_v24 = vrot.slane %v2846_v16, 4  ;;  %v10847_v35 = vpop.f32.mrf.mxu0 }
 0x17f   : > { %v8958_v36 = vld [vmem:[%s12207_s2] ss:$0 sm:$0xff]  ;;  %4380 = vst [vmem:[#allocation3 + $0x25c] sm:$0xf] %v4348_v61  ;;  %v2835_v30 = vsel %vm9133_vm11, %v10765_v44, %v2834_v10  ;;  %v2839_v20 = vor.u32 %v2838_v15, %v2834_v10  ;;  %v841_v51 = vand.u32 15, %v643_v3  ;;  %vm12566_vm7 = vnez %v12378_v40  ;;  %v12567_v58 = vld [vmem:[#allocation14_spill] sm:$0xff]  ;;  %6604 = vmatmul.mubr.bf16.gmra.mxu1 %v8828_v56  ;;  %v10857_v3 = vpop.f32.mrf.mxu1 }
 0x180   : > { %v10834_v59 = vadd.f32 %v8958_v36, %v383_v49  ;;  %12565 = vst [vmem:[#allocation70_spill] sm:$0xff] %v10842_v22  ;;  %v3469_v55 = vld [vmem:[#allocation2 + $0x40] sm:$0xf]  ;;  %v4349_v49 = vld [vmem:[#allocation2 + $0x58] sm:$0xf]  ;;  %v3645_v13 = vsel %vm9133_vm11, %v3640_v21, %v10825_v63  ;;  %v3030_v33 = vsel %vm12566_vm7, %v2997_v34, 0  ;;  %vm12568_vm9 = vnez %v12567_v58 }
 0x181   : > { %2962 = vst [vmem:[#allocation3 + $0x368] sm:$0xf] %v2835_v30  ;;  %v3031_v60 = vsel %vm12568_vm9, %v2998_v2, 0  ;;  %v3274_v10 = vrot.slane %v10756_v43, 4  ;;  %4381 = vst [vmem:[#allocation3 + $0x280] sm:$0xf] %v4349_v49  ;;  %v2849_v15 = vor.u32 %v2848_v24, %v2844_v46  ;;  %v10888_v22 = vadd.f32 %v10805_v42, %v10779_v25 }
 0x182   : > { %v2840_v44 = vrot.slane %v2839_v20, 4  ;;  %3889 = vst [vmem:[#allocation3 + $0x1a0] sm:$0xf] %v3645_v13  ;;  %vm1091_vm4 = vcmp.ne.s32.totalorder %v841_v51, 15  ;;  %v3276_v45 = vshrl.u32 %v3030_v33, 16  ;;  %v3279_v21 = vshll.u32 %v3030_v33, 16  ;;  %v10866_v20 = vpop.f32.mrf.mxu0 }
 0x183   : > { %v3470_v16 = vld [vmem:[#allocation2 + $0x44] sm:$0xf]  ;;  %vm2192_vm6 = vmpackc.low %vm1091_vm4, %vm1091_vm4  ;;  %v3285_v61 = vshrl.u32 %v3031_v60, 16  ;;  %v3288_v36 = vshll.u32 %v3031_v60, 16  ;;  %v3502_v34 = vsel %vm10374_vm15, %v3469_v55, 0  ;;  %v10864_v2 = vrot.slane %v2849_v15, 4 }
 0x184   : > { %v2845_v43 = vsel %vm9133_vm11, %v2840_v44, %v2844_v46  ;;  %v2224_v56 = vsel %vm2192_vm6, 65537, %v12430_v17  ;;  %v3278_v30 = vrot.slane %v3276_v45, 7  ;;  %vm12569_vm4 = vcmp.ne.s16.totalorder %v10371_v26, 0  ;;  %v10874_v44 = vpop.f32.mrf.mxu1  ;;  %v2999_v58 = vld [vmem:[#allocation2 + $0x7c] sm:$0xf]  ;;  %12570 = vst [vmem:[#allocation71_spill] sm:$0xff] %v10888_v22 }
 0x185   : > { %2963 = vst [vmem:[#allocation3 + $0x38c] sm:$0xf] %v2845_v43  ;;  %v2472_v51 = vshrl.u32 %v2224_v56, 16  ;;  %v2475_v24 = vshll.u32 %v2224_v56, 16  ;;  %v10868_v49 = vrot.slane %v3285_v61, 7  ;;  %v10872_v13 = vsel %vm12569_vm4, %v3470_v16, 0 }
 0x186   : > { %v3281_v55 = vor.u32 %v3279_v21, %v3278_v30  ;;  %v3283_v33 = vrot.slane %v3278_v30, 4  ;;  %v3648_v60 = vrot.slane %v3646_v52, 4  ;;  %v3652_v46 = vshll.u32 %v3502_v34, 16  ;;  %v2095_v56 = vld [vmem:[#allocation2 + $0x70] sm:$0xf]  ;;  %v10882_v30 = vpop.f32.mrf.mxu0  ;;  %v12573_v42 = vld [vmem:[#allocation17_spill] sm:$0xff] }
 0x187   : > { %v2474_v15 = vrot.slane %v2472_v51, 7  ;;  %v3290_v45 = vor.u32 %v3288_v36, %v10868_v49  ;;  %v3656_v11 = vshrl.u32 %v3502_v34, 16  ;;  %v3662_v43 = vshll.u32 %v10872_v13, 16  ;;  %v3000_v52 = vld [vmem:[#allocation2 + $0x80] sm:$0xf] }
 0x188   : > { %v3282_v61 = vsel %vm9192_vm14, %v3274_v10, %v3281_v55  ;;  %v3649_v16 = vor.u32 %v3648_v60, %v10825_v63  ;;  %v3654_v40 = vrot.slane %v3652_v46, 5  ;;  %v8840_v51 = vld [vmem:[#allocation3 + $0x178] ss:$36 sps:$4 sm:$0xff]   ;;  %v645_v60 = vadd.s32 232, %v9035_v7  ;;  %v10893_v46 = vpop.f32.mrf.mxu1  ;;  %v4350_v21 = vld [vmem:[#allocation2 + $0x5c] sm:$0xf] }
 0x189   : > { %v8837_v26 = vld [vmem:[#allocation3 + $0x17c] ss:$36 sps:$4 sm:$0xff]   ;;  %v2477_v6 = vor.u32 %v2475_v24, %v2474_v15  ;;  %v2479_v36 = vrot.slane %v2474_v15, 4  ;;  %v3291_v34 = vsel %vm9192_vm14, %v3283_v33, %v3290_v45  ;;  %3386 = vst [vmem:[#allocation3 + $0x3b4] sm:$0xf] %v3282_v61  ;;  %v3658_v10 = vrot.slane %v3656_v11, 4 }
 0x18a   : > { %3387 = vst [vmem:[#allocation3 + $0x3d8] sm:$0xf] %v3291_v34  ;;  %v3650_v63 = vrot.slane %v3649_v16, 4  ;;  %v10890_v55 = vrot.slane %v3662_v43, 5  ;;  %12571 = vst [vmem:[#allocation72_spill] sm:$0xff] %v10893_v46  ;;  %6716 = vmatprep.mubr.bf16.mxu0 %v8837_v26  ;;  %vm12574_vm6 = vnez %v12573_v42  ;;  %v12575_v15 = vld [vmem:[#allocation18_spill] sm:$0xff]  ;;  %v10919_v34 = vpop.f32.mrf.mxu0 }
 0x18b   : > { %v2096_v24 = vld [vmem:[#allocation2 + $0x74] sm:$0xf]  ;;  %v2478_v33 = vsel %vm9192_vm14, %v9681_v29, %v2477_v6  ;;  %v10901_v25 = vsel %vm9192_vm14, %v2479_v36, %v9679_v8  ;;  %v3032_v11 = vsel %vm12574_vm6, %v2999_v58, 0  ;;  %vm12576_vm4 = vnez %v12575_v15  ;;  %v4351_v43 = vld [vmem:[#allocation2 + $0x60] sm:$0xf]  ;;  %6717 = vmatmul.mubr.bf16.gmra.mxu0 %v8840_v51 }
 0x18c   : > { %12572 = vst [vmem:[#allocation73_spill] sm:$0xff] %v10901_v25  ;;  %v10907_v45 = vsel %vm12576_vm4, %v3000_v52, 0  ;;  %4382 = vst [vmem:[#allocation3 + $0x2a4] sm:$0xf] %v4350_v21  ;;  %v8832_v26 = vld [vmem:[#allocation3 + $0x36c] ss:$36 sps:$4 sm:$0xff]   ;;  %v3655_v6 = vsel %vm9133_vm11, %v3650_v63, %v3654_v40  ;;  %v3659_v36 = vor.u32 %v3658_v10, %v3654_v40  ;;  %v10917_v58 = vadd.f32 %v10812_v48, %v10793_v27  ;;  %v10927_v48 = vpop.f32.mrf.mxu1 }
 0x18d   : > { %v8836_v61 = vld [vmem:[#allocation3 + $0x368] ss:$36 sps:$4 sm:$0xff]   ;;  %vm10909_vm9 = vcmp.ne.s16.totalorder %v2478_v33, 0  ;;  %v12577_v16 = vmov 0  ;;  %4383 = vst [vmem:[#allocation3 + $0x2c8] sm:$0xf] %v4351_v43  ;;  %6611 = vmatprep.mubr.bf16.mxu1 %v8832_v26  ;;  %v10932_v26 = vpop.f32.mrf.mxu0 }
 0x18e   : > { %v12578_v16 = vsel %vm10909_vm9, 4294967295, %v12577_v16  ;;  %12580 = vst [vmem:[#allocation75_spill] sm:$0xff] %v10917_v58  ;;  %vm12334_vm4 = vcmp.ne.s16.totalorder %v10901_v25, 0  ;;  %v2576_v21 = vsel %vm10909_vm9, %v2095_v56, 0  ;;  %3890 = vst [vmem:[#allocation3 + $0x1c4] sm:$0xf] %v3655_v6  ;;  %6612 = vmatmul.mubr.bf16.gmra.mxu1 %v8836_v61 }
 0x18f   : > { %12579 = vst [vmem:[#allocation74_spill] sm:$0xff] %v12578_v16  ;;  %v855_v52 = vand.u32 15, %v645_v60  ;;  %v3292_v51 = vrot.slane %v10868_v49, 4  ;;  %v2577_v40 = vsel %vm12334_vm4, %v2096_v24, 0  ;;  %v2852_v63 = vshll.u32 %v2576_v21, 16  ;;  %12581 = vst [vmem:[#allocation76_spill] sm:$0xff] %v10927_v48 }
 0x190   : > { %v2856_v10 = vshrl.u32 %v2576_v21, 16  ;;  %v3660_v27 = vrot.slane %v3659_v36, 4  ;;  %v2862_v33 = vshll.u32 %v2577_v40, 16  ;;  %v2866_v43 = vshrl.u32 %v2577_v40, 16  ;;  %v3471_v21 = vld [vmem:[#allocation2 + $0x48] sm:$0xf] }
 0x191   : > { %vm1093_vm6 = vcmp.ne.s32.totalorder %v855_v52, 15  ;;  %v3294_v46 = vshrl.u32 %v3032_v11, 16  ;;  %v2854_v22 = vrot.slane %v2852_v63, 5  ;;  %v3297_v60 = vshll.u32 %v3032_v11, 16  ;;  %v3472_v48 = vld [vmem:[#allocation2 + $0x4c] sm:$0xf] }
 0x192   : > { %v2858_v56 = vrot.slane %v2856_v10, 4  ;;  %v3665_v49 = vsel %vm9133_vm11, %v3660_v27, %v10890_v55  ;;  %vm2194_vm7 = vmpackc.low %vm1093_vm6, %vm1093_vm6  ;;  %v2864_v24 = vrot.slane %v2862_v33, 5  ;;  %v2868_v36 = vrot.slane %v2866_v43, 4  ;;  %v10938_v27 = vpop.f32.mrf.mxu1  ;;  %v3485_v16 = vld [vmem:[#allocation2 + $0x80] sm:$0xf] }
 0x193   : > { %3891 = vst [vmem:[#allocation3 + $0x1e8] sm:$0xf] %v3665_v49  ;;  %v2226_v6 = vsel %vm2194_vm7, 65537, %v12430_v17  ;;  %v3296_v61 = vrot.slane %v3294_v46, 7  ;;  %v2855_v52 = vsel %vm9133_vm11, %v10864_v2, %v2854_v22  ;;  %v3303_v49 = vshrl.u32 %v10907_v45, 16  ;;  %v10944_v2 = vpop.f32.mrf.mxu0 }
 0x194   : > { %v2859_v40 = vor.u32 %v2858_v56, %v2854_v22  ;;  %v2490_v63 = vshrl.u32 %v2226_v6, 16  ;;  %v2493_v10 = vshll.u32 %v2226_v6, 16  ;;  %2964 = vst [vmem:[#allocation3 + $0x3b0] sm:$0xf] %v2855_v52  ;;  %v2869_v11 = vor.u32 %v2868_v36, %v2864_v24 }
 0x195   : > { %v3299_v15 = vor.u32 %v3297_v60, %v3296_v61  ;;  %v3301_v33 = vrot.slane %v3296_v61, 4  ;;  %v3306_v46 = vshll.u32 %v10907_v45, 16  ;;  %v3504_v58 = vsel %vm10432_vm1, %v3471_v21, 0  ;;  %v2097_v45 = vld [vmem:[#allocation2 + $0x78] sm:$0xf] }
 0x196   : > { %v2860_v42 = vrot.slane %v2859_v40, 4  ;;  %v2492_v43 = vrot.slane %v2490_v63, 7  ;;  %v10946_v22 = vrot.slane %v2869_v11, 4  ;;  %v10950_v6 = vrot.slane %v3303_v49, 7  ;;  %v10960_v63 = vpop.f32.mrf.mxu1 }
 0x197   : > { %v3300_v56 = vsel %vm9192_vm14, %v3292_v51, %v3299_v15  ;;  %vm12582_vm7 = vcmp.ne.s16.totalorder %v10426_v54, 0  ;;  %v12583_v21 = vshrl.u32 %v10872_v13, 16  ;;  %v2098_v15 = vld [vmem:[#allocation2 + $0x7c] sm:$0xf]  ;;  %v3672_v11 = vshll.u32 %v3504_v58, 16 }
 0x198   : > { %v10954_v60 = vsel %vm12582_vm7, %v3472_v48, 0  ;;  %v2865_v36 = vsel %vm9133_vm11, %v2860_v42, %v2864_v24  ;;  %v2495_v61 = vor.u32 %v2493_v10, %v2492_v43  ;;  %v2497_v52 = vrot.slane %v2492_v43, 4  ;;  %3388 = vst [vmem:[#allocation3 + $0x3fc] sm:$0xf] %v3300_v56  ;;  %v10974_v43 = vpop.f32.mrf.mxu0 }
 0x199   : > { %v3668_v40 = vrot.slane %v12583_v21, 4  ;;  %2965 = vst [vmem:[#allocation3 + $0x3d4] sm:$0xf] %v2865_v36  ;;  %v3308_v51 = vor.u32 %v3306_v46, %v10950_v6  ;;  %v3676_v49 = vshrl.u32 %v3504_v58, 16  ;;  %v3682_v48 = vshll.u32 %v10954_v60, 16 }
 0x19a   : > { %v8844_v54 = vld [vmem:[#allocation3 + $0x1c4] ss:$36 sps:$4 sm:$0xff]   ;;  %v2496_v42 = vsel %vm9192_vm14, %v9681_v29, %v2495_v61  ;;  %v10970_v13 = vsel %vm9192_vm14, %v2497_v52, %v9679_v8  ;;  %v12585_v58 = vmov 0  ;;  %v3674_v56 = vrot.slane %v3672_v11, 5  ;;  %v4352_v36 = vld [vmem:[#allocation2 + $0x64] sm:$0xf] }
 0x19b   : > { %12584 = vst [vmem:[#allocation77_spill] sm:$0xff] %v10970_v13  ;;  %v3669_v24 = vor.u32 %v3668_v40, %v10890_v55  ;;  %vm10976_vm6 = vcmp.ne.s16.totalorder %v2496_v42, 0  ;;  %vm12333_vm7 = vcmp.ne.s16.totalorder %v10970_v13, 0  ;;  %v3309_v46 = vsel %vm9192_vm14, %v3301_v33, %v3308_v51  ;;  %6724 = vmatprep.mubr.bf16.mxu0 %v8844_v54  ;;  %v10987_v40 = vpop.f32.mrf.mxu1  ;;  %4384 = vst [vmem:[#allocation3 + $0x2ec] sm:$0xf] %v4352_v36 }
 0x19c   : > { %v12586_v58 = vsel %vm10976_vm6, 4294967295, %v12585_v58  ;;  %v2578_v61 = vsel %vm10976_vm6, %v2097_v45, 0  ;;  %v2579_v55 = vsel %vm12333_vm7, %v2098_v15, 0  ;;  %3389 = vst [vmem:[#allocation3 + $0x420] sm:$0xf] %v3309_v46  ;;  %v3678_v21 = vrot.slane %v3676_v49, 4  ;;  %6725 = vmatmul.mubr.bf16.gmra.mxu0 %v8846_v12 }
 0x19d   : > { %12587 = vst [vmem:[#allocation78_spill] sm:$0xff] %v12586_v58  ;;  %v3670_v52 = vrot.slane %v3669_v24, 4  ;;  %v2872_v42 = vshll.u32 %v2578_v61, 16  ;;  %v2876_v10 = vshrl.u32 %v2578_v61, 16  ;;  %v2882_v8 = vshll.u32 %v2579_v55, 16  ;;  %v10994_v24 = vpop.f32.mrf.mxu0 }
 0x19e   : > { %v2886_v33 = vshrl.u32 %v2579_v55, 16  ;;  %v4353_v51 = vld [vmem:[#allocation2 + $0x68] sm:$0xf]  ;;  %v3679_v11 = vor.u32 %v3678_v21, %v3674_v56  ;;  %v10991_v45 = vrot.slane %v3682_v48, 5  ;;  %v454_v15 = vmax.f32 %v10834_v59, 0.0 }
 0x19f   : > { %v3675_v54 = vsel %vm9133_vm11, %v3670_v52, %v3674_v56  ;;  %v3001_v46 = vld [vmem:[#allocation2 + $0x84] sm:$0xf]  ;;  %4385 = vst [vmem:[#allocation3 + $0x310] sm:$0xf] %v4353_v51  ;;  %v2874_v49 = vrot.slane %v2872_v42, 5  ;;  %v2878_v36 = vrot.slane %v2876_v10, 4  ;;  %v10999_v48 = vadd.f32 %v10731_v31, %v10711_v19  ;;  %v11005_v56 = vpop.f32.mrf.mxu1 }
 0x1a0   : > { %v2884_v12 = vrot.slane %v2882_v8, 5  ;;  %3892 = vst [vmem:[#allocation3 + $0x20c] sm:$0xf] %v3675_v54  ;;  %v647_v61 = vadd.s32 248, %v9035_v7  ;;  %v3473_v55 = vld [vmem:[#allocation2 + $0x50] sm:$0xf]  ;;  %v7828_v52 = vpack.c.bf16 %v454_v15, %v454_v15  ;;  %v11003_v59 = vadd.f32 %v10777_v9, %v10758_v18 }
 0x1a1   : > { %v8841_v13 = vld [vmem:[#allocation3 + $0x3b4] ss:$36 sps:$4 sm:$0xff]   ;;  %v3680_v25 = vrot.slane %v3679_v11, 4  ;;  %12588 = vst [vmem:[#allocation79_spill] sm:$0xff] %v10999_v48  ;;  %v2875_v8 = vsel %vm9133_vm11, %v10946_v22, %v2874_v49  ;;  %v2879_v7 = vor.u32 %v2878_v36, %v2874_v49  ;;  %v2888_v21 = vrot.slane %v2886_v33, 4  ;;  %v12590_v31 = vld [vmem:[#allocation21_spill] sm:$0xff]  ;;  %v11018_v22 = vpop.f32.mrf.mxu0  ;;  %v11026_v36 = vpop.f32.mrf.mxu1 }
 0x1a2   : > { %v8843_v58 = vld [vmem:[#allocation3 + $0x3b0] ss:$36 sps:$4 sm:$0xff]   ;;  %12589 = vst [vmem:[#allocation80_spill] sm:$0xff] %v11003_v59  ;;  %v869_v10 = vand.u32 15, %v647_v61  ;;  %v3474_v42 = vld [vmem:[#allocation2 + $0x54] sm:$0xf]  ;;  %6619 = vmatprep.mubr.bf16.mxu1 %v8841_v13  ;;  %vm12591_vm7 = vnez %v12590_v31 }
 0x1a3   : > { %2966 = vst [vmem:[#allocation3 + $0x3f8] sm:$0xf] %v2875_v8  ;;  %v3685_v19 = vsel %vm9133_vm11, %v3680_v25, %v10991_v45  ;;  %614 = vst [vmem:[#allocation2 + $0x88] sm:$0xf] %v7828_v52  ;;  %v3034_v18 = vsel %vm12591_vm7, %v3001_v46, 0  ;;  %v3310_v9 = vrot.slane %v10950_v6, 4  ;;  %6620 = vmatmul.mubr.bf16.gmra.mxu1 %v8843_v58  ;;  %v2889_v13 = vor.u32 %v2888_v21, %v2884_v12 }
 0x1a4   : > { %v3506_v51 = vsel %vm10500_vm13, %v3473_v55, 0  ;;  %v2880_v33 = vrot.slane %v2879_v7, 4  ;;  %3893 = vst [vmem:[#allocation3 + $0x230] sm:$0xf] %v3685_v19  ;;  %vm1095_vm4 = vcmp.ne.s32.totalorder %v869_v10, 15  ;;  %v3312_v54 = vshrl.u32 %v3034_v18, 16 }
 0x1a5   : > { %vm2196_vm1 = vmpackc.low %vm1095_vm4, %vm1095_vm4  ;;  %v3315_v11 = vshll.u32 %v3034_v18, 16  ;;  %vm12592_vm15 = vcmp.ne.s16.totalorder %v10497_v57, 0  ;;  %v12593_v15 = vshrl.u32 %v10954_v60, 16  ;;  %v3692_v46 = vshll.u32 %v3506_v51, 16  ;;  %v3911_v49 = vld [vmem:[#allocation2 + $0x14] sm:$0xf] }
 0x1a6   : > { %v11022_v25 = vsel %vm12592_vm15, %v3474_v42, 0  ;;  %v2885_v58 = vsel %vm9133_vm11, %v2880_v33, %v2884_v12  ;;  %v2228_v61 = vsel %vm2196_vm1, 65537, %v12430_v17  ;;  %v11031_v55 = vrot.slane %v2889_v13, 4  ;;  %v3910_v8 = vld [vmem:[#allocation2 + $0x10] sm:$0x8]  ;;  %v11036_v42 = vpop.f32.mrf.mxu0  ;;  %v12594_v31 = vld [vmem:[#allocation4_spill] sm:$0xff] }
 0x1a7   : > { %v3688_v6 = vrot.slane %v12593_v15, 4  ;;  %v11033_v52 = vrot.slane %v3312_v54, 7  ;;  %2967 = vst [vmem:[#allocation3 + $0x41c] sm:$0xf] %v2885_v58  ;;  %v2508_v7 = vshrl.u32 %v2228_v61, 16  ;;  %v2511_v10 = vshll.u32 %v2228_v61, 16 }
 0x1a8   : > { %v3694_v21 = vrot.slane %v3692_v46, 5  ;;  %v4354_v19 = vld [vmem:[#allocation2 + $0x6c] sm:$0xf]  ;;  %v3696_v33 = vshrl.u32 %v3506_v51, 16  ;;  %v3702_v17 = vshll.u32 %v11022_v25, 16  ;;  %vm12595_vm15 = vcmp.ne.s16.totalorder %v12594_v31, 0 }
 0x1a9   : > { %v3689_v60 = vor.u32 %v3688_v6, %v10991_v45  ;;  %v3317_v18 = vor.u32 %v3315_v11, %v11033_v52  ;;  %v4355_v13 = vld [vmem:[#allocation2 + $0x70] sm:$0xf]  ;;  %4386 = vst [vmem:[#allocation3 + $0x334] sm:$0xf] %v4354_v19  ;;  %v2510_v54 = vrot.slane %v2508_v7, 7  ;;  %v3943_v45 = vsel %vm12595_vm15, %v3910_v8, 0  ;;  %v11044_v6 = vpop.f32.mrf.mxu1 }
 0x1aa   : > { %v3912_v61 = vld [vmem:[#allocation2 + $0x18] sm:$0xf]  ;;  %4387 = vst [vmem:[#allocation3 + $0x358] sm:$0xf] %v4355_v13  ;;  %v2099_v46 = vld [vmem:[#allocation2 + $0x80] sm:$0xf] }
 0x1ab   : > { %v3690_v15 = vrot.slane %v3689_v60, 4  ;;  %v2100_v11 = vld [vmem:[#allocation2 + $0x84] sm:$0x1]  ;;  %v3002_v57 = vld [vmem:[#allocation2 + $0x88] sm:$0xf]  ;;  %v3318_v51 = vsel %vm9192_vm14, %v3310_v9, %v3317_v18  ;;  %v3698_v12 = vrot.slane %v3696_v33, 4  ;;  %v2513_v31 = vor.u32 %v2511_v10, %v2510_v54  ;;  %v11060_v18 = vpop.f32.mrf.mxu0 }
 0x1ac   : > { %v11048_v14 = vrot.slane %v3702_v17, 5  ;;  %v12596_v7 = vld [vmem:[#allocation6_spill] sm:$0xff]  ;;  %v8855_v58 = vld [vmem:[#allocation3 + $0x208] ss:$36 sps:$4 sm:$0xff]   ;;  %v2515_v8 = vrot.slane %v2510_v54, 4  ;;  %v12598_v59 = vld [vmem:[#allocation31_spill] sm:$0xff] }
 0x1ad   : > { %vm12597_vm1 = vnez %v12596_v7  ;;  %v8852_v19 = vld [vmem:[#allocation3 + $0x20c] ss:$36 sps:$4 sm:$0xff]   ;;  %3390 = vst [vmem:[#allocation3 + $0x444] sm:$0xf] %v3318_v51  ;;  %v3695_v13 = vsel %vm9133_vm11, %v3690_v15, %v3694_v21  ;;  %v12599_v48 = vld [vmem:[#allocation32_spill] sm:$0xff]  ;;  %vm12600_vm4 = vcmp.ne.s16.totalorder %v9151_v1, 0  ;;  %v2514_v15 = vsel %vm9192_vm14, %v9681_v29, %v2513_v31 }
 0x1ae   : > { %v11052_v60 = vsel %vm12597_vm1, %v3911_v49, 0  ;;  %v4505_v9 = vsel %vm9133_vm11, %v12599_v48, %v12598_v59  ;;  %v3035_v33 = vsel %vm12600_vm4, %v3002_v57, 0  ;;  %v3699_v49 = vor.u32 %v3698_v12, %v3694_v21  ;;  %3894 = vst [vmem:[#allocation3 + $0x254] sm:$0xf] %v3695_v13  ;;  %v12601_v17 = vld [vmem:[#allocation7_spill] sm:$0xff]  ;;  %6732 = vmatprep.mubr.bf16.mxu0 %v8852_v19  ;;  %v11075_v21 = vpop.f32.mrf.mxu1 }
 0x1af   : > { %vm12602_vm15 = vnez %v12601_v17  ;;  %v3977_v54 = vshrl.u32 %v3943_v45, 16  ;;  %v3423_v51 = vld [vmem:[#allocation2 + $0x88] sm:$0xf]  ;;  %4821 = vst [vmem:[#allocation3 + $0x8c] sm:$0xf] %v4505_v9  ;;  %vm11071_vm1 = vcmp.ne.s16.totalorder %v2515_v8, 0  ;;  %6733 = vmatmul.mubr.bf16.gmra.mxu0 %v8855_v58  ;;  %v11083_v19 = vadd.f32 %v10847_v35, %v10821_v4 }
 0x1b0   : > { %v11066_v10 = vsel %vm12602_vm15, %v3912_v61, 0  ;;  %v12603_v48 = vmov 0  ;;  %v3321_v7 = vshrl.u32 %v3035_v33, 16  ;;  %v3324_v57 = vshll.u32 %v3035_v33, 16  ;;  %3455 = vst [vmem:[#allocation3 + $0x46c] sm:$0xf] %v3423_v51  ;;  %v11097_v33 = vpop.f32.mrf.mxu0 }
 0x1b1   : > { %v12604_v48 = vsel %vm11071_vm1, 4294967295, %v12603_v48  ;;  %v8847_v12 = vld [vmem:[#allocation3 + $0x3fc] ss:$36 sps:$4 sm:$0xff]   ;;  %vm11077_vm4 = vcmp.ne.s16.totalorder %v2514_v15, 0  ;;  %v12606_v45 = vmov 0  ;;  %v11087_v29 = vadd.f32 %v10874_v44, %v10857_v3 }
 0x1b2   : > { %12605 = vst [vmem:[#allocation4_spill] sm:$0xff] %v12604_v48  ;;  %v8851_v61 = vld [vmem:[#allocation3 + $0x3f8] ss:$36 sps:$4 sm:$0xff]   ;;  %v12607_v45 = vsel %vm11077_vm4, 4294967295, %v12606_v45  ;;  %v11091_v31 = vadd.f32 %v10882_v30, %v10866_v20  ;;  %v2580_v8 = vsel %vm11077_vm4, %v2099_v46, 0  ;;  %v2581_v58 = vsel %vm11071_vm1, %v2100_v11, 0  ;;  %6627 = vmatprep.mubr.bf16.mxu1 %v8847_v12 }
 0x1b3   : > { %12608 = vst [vmem:[#allocation6_spill] sm:$0xff] %v12607_v45  ;;  %12609 = vst [vmem:[#allocation31_spill] sm:$0xff] %v11087_v29  ;;  %v3323_v13 = vrot.slane %v3321_v7, 7  ;;  %v3700_v9 = vrot.slane %v3699_v49, 4  ;;  %v2892_v4 = vshll.u32 %v2580_v8, 16  ;;  %v2896_v35 = vshrl.u32 %v2580_v8, 16  ;;  %6628 = vmatmul.mubr.bf16.gmra.mxu1 %v8851_v61  ;;  %v11104_v49 = vpop.f32.mrf.mxu1 }
 0x1b4   : > { %v2902_v17 = vshll.u32 %v2581_v58, 16  ;;  %v7546_v3 = vrot.slane %v3977_v54, 11  ;;  %v3475_v44 = vld [vmem:[#allocation2 + $0x58] sm:$0xf]  ;;  %v3982_v30 = vshrl.u32 %v11052_v60, 16  ;;  %v3985_v46 = vshll.u32 %v11052_v60, 16 }
 0x1b5   : > { %v3326_v51 = vor.u32 %v3324_v57, %v3323_v13  ;;  %v3705_v20 = vsel %vm9133_vm11, %v3700_v9, %v11048_v14  ;;  %v3476_v11 = vld [vmem:[#allocation2 + $0x5c] sm:$0xf]  ;;  %v2894_v15 = vrot.slane %v2892_v4, 5  ;;  %v2898_v7 = vrot.slane %v2896_v35, 4  ;;  %v11114_v13 = vpop.f32.mrf.mxu0  ;;  %v11125_v29 = vpop.f32.mrf.mxu1  ;;  %v3478_v1 = vld [vmem:[#allocation2 + $0x64] sm:$0xf] }
 0x1b6   : > { %v2904_v12 = vrot.slane %v2902_v17, 5  ;;  %3895 = vst [vmem:[#allocation3 + $0x278] sm:$0xf] %v3705_v20  ;;  %v3991_v54 = vshrl.u32 %v11066_v10, 16  ;;  %v12610_v61 = vrot.slane %v11033_v52, 4  ;;  %v3984_v8 = vrot.slane %v3982_v30, 7 }
 0x1b7   : > { %v3994_v58 = vshll.u32 %v11066_v10, 16  ;;  %v3508_v60 = vsel %vm10569_vm5, %v3475_v44, 0  ;;  %v2895_v9 = vsel %vm9133_vm11, %v11031_v55, %v2894_v15  ;;  %v2899_v4 = vor.u32 %v2898_v7, %v2894_v15  ;;  %v4356_v17 = vld [vmem:[#allocation2 + $0x74] sm:$0xf]  ;;  %v12653_v48 = vld [vmem:[#allocation37_spill] sm:$0xff] }
 0x1b8   : > { %v3327_v57 = vsel %vm9192_vm14, %v12610_v61, %v3326_v51  ;;  %v11119_v35 = vrot.slane %v3991_v54, 7  ;;  %vm12611_vm15 = vcmp.ne.s16.totalorder %v10562_v28, 0  ;;  %v4357_v51 = vld [vmem:[#allocation2 + $0x78] sm:$0xf]  ;;  %2968 = vst [vmem:[#allocation3 + $0x440] sm:$0xf] %v2895_v9  ;;  %v3987_v10 = vor.u32 %v3985_v46, %v3984_v8 }
 0x1b9   : > { %3391 = vst [vmem:[#allocation3 + $0x468] sm:$0xf] %v3327_v57  ;;  %v3509_v52 = vsel %vm12611_vm15, %v3476_v11, 0  ;;  %v3989_v20 = vrot.slane %v3984_v8, 4  ;;  %v12612_v44 = vshrl.u32 %v11022_v25, 16  ;;  %v3712_v61 = vshll.u32 %v3508_v60, 16 }
 0x1ba   : > { %4388 = vst [vmem:[#allocation3 + $0x37c] sm:$0xf] %v4356_v17  ;;  %4389 = vst [vmem:[#allocation3 + $0x3a0] sm:$0xf] %v4357_v51  ;;  %v2900_v55 = vrot.slane %v2899_v4, 4  ;;  %v3996_v15 = vor.u32 %v3994_v58, %v11119_v35  ;;  %v3716_v7 = vshrl.u32 %v3508_v60, 16  ;;  %v3988_v11 = vsel %vm9192_vm14, %v7546_v3, %v3987_v10 }
 0x1bb   : > { %v3708_v30 = vrot.slane %v12612_v44, 4  ;;  %v3722_v54 = vshll.u32 %v3509_v52, 16  ;;  %v3714_v46 = vrot.slane %v3712_v61, 5  ;;  %v3726_v8 = vshrl.u32 %v3509_v52, 16  ;;  %v3913_v9 = vld [vmem:[#allocation2 + $0x1c] sm:$0xf]  ;;  %v11131_v44 = vpop.f32.mrf.mxu0 }
 0x1bc   : > { %v3914_v25 = vld [vmem:[#allocation2 + $0x20] sm:$0xf]  ;;  %v2905_v17 = vsel %vm9133_vm11, %v2900_v55, %v2904_v12  ;;  %v3997_v4 = vsel %vm9192_vm14, %v3989_v20, %v3996_v15  ;;  %4300 = vst [vmem:[#allocation3 + $0x18] sm:$0xf] %v3988_v11  ;;  %v3718_v58 = vrot.slane %v3716_v7, 4  ;;  %v11139_v10 = vadd.f32 %v10932_v26, %v10919_v34  ;;  %v12613_v55 = vld [vmem:[#allocation11_spill] sm:$0xff] }
 0x1bd   : > { %v3709_v57 = vor.u32 %v3708_v30, %v11048_v14  ;;  %v3724_v60 = vrot.slane %v3722_v54, 5  ;;  %v3477_v51 = vld [vmem:[#allocation2 + $0x60] sm:$0xf]  ;;  %2969 = vst [vmem:[#allocation3 + $0x464] sm:$0xf] %v2905_v17  ;;  %v8255_v12 = vadd.f32 %v10960_v63, %v10938_v27  ;;  %v11145_v20 = vadd.f32 %v10974_v43, %v10944_v2  ;;  %v11147_v30 = vpop.f32.mrf.mxu1  ;;  %v11156_v2 = vpop.f32.mrf.mxu0 }
 0x1be   : > { %v8859_v3 = vld [vmem:[#allocation3 + $0x254] ss:$36 sps:$4 sm:$0xff]   ;;  %4301 = vst [vmem:[#allocation3 + $0x3c] sm:$0xf] %v3997_v4  ;;  %v3719_v61 = vor.u32 %v3718_v58, %v3714_v46  ;;  %vm12614_vm15 = vnez %v12613_v55  ;;  %v12615_v7 = vld [vmem:[#allocation13_spill] sm:$0xff]  ;;  %v3998_v11 = vrot.slane %v11119_v35, 4  ;;  %v11283_v47 = vadd.f32 %v11114_v13, %v11097_v33 }
 0x1bf   : > { %v8861_v14 = vld [vmem:[#allocation3 + $0x250] ss:$36 sps:$4 sm:$0xff]   ;;  %v3710_v52 = vrot.slane %v3709_v57, 4  ;;  %v3946_v15 = vsel %vm12614_vm15, %v3913_v9, 0  ;;  %vm12616_vm7 = vnez %v12615_v7  ;;  %6740 = vmatprep.mubr.bf16.mxu0 %v8859_v3  ;;  %v3510_v9 = vsel %vm10624_vm12, %v3477_v51, 0  ;;  %v11164_v58 = vpop.f32.mrf.mxu1 }
 0x1c0   : > { %v3947_v54 = vsel %vm12616_vm7, %v3914_v25, 0  ;;  %v4000_v26 = vshrl.u32 %v3946_v15, 16  ;;  %v4003_v27 = vshll.u32 %v3946_v15, 16  ;;  %6741 = vmatmul.mubr.bf16.gmra.mxu0 %v8861_v14  ;;  %v3720_v43 = vrot.slane %v3719_v61, 4 }
 0x1c1   : > { %v3715_v34 = vsel %vm9133_vm11, %v3710_v52, %v3714_v46  ;;  %v4009_v63 = vshrl.u32 %v3947_v54, 16  ;;  %v4012_v57 = vshll.u32 %v3947_v54, 16  ;;  %vm12617_vm7 = vcmp.ne.s16.totalorder %v10619_v32, 0  ;;  %v3916_v54 = vld [vmem:[#allocation2 + $0x28] sm:$0xf] }
 0x1c2   : > { %3896 = vst [vmem:[#allocation3 + $0x29c] sm:$0xf] %v3715_v34  ;;  %v3511_v25 = vsel %vm12617_vm7, %v3478_v1, 0  ;;  %v4002_v35 = vrot.slane %v4000_v26, 7  ;;  %v3728_v4 = vrot.slane %v3726_v8, 4  ;;  %v3732_v46 = vshll.u32 %v3510_v9, 16  ;;  %v11169_v26 = vpop.f32.mrf.mxu0 }
 0x1c3   : > { %v11162_v17 = vrot.slane %v4009_v63, 7  ;;  %v3725_v3 = vsel %vm9133_vm11, %v3720_v43, %v3724_v60  ;;  %v3736_v14 = vshrl.u32 %v3510_v9, 16  ;;  %v3742_v52 = vshll.u32 %v3511_v25, 16  ;;  %v3915_v1 = vld [vmem:[#allocation2 + $0x24] sm:$0xf] }
 0x1c4   : > { %v3746_v61 = vshrl.u32 %v3511_v25, 16  ;;  %3897 = vst [vmem:[#allocation3 + $0x2c0] sm:$0xf] %v3725_v3  ;;  %v4005_v55 = vor.u32 %v4003_v27, %v4002_v35  ;;  %v4007_v15 = vrot.slane %v4002_v35, 4  ;;  %v3729_v7 = vor.u32 %v3728_v4, %v3724_v60  ;;  %v3479_v34 = vld [vmem:[#allocation2 + $0x68] sm:$0xf] }
 0x1c5   : > { %v4014_v51 = vor.u32 %v4012_v57, %v11162_v17  ;;  %v8856_v8 = vld [vmem:[#allocation3 + $0x444] ss:$36 sps:$4 sm:$0xff]   ;;  %v3734_v32 = vrot.slane %v3732_v46, 5  ;;  %v11172_v0 = vadd.f32 %v8255_v12, %v10685_v50  ;;  %v8258_v43 = vadd.f32 %v11005_v56, %v10987_v40  ;;  %v8864_v57 = vld [vmem:[#allocation3 + $0x1c] ss:$36 sps:$4 sm:$0xff]   ;;  %v11186_v12 = vpop.f32.mrf.mxu1 }
 0x1c6   : > { %v8858_v63 = vld [vmem:[#allocation3 + $0x440] ss:$36 sps:$4 sm:$0xff]   ;;  %v11178_v27 = vadd.f32 %v11018_v22, %v10994_v24  ;;  %v4006_v60 = vsel %vm9192_vm14, %v3998_v11, %v4005_v55  ;;  %v3730_v25 = vrot.slane %v3729_v7, 4  ;;  %v3480_v35 = vld [vmem:[#allocation2 + $0x6c] sm:$0xf]  ;;  %v8261_v50 = vadd.f32 %v11044_v6, %v11026_v36  ;;  %6635 = vmatprep.mubr.bf16.mxu1 %v8856_v8  ;;  %v12618_v56 = vld [vmem:[#allocation15_spill] sm:$0xff] }
 0x1c7   : > { %v4015_v9 = vsel %vm9192_vm14, %v4007_v15, %v4014_v51  ;;  %4302 = vst [vmem:[#allocation3 + $0x60] sm:$0xf] %v4006_v60  ;;  %v3738_v40 = vrot.slane %v3736_v14, 4  ;;  %v3744_v24 = vrot.slane %v3742_v52, 5  ;;  %vm12619_vm15 = vnez %v12618_v56  ;;  %v12620_v4 = vld [vmem:[#allocation16_spill] sm:$0xff]  ;;  %6636 = vmatmul.mubr.bf16.gmra.mxu1 %v8858_v63  ;;  %v11195_v15 = vpop.f32.mrf.mxu0 }
 0x1c8   : > { %4303 = vst [vmem:[#allocation3 + $0x84] sm:$0xf] %v4015_v9  ;;  %v3948_v22 = vsel %vm12619_vm15, %v3915_v1, 0  ;;  %vm12621_vm7 = vnez %v12620_v4  ;;  %v4358_v46 = vld [vmem:[#allocation2 + $0x7c] sm:$0xf]  ;;  %v3735_v3 = vsel %vm9133_vm11, %v3730_v25, %v3734_v32  ;;  %v4016_v36 = vrot.slane %v11162_v17, 4  ;;  %6837 = vmatprep.mubr.bf16.mxu1 %v8864_v57  ;;  %v11201_v9 = vpop.f32.mrf.mxu1 }
 0x1c9   : > { %v3949_v11 = vsel %vm12621_vm7, %v3916_v54, 0  ;;  %v4018_v6 = vshrl.u32 %v3948_v22, 16  ;;  %v4021_v55 = vshll.u32 %v3948_v22, 16  ;;  %v4359_v51 = vld [vmem:[#allocation2 + $0x80] sm:$0xf]  ;;  %v3739_v14 = vor.u32 %v3738_v40, %v3734_v32 }
 0x1ca   : > { %4390 = vst [vmem:[#allocation3 + $0x3c4] sm:$0xf] %v4358_v46  ;;  %3898 = vst [vmem:[#allocation3 + $0x2e4] sm:$0xf] %v3735_v3  ;;  %v4027_v52 = vshrl.u32 %v3949_v11, 16  ;;  %v4030_v7 = vshll.u32 %v3949_v11, 16  ;;  %v11204_v32 = vadd.f32 %v8258_v43, %v10838_v62  ;;  %v11207_v40 = vadd.f32 %v8261_v50, %v10726_v39  ;;  %v11215_v3 = vpop.f32.mrf.mxu0 }
 0x1cb   : > { %v3512_v1 = vsel %vm10719_vm3, %v3479_v34, 0  ;;  %4391 = vst [vmem:[#allocation3 + $0x3e8] sm:$0xf] %v4359_v51  ;;  %v4020_v54 = vrot.slane %v4018_v6, 7  ;;  %vm12622_vm15 = vcmp.ne.s16.totalorder %v10708_v23, 0  ;;  %v3748_v17 = vrot.slane %v3746_v61, 4 }
 0x1cc   : > { %v3513_v8 = vsel %vm12622_vm15, %v3480_v35, 0  ;;  %v3752_v63 = vshll.u32 %v3512_v1, 16  ;;  %v3917_v60 = vld [vmem:[#allocation2 + $0x2c] sm:$0xf]  ;;  %v8866_v25 = vld [vmem:[#allocation3 + $0x29c] ss:$36 sps:$4 sm:$0xff]   ;;  %v11211_v34 = vadd.f32 %v11060_v18, %v11036_v42  ;;  %v8267_v33 = vadd.f32 %v11147_v30, %v11125_v29 }
 0x1cd   : > { %v8868_v56 = vld [vmem:[#allocation3 + $0x298] ss:$36 sps:$4 sm:$0xff]   ;;  %v3740_v57 = vrot.slane %v3739_v14, 4  ;;  %12623 = vst [vmem:[#allocation32_spill] sm:$0xff] %v11204_v32  ;;  %12624 = vst [vmem:[#allocation7_spill] sm:$0xff] %v11207_v40  ;;  %v4023_v35 = vor.u32 %v4021_v55, %v4020_v54  ;;  %v4025_v61 = vrot.slane %v4020_v54, 4  ;;  %v3749_v11 = vor.u32 %v3748_v17, %v3744_v24  ;;  %6748 = vmatprep.mubr.bf16.mxu0 %v8866_v25 }
 0x1ce   : > { %v8862_v22 = vld [vmem:[#allocation3 + $0x18] ss:$36 sps:$4 sm:$0xff]   ;;  %v11213_v4 = vrot.slane %v4027_v52, 7  ;;  %v3754_v43 = vrot.slane %v3752_v63, 5  ;;  %v3756_v39 = vshrl.u32 %v3512_v1, 16  ;;  %v3762_v50 = vshll.u32 %v3513_v8, 16  ;;  %6749 = vmatmul.mubr.bf16.gmra.mxu0 %v8868_v56  ;;  %v11222_v52 = vpop.f32.mrf.mxu1 }
 0x1cf   : > { %v3918_v46 = vld [vmem:[#allocation2 + $0x30] sm:$0xf]  ;;  %v3745_v62 = vsel %vm9133_vm11, %v3740_v57, %v3744_v24  ;;  %v8869_v42 = vld [vmem:[#allocation3 + $0x64] ss:$36 sps:$4 sm:$0xff]   ;;  %v4024_v18 = vsel %vm9192_vm14, %v4016_v36, %v4023_v35  ;;  %v3750_v51 = vrot.slane %v3749_v11, 4  ;;  %v3766_v14 = vshrl.u32 %v3513_v8, 16  ;;  %6838 = vmatmul.mubr.bf16.vlgmr.msra.gmra.mxu1 %v8862_v22  ;;  %v11233_v35 = vpop.f32.mrf.mxu0 }
 0x1d0   : > { %v3481_v6 = vld [vmem:[#allocation2 + $0x70] sm:$0xf]  ;;  %3899 = vst [vmem:[#allocation3 + $0x308] sm:$0xf] %v3745_v62  ;;  %v4032_v55 = vor.u32 %v4030_v7, %v11213_v4  ;;  %4304 = vst [vmem:[#allocation3 + $0xa8] sm:$0xf] %v4024_v18  ;;  %6845 = vmatprep.mubr.bf16.mxu1 %v8869_v42  ;;  %v11295_v13 = vadd.f32 %v11156_v2, %v11131_v44 }
 0x1d1   : > { %v3758_v54 = vrot.slane %v3756_v39, 4  ;;  %v3764_v17 = vrot.slane %v3762_v50, 5  ;;  %v12625_v24 = vld [vmem:[#allocation19_spill] sm:$0xff]  ;;  %v12627_v63 = vld [vmem:[#allocation20_spill] sm:$0xff]  ;;  %v3755_v7 = vsel %vm9133_vm11, %v3750_v51, %v3754_v43  ;;  %v4034_v8 = vrot.slane %v11213_v4, 4  ;;  %v11239_v4 = vpop.f32.mrf.mxu1 }
 0x1d2   : > { %vm12626_vm7 = vnez %v12625_v24  ;;  %vm12628_vm15 = vnez %v12627_v63  ;;  %v3482_v56 = vld [vmem:[#allocation2 + $0x74] sm:$0xf]  ;;  %v4033_v36 = vsel %vm9192_vm14, %v4025_v61, %v4032_v55  ;;  %3900 = vst [vmem:[#allocation3 + $0x32c] sm:$0xf] %v3755_v7  ;;  %v4360_v39 = vld [vmem:[#allocation2 + $0x84] sm:$0xf] }
 0x1d3   : > { %v3950_v1 = vsel %vm12626_vm7, %v3917_v60, 0  ;;  %v3951_v25 = vsel %vm12628_vm15, %v3918_v46, 0  ;;  %4305 = vst [vmem:[#allocation3 + $0xcc] sm:$0xf] %v4033_v36  ;;  %v3759_v11 = vor.u32 %v3758_v54, %v3754_v43  ;;  %v3514_v61 = vsel %vm10807_vm8, %v3481_v6, 0  ;;  %v11252_v32 = vpop.f32.mrf.mxu1 }
 0x1d4   : > { %v4036_v57 = vshrl.u32 %v3950_v1, 16  ;;  %v4039_v60 = vshll.u32 %v3950_v1, 16  ;;  %v4045_v62 = vshrl.u32 %v3951_v25, 16  ;;  %v4048_v46 = vshll.u32 %v3951_v25, 16  ;;  %v4361_v55 = vld [vmem:[#allocation2 + $0x88] sm:$0xf] }
 0x1d5   : > { %vm12629_vm7 = vcmp.ne.s16.totalorder %v10801_v41, 0  ;;  %v3768_v18 = vrot.slane %v3766_v14, 4  ;;  %4392 = vst [vmem:[#allocation3 + $0x40c] sm:$0xf] %v4360_v39  ;;  %v3760_v42 = vrot.slane %v3759_v11, 4  ;;  %v3772_v43 = vshll.u32 %v3514_v61, 16 }
 0x1d6   : > { %v4038_v22 = vrot.slane %v4036_v57, 7  ;;  %v3515_v50 = vsel %vm12629_vm7, %v3482_v56, 0  ;;  %v11241_v51 = vrot.slane %v4045_v62, 7  ;;  %v3776_v54 = vshrl.u32 %v3514_v61, 16  ;;  %v3919_v24 = vld [vmem:[#allocation2 + $0x34] sm:$0xf]  ;;  %v11243_v57 = vpop.f32.mrf.mxu0 }
 0x1d7   : > { %4393 = vst [vmem:[#allocation3 + $0x430] sm:$0xf] %v4361_v55  ;;  %v8873_v1 = vld [vmem:[#allocation3 + $0x60] ss:$36 sps:$4 sm:$0xff]   ;;  %v3769_v36 = vor.u32 %v3768_v18, %v3764_v17  ;;  %v3782_v6 = vshll.u32 %v3515_v50, 16  ;;  %v3765_v39 = vsel %vm9133_vm11, %v3760_v42, %v3764_v17  ;;  %v3774_v62 = vrot.slane %v3772_v43, 5 }
 0x1d8   : > { %v4041_v63 = vor.u32 %v4039_v60, %v4038_v22  ;;  %v4043_v25 = vrot.slane %v4038_v22, 4  ;;  %v3920_v7 = vld [vmem:[#allocation2 + $0x38] sm:$0xf]  ;;  %v8871_v14 = vld [vmem:[#allocation3 + $0x2e4] ss:$36 sps:$4 sm:$0xff]   ;;  %v4050_v11 = vor.u32 %v4048_v46, %v11241_v51  ;;  %v8264_v61 = vadd.f32 %v11104_v49, %v11075_v21  ;;  %v12630_v42 = vld [vmem:[#allocation22_spill] sm:$0xff]  ;;  %6846 = vmatmul.mubr.bf16.gmra.mxu1 %v8873_v1 }
 0x1d9   : > { %v8874_v56 = vld [vmem:[#allocation3 + $0x2e0] ss:$36 sps:$4 sm:$0xff]   ;;  %3901 = vst [vmem:[#allocation3 + $0x350] sm:$0xf] %v3765_v39  ;;  %v3770_v22 = vrot.slane %v3769_v36, 4  ;;  %v3778_v18 = vrot.slane %v3776_v54, 4  ;;  %6756 = vmatprep.mubr.bf16.mxu0 %v8871_v14  ;;  %vm12631_vm15 = vnez %v12630_v42 }
 0x1da   : > { %v4042_v60 = vsel %vm9192_vm14, %v4034_v8, %v4041_v63  ;;  %v3784_v55 = vrot.slane %v3782_v6, 5  ;;  %v3483_v40 = vld [vmem:[#allocation2 + $0x78] sm:$0xf]  ;;  %v4051_v17 = vsel %vm9192_vm14, %v4043_v25, %v4050_v11  ;;  %v3786_v46 = vshrl.u32 %v3515_v50, 16  ;;  %v12632_v21 = vld [vmem:[#allocation23_spill] sm:$0xff]  ;;  %6757 = vmatmul.mubr.bf16.gmra.mxu0 %v8874_v56  ;;  %v11263_v6 = vpop.f32.mrf.mxu0  ;;  %v12634_v11 = vld [vmem:[#allocation73_spill] sm:$0xff] }
 0x1db   : > { %4306 = vst [vmem:[#allocation3 + $0xf0] sm:$0xf] %v4042_v60  ;;  %v3952_v43 = vsel %vm12631_vm15, %v3919_v24, 0  ;;  %vm12633_vm7 = vnez %v12632_v21  ;;  %v3484_v39 = vld [vmem:[#allocation2 + $0x7c] sm:$0xf]  ;;  %v3775_v54 = vsel %vm9133_vm11, %v3770_v22, %v3774_v62  ;;  %v3779_v63 = vor.u32 %v3778_v18, %v3774_v62  ;;  %v11269_v62 = vpop.f32.mrf.mxu1 }
 0x1dc   : > { %v3953_v49 = vsel %vm12633_vm7, %v3920_v7, 0  ;;  %v8875_v8 = vld [vmem:[#allocation3 + $0xac] ss:$36 sps:$4 sm:$0xff]   ;;  %4307 = vst [vmem:[#allocation3 + $0x114] sm:$0xf] %v4051_v17  ;;  %v4052_v36 = vrot.slane %v11241_v51, 4 }
 0x1dd   : > { %v4054_v25 = vshrl.u32 %v3952_v43, 16  ;;  %3902 = vst [vmem:[#allocation3 + $0x374] sm:$0xf] %v3775_v54  ;;  %v4057_v50 = vshll.u32 %v3952_v43, 16  ;;  %v4063_v24 = vshrl.u32 %v3953_v49, 16  ;;  %v4066_v14 = vshll.u32 %v3953_v49, 16  ;;  %6853 = vmatprep.mubr.bf16.mxu1 %v8875_v8 }
 0x1de   : > { %v3516_v7 = vsel %vm10909_vm9, %v3483_v40, 0  ;;  %v3780_v1 = vrot.slane %v3779_v63, 4  ;;  %vm12635_vm15 = vcmp.ne.s16.totalorder %v12634_v11, 0  ;;  %v3788_v22 = vrot.slane %v3786_v46, 4  ;;  %v3921_v43 = vld [vmem:[#allocation2 + $0x3c] sm:$0xf] }
 0x1df   : > { %v4056_v56 = vrot.slane %v4054_v25, 7  ;;  %v3517_v60 = vsel %vm12635_vm15, %v3484_v39, 0  ;;  %v11271_v51 = vrot.slane %v4063_v24, 7  ;;  %v3792_v18 = vshll.u32 %v3516_v7, 16  ;;  %v8880_v21 = vld [vmem:[#allocation3 + $0xa8] ss:$36 sps:$4 sm:$0xff]   ;;  %v11275_v25 = vpop.f32.mrf.mxu0 }
 0x1e0   : > { %v3796_v17 = vshrl.u32 %v3516_v7, 16  ;;  %v3802_v42 = vshll.u32 %v3517_v60, 16  ;;  %v3785_v49 = vsel %vm9133_vm11, %v3780_v1, %v3784_v55  ;;  %v3789_v54 = vor.u32 %v3788_v22, %v3784_v55  ;;  %v3922_v63 = vld [vmem:[#allocation2 + $0x40] sm:$0xf]  ;;  %v8878_v39 = vld [vmem:[#allocation3 + $0x32c] ss:$36 sps:$4 sm:$0xff]   ;;  %v11287_v22 = vpop.f32.mrf.mxu1  ;;  %6854 = vmatmul.mubr.bf16.gmra.mxu1 %v8880_v21 }
 0x1e1   : > { %v4059_v40 = vor.u32 %v4057_v50, %v4056_v56  ;;  %v4061_v8 = vrot.slane %v4056_v56, 4  ;;  %v8881_v46 = vld [vmem:[#allocation3 + $0x328] ss:$36 sps:$4 sm:$0xff]   ;;  %3903 = vst [vmem:[#allocation3 + $0x398] sm:$0xf] %v3785_v49  ;;  %v4068_v24 = vor.u32 %v4066_v14, %v11271_v51  ;;  %v3794_v11 = vrot.slane %v3792_v18, 5  ;;  %6764 = vmatprep.mubr.bf16.mxu0 %v8878_v39 }
 0x1e2   : > { %v12636_v7 = vld [vmem:[#allocation79_spill] sm:$0xff]  ;;  %v3790_v50 = vrot.slane %v3789_v54, 4  ;;  %v3798_v1 = vrot.slane %v3796_v17, 4  ;;  %v3804_v56 = vrot.slane %v3802_v42, 5  ;;  %v4362_v49 = vld [vmem:[#allocation2 + $0x8c] sm:$0xf]  ;;  %6765 = vmatmul.mubr.bf16.gmra.mxu0 %v8881_v46  ;;  %v11303_v54 = vpop.f32.mrf.mxu0 }
 0x1e3   : > { %v11279_v41 = vadd.f32 %v8264_v61, %v12636_v7  ;;  %v4060_v55 = vsel %vm9192_vm14, %v4052_v36, %v4059_v40  ;;  %v8882_v14 = vld [vmem:[#allocation3 + $0xf4] ss:$36 sps:$4 sm:$0xff]   ;;  %v4069_v18 = vsel %vm9192_vm14, %v4061_v8, %v4068_v24  ;;  %v3806_v61 = vshrl.u32 %v3517_v60, 16  ;;  %v3486_v7 = vld [vmem:[#allocation2 + $0x84] sm:$0xf]  ;;  %v12640_v60 = vld [vmem:[#allocation28_spill] sm:$0xff] }
 0x1e4   : > { %4308 = vst [vmem:[#allocation3 + $0x138] sm:$0xf] %v4060_v55  ;;  %4394 = vst [vmem:[#allocation3 + $0x454] sm:$0xf] %v4362_v49  ;;  %v3795_v36 = vsel %vm9133_vm11, %v3790_v50, %v3794_v11  ;;  %v3799_v17 = vor.u32 %v3798_v1, %v3794_v11  ;;  %v12638_v42 = vld [vmem:[#allocation27_spill] sm:$0xff]  ;;  %vm12641_vm15 = vnez %v12640_v60  ;;  %6861 = vmatprep.mubr.bf16.mxu1 %v8882_v14  ;;  %v4070_v44 = vrot.slane %v11271_v51, 4 }
 0x1e5   : > { %12637 = vst [vmem:[#allocation11_spill] sm:$0xff] %v11279_v41  ;;  %4309 = vst [vmem:[#allocation3 + $0x15c] sm:$0xf] %v4069_v18  ;;  %vm12639_vm7 = vnez %v12638_v42  ;;  %v3955_v8 = vsel %vm12641_vm15, %v3922_v63, 0  ;;  %v4363_v29 = vld [vmem:[#allocation2 + $0x90] sm:$0xf]  ;;  %v11310_v63 = vpop.f32.mrf.mxu1 }
 0x1e6   : > { %v3954_v40 = vsel %vm12639_vm7, %v3921_v43, 0  ;;  %3904 = vst [vmem:[#allocation3 + $0x3bc] sm:$0xf] %v3795_v36  ;;  %v4081_v21 = vshrl.u32 %v3955_v8, 16  ;;  %4395 = vst [vmem:[#allocation3 + $0x478] sm:$0xf] %v4363_v29 }
 0x1e7   : > { %v4072_v30 = vshrl.u32 %v3954_v40, 16  ;;  %v4075_v2 = vshll.u32 %v3954_v40, 16  ;;  %v3800_v39 = vrot.slane %v3799_v17, 4  ;;  %v4084_v46 = vshll.u32 %v3955_v8, 16  ;;  %v12643_v43 = vld [vmem:[#allocation77_spill] sm:$0xff]  ;;  %v12645_v40 = vld [vmem:[#allocation70_spill] sm:$0xff] }
 0x1e8   : > { %v3518_v24 = vsel %vm10976_vm6, %v3485_v16, 0  ;;  %vm12644_vm7 = vcmp.ne.s16.totalorder %v12643_v43, 0  ;;  %v8886_v50 = vld [vmem:[#allocation3 + $0xf0] ss:$36 sps:$4 sm:$0xff]   ;;  %v11312_v49 = vrot.slane %v4081_v21, 7  ;;  %v3808_v14 = vrot.slane %v3806_v61, 4 }
 0x1e9   : > { %v3519_v55 = vsel %vm12644_vm7, %v3486_v7, 0  ;;  %v4074_v1 = vrot.slane %v4072_v30, 7  ;;  %v3812_v51 = vshll.u32 %v3518_v24, 16  ;;  %v8884_v18 = vld [vmem:[#allocation3 + $0x374] ss:$36 sps:$4 sm:$0xff]   ;;  %v3805_v17 = vsel %vm9133_vm11, %v3800_v39, %v3804_v56  ;;  %v11321_v7 = vpop.f32.mrf.mxu0  ;;  %6862 = vmatmul.mubr.bf16.gmra.mxu1 %v8886_v50 }
 0x1ea   : > { %v8887_v36 = vld [vmem:[#allocation3 + $0x370] ss:$36 sps:$4 sm:$0xff]   ;;  %v3816_v42 = vshrl.u32 %v3518_v24, 16  ;;  %v11317_v60 = vadd.f32 %v8267_v33, %v12645_v40  ;;  %v8270_v16 = vadd.f32 %v11186_v12, %v11164_v58  ;;  %3905 = vst [vmem:[#allocation3 + $0x3e0] sm:$0xf] %v3805_v17  ;;  %v4086_v61 = vor.u32 %v4084_v46, %v11312_v49  ;;  %6772 = vmatprep.mubr.bf16.mxu0 %v8884_v18  ;;  %v11324_v33 = vpop.f32.mrf.mxu1  ;;  %v12647_v46 = vld [vmem:[#allocation80_spill] sm:$0xff] }
 0x1eb   : > { %v4077_v8 = vor.u32 %v4075_v2, %v4074_v1  ;;  %v4079_v29 = vrot.slane %v4074_v1, 4  ;;  %v3809_v30 = vor.u32 %v3808_v14, %v3804_v56  ;;  %v3923_v21 = vld [vmem:[#allocation2 + $0x44] sm:$0xf]  ;;  %v3924_v41 = vld [vmem:[#allocation2 + $0x48] sm:$0xf]  ;;  %v3814_v43 = vrot.slane %v3812_v51, 5  ;;  %6773 = vmatmul.mubr.bf16.gmra.mxu0 %v8887_v36 }
 0x1ec   : > { %12646 = vst [vmem:[#allocation13_spill] sm:$0xff] %v11317_v60  ;;  %v3818_v39 = vrot.slane %v3816_v42, 4  ;;  %v3822_v24 = vshll.u32 %v3519_v55, 16  ;;  %v3826_v11 = vshrl.u32 %v3519_v55, 16  ;;  %v8888_v40 = vld [vmem:[#allocation3 + $0x13c] ss:$36 sps:$4 sm:$0xff]   ;;  %v11331_v56 = vadd.f32 %v8270_v16, %v12647_v46 }
 0x1ed   : > { %v4078_v58 = vsel %vm9192_vm14, %v4070_v44, %v4077_v8  ;;  %v4087_v12 = vsel %vm9192_vm14, %v4079_v29, %v4086_v61  ;;  %v3810_v2 = vrot.slane %v3809_v30, 4  ;;  %v3487_v1 = vld [vmem:[#allocation2 + $0x88] sm:$0xf]  ;;  %v12649_v51 = vld [vmem:[#allocation33_spill] sm:$0xff]  ;;  %v3488_v42 = vld [vmem:[#allocation2 + $0x8c] sm:$0x1]  ;;  %v11337_v8 = vpop.f32.mrf.mxu0  ;;  %6869 = vmatprep.mubr.bf16.mxu1 %v8888_v40 }
 0x1ee   : > { %12648 = vst [vmem:[#allocation15_spill] sm:$0xff] %v11331_v56  ;;  %4310 = vst [vmem:[#allocation3 + $0x180] sm:$0xf] %v4078_v58  ;;  %v3819_v14 = vor.u32 %v3818_v39, %v3814_v43  ;;  %v3824_v55 = vrot.slane %v3822_v24, 5  ;;  %vm12650_vm15 = vnez %v12649_v51  ;;  %v12651_v17 = vld [vmem:[#allocation34_spill] sm:$0xff]  ;;  %v4088_v50 = vrot.slane %v11312_v49, 4  ;;  %v11344_v58 = vpop.f32.mrf.mxu1 }
 0x1ef   : > { %4311 = vst [vmem:[#allocation3 + $0x1a4] sm:$0xf] %v4087_v12  ;;  %v3956_v18 = vsel %vm12650_vm15, %v3923_v21, 0  ;;  %vm12652_vm7 = vnez %v12651_v17  ;;  %v3815_v16 = vsel %vm9133_vm11, %v3810_v2, %v3814_v43  ;;  %v3925_v61 = vld [vmem:[#allocation2 + $0x4c] sm:$0xf]  ;;  %v3520_v21 = vsel %vm11077_vm4, %v3487_v1, 0 }
 0x1f0   : > { %v3957_v44 = vsel %vm12652_vm7, %v3924_v41, 0  ;;  %v4090_v36 = vshrl.u32 %v3956_v18, 16  ;;  %v4093_v29 = vshll.u32 %v3956_v18, 16  ;;  %v3820_v30 = vrot.slane %v3819_v14, 4  ;;  %3906 = vst [vmem:[#allocation3 + $0x404] sm:$0xf] %v3815_v16  ;;  %v11363_v45 = vpop.f32.mrf.mxu1 }
 0x1f1   : > { %v4099_v39 = vshrl.u32 %v3957_v44, 16  ;;  %v4102_v24 = vshll.u32 %v3957_v44, 16  ;;  %v3926_v41 = vld [vmem:[#allocation2 + $0x50] sm:$0xf]  ;;  %v3521_v43 = vsel %vm11071_vm1, %v3488_v42, 0  ;;  %v3828_v2 = vrot.slane %v3826_v11, 4  ;;  %v11358_v44 = vpop.f32.mrf.mxu0 }
 0x1f2   : > { %v8893_v12 = vld [vmem:[#allocation3 + $0x138] ss:$36 sps:$4 sm:$0xff]   ;;  %v4092_v40 = vrot.slane %v4090_v36, 7  ;;  %v3832_v49 = vshll.u32 %v3520_v21, 16  ;;  %v3825_v14 = vsel %vm9133_vm11, %v3820_v30, %v3824_v55  ;;  %v11354_v1 = vadd.f32 %v11195_v15, %v11169_v26  ;;  %v4397_v15 = vld [vmem:[#allocation2 + $0x18] sm:$0xf] }
 0x1f3   : > { %v8891_v46 = vld [vmem:[#allocation3 + $0x3bc] ss:$36 sps:$4 sm:$0xff]   ;;  %v11350_v18 = vrot.slane %v4099_v39, 7  ;;  %v8273_v17 = vadd.f32 %v11222_v52, %v11201_v9  ;;  %3907 = vst [vmem:[#allocation3 + $0x428] sm:$0xf] %v3825_v14  ;;  %v3829_v16 = vor.u32 %v3828_v2, %v3824_v55  ;;  %v3836_v39 = vshrl.u32 %v3520_v21, 16  ;;  %v11365_v9 = vpop.f32.mrf.mxu0  ;;  %6870 = vmatmul.mubr.bf16.gmra.mxu1 %v8893_v12 }
 0x1f4   : > { %v8894_v51 = vld [vmem:[#allocation3 + $0x3b8] ss:$36 sps:$4 sm:$0xff]   ;;  %v4095_v42 = vor.u32 %v4093_v29, %v4092_v40  ;;  %v4097_v11 = vrot.slane %v4092_v40, 4  ;;  %v3834_v36 = vrot.slane %v3832_v49, 5  ;;  %6780 = vmatprep.mubr.bf16.mxu0 %v8891_v46  ;;  %v3842_v60 = vshll.u32 %v3521_v43, 16  ;;  %v12655_v40 = vld [vmem:[#allocation38_spill] sm:$0xff] }
 0x1f5   : > { %v4396_v56 = vld [vmem:[#allocation2 + $0x14] sm:$0xf]  ;;  %v4104_v30 = vor.u32 %v4102_v24, %v11350_v18  ;;  %vm12654_vm15 = vnez %v12653_v48  ;;  %v8895_v52 = vld [vmem:[#allocation3 + $0x184] ss:$36 sps:$4 sm:$0xff]   ;;  %v3830_v55 = vrot.slane %v3829_v16, 4  ;;  %vm12656_vm7 = vnez %v12655_v40  ;;  %6781 = vmatmul.mubr.bf16.gmra.mxu0 %v8894_v51 }
 0x1f6   : > { %v3958_v26 = vsel %vm12654_vm15, %v3925_v61, 0  ;;  %v4096_v29 = vsel %vm9192_vm14, %v4088_v50, %v4095_v42  ;;  %v3959_v2 = vsel %vm12656_vm7, %v3926_v41, 0  ;;  %v12657_v49 = vld [vmem:[#allocation75_spill] sm:$0xff]  ;;  %v3838_v61 = vrot.slane %v3836_v39, 4  ;;  %v4398_v46 = vld [vmem:[#allocation2 + $0x1c] sm:$0xf]  ;;  %6877 = vmatprep.mubr.bf16.mxu1 %v8895_v52  ;;  %v11379_v42 = vpop.f32.mrf.mxu0 }
 0x1f7   : > { %v11372_v24 = vadd.f32 %v8273_v17, %v12657_v49  ;;  %v4105_v48 = vsel %vm9192_vm14, %v4097_v11, %v4104_v30  ;;  %4312 = vst [vmem:[#allocation3 + $0x1c8] sm:$0xf] %v4096_v29  ;;  %v3844_v21 = vrot.slane %v3842_v60, 5  ;;  %v4106_v43 = vrot.slane %v11350_v18, 4  ;;  %v12658_v11 = vld [vmem:[#allocation24_spill] sm:$0xff]  ;;  %v11385_v30 = vpop.f32.mrf.mxu1 }
 0x1f8   : > { %4313 = vst [vmem:[#allocation3 + $0x1ec] sm:$0xf] %v4105_v48  ;;  %v3835_v50 = vsel %vm9133_vm11, %v3830_v55, %v3834_v36  ;;  %v4108_v41 = vshrl.u32 %v3958_v26, 16  ;;  %v4111_v14 = vshll.u32 %v3958_v26, 16  ;;  %v4117_v17 = vshrl.u32 %v3959_v2, 16  ;;  %v12661_v55 = vld [vmem:[#allocation25_spill] sm:$0xff] }
 0x1f9   : > { %v3839_v12 = vor.u32 %v3838_v61, %v3834_v36  ;;  %3908 = vst [vmem:[#allocation3 + $0x44c] sm:$0xf] %v3835_v50  ;;  %v4120_v51 = vshll.u32 %v3959_v2, 16  ;;  %vm12659_vm15 = vcmp.ne.s16.totalorder %v12658_v11, 0  ;;  %v4430_v18 = vsel %vm9714_vm2, %v4397_v15, 0 }
 0x1fa   : > { %v4429_v16 = vsel %vm12659_vm15, %v4396_v56, 0  ;;  %v8899_v39 = vld [vmem:[#allocation3 + $0x180] ss:$36 sps:$4 sm:$0xff]   ;;  %v4110_v52 = vrot.slane %v4108_v41, 7  ;;  %v11387_v29 = vrot.slane %v4117_v17, 7  ;;  %vm12662_vm7 = vcmp.ne.s16.totalorder %v12661_v55, 0  ;;  %v11402_v17 = vpop.f32.mrf.mxu0 }
 0x1fb   : > { %v4431_v26 = vsel %vm12662_vm7, %v4398_v46, 0  ;;  %v4463_v40 = vshrl.u32 %v4429_v16, 16  ;;  %v8897_v49 = vld [vmem:[#allocation3 + $0x404] ss:$36 sps:$4 sm:$0xff]   ;;  %v3840_v48 = vrot.slane %v3839_v12, 4  ;;  %v11393_v2 = vadd.f32 %v11233_v35, %v11215_v3  ;;  %6878 = vmatmul.mubr.bf16.gmra.mxu1 %v8899_v39 }
 0x1fc   : > { %v8900_v36 = vld [vmem:[#allocation3 + $0x400] ss:$36 sps:$4 sm:$0xff]   ;;  %v8276_v56 = vadd.f32 %v11252_v32, %v11239_v4  ;;  %v11399_v15 = vadd.f32 %v11263_v6, %v11243_v57  ;;  %v4113_v61 = vor.u32 %v4111_v14, %v4110_v52  ;;  %v4115_v50 = vrot.slane %v4110_v52, 4  ;;  %6788 = vmatprep.mubr.bf16.mxu0 %v8897_v49  ;;  %v3927_v60 = vld [vmem:[#allocation2 + $0x54] sm:$0xf]  ;;  %v11406_v32 = vpop.f32.mrf.mxu1 }
 0x1fd   : > { %v4122_v41 = vor.u32 %v4120_v51, %v11387_v29  ;;  %v4465_v46 = vrot.slane %v4463_v40, 4  ;;  %v3845_v12 = vsel %vm9133_vm11, %v3840_v48, %v3844_v21  ;;  %v4466_v3 = vshll.u32 %v4429_v16, 16  ;;  %v3928_v51 = vld [vmem:[#allocation2 + $0x58] sm:$0xf]  ;;  %6789 = vmatmul.mubr.bf16.gmra.mxu0 %v8900_v36  ;;  %v8901_v52 = vld [vmem:[#allocation3 + $0x1cc] ss:$36 sps:$4 sm:$0xff]   ;;  %v11421_v36 = vpop.f32.mrf.mxu0 }
 0x1fe   : > { %v4472_v35 = vshll.u32 %v4430_v18, 16  ;;  %v4476_v11 = vshrl.u32 %v4430_v18, 16  ;;  %3909 = vst [vmem:[#allocation3 + $0x470] sm:$0xf] %v3845_v12  ;;  %v4114_v4 = vsel %vm9192_vm14, %v4106_v43, %v4113_v61  ;;  %v4482_v6 = vshll.u32 %v4431_v26, 16  ;;  %6885 = vmatprep.mubr.bf16.mxu1 %v8901_v52 }
 0x1ff   : > { %v4123_v57 = vsel %vm9192_vm14, %v4115_v50, %v4122_v41  ;;  %v4486_v14 = vshrl.u32 %v4431_v26, 16  ;;  %4314 = vst [vmem:[#allocation3 + $0x210] sm:$0xf] %v4114_v4  ;;  %v4468_v21 = vrot.slane %v4466_v3, 5  ;;  %v4401_v16 = vld [vmem:[#allocation2 + $0x28] sm:$0xf]  ;;  %v11413_v18 = vadd.f32 %v8276_v56, %v11083_v19  ;;  %v11428_v41 = vpop.f32.mrf.mxu1  ;;  %v11434_v61 = vpop.f32.mrf.mxu0 }
 0x200   : > { %4315 = vst [vmem:[#allocation3 + $0x234] sm:$0xf] %v4123_v57  ;;  %v8279_v55 = vadd.f32 %v11287_v22, %v11269_v62  ;;  %v11419_v43 = vadd.f32 %v11303_v54, %v11275_v25  ;;  %v4474_v40 = vrot.slane %v4472_v35, 5  ;;  %v4478_v26 = vrot.slane %v4476_v11, 4  ;;  %v12664_v19 = vld [vmem:[#allocation42_spill] sm:$0xff] }
 0x201   : > { %v4484_v49 = vrot.slane %v4482_v6, 5  ;;  %v4488_v39 = vrot.slane %v4486_v14, 4  ;;  %v4469_v48 = vor.u32 %v4468_v21, %v4465_v46  ;;  %v3960_v50 = vsel %vm10138_vm10, %v3927_v60, 0  ;;  %v4402_v22 = vld [vmem:[#allocation2 + $0x2c] sm:$0xf] }
 0x202   : > { %vm12665_vm2 = vnez %v12664_v19  ;;  %v4124_v62 = vrot.slane %v11387_v29, 4  ;;  %v4479_v25 = vor.u32 %v4478_v26, %v4474_v40  ;;  %v4126_v12 = vshrl.u32 %v3960_v50, 16  ;;  %v8906_v35 = vld [vmem:[#allocation3 + $0x1c8] ss:$36 sps:$4 sm:$0xff]   ;;  %v4403_v21 = vld [vmem:[#allocation2 + $0x30] sm:$0xf] }
 0x203   : > { %v3961_v56 = vsel %vm12665_vm2, %v3928_v51, 0  ;;  %v4489_v54 = vor.u32 %v4488_v39, %v4484_v49  ;;  %v4129_v3 = vshll.u32 %v3960_v50, 16  ;;  %v4470_v11 = vrot.slane %v4469_v48, 4  ;;  %v12667_v51 = vld [vmem:[#allocation35_spill] sm:$0xff]  ;;  %v8907_v39 = vld [vmem:[#allocation3 + $0x448] ss:$36 sps:$4 sm:$0xff]   ;;  %6886 = vmatmul.mubr.bf16.gmra.mxu1 %v8906_v35 }
 0x204   : > { %v4135_v4 = vshrl.u32 %v3961_v56, 16  ;;  %v4138_v57 = vshll.u32 %v3961_v56, 16  ;;  %v4434_v6 = vsel %vm9974_vm0, %v4401_v16, 0  ;;  %v4480_v60 = vrot.slane %v4479_v25, 4  ;;  %v11445_v56 = vpop.f32.mrf.mxu1  ;;  %v8908_v25 = vld [vmem:[#allocation3 + $0x214] ss:$36 sps:$4 sm:$0xff]  }
 0x205   : > { %v4490_v14 = vrot.slane %v4489_v54, 4  ;;  %v4128_v52 = vrot.slane %v4126_v12, 7  ;;  %vm12668_vm10 = vcmp.ne.s16.totalorder %v12667_v51, 0  ;;  %v8904_v26 = vld [vmem:[#allocation3 + $0x44c] ss:$36 sps:$4 sm:$0xff]   ;;  %v4475_v50 = vsel %vm9133_vm11, %v4470_v11, %v4474_v40  ;;  %6893 = vmatprep.mubr.bf16.mxu1 %v8908_v25  ;;  %v11458_v51 = vpop.f32.mrf.mxu0 }
 0x206   : > { %v4435_v29 = vsel %vm12668_vm10, %v4402_v22, 0  ;;  %v11438_v48 = vrot.slane %v4135_v4, 7  ;;  %v11441_v19 = vadd.f32 %v8279_v55, %v11091_v31  ;;  %v8282_v16 = vadd.f32 %v11324_v33, %v11310_v63  ;;  %v12670_v54 = vld [vmem:[#allocation30_spill] sm:$0xff]  ;;  %4818 = vst [vmem:[#allocation3 + $0x20] sm:$0xf] %v4475_v50  ;;  %6796 = vmatprep.mubr.bf16.mxu0 %v8904_v26  ;;  %v12671_v63 = vld [vmem:[#allocation29_spill] sm:$0xff]  ;;  %v11462_v25 = vpop.f32.mrf.mxu1 }
 0x207   : > { %v4485_v22 = vsel %vm9133_vm11, %v4480_v60, %v4484_v49  ;;  %v4495_v12 = vsel %vm9133_vm11, %v4490_v14, %v12670_v54  ;;  %v4131_v40 = vor.u32 %v4129_v3, %v4128_v52  ;;  %v4133_v11 = vrot.slane %v4128_v52, 4  ;;  %v4404_v46 = vld [vmem:[#allocation2 + $0x34] sm:$0xf]  ;;  %6797 = vmatmul.mubr.bf16.gmra.mxu0 %v8907_v39  ;;  %v12672_v3 = vld [vmem:[#allocation40_spill] sm:$0xff]  ;;  %v3930_v39 = vld [vmem:[#allocation2 + $0x60] sm:$0xf] }
 0x208   : > { %12669 = vst [vmem:[#allocation16_spill] sm:$0xff] %v11441_v19  ;;  %4819 = vst [vmem:[#allocation3 + $0x44] sm:$0xf] %v4485_v22  ;;  %v4140_v31 = vor.u32 %v4138_v57, %v11438_v48  ;;  %v4506_v33 = vshrl.u32 %v12671_v63, 16  ;;  %v4512_v55 = vshll.u32 %v4434_v6, 16  ;;  %v4516_v4 = vshrl.u32 %v4434_v6, 16 }
 0x209   : > { %4820 = vst [vmem:[#allocation3 + $0x68] sm:$0xf] %v4495_v12  ;;  %v4132_v49 = vsel %vm9192_vm14, %v4124_v62, %v4131_v40  ;;  %v4522_v60 = vshll.u32 %v4435_v29, 16  ;;  %v4526_v14 = vshrl.u32 %v4435_v29, 16  ;;  %vm12673_vm0 = vnez %v12672_v3  ;;  %v3929_v35 = vld [vmem:[#allocation2 + $0x5c] sm:$0xf] }
 0x20a   : > { %v4436_v52 = vsel %vm12673_vm0, %v4403_v21, 0  ;;  %v4141_v57 = vsel %vm9192_vm14, %v4133_v11, %v4140_v31  ;;  %4316 = vst [vmem:[#allocation3 + $0x258] sm:$0xf] %v4132_v49  ;;  %v4508_v26 = vrot.slane %v4506_v33, 4  ;;  %v4514_v6 = vrot.slane %v4512_v55, 5  ;;  %v12674_v29 = vld [vmem:[#allocation39_spill] sm:$0xff] }
 0x20b   : > { %v4518_v50 = vrot.slane %v4516_v4, 4  ;;  %4317 = vst [vmem:[#allocation3 + $0x27c] sm:$0xf] %v4141_v57  ;;  %v4524_v62 = vrot.slane %v4522_v60, 5  ;;  %v4528_v22 = vrot.slane %v4526_v14, 4  ;;  %vm12675_vm15 = vcmp.ne.s16.totalorder %v12674_v29, 0  ;;  %v11474_v14 = vpop.f32.mrf.mxu0 }
 0x20c   : > { %v11466_v54 = vsel %vm12675_vm15, %v4404_v46, 0  ;;  %v4532_v21 = vshll.u32 %v4436_v52, 16  ;;  %v8910_v12 = vld [vmem:[#allocation3 + $0x210] ss:$36 sps:$4 sm:$0xff]   ;;  %v4509_v40 = vor.u32 %v4508_v26, %v12598_v59  ;;  %v4536_v11 = vshrl.u32 %v4436_v52, 16  ;;  %v12676_v4 = vld [vmem:[#allocation45_spill] sm:$0xff]  ;;  %v11478_v26 = vpop.f32.mrf.mxu1 }
 0x20d   : > { %v4519_v63 = vor.u32 %v4518_v50, %v4514_v6  ;;  %v4542_v31 = vshll.u32 %v11466_v54, 16  ;;  %v4529_v33 = vor.u32 %v4528_v22, %v4524_v62  ;;  %vm12677_vm7 = vnez %v12676_v4  ;;  %v12678_v3 = vld [vmem:[#allocation46_spill] sm:$0xff]  ;;  %v4405_v59 = vld [vmem:[#allocation2 + $0x38] sm:$0xf]  ;;  %6894 = vmatmul.mubr.bf16.gmra.mxu1 %v8910_v12 }
 0x20e   : > { %v4534_v55 = vrot.slane %v4532_v21, 5  ;;  %v3962_v49 = vsel %vm12677_vm7, %v3929_v35, 0  ;;  %vm12679_vm2 = vnez %v12678_v3  ;;  %v4510_v46 = vrot.slane %v4509_v40, 4  ;;  %v12682_v3 = vld [vmem:[#allocation44_spill] sm:$0xff] }
 0x20f   : > { %v3963_v60 = vsel %vm12679_vm2, %v3930_v39, 0  ;;  %v4520_v57 = vrot.slane %v4519_v63, 4  ;;  %v4538_v29 = vrot.slane %v4536_v11, 4  ;;  %v11476_v19 = vrot.slane %v4542_v31, 5  ;;  %v8911_v52 = vld [vmem:[#allocation3 + $0x20] ss:$36 sps:$4 sm:$0xff]  }
 0x210   : > { %v11481_v50 = vadd.f32 %v8282_v16, %v11139_v10  ;;  %v11485_v35 = vadd.f32 %v11337_v8, %v11321_v7  ;;  %v8285_v39 = vadd.f32 %v11363_v45, %v11344_v58  ;;  %v11491_v22 = vadd.f32 %v11365_v9, %v11358_v44  ;;  %v8912_v21 = vld [vmem:[#allocation3 + $0x68] ss:$36 sps:$4 sm:$0xff]   ;;  %v4406_v11 = vld [vmem:[#allocation2 + $0x3c] sm:$0xf]  ;;  %8613 = vmatprep.mubr.bf16.mxu0 %v8911_v52  ;;  %v11498_v44 = vpop.f32.mrf.mxu0  ;;  %v8915_v9 = vld [vmem:[#allocation3 + $0x25c] ss:$36 sps:$4 sm:$0xff]  }
 0x211   : > { %v4515_v40 = vsel %vm9133_vm11, %v4510_v46, %v4514_v6  ;;  %v4525_v10 = vsel %vm9133_vm11, %v4520_v57, %v4524_v62  ;;  %v4530_v16 = vrot.slane %v4529_v33, 4  ;;  %v4539_v63 = vor.u32 %v4538_v29, %v4534_v55  ;;  %8614 = vmatmul.mubr.bf16.vlgmr.msra.gmra.mxu0 %v8912_v21  ;;  %v11507_v33 = vpop.f32.mrf.mxu1  ;;  %v4407_v57 = vld [vmem:[#allocation2 + $0x40] sm:$0xf]  ;;  %6901 = vmatprep.mubr.bf16.mxu1 %v8915_v9  ;;  %v4408_v9 = vld [vmem:[#allocation2 + $0x44] sm:$0xf] }
 0x212   : > { %12680 = vst [vmem:[#allocation19_spill] sm:$0xff] %v11481_v50  ;;  %4822 = vst [vmem:[#allocation3 + $0xb0] sm:$0xf] %v4515_v40  ;;  %v4142_v45 = vrot.slane %v11438_v48, 4  ;;  %v4144_v7 = vshrl.u32 %v3962_v49, 16  ;;  %v4147_v8 = vshll.u32 %v3962_v49, 16  ;;  %v11503_v62 = vadd.f32 %v8285_v39, %v11145_v20  ;;  %v11513_v29 = vpop.f32.mrf.mxu0 }
 0x213   : > { %4823 = vst [vmem:[#allocation3 + $0xd4] sm:$0xf] %v4525_v10  ;;  %v4153_v58 = vshrl.u32 %v3963_v60, 16  ;;  %v4535_v6 = vsel %vm9133_vm11, %v4530_v16, %v4534_v55  ;;  %v4540_v12 = vrot.slane %v4539_v63, 4  ;;  %v8288_v31 = vadd.f32 %v11406_v32, %v11385_v30  ;;  %v8913_v55 = vld [vmem:[#allocation3 + $0x258] ss:$36 sps:$4 sm:$0xff]  }
 0x214   : > { %12681 = vst [vmem:[#allocation20_spill] sm:$0xff] %v11503_v62  ;;  %4824 = vst [vmem:[#allocation3 + $0xf8] sm:$0xf] %v4535_v6  ;;  %v4146_v48 = vrot.slane %v4144_v7, 7  ;;  %v4156_v49 = vshll.u32 %v3963_v60, 16  ;;  %vm12683_vm10 = vnez %v12682_v3  ;;  %v12684_v30 = vld [vmem:[#allocation43_spill] sm:$0xff]  ;;  %v11522_v10 = vpop.f32.mrf.mxu0  ;;  %v11524_v6 = vpop.f32.mrf.mxu1 }
 0x215   : > { %v11509_v4 = vrot.slane %v4153_v58, 7  ;;  %v4438_v46 = vsel %vm12683_vm10, %v4405_v59, 0  ;;  %v4545_v20 = vsel %vm9133_vm11, %v4540_v12, %v11476_v19  ;;  %vm12685_vm0 = vcmp.ne.s16.totalorder %v12684_v30, 0  ;;  %v12686_v12 = vld [vmem:[#allocation48_spill] sm:$0xff]  ;;  %v3932_v3 = vld [vmem:[#allocation2 + $0x68] sm:$0xf]  ;;  %6902 = vmatmul.mubr.bf16.gmra.mxu1 %v8913_v55 }
 0x216   : > { %v4439_v32 = vsel %vm12685_vm0, %v4406_v11, 0  ;;  %v4546_v52 = vshrl.u32 %v11466_v54, 16  ;;  %v4552_v39 = vshll.u32 %v4438_v46, 16  ;;  %4825 = vst [vmem:[#allocation3 + $0x11c] sm:$0xf] %v4545_v20  ;;  %v4149_v60 = vor.u32 %v4147_v8, %v4146_v48 }
 0x217   : > { %v4151_v21 = vrot.slane %v4146_v48, 4  ;;  %v4158_v59 = vor.u32 %v4156_v49, %v11509_v4  ;;  %v4556_v40 = vshrl.u32 %v4438_v46, 16  ;;  %v4562_v7 = vshll.u32 %v4439_v32, 16  ;;  %v3931_v49 = vld [vmem:[#allocation2 + $0x64] sm:$0xf] }
 0x218   : > { %v4548_v16 = vrot.slane %v4546_v52, 4  ;;  %v4554_v63 = vrot.slane %v4552_v39, 5  ;;  %v4566_v58 = vshrl.u32 %v4439_v32, 16  ;;  %v4150_v11 = vsel %vm9192_vm14, %v4142_v45, %v4149_v60  ;;  %v11542_v52 = vpop.f32.mrf.mxu0  ;;  %v12689_v60 = vld [vmem:[#allocation47_spill] sm:$0xff] }
 0x219   : > { %v4159_v54 = vsel %vm9192_vm14, %v4151_v21, %v4158_v59  ;;  %v4558_v8 = vrot.slane %v4556_v40, 4  ;;  %vm12687_vm15 = vnez %v12686_v12  ;;  %4318 = vst [vmem:[#allocation3 + $0x2a0] sm:$0xf] %v4150_v11  ;;  %v11534_v30 = vadd.f32 %v8288_v31, %v11178_v27  ;;  %v11546_v40 = vpop.f32.mrf.mxu1 }
 0x21a   : > { %v4440_v48 = vsel %vm12687_vm15, %v4407_v57, 0  ;;  %v8916_v46 = vld [vmem:[#allocation3 + $0xb0] ss:$36 sps:$4 sm:$0xff]   ;;  %4319 = vst [vmem:[#allocation3 + $0x2c4] sm:$0xf] %v4159_v54  ;;  %v4549_v20 = vor.u32 %v4548_v16, %v11476_v19  ;;  %v11538_v45 = vadd.f32 %v11402_v17, %v11379_v42  ;;  %v8291_v32 = vadd.f32 %v11445_v56, %v11428_v41  ;;  %v12691_v16 = vld [vmem:[#allocation49_spill] sm:$0xff] }
 0x21b   : > { %12688 = vst [vmem:[#allocation22_spill] sm:$0xff] %v11534_v30  ;;  %v4559_v57 = vor.u32 %v4558_v8, %v4554_v63  ;;  %v4564_v39 = vrot.slane %v4562_v7, 5  ;;  %v4568_v55 = vrot.slane %v4566_v58, 4  ;;  %vm12690_vm7 = vcmp.ne.s16.totalorder %v12689_v60, 0  ;;  %8617 = vmatprep.mubr.bf16.mxu0 %v8916_v46  ;;  %v12693_v56 = vld [vmem:[#allocation50_spill] sm:$0xff] }
 0x21c   : > { %v4441_v21 = vsel %vm12690_vm7, %v4408_v9, 0  ;;  %v4550_v19 = vrot.slane %v4549_v20, 4  ;;  %v4572_v59 = vshll.u32 %v4440_v48, 16  ;;  %v4576_v27 = vshrl.u32 %v4440_v48, 16  ;;  %v4409_v7 = vld [vmem:[#allocation2 + $0x48] sm:$0xf]  ;;  %v11557_v48 = vpop.f32.mrf.mxu0 }
 0x21d   : > { %v4582_v31 = vshll.u32 %v4441_v21, 16  ;;  %v4560_v42 = vrot.slane %v4559_v57, 4  ;;  %v4569_v17 = vor.u32 %v4568_v55, %v4564_v39  ;;  %vm12692_vm2 = vnez %v12691_v16  ;;  %v8917_v58 = vld [vmem:[#allocation3 + $0xf8] ss:$36 sps:$4 sm:$0xff]   ;;  %v4410_v57 = vld [vmem:[#allocation2 + $0x4c] sm:$0xf] }
 0x21e   : > { %v3964_v41 = vsel %vm12692_vm2, %v3931_v49, 0  ;;  %vm12694_vm10 = vnez %v12693_v56  ;;  %v4555_v9 = vsel %vm9133_vm11, %v4550_v19, %v4554_v63  ;;  %v4574_v54 = vrot.slane %v4572_v59, 5  ;;  %8618 = vmatmul.mubr.bf16.gmra.mxu0 %v8917_v58  ;;  %v11562_v59 = vpop.f32.mrf.mxu1  ;;  %v12698_v56 = vld [vmem:[#allocation51_spill] sm:$0xff] }
 0x21f   : > { %v3965_v11 = vsel %vm12694_vm10, %v3932_v3, 0  ;;  %v4578_v8 = vrot.slane %v4576_v27, 4  ;;  %v11555_v12 = vadd.f32 %v8291_v32, %v11211_v34  ;;  %v4565_v46 = vsel %vm9133_vm11, %v4560_v42, %v4564_v39  ;;  %4826 = vst [vmem:[#allocation3 + $0x140] sm:$0xf] %v4555_v9  ;;  %v12696_v39 = vld [vmem:[#allocation52_spill] sm:$0xff]  ;;  %v11576_v9 = vpop.f32.mrf.mxu0 }
 0x220   : > { %v4570_v20 = vrot.slane %v4569_v17, 4  ;;  %v4584_v49 = vrot.slane %v4582_v31, 5  ;;  %v4160_v3 = vrot.slane %v11509_v4, 4  ;;  %4827 = vst [vmem:[#allocation3 + $0x164] sm:$0xf] %v4565_v46  ;;  %v4162_v63 = vshrl.u32 %v3964_v41, 16 }
 0x221   : > { %12695 = vst [vmem:[#allocation23_spill] sm:$0xff] %v11555_v12  ;;  %v4579_v55 = vor.u32 %v4578_v8, %v4574_v54  ;;  %v4165_v60 = vshll.u32 %v3964_v41, 16  ;;  %v4171_v19 = vshrl.u32 %v3965_v11, 16  ;;  %v8918_v34 = vld [vmem:[#allocation3 + $0x2a0] ss:$36 sps:$4 sm:$0xff]   ;;  %v4174_v27 = vshll.u32 %v3965_v11, 16  ;;  %v11589_v12 = vpop.f32.mrf.mxu0 }
 0x222   : > { %v4575_v32 = vsel %vm9133_vm11, %v4570_v20, %v4574_v54  ;;  %vm12697_vm0 = vnez %v12696_v39  ;;  %v11570_v4 = vadd.f32 %v11434_v61, %v11421_v36  ;;  %v8920_v31 = vld [vmem:[#allocation3 + $0x2a4] ss:$36 sps:$4 sm:$0xff]   ;;  %v4164_v16 = vrot.slane %v4162_v63, 7  ;;  %v4412_v63 = vld [vmem:[#allocation2 + $0x54] sm:$0xf] }
 0x223   : > { %v4442_v42 = vsel %vm12697_vm0, %v4409_v7, 0  ;;  %v4580_v17 = vrot.slane %v4579_v55, 4  ;;  %4828 = vst [vmem:[#allocation3 + $0x188] sm:$0xf] %v4575_v32  ;;  %v11572_v41 = vrot.slane %v4171_v19, 7  ;;  %vm12699_vm15 = vcmp.ne.s16.totalorder %v12698_v56, 0  ;;  %6909 = vmatprep.mubr.bf16.mxu1 %v8920_v31  ;;  %v11581_v19 = vpop.f32.mrf.mxu1 }
 0x224   : > { %v4443_v58 = vsel %vm12699_vm15, %v4410_v57, 0  ;;  %v4586_v54 = vshrl.u32 %v4441_v21, 16  ;;  %v4592_v11 = vshll.u32 %v4442_v42, 16  ;;  %v4596_v8 = vshrl.u32 %v4442_v42, 16  ;;  %v4411_v7 = vld [vmem:[#allocation2 + $0x50] sm:$0xf]  ;;  %6910 = vmatmul.mubr.bf16.gmra.mxu1 %v8918_v34 }
 0x225   : > { %v4602_v46 = vshll.u32 %v4443_v58, 16  ;;  %v4585_v36 = vsel %vm9133_vm11, %v4580_v17, %v4584_v49  ;;  %v4167_v61 = vor.u32 %v4165_v60, %v4164_v16  ;;  %v4169_v20 = vrot.slane %v4164_v16, 4  ;;  %v3933_v42 = vld [vmem:[#allocation2 + $0x6c] sm:$0xf]  ;;  %v12700_v16 = vld [vmem:[#allocation55_spill] sm:$0xff] }
 0x226   : > { %v4176_v55 = vor.u32 %v4174_v27, %v11572_v41  ;;  %4829 = vst [vmem:[#allocation3 + $0x1ac] sm:$0xf] %v4585_v36  ;;  %v4588_v57 = vrot.slane %v4586_v54, 4  ;;  %v4594_v32 = vrot.slane %v4592_v11, 5  ;;  %v4598_v21 = vrot.slane %v4596_v8, 4  ;;  %v12702_v8 = vld [vmem:[#allocation54_spill] sm:$0xff] }
 0x227   : > { %v4604_v39 = vrot.slane %v4602_v46, 5  ;;  %v4168_v31 = vsel %vm9192_vm14, %v4160_v3, %v4167_v61  ;;  %v4606_v60 = vshrl.u32 %v4443_v58, 16  ;;  %vm12701_vm7 = vnez %v12700_v16  ;;  %v3934_v56 = vld [vmem:[#allocation2 + $0x70] sm:$0xf]  ;;  %v8921_v34 = vld [vmem:[#allocation3 + $0x140] ss:$36 sps:$4 sm:$0xff]  }
 0x228   : > { %v4177_v17 = vsel %vm9192_vm14, %v4169_v20, %v4176_v55  ;;  %v4444_v27 = vsel %vm12701_vm7, %v4411_v7, 0  ;;  %4320 = vst [vmem:[#allocation3 + $0x2e8] sm:$0xf] %v4168_v31  ;;  %v4589_v54 = vor.u32 %v4588_v57, %v4584_v49  ;;  %v4599_v11 = vor.u32 %v4598_v21, %v4594_v32  ;;  %v12704_v20 = vld [vmem:[#allocation53_spill] sm:$0xff]  ;;  %v4413_v55 = vld [vmem:[#allocation2 + $0x58] sm:$0xf]  ;;  %v11595_v7 = vpop.f32.mrf.mxu1  ;;  %8621 = vmatprep.mubr.bf16.mxu0 %v8921_v34 }
 0x229   : > { %4321 = vst [vmem:[#allocation3 + $0x30c] sm:$0xf] %v4177_v17  ;;  %vm12703_vm2 = vcmp.ne.s16.totalorder %v12702_v8, 0  ;;  %v4612_v36 = vshll.u32 %v4444_v27, 16  ;;  %v4608_v3 = vrot.slane %v4606_v60, 4  ;;  %v4616_v61 = vshrl.u32 %v4444_v27, 16  ;;  %v11602_v8 = vpop.f32.mrf.mxu0 }
 0x22a   : > { %v4445_v46 = vsel %vm12703_vm2, %v4412_v63, 0  ;;  %vm12705_vm10 = vnez %v12704_v20  ;;  %v4590_v16 = vrot.slane %v4589_v54, 4  ;;  %v4600_v62 = vrot.slane %v4599_v11, 4  ;;  %v12706_v17 = vld [vmem:[#allocation8_spill] sm:$0xff] }
 0x22b   : > { %v4622_v30 = vshll.u32 %v4445_v46, 16  ;;  %v3966_v58 = vsel %vm12705_vm10, %v3933_v42, 0  ;;  %v4614_v31 = vrot.slane %v4612_v36, 5  ;;  %vm12707_vm0 = vnez %v12706_v17  ;;  %v4414_v27 = vld [vmem:[#allocation2 + $0x5c] sm:$0xf] }
 0x22c   : > { %v3967_v49 = vsel %vm12707_vm0, %v3934_v56, 0  ;;  %v4609_v57 = vor.u32 %v4608_v3, %v4604_v39  ;;  %v4618_v21 = vrot.slane %v4616_v61, 4  ;;  %v4178_v60 = vrot.slane %v11572_v41, 4  ;;  %v11610_v3 = vpop.f32.mrf.mxu1 }
 0x22d   : > { %v11599_v63 = vrot.slane %v4622_v30, 5  ;;  %v4595_v42 = vsel %vm9133_vm11, %v4590_v16, %v4594_v32  ;;  %v4605_v34 = vsel %vm9133_vm11, %v4600_v62, %v4604_v39  ;;  %v4180_v54 = vshrl.u32 %v3966_v58, 16  ;;  %v8922_v36 = vld [vmem:[#allocation3 + $0x188] ss:$36 sps:$4 sm:$0xff]   ;;  %v12709_v16 = vld [vmem:[#allocation56_spill] sm:$0xff] }
 0x22e   : > { %v4183_v11 = vshll.u32 %v3966_v58, 16  ;;  %v4610_v20 = vrot.slane %v4609_v57, 4  ;;  %4830 = vst [vmem:[#allocation3 + $0x1d0] sm:$0xf] %v4595_v42  ;;  %4831 = vst [vmem:[#allocation3 + $0x1f4] sm:$0xf] %v4605_v34  ;;  %v4619_v56 = vor.u32 %v4618_v21, %v4614_v31  ;;  %v8294_v41 = vadd.f32 %v11478_v26, %v11462_v25  ;;  %8622 = vmatmul.mubr.bf16.gmra.mxu0 %v8922_v36  ;;  %v11623_v26 = vpop.f32.mrf.mxu0 }
 0x22f   : > { %v4189_v30 = vshrl.u32 %v3967_v49, 16  ;;  %v4182_v61 = vrot.slane %v4180_v54, 7  ;;  %v4192_v17 = vshll.u32 %v3967_v49, 16  ;;  %v4446_v32 = vsel %vm10500_vm13, %v4413_v55, 0  ;;  %v4415_v39 = vld [vmem:[#allocation2 + $0x60] sm:$0xf] }
 0x230   : > { %vm12710_vm15 = vcmp.ne.s16.totalorder %v12709_v16, 0  ;;  %v8923_v58 = vld [vmem:[#allocation3 + $0x2e8] ss:$36 sps:$4 sm:$0xff]   ;;  %v4615_v57 = vsel %vm9133_vm11, %v4610_v20, %v4614_v31  ;;  %v4620_v21 = vrot.slane %v4619_v56, 4  ;;  %v11621_v25 = vadd.f32 %v8294_v41, %v11283_v47 }
 0x231   : > { %v4447_v62 = vsel %vm12710_vm15, %v4414_v27, 0  ;;  %v11618_v42 = vrot.slane %v4189_v30, 7  ;;  %v8925_v49 = vld [vmem:[#allocation3 + $0x2ec] ss:$36 sps:$4 sm:$0xff]   ;;  %4832 = vst [vmem:[#allocation3 + $0x218] sm:$0xf] %v4615_v57  ;;  %v4185_v50 = vor.u32 %v4183_v11, %v4182_v61  ;;  %v11629_v30 = vpop.f32.mrf.mxu1 }
 0x232   : > { %v4187_v55 = vrot.slane %v4182_v61, 4  ;;  %v4626_v34 = vshrl.u32 %v4445_v46, 16  ;;  %v4632_v27 = vshll.u32 %v4446_v32, 16  ;;  %v4625_v54 = vsel %vm9133_vm11, %v4620_v21, %v11599_v63  ;;  %v4416_v56 = vld [vmem:[#allocation2 + $0x64] sm:$0xf]  ;;  %6917 = vmatprep.mubr.bf16.mxu1 %v8925_v49  ;;  %v11637_v49 = vpop.f32.mrf.mxu0 }
 0x233   : > { %v4194_v31 = vor.u32 %v4192_v17, %v11618_v42  ;;  %v4636_v36 = vshrl.u32 %v4446_v32, 16  ;;  %v4642_v20 = vshll.u32 %v4447_v62, 16  ;;  %4833 = vst [vmem:[#allocation3 + $0x23c] sm:$0xf] %v4625_v54  ;;  %v4186_v47 = vsel %vm9192_vm14, %v4178_v60, %v4185_v50  ;;  %v3935_v61 = vld [vmem:[#allocation2 + $0x74] sm:$0xf]  ;;  %6918 = vmatmul.mubr.bf16.gmra.mxu1 %v8923_v58 }
 0x234   : > { %v4628_v11 = vrot.slane %v4626_v34, 4  ;;  %v4634_v41 = vrot.slane %v4632_v27, 5  ;;  %v4646_v46 = vshrl.u32 %v4447_v62, 16  ;;  %4322 = vst [vmem:[#allocation3 + $0x330] sm:$0xf] %v4186_v47  ;;  %v4448_v57 = vsel %vm10569_vm5, %v4415_v39, 0  ;;  %v11650_v27 = vpop.f32.mrf.mxu1 }
 0x235   : > { %v4195_v16 = vsel %vm9192_vm14, %v4187_v55, %v4194_v31  ;;  %v4638_v17 = vrot.slane %v4636_v36, 4  ;;  %v4644_v32 = vrot.slane %v4642_v20, 5  ;;  %v3936_v21 = vld [vmem:[#allocation2 + $0x78] sm:$0xf]  ;;  %v8926_v54 = vld [vmem:[#allocation3 + $0x1d0] ss:$36 sps:$4 sm:$0xff]   ;;  %v11642_v62 = vadd.f32 %v11474_v14, %v11458_v51 }
 0x236   : > { %4323 = vst [vmem:[#allocation3 + $0x354] sm:$0xf] %v4195_v16  ;;  %v4629_v60 = vor.u32 %v4628_v11, %v11599_v63  ;;  %v8297_v58 = vadd.f32 %v11524_v6, %v11507_v33  ;;  %v8367_v50 = vadd.f32 %v11513_v29, %v11498_v44  ;;  %v4648_v5 = vrot.slane %v4646_v46, 4  ;;  %8625 = vmatprep.mubr.bf16.mxu0 %v8926_v54  ;;  %v12712_v51 = vld [vmem:[#allocation10_spill] sm:$0xff]  ;;  %v12714_v47 = vld [vmem:[#allocation9_spill] sm:$0xff]  ;;  %v11656_v11 = vpop.f32.mrf.mxu0 }
 0x237   : > { %v4639_v55 = vor.u32 %v4638_v17, %v4634_v41  ;;  %vm12711_vm13 = vcmp.ne.s16.totalorder %v10562_v28, 0  ;;  %v4652_v34 = vshll.u32 %v4448_v57, 16  ;;  %v4656_v31 = vshrl.u32 %v4448_v57, 16  ;;  %v4417_v29 = vld [vmem:[#allocation2 + $0x68] sm:$0xf] }
 0x238   : > { %v4449_v39 = vsel %vm12711_vm13, %v4416_v56, 0  ;;  %v4630_v63 = vrot.slane %v4629_v60, 4  ;;  %vm12713_vm5 = vnez %v12712_v51  ;;  %v4649_v33 = vor.u32 %v4648_v5, %v4644_v32  ;;  %v4418_v17 = vld [vmem:[#allocation2 + $0x6c] sm:$0xf] }
 0x239   : > { %v4662_v36 = vshll.u32 %v4449_v39, 16  ;;  %v3968_v14 = vsel %vm12713_vm5, %v3935_v61, 0  ;;  %v4640_v20 = vrot.slane %v4639_v55, 4  ;;  %v4654_v6 = vrot.slane %v4652_v34, 5  ;;  %v11668_v55 = vpop.f32.mrf.mxu1 }
 0x23a   : > { %vm12715_vm7 = vnez %v12714_v47  ;;  %v4635_v28 = vsel %vm9133_vm11, %v4630_v63, %v4634_v41  ;;  %v4658_v56 = vrot.slane %v4656_v31, 4  ;;  %v4196_v16 = vrot.slane %v11618_v42, 4  ;;  %v8927_v57 = vld [vmem:[#allocation3 + $0x218] ss:$36 sps:$4 sm:$0xff]  }
 0x23b   : > { %v3969_v44 = vsel %vm12715_vm7, %v3936_v21, 0  ;;  %v11660_v46 = vrot.slane %v4662_v36, 5  ;;  %v4645_v61 = vsel %vm9133_vm11, %v4640_v20, %v4644_v32  ;;  %v4650_v54 = vrot.slane %v4649_v33, 4  ;;  %4834 = vst [vmem:[#allocation3 + $0x260] sm:$0xf] %v4635_v28  ;;  %8626 = vmatmul.mubr.bf16.gmra.mxu0 %v8927_v57 }
 0x23c   : > { %v4198_v60 = vshrl.u32 %v3968_v14, 16  ;;  %v11666_v21 = vadd.f32 %v8297_v58, %v11295_v13  ;;  %4835 = vst [vmem:[#allocation3 + $0x284] sm:$0xf] %v4645_v61  ;;  %v4659_v41 = vor.u32 %v4658_v56, %v4654_v6  ;;  %v4201_v5 = vshll.u32 %v3968_v14, 16  ;;  %v8930_v31 = vld [vmem:[#allocation3 + $0x334] ss:$36 sps:$4 sm:$0xff]   ;;  %v11677_v58 = vpop.f32.mrf.mxu0  ;;  %v11685_v61 = vpop.f32.mrf.mxu1 }
 0x23d   : > { %v4207_v34 = vshrl.u32 %v3969_v44, 16  ;;  %v4210_v63 = vshll.u32 %v3969_v44, 16  ;;  %v8928_v42 = vld [vmem:[#allocation3 + $0x330] ss:$36 sps:$4 sm:$0xff]   ;;  %v4655_v36 = vsel %vm9133_vm11, %v4650_v54, %v4654_v6  ;;  %v11673_v51 = vadd.f32 %v8367_v50, %v11172_v0  ;;  %6925 = vmatprep.mubr.bf16.mxu1 %v8930_v31  ;;  %v4419_v57 = vld [vmem:[#allocation2 + $0x70] sm:$0xf] }
 0x23e   : > { %12716 = vst [vmem:[#allocation79_spill] sm:$0xff] %v11666_v21  ;;  %v4200_v32 = vrot.slane %v4198_v60, 7  ;;  %v8300_v13 = vadd.f32 %v11562_v59, %v11546_v40  ;;  %v4660_v20 = vrot.slane %v4659_v41, 4  ;;  %4836 = vst [vmem:[#allocation3 + $0x2a8] sm:$0xf] %v4655_v36  ;;  %v4450_v47 = vsel %vm10624_vm12, %v4417_v29, 0  ;;  %6926 = vmatmul.mubr.bf16.gmra.mxu1 %v8928_v42  ;;  %v11693_v36 = vpop.f32.mrf.mxu0 }
 0x23f   : > { %12717 = vst [vmem:[#allocation27_spill] sm:$0xff] %v11673_v51  ;;  %v11679_v14 = vrot.slane %v4207_v34, 7  ;;  %v12719_v44 = vld [vmem:[#allocation58_spill] sm:$0xff]  ;;  %v4666_v0 = vshrl.u32 %v4449_v39, 16  ;;  %v4672_v50 = vshll.u32 %v4450_v47, 16  ;;  %v4676_v54 = vshrl.u32 %v4450_v47, 16 }
 0x240   : > { %vm12720_vm2 = vcmp.ne.s16.totalorder %v12719_v44, 0  ;;  %v4203_v6 = vor.u32 %v4201_v5, %v4200_v32  ;;  %v4205_v56 = vrot.slane %v4200_v32, 4  ;;  %v4665_v40 = vsel %vm9133_vm11, %v4660_v20, %v11660_v46  ;;  %v4420_v60 = vld [vmem:[#allocation2 + $0x74] sm:$0xf]  ;;  %v3937_v41 = vld [vmem:[#allocation2 + $0x7c] sm:$0xf] }
 0x241   : > { %v4451_v28 = vsel %vm12720_vm2, %v4418_v17, 0  ;;  %v4212_v59 = vor.u32 %v4210_v63, %v11679_v14  ;;  %4837 = vst [vmem:[#allocation3 + $0x2cc] sm:$0xf] %v4665_v40  ;;  %v4668_v39 = vrot.slane %v4666_v0, 4  ;;  %v4674_v5 = vrot.slane %v4672_v50, 5 }
 0x242   : > { %v4682_v29 = vshll.u32 %v4451_v28, 16  ;;  %v4204_v17 = vsel %vm9192_vm14, %v4196_v16, %v4203_v6  ;;  %v4686_v34 = vshrl.u32 %v4451_v28, 16  ;;  %v3938_v31 = vld [vmem:[#allocation2 + $0x80] sm:$0xf]  ;;  %v4678_v32 = vrot.slane %v4676_v54, 4  ;;  %v11707_v6 = vpop.f32.mrf.mxu1  ;;  %v12725_v54 = vld [vmem:[#allocation14_spill] sm:$0xff] }
 0x243   : > { %v4213_v42 = vsel %vm9192_vm14, %v4205_v56, %v4212_v59  ;;  %4324 = vst [vmem:[#allocation3 + $0x378] sm:$0xf] %v4204_v17  ;;  %v4452_v20 = vsel %vm10719_vm3, %v4419_v57, 0  ;;  %v8931_v33 = vld [vmem:[#allocation3 + $0x260] ss:$36 sps:$4 sm:$0xff]   ;;  %v4669_v47 = vor.u32 %v4668_v39, %v11660_v46  ;;  %vm12721_vm12 = vcmp.ne.s16.totalorder %v10708_v23, 0 }
 0x244   : > { %v4684_v63 = vrot.slane %v4682_v29, 5  ;;  %4325 = vst [vmem:[#allocation3 + $0x39c] sm:$0xf] %v4213_v42  ;;  %v4688_v16 = vrot.slane %v4686_v34, 4  ;;  %v11702_v44 = vsel %vm12721_vm12, %v4420_v60, 0  ;;  %v11705_v28 = vadd.f32 %v8300_v13, %v11354_v1  ;;  %8629 = vmatprep.mubr.bf16.mxu0 %v8931_v33  ;;  %v12723_v59 = vld [vmem:[#allocation12_spill] sm:$0xff]  ;;  %v11714_v29 = vpop.f32.mrf.mxu0 }
 0x245   : > { %v4679_v56 = vor.u32 %v4678_v32, %v4674_v5  ;;  %v4692_v0 = vshll.u32 %v4452_v20, 16  ;;  %v4696_v50 = vshrl.u32 %v4452_v20, 16  ;;  %v4702_v37 = vshll.u32 %v11702_v44, 16  ;;  %v4421_v39 = vld [vmem:[#allocation2 + $0x78] sm:$0xf] }
 0x246   : > { %12722 = vst [vmem:[#allocation28_spill] sm:$0xff] %v11705_v28  ;;  %v4670_v57 = vrot.slane %v4669_v47, 4  ;;  %v4689_v40 = vor.u32 %v4688_v16, %v4684_v63  ;;  %vm12724_vm3 = vnez %v12723_v59  ;;  %vm12726_vm10 = vnez %v12725_v54  ;;  %v4422_v33 = vld [vmem:[#allocation2 + $0x7c] sm:$0xf]  ;;  %v8935_v54 = vld [vmem:[#allocation3 + $0x37c] ss:$36 sps:$4 sm:$0xff]  }
 0x247   : > { %v3970_v46 = vsel %vm12724_vm3, %v3937_v41, 0  ;;  %v3971_v23 = vsel %vm12726_vm10, %v3938_v31, 0  ;;  %v4680_v1 = vrot.slane %v4679_v56, 4  ;;  %v4694_v13 = vrot.slane %v4692_v0, 5  ;;  %v11721_v41 = vpop.f32.mrf.mxu1  ;;  %6933 = vmatprep.mubr.bf16.mxu1 %v8935_v54  ;;  %v12731_v54 = vld [vmem:[#allocation73_spill] sm:$0xff] }
 0x248   : > { %v4698_v60 = vrot.slane %v4696_v50, 4  ;;  %v11716_v17 = vrot.slane %v4702_v37, 5  ;;  %v4675_v34 = vsel %vm9133_vm11, %v4670_v57, %v4674_v5  ;;  %v4690_v42 = vrot.slane %v4689_v40, 4  ;;  %v8932_v47 = vld [vmem:[#allocation3 + $0x2a8] ss:$36 sps:$4 sm:$0xff]   ;;  %v11729_v40 = vpop.f32.mrf.mxu0 }
 0x249   : > { %v4214_v32 = vrot.slane %v11679_v14, 4  ;;  %v4216_v20 = vshrl.u32 %v3970_v46, 16  ;;  %v4685_v31 = vsel %vm9133_vm11, %v4680_v1, %v4684_v63  ;;  %4838 = vst [vmem:[#allocation3 + $0x2f0] sm:$0xf] %v4675_v34  ;;  %v4219_v56 = vshll.u32 %v3970_v46, 16  ;;  %8630 = vmatmul.mubr.bf16.gmra.mxu0 %v8932_v47 }
 0x24a   : > { %v4699_v16 = vor.u32 %v4698_v60, %v4694_v13  ;;  %v4225_v0 = vshrl.u32 %v3971_v23, 16  ;;  %4839 = vst [vmem:[#allocation3 + $0x314] sm:$0xf] %v4685_v31  ;;  %v4695_v50 = vsel %vm9133_vm11, %v4690_v42, %v4694_v13  ;;  %v4228_v37 = vshll.u32 %v3971_v23, 16  ;;  %v4423_v42 = vld [vmem:[#allocation2 + $0x80] sm:$0xf] }
 0x24b   : > { %v4218_v5 = vrot.slane %v4216_v20, 7  ;;  %v4454_v14 = vsel %vm10807_vm8, %v4421_v39, 0  ;;  %v8933_v59 = vld [vmem:[#allocation3 + $0x378] ss:$36 sps:$4 sm:$0xff]   ;;  %4840 = vst [vmem:[#allocation3 + $0x338] sm:$0xf] %v4695_v50  ;;  %v11733_v63 = vadd.f32 %v11542_v52, %v11522_v10  ;;  %v11737_v46 = vadd.f32 %v11595_v7, %v11581_v19  ;;  %v11747_v20 = vpop.f32.mrf.mxu1 }
 0x24c   : > { %v4700_v51 = vrot.slane %v4699_v16, 4  ;;  %v11741_v23 = vadd.f32 %v11576_v9, %v11557_v48  ;;  %v11743_v60 = vrot.slane %v4225_v0, 7  ;;  %v12728_v39 = vld [vmem:[#allocation66_spill] sm:$0xff]  ;;  %v4706_v52 = vshrl.u32 %v11702_v44, 16  ;;  %v4424_v9 = vld [vmem:[#allocation2 + $0x84] sm:$0xf]  ;;  %6934 = vmatmul.mubr.bf16.gmra.mxu1 %v8933_v59 }
 0x24d   : > { %v4221_v1 = vor.u32 %v4219_v56, %v4218_v5  ;;  %v4223_v13 = vrot.slane %v4218_v5, 4  ;;  %vm12729_vm8 = vcmp.ne.s16.totalorder %v12728_v39, 0  ;;  %v4712_v19 = vshll.u32 %v4454_v14, 16  ;;  %v3939_v16 = vld [vmem:[#allocation2 + $0x84] sm:$0xf]  ;;  %v11756_v56 = vpop.f32.mrf.mxu0 }
 0x24e   : > { %v4455_v34 = vsel %vm12729_vm8, %v4422_v33, 0  ;;  %v4705_v10 = vsel %vm9133_vm11, %v4700_v51, %v11716_v17  ;;  %v4716_v48 = vshrl.u32 %v4454_v14, 16  ;;  %v4230_v33 = vor.u32 %v4228_v37, %v11743_v60  ;;  %v3940_v57 = vld [vmem:[#allocation2 + $0x88] sm:$0xf] }
 0x24f   : > { %4841 = vst [vmem:[#allocation3 + $0x35c] sm:$0xf] %v4705_v10  ;;  %v4222_v7 = vsel %vm9192_vm14, %v4214_v32, %v4221_v1  ;;  %v4722_v47 = vshll.u32 %v4455_v34, 16  ;;  %v4726_v31 = vshrl.u32 %v4455_v34, 16  ;;  %v4708_v0 = vrot.slane %v4706_v52, 4  ;;  %v11764_v1 = vpop.f32.mrf.mxu1 }
 0x250   : > { %4326 = vst [vmem:[#allocation3 + $0x3c0] sm:$0xf] %v4222_v7  ;;  %v4714_v51 = vrot.slane %v4712_v19, 5  ;;  %v4718_v50 = vrot.slane %v4716_v48, 4  ;;  %v4456_v5 = vsel %vm10909_vm9, %v4423_v42, 0  ;;  %v4231_v14 = vsel %vm9192_vm14, %v4223_v13, %v4230_v33  ;;  %v12733_v7 = vld [vmem:[#allocation17_spill] sm:$0xff] }
 0x251   : > { %v4724_v59 = vrot.slane %v4722_v47, 5  ;;  %v4728_v32 = vrot.slane %v4726_v31, 4  ;;  %vm12732_vm0 = vcmp.ne.s16.totalorder %v12731_v54, 0  ;;  %v8936_v39 = vld [vmem:[#allocation3 + $0x2f0] ss:$36 sps:$4 sm:$0xff]   ;;  %v4709_v34 = vor.u32 %v4708_v0, %v11716_v17  ;;  %v11771_v47 = vpop.f32.mrf.mxu0 }
 0x252   : > { %v4457_v37 = vsel %vm12732_vm0, %v4424_v9, 0  ;;  %4327 = vst [vmem:[#allocation3 + $0x3e4] sm:$0xf] %v4231_v14  ;;  %v4719_v10 = vor.u32 %v4718_v50, %v4714_v51  ;;  %v4732_v52 = vshll.u32 %v4456_v5, 16  ;;  %v4736_v19 = vshrl.u32 %v4456_v5, 16  ;;  %v12735_v13 = vld [vmem:[#allocation18_spill] sm:$0xff]  ;;  %8633 = vmatprep.mubr.bf16.mxu0 %v8936_v39 }
 0x253   : > { %v4729_v48 = vor.u32 %v4728_v32, %v4724_v59  ;;  %v4742_v42 = vshll.u32 %v4457_v37, 16  ;;  %vm12734_vm9 = vnez %v12733_v7  ;;  %vm12736_vm15 = vnez %v12735_v13  ;;  %v4425_v28 = vld [vmem:[#allocation2 + $0x88] sm:$0xf]  ;;  %v4426_v32 = vld [vmem:[#allocation2 + $0x8c] sm:$0xf]  ;;  %v11776_v7 = vpop.f32.mrf.mxu1 }
 0x254   : > { %v3972_v44 = vsel %vm12734_vm9, %v3939_v16, 0  ;;  %v3973_v33 = vsel %vm12736_vm15, %v3940_v57, 0  ;;  %v4710_v9 = vrot.slane %v4709_v34, 4  ;;  %v4720_v31 = vrot.slane %v4719_v10, 4 }
 0x255   : > { %v4734_v54 = vrot.slane %v4732_v52, 5  ;;  %v4738_v14 = vrot.slane %v4736_v19, 4  ;;  %v4730_v17 = vrot.slane %v4729_v48, 4  ;;  %v11773_v0 = vrot.slane %v4742_v42, 5  ;;  %v11784_v42 = vpop.f32.mrf.mxu0 }
 0x256   : > { %v4232_v50 = vrot.slane %v11743_v60, 4  ;;  %v4234_v5 = vshrl.u32 %v3972_v44, 16  ;;  %v8937_v16 = vld [vmem:[#allocation3 + $0x338] ss:$36 sps:$4 sm:$0xff]   ;;  %v4715_v57 = vsel %vm9133_vm11, %v4710_v9, %v4714_v51  ;;  %v4725_v39 = vsel %vm9133_vm11, %v4720_v31, %v4724_v59  ;;  %v12738_v9 = vld [vmem:[#allocation77_spill] sm:$0xff] }
 0x257   : > { %v4739_v34 = vor.u32 %v4738_v14, %v4734_v54  ;;  %v4237_v10 = vshll.u32 %v3972_v44, 16  ;;  %4842 = vst [vmem:[#allocation3 + $0x380] sm:$0xf] %v4715_v57  ;;  %4843 = vst [vmem:[#allocation3 + $0x3a4] sm:$0xf] %v4725_v39  ;;  %v4735_v52 = vsel %vm9133_vm11, %v4730_v17, %v4734_v54  ;;  %v4243_v60 = vshrl.u32 %v3973_v33, 16  ;;  %8634 = vmatmul.mubr.bf16.gmra.mxu0 %v8937_v16  ;;  %v11798_v16 = vpop.f32.mrf.mxu1 }
 0x258   : > { %v4236_v19 = vrot.slane %v4234_v5, 7  ;;  %v4246_v48 = vshll.u32 %v3973_v33, 16  ;;  %4844 = vst [vmem:[#allocation3 + $0x3c8] sm:$0xf] %v4735_v52  ;;  %v4458_v51 = vsel %vm10976_vm6, %v4425_v28, 0  ;;  %vm12739_vm13 = vcmp.ne.s16.totalorder %v12738_v9, 0 }
 0x259   : > { %v4740_v13 = vrot.slane %v4739_v34, 4  ;;  %v4459_v59 = vsel %vm12739_vm13, %v4426_v32, 0  ;;  %v4746_v44 = vshrl.u32 %v4457_v37, 16  ;;  %v4427_v31 = vld [vmem:[#allocation2 + $0x90] sm:$0xf]  ;;  %v12740_v17 = vld [vmem:[#allocation32_spill] sm:$0xff]  ;;  %v11796_v5 = vadd.f32 %v11737_v46, %v11393_v2  ;;  %v11807_v46 = vpop.f32.mrf.mxu1 }
 0x25a   : > { %v8938_v14 = vld [vmem:[#allocation3 + $0x3c0] ss:$36 sps:$4 sm:$0xff]   ;;  %v4239_v39 = vor.u32 %v4237_v10, %v4236_v19  ;;  %v4241_v54 = vrot.slane %v4236_v19, 4  ;;  %v11792_v33 = vadd.f32 %v11733_v63, %v12740_v17  ;;  %v11803_v28 = vrot.slane %v4243_v60, 7  ;;  %v4428_v34 = vld [vmem:[#allocation2 + $0x94] sm:$0x1]  ;;  %v11809_v19 = vpop.f32.mrf.mxu0 }
 0x25b   : > { %v8940_v57 = vld [vmem:[#allocation3 + $0x3c4] ss:$36 sps:$4 sm:$0xff]   ;;  %12742 = vst [vmem:[#allocation80_spill] sm:$0xff] %v11796_v5  ;;  %v4745_v21 = vsel %vm9133_vm11, %v4740_v13, %v11773_v0  ;;  %v4748_v37 = vrot.slane %v4746_v44, 4  ;;  %v4752_v32 = vshll.u32 %v4458_v51, 16  ;;  %v4756_v10 = vshrl.u32 %v4458_v51, 16 }
 0x25c   : > { %12741 = vst [vmem:[#allocation70_spill] sm:$0xff] %v11792_v33  ;;  %6941 = vmatprep.mubr.bf16.mxu1 %v8940_v57  ;;  %4845 = vst [vmem:[#allocation3 + $0x3ec] sm:$0xf] %v4745_v21  ;;  %v4240_v63 = vsel %vm9192_vm14, %v4232_v50, %v4239_v39  ;;  %v4762_v52 = vshll.u32 %v4459_v59, 16  ;;  %v4766_v2 = vshrl.u32 %v4459_v59, 16  ;;  %v4248_v13 = vor.u32 %v4246_v48, %v11803_v28  ;;  %v12745_v48 = vld [vmem:[#allocation7_spill] sm:$0xff] }
 0x25d   : > { %6942 = vmatmul.mubr.bf16.gmra.mxu1 %v8938_v14  ;;  %4328 = vst [vmem:[#allocation3 + $0x408] sm:$0xf] %v4240_v63  ;;  %v4749_v60 = vor.u32 %v4748_v37, %v11773_v0  ;;  %v4754_v9 = vrot.slane %v4752_v32, 5  ;;  %v4460_v57 = vsel %vm11077_vm4, %v4427_v31, 0  ;;  %v3941_v17 = vld [vmem:[#allocation2 + $0x8c] sm:$0xf]  ;;  %v11821_v63 = vadd.f32 %v11741_v23, %v12745_v48  ;;  %v11827_v37 = vpop.f32.mrf.mxu1 }
 0x25e   : > { %v4758_v21 = vrot.slane %v4756_v10, 4  ;;  %v4764_v50 = vrot.slane %v4762_v52, 5  ;;  %v4768_v51 = vrot.slane %v4766_v2, 4  ;;  %v4461_v59 = vsel %vm11071_vm1, %v4428_v34, 0  ;;  %v3942_v33 = vld [vmem:[#allocation2 + $0x90] sm:$0xf]  ;;  %v11829_v2 = vpop.f32.mrf.mxu0 }
 0x25f   : > { %v8941_v5 = vld [vmem:[#allocation3 + $0x380] ss:$36 sps:$4 sm:$0xff]   ;;  %v4249_v14 = vsel %vm9192_vm14, %v4241_v54, %v4248_v13  ;;  %v8306_v0 = vadd.f32 %v11629_v30, %v11610_v3  ;;  %v8376_v31 = vadd.f32 %v11602_v8, %v11589_v12  ;;  %v4750_v32 = vrot.slane %v4749_v60, 4  ;;  %v12746_v23 = vld [vmem:[#allocation21_spill] sm:$0xff] }
 0x260   : > { %4329 = vst [vmem:[#allocation3 + $0x42c] sm:$0xf] %v4249_v14  ;;  %v4759_v34 = vor.u32 %v4758_v21, %v4754_v9  ;;  %v4769_v10 = vor.u32 %v4768_v51, %v4764_v50  ;;  %v4772_v52 = vshll.u32 %v4460_v57, 16  ;;  %8637 = vmatprep.mubr.bf16.mxu0 %v8941_v5  ;;  %v4776_v54 = vshrl.u32 %v4460_v57, 16  ;;  %v12748_v39 = vld [vmem:[#allocation5_spill] sm:$0xff]  ;;  %v12750_v57 = vld [vmem:[#allocation11_spill] sm:$0xff] }
 0x261   : > { %v4782_v13 = vshll.u32 %v4461_v59, 16  ;;  %vm12747_vm6 = vnez %v12746_v23  ;;  %vm12749_vm1 = vcmp.ne.s16.totalorder %v12748_v39, 0  ;;  %v4755_v12 = vsel %vm9133_vm11, %v4750_v32, %v4754_v9  ;;  %v8945_v39 = vld [vmem:[#allocation3 + $0x40c] ss:$36 sps:$4 sm:$0xff]  }
 0x262   : > { %v3974_v44 = vsel %vm12747_vm6, %v3941_v17, 0  ;;  %v3975_v3 = vsel %vm12749_vm1, %v3942_v33, 0  ;;  %v4760_v8 = vrot.slane %v4759_v34, 4  ;;  %v4770_v30 = vrot.slane %v4769_v10, 4  ;;  %4846 = vst [vmem:[#allocation3 + $0x410] sm:$0xf] %v4755_v12  ;;  %v8323_v17 = vpop.f32.mrf.mxu1  ;;  %v8395_v34 = vpop.f32.mrf.mxu0  ;;  %6949 = vmatprep.mubr.bf16.mxu1 %v8945_v39 }
 0x263   : > { %v4774_v60 = vrot.slane %v4772_v52, 5  ;;  %v8942_v21 = vld [vmem:[#allocation3 + $0x3c8] ss:$36 sps:$4 sm:$0xff]   ;;  %v4778_v51 = vrot.slane %v4776_v54, 4  ;;  %v4784_v14 = vrot.slane %v4782_v13, 5  ;;  %v11838_v5 = vadd.f32 %v8306_v0, %v11399_v15 }
 0x264   : > { %v11841_v59 = vadd.f32 %v8376_v31, %v12750_v57  ;;  %v4765_v33 = vsel %vm9133_vm11, %v4760_v8, %v4764_v50  ;;  %v4250_v48 = vrot.slane %v11803_v28, 4  ;;  %v4252_v32 = vshrl.u32 %v3974_v44, 16  ;;  %8638 = vmatmul.mubr.bf16.gmra.mxu0 %v8942_v21  ;;  %v8396_v28 = vpop.f32.mrf.mxu0  ;;  %v8950_v39 = vld [vmem:[#allocation3 + $0x454] ss:$36 sps:$4 sm:$0xff]  }
 0x265   : > { %v4775_v9 = vsel %vm9133_vm11, %v4770_v30, %v4774_v60  ;;  %4847 = vst [vmem:[#allocation3 + $0x434] sm:$0xf] %v4765_v33  ;;  %v4779_v10 = vor.u32 %v4778_v51, %v4774_v60  ;;  %v4255_v15 = vshll.u32 %v3974_v44, 16  ;;  %v4261_v0 = vshrl.u32 %v3975_v3, 16  ;;  %v12751_v60 = vld [vmem:[#allocation13_spill] sm:$0xff] }
 0x266   : > { %4848 = vst [vmem:[#allocation3 + $0x458] sm:$0xf] %v4775_v9  ;;  %v4264_v52 = vshll.u32 %v3975_v3, 16  ;;  %v4254_v31 = vrot.slane %v4252_v32, 7  ;;  %v8309_v54 = vadd.f32 %v11668_v55, %v11650_v27  ;;  %v8379_v50 = vadd.f32 %v11637_v49, %v11623_v26  ;;  %v8325_v27 = vpop.f32.mrf.mxu1  ;;  %v12757_v32 = vld [vmem:[#allocation61_spill] sm:$0xff] }
 0x267   : > { %v8312_v13 = vadd.f32 %v11707_v6, %v11685_v61  ;;  %v8943_v23 = vld [vmem:[#allocation3 + $0x408] ss:$36 sps:$4 sm:$0xff]   ;;  %v4780_v12 = vrot.slane %v4779_v10, 4  ;;  %v8382_v8 = vadd.f32 %v11677_v58, %v11656_v11  ;;  %v8315_v44 = vadd.f32 %v11747_v20, %v11721_v41  ;;  %v8398_v61 = vpop.f32.mrf.mxu0  ;;  %v12752_v41 = vld [vmem:[#allocation15_spill] sm:$0xff] }
 0x268   : > { %v8385_v3 = vadd.f32 %v11714_v29, %v11693_v36  ;;  %v4257_v55 = vor.u32 %v4255_v15, %v4254_v31  ;;  %v4259_v30 = vrot.slane %v4254_v31, 4  ;;  %v4263_v26 = vrot.slane %v4261_v0, 7  ;;  %v8326_v29 = vpop.f32.mrf.mxu1  ;;  %6950 = vmatmul.mubr.bf16.gmra.mxu1 %v8943_v23  ;;  %v12758_v0 = vld [vmem:[#allocation20_spill] sm:$0xff] }
 0x269   : > { %v11861_v49 = vadd.f32 %v8309_v54, %v11419_v43  ;;  %v4785_v6 = vsel %vm9133_vm11, %v4780_v12, %v4784_v14  ;;  %v11866_v11 = vadd.f32 %v8379_v50, %v12751_v60  ;;  %v11869_v58 = vadd.f32 %v8312_v13, %v11485_v35  ;;  %6957 = vmatprep.mubr.bf16.mxu1 %v8950_v39  ;;  %v12761_v60 = vld [vmem:[#allocation65_spill] sm:$0xff] }
 0x26a   : > { %v11872_v36 = vadd.f32 %v8382_v8, %v12752_v41  ;;  %4849 = vst [vmem:[#allocation3 + $0x47c] sm:$0xf] %v4785_v6  ;;  %v4258_v43 = vsel %vm9192_vm14, %v4250_v48, %v4257_v55  ;;  %v4266_v20 = vor.u32 %v4264_v52, %v4263_v26  ;;  %v11877_v21 = vadd.f32 %v8315_v44, %v11491_v22  ;;  %v8328_v33 = vpop.f32.mrf.mxu1  ;;  %v12760_v8 = vld [vmem:[#allocation23_spill] sm:$0xff] }
 0x26b   : > { %v11880_v53 = vadd.f32 %v8385_v3, %v11372_v24  ;;  %4330 = vst [vmem:[#allocation3 + $0x450] sm:$0xf] %v4258_v43  ;;  %v8318_v35 = vadd.f32 %v11776_v7, %v11764_v1  ;;  %v8388_v51 = vadd.f32 %v11756_v56, %v11729_v40  ;;  %v8321_v14 = vadd.f32 %v11807_v46, %v11798_v16  ;;  %v8399_v7 = vpop.f32.mrf.mxu0  ;;  %v12762_v43 = vld [vmem:[#allocation63_spill] sm:$0xff] }
 0x26c   : > { %v8391_v57 = vadd.f32 %v11784_v42, %v11771_v47  ;;  %v8946_v9 = vld [vmem:[#allocation3 + $0x410] ss:$36 sps:$4 sm:$0xff]   ;;  %v4267_v22 = vsel %vm9192_vm14, %v4259_v30, %v4266_v20  ;;  %v8324_v24 = vadd.f32 %v8323_v17, %v11827_v37  ;;  %v8394_v48 = vadd.f32 %v11829_v2, %v11809_v19  ;;  %v12753_v42 = vld [vmem:[#allocation16_spill] sm:$0xff]  ;;  %v8329_v16 = vpop.f32.mrf.mxu1  ;;  %v12754_v19 = vld [vmem:[#allocation19_spill] sm:$0xff] }
 0x26d   : > { %v8327_v1 = vadd.f32 %v8326_v29, %v8325_v27  ;;  %4331 = vst [vmem:[#allocation3 + $0x474] sm:$0xf] %v4267_v22  ;;  %v11896_v40 = vadd.f32 %v8318_v35, %v11538_v45  ;;  %v11899_v56 = vadd.f32 %v8388_v51, %v11413_v18  ;;  %v11902_v47 = vadd.f32 %v8321_v14, %v11570_v4  ;;  %v12755_v2 = vld [vmem:[#allocation62_spill] sm:$0xff]  ;;  %v12756_v18 = vld [vmem:[#allocation60_spill] sm:$0xff]  ;;  %v8401_v13 = vpop.f32.mrf.mxu0 }
 0x26e   : > { %v11905_v38 = vadd.f32 %v8391_v57, %v12753_v42  ;;  %8641 = vmatprep.mubr.bf16.mxu0 %v8946_v9  ;;  %v11908_v46 = vadd.f32 %v8324_v24, %v11642_v62  ;;  %v11911_v37 = vadd.f32 %v8394_v48, %v12754_v19  ;;  %v8397_v17 = vadd.f32 %v8396_v28, %v8395_v34  ;;  %v12759_v62 = vld [vmem:[#allocation22_spill] sm:$0xff]  ;;  %v8331_v3 = vpop.f32.mrf.mxu1  ;;  %v12763_v20 = vld [vmem:[#allocation64_spill] sm:$0xff] }
 0x26f   : > { %v11914_v45 = vadd.f32 %v8327_v1, %v12755_v2  ;;  %v8218_v10 = vadd.f32 %v12757_v32, %v12756_v18  ;;  %v8330_v4 = vadd.f32 %v8329_v16, %v8328_v33  ;;  %v8400_v15 = vadd.f32 %v8399_v7, %v8398_v61  ;;  %v8402_v12 = vpop.f32.mrf.mxu0  ;;  %v12764_v1 = vld [vmem:[#allocation79_spill] sm:$0xff]  ;;  %v12766_v32 = vld [vmem:[#allocation28_spill] sm:$0xff] }
 0x270   : > { %v11919_v52 = vadd.f32 %v8397_v17, %v12758_v0  ;;  %v8403_v34 = vadd.f32 %v8402_v12, %v8401_v13  ;;  %v8332_v30 = vpop.f32.mrf.mxu1  ;;  %v8224_v35 = vadd.f32 %v12763_v20, %v12762_v43  ;;  %v12765_v2 = vld [vmem:[#allocation71_spill] sm:$0xff] }
 0x271   : > { %v8947_v31 = vld [vmem:[#allocation3 + $0x458] ss:$36 sps:$4 sm:$0xff]   ;;  %v11921_v54 = vadd.f32 %v8330_v4, %v8218_v10  ;;  %v11924_v50 = vadd.f32 %v8400_v15, %v12759_v62  ;;  %v8404_v28 = vpop.f32.mrf.mxu0  ;;  %v8333_v26 = vadd.f32 %v8332_v30, %v8331_v3  ;;  %v12767_v4 = vld [vmem:[#allocation68_spill] sm:$0xff]  ;;  %v12768_v15 = vld [vmem:[#allocation69_spill] sm:$0xff] }
 0x272   : > { %8642 = vmatmul.mubr.bf16.gmra.mxu0 %v8947_v31  ;;  %v11927_v44 = vadd.f32 %v8403_v34, %v12760_v8  ;;  %v8334_v6 = vpop.f32.mrf.mxu1  ;;  %v8230_v0 = vadd.f32 %v12768_v15, %v12767_v4  ;;  %v12769_v34 = vld [vmem:[#allocation80_spill] sm:$0xff] }
 0x273   : > { %v8405_v27 = vpop.f32.mrf.mxu0  ;;  %v11933_v41 = vadd.f32 %v8333_v26, %v12761_v60  ;;  %v12770_v60 = vld [vmem:[#allocation31_spill] sm:$0xff] }
 0x274   : > { %v8948_v23 = vld [vmem:[#allocation3 + $0x450] ss:$36 sps:$4 sm:$0xff]   ;;  %v8406_v55 = vadd.f32 %v8405_v27, %v8404_v28  ;;  %v8335_v29 = vpop.f32.mrf.mxu1 }
 0x275   : > { %6958 = vmatmul.mubr.bf16.gmra.mxu1 %v8948_v23  ;;  %v8336_v51 = vadd.f32 %v8335_v29, %v8334_v6  ;;  %v8407_v57 = vpop.f32.mrf.mxu0 }
 0x276   : > { %v11930_v61 = vadd.f32 %v8406_v55, %v11621_v25  ;;  %v8337_v9 = vpop.f32.mrf.mxu1 }
 0x277   : > { %v11937_v14 = vadd.f32 %v8336_v51, %v8224_v35  ;;  %v8408_v33 = vpop.f32.mrf.mxu0  ;;  %v12771_v35 = vld [vmem:[#allocation72_spill] sm:$0xff] }
 0x278   : > { %v8409_v22 = vadd.f32 %v8408_v33, %v8407_v57  ;;  %v8338_v48 = vpop.f32.mrf.mxu1  ;;  %v12772_v51 = vld [vmem:[#allocation76_spill] sm:$0xff] }
 0x279   : > { %v8410_v24 = vpop.f32.mrf.mxu0  ;;  %v8339_v7 = vadd.f32 %v8338_v48, %v8337_v9  ;;  %v8236_v57 = vadd.f32 %v12772_v51, %v12771_v35 }
 0x27a   : > { %v11940_v25 = vadd.f32 %v8409_v22, %v12764_v1  ;;  %v8340_v16 = vpop.f32.mrf.mxu1 }
 0x27b   : > { %v8411_v42 = vpop.f32.mrf.mxu0  ;;  %v11943_v17 = vadd.f32 %v8339_v7, %v12765_v2 }
 0x27c   : > { %v8412_v19 = vadd.f32 %v8411_v42, %v8410_v24  ;;  %v8341_v18 = vpop.f32.mrf.mxu1 }
 0x27d   : > { %v8342_v31 = vadd.f32 %v8341_v18, %v8340_v16 }
 0x27e   : > { %v11946_v10 = vadd.f32 %v8412_v19, %v12766_v32 }
 0x27f   : > { %v11950_v62 = vadd.f32 %v8342_v31, %v8230_v0 }
 0x280   : > { %v8413_v13 = vpop.f32.mrf.mxu0 }
 0x282   : > { %v8414_v23 = vpop.f32.mrf.mxu0 }
 0x283   : > { %v8415_v39 = vadd.f32 %v8414_v23, %v8413_v13 }
 0x284   : > { %v8416_v12 = vpop.f32.mrf.mxu0 }
 0x285   : > { %v11953_v28 = vadd.f32 %v8415_v39, %v12769_v34 }
 0x286   : > { %v8417_v8 = vpop.f32.mrf.mxu0 }
 0x287   : > { %v8343_v3 = vpop.f32.mrf.mxu1  ;;  %v8418_v27 = vadd.f32 %v8417_v8, %v8416_v12 }
 0x289   : > { %v8344_v55 = vpop.f32.mrf.mxu1  ;;  %v11956_v30 = vadd.f32 %v8418_v27, %v11838_v5 }
 0x28a   : > { %v8345_v26 = vadd.f32 %v8344_v55, %v8343_v3 }
 0x28b   : > { %v8346_v6 = vpop.f32.mrf.mxu1 }
 0x28c   : > { %v11959_v29 = vadd.f32 %v8345_v26, %v12770_v60 }
 0x28d   : > { %v8347_v43 = vpop.f32.mrf.mxu1 }
 0x28e   : > { %v8419_v20 = vpop.f32.mrf.mxu0  ;;  %v8348_v33 = vadd.f32 %v8347_v43, %v8346_v6 }
 0x28f   : > { %v11963_v9 = vpop.f32.mrf.mxu1 }
 0x290   : > { %v8420_v22 = vpop.f32.mrf.mxu0  ;;  %v11965_v24 = vadd.f32 %v8348_v33, %v8236_v57 }
 0x291   : > { %v8421_v48 = vadd.f32 %v8420_v22, %v8419_v20  ;;  %v11967_v1 = vpop.f32.mrf.mxu1 }
 0x292   : > { %v8422_v5 = vpop.f32.mrf.mxu0 }
 0x293   : > { %v11970_v7 = vadd.f32 %v8421_v48, %v11861_v49  ;;  %v11972_v42 = vpop.f32.mrf.mxu1 }
 0x294   : > { %v8423_v16 = vpop.f32.mrf.mxu0 }
 0x295   : > { %v8424_v19 = vadd.f32 %v8423_v16, %v8422_v5  ;;  %v11974_v2 = vpop.f32.mrf.mxu1 }
 0x297   : > { %v11977_v18 = vadd.f32 %v8424_v19, %v11869_v58 }
 0x298   : > { %v11979_v32 = vpop.f32.mrf.mxu1 }
 0x29a   : > { %v8425_v4 = vpop.f32.mrf.mxu0  ;;  %v11981_v15 = vpop.f32.mrf.mxu1 }
 0x29c   : > { %v8426_v0 = vpop.f32.mrf.mxu0  ;;  %v11983_v13 = vpop.f32.mrf.mxu1 }
 0x29d   : > { %v8427_v31 = vadd.f32 %v8426_v0, %v8425_v4 }
 0x29e   : > { %v8428_v49 = vpop.f32.mrf.mxu0  ;;  %v11988_v39 = vpop.f32.mrf.mxu1 }
 0x29f   : > { %v11986_v23 = vadd.f32 %v8427_v31, %v11877_v21 }
 0x2a0   : > { %v8429_v12 = vpop.f32.mrf.mxu0  ;;  %v11990_v8 = vpop.f32.mrf.mxu1 }
 0x2a1   : > { %v8430_v34 = vadd.f32 %v8429_v12, %v8428_v49 }
 0x2a2   : > { %v8431_v58 = vpop.f32.mrf.mxu0  ;;  %v11995_v27 = vpop.f32.mrf.mxu1 }
 0x2a3   : > { %v11993_v3 = vadd.f32 %v8430_v34, %v11896_v40 }
 0x2a4   : > { %v8432_v55 = vpop.f32.mrf.mxu0  ;;  %v11997_v6 = vpop.f32.mrf.mxu1 }
 0x2a5   : > { %v8433_v26 = vadd.f32 %v8432_v55, %v8431_v58 }
 0x2a6   : > { %v8434_v60 = vpop.f32.mrf.mxu0  ;;  %v12002_v43 = vpop.f32.mrf.mxu1 }
 0x2a7   : > { %v12000_v21 = vadd.f32 %v8433_v26, %v11902_v47 }
 0x2a8   : > { %v8435_v20 = vpop.f32.mrf.mxu0 }
 0x2a9   : > { %v8436_v35 = vadd.f32 %v8435_v20, %v8434_v60  ;;  %v12004_v51 = vpop.f32.mrf.mxu1 }
 0x2ab   : > { %v8437_v57 = vpop.f32.mrf.mxu0  ;;  %v12007_v40 = vadd.f32 %v8436_v35, %v11908_v46  ;;  %v12009_v33 = vpop.f32.mrf.mxu1 }
 0x2ad   : > { %v8438_v22 = vpop.f32.mrf.mxu0  ;;  %v12011_v5 = vpop.f32.mrf.mxu1 }
 0x2ae   : > { %v8439_v48 = vadd.f32 %v8438_v22, %v8437_v57 }
 0x2af   : > { %v8440_v16 = vpop.f32.mrf.mxu0  ;;  %v12016_v19 = vpop.f32.mrf.mxu1 }
 0x2b0   : > { %v12014_v47 = vadd.f32 %v8439_v48, %v11914_v45 }
 0x2b1   : > { %v8441_v4 = vpop.f32.mrf.mxu0 }
 0x2b2   : > { %12773 = vst [vmem:[#allocation33_spill] sm:$0xff] %v12014_v47  ;;  %v8442_v0 = vadd.f32 %v8441_v4, %v8440_v16 }
 0x2b3   : > { %v12018_v31 = vpop.f32.mrf.mxu1 }
 0x2b4   : > { %v12021_v46 = vadd.f32 %v8442_v0, %v11921_v54 }
 0x2b5   : > { %v8443_v49 = vpop.f32.mrf.mxu0  ;;  %v12023_v12 = vpop.f32.mrf.mxu1 }
 0x2b6   : > { %12774 = vst [vmem:[#allocation34_spill] sm:$0xff] %v12021_v46 }
 0x2b7   : > { %v8444_v34 = vpop.f32.mrf.mxu0  ;;  %v12025_v55 = vpop.f32.mrf.mxu1 }
 0x2b8   : > { %v8445_v58 = vadd.f32 %v8444_v34, %v8443_v49 }
 0x2b9   : > { %v8446_v26 = vpop.f32.mrf.mxu0  ;;  %v12030_v60 = vpop.f32.mrf.mxu1 }
 0x2ba   : > { %v12028_v45 = vadd.f32 %v8445_v58, %v11933_v41 }
 0x2bb   : > { %v8447_v20 = vpop.f32.mrf.mxu0  ;;  %v12032_v57 = vpop.f32.mrf.mxu1 }
 0x2bc   : > { %12775 = vst [vmem:[#allocation37_spill] sm:$0xff] %v12028_v45  ;;  %v8448_v35 = vadd.f32 %v8447_v20, %v8446_v26 }
 0x2bd   : > { %v8449_v22 = vpop.f32.mrf.mxu0  ;;  %v12037_v48 = vpop.f32.mrf.mxu1 }
 0x2be   : > { %v12035_v54 = vadd.f32 %v8448_v35, %v11937_v14 }
 0x2bf   : > { %v8450_v16 = vpop.f32.mrf.mxu0  ;;  %v12039_v0 = vpop.f32.mrf.mxu1 }
 0x2c0   : > { %12776 = vst [vmem:[#allocation38_spill] sm:$0xff] %v12035_v54  ;;  %v8451_v4 = vadd.f32 %v8450_v16, %v8449_v22 }
 0x2c1   : > { %v8452_v49 = vpop.f32.mrf.mxu0  ;;  %v12044_v34 = vpop.f32.mrf.mxu1 }
 0x2c2   : > { %v12042_v41 = vadd.f32 %v8451_v4, %v11943_v17 }
 0x2c3   : > { %v8453_v58 = vpop.f32.mrf.mxu0  ;;  %v12046_v20 = vpop.f32.mrf.mxu1 }
 0x2c4   : > { %12777 = vst [vmem:[#allocation75_spill] sm:$0xff] %v12042_v41  ;;  %v8454_v26 = vadd.f32 %v8453_v58, %v8452_v49 }
 0x2c5   : > { %v12051_v35 = vpop.f32.mrf.mxu1 }
 0x2c6   : > { %v12049_v46 = vadd.f32 %v8454_v26, %v11950_v62  ;;  %v8479_v62 = vadd.f32 %v11967_v1, %v11963_v9  ;;  %v8485_v26 = vadd.f32 %v11981_v15, %v11979_v32  ;;  %v12781_v1 = vld [vmem:[#allocation27_spill] sm:$0xff] }
 0x2c7   : > { %v8455_v14 = vpop.f32.mrf.mxu0  ;;  %v12053_v16 = vpop.f32.mrf.mxu1 }
 0x2c8   : > { %12778 = vst [vmem:[#allocation24_spill] sm:$0xff] %v12049_v46  ;;  %v6848_v9 = vadd.f32 %v8485_v26, %v11821_v63  ;;  %v6840_v32 = vadd.f32 %v8479_v62, %v12781_v1  ;;  %v12782_v46 = vld [vmem:[#allocation70_spill] sm:$0xff]  ;;  %v8491_v62 = vadd.f32 %v11995_v27, %v11990_v8  ;;  %v8500_v1 = vadd.f32 %v12016_v19, %v12011_v5 }
 0x2c9   : > { %v8456_v54 = vpop.f32.mrf.mxu0  ;;  %v12058_v4 = vpop.f32.mrf.mxu1  ;;  %v8494_v8 = vadd.f32 %v12002_v43, %v11997_v6 }
 0x2ca   : > { %v8457_v22 = vadd.f32 %v8456_v54, %v8455_v14  ;;  %v8488_v54 = vadd.f32 %v11988_v39, %v11983_v13 }
 0x2cb   : > { %v8458_v45 = vpop.f32.mrf.mxu0 }
 0x2cc   : > { %v12056_v17 = vadd.f32 %v8457_v22, %v11959_v29  ;;  %v6851_v15 = vadd.f32 %v8488_v54, %v11841_v59 }
 0x2cd   : > { %v8459_v41 = vpop.f32.mrf.mxu0  ;;  %v12060_v58 = vpop.f32.mrf.mxu1 }
 0x2ce   : > { %12779 = vst [vmem:[#allocation26_spill] sm:$0xff] %v12056_v17  ;;  %v8460_v49 = vadd.f32 %v8459_v41, %v8458_v45  ;;  %v8482_v45 = vadd.f32 %v11974_v2, %v11972_v42 }
 0x2cf   : > { %v12071_v22 = vpop.f32.mrf.mxu1 }
 0x2d0   : > { %v12069_v14 = vadd.f32 %v8460_v49, %v11965_v24  ;;  %v6843_v47 = vadd.f32 %v8482_v45, %v12782_v46 }
 0x2d1   : > { %v8615_v29 = vpop.f32.mrf.mxu0  ;;  %v12075_v17 = vpop.f32.mrf.mxu1 }
 0x2d2   : > { %12780 = vst [vmem:[#allocation25_spill] sm:$0xff] %v12069_v14  ;;  %v7009_v24 = vadd.f32 %v8615_v29, %v6848_v9 }
 0x2d3   : > { %v7000_v41 = vpop.f32.mrf.mxu0  ;;  %v12080_v39 = vpop.f32.mrf.mxu1 }
 0x2d4   : > { %v7001_v49 = vadd.f32 %v7000_v41, %v6840_v32  ;;  %v8497_v41 = vadd.f32 %v12009_v33, %v12004_v51  ;;  %v7327_v32 = vmul.f32 %v7009_v24, %v7009_v24 }
 0x2d5   : > { %v8616_v13 = vpop.f32.mrf.mxu0  ;;  %v12090_v42 = vpop.f32.mrf.mxu1 }
 0x2d6   : > { %v7012_v14 = vadd.f32 %v8616_v13, %v6851_v15  ;;  %v7325_v54 = vmul.f32 %v7001_v49, %v7001_v49  ;;  %v6864_v33 = vadd.f32 %v8497_v41, %v11880_v53 }
 0x2d7   : > { %v7003_v63 = vpop.f32.mrf.mxu0  ;;  %v12094_v26 = vpop.f32.mrf.mxu1 }
 0x2d8   : > { %v8008_v59 = vpack.c.bf16 %v7012_v14, %v7009_v24  ;;  %v7004_v2 = vadd.f32 %v7003_v63, %v6843_v47  ;;  %v7328_v13 = vmul.f32 %v7012_v14, %v7012_v14 }
 0x2d9   : > { %v12099_v9 = vpop.f32.mrf.mxu1 }
 0x2da   : > { %8110 = vst [vmem:[%s12088_s13 + $0x8] sm:$0xff] %v8008_v59   ;;  %v8003_v46 = vpack.c.bf16 %v7004_v2, %v7001_v49  ;;  %v7287_v29 = vadd.f32 %v7004_v2, %v7001_v49  ;;  %v7326_v45 = vmul.f32 %v7004_v2, %v7004_v2  ;;  %v6856_v49 = vadd.f32 %v8491_v62, %v11866_v11 }
 0x2db   : > { %v12107_v2 = vpop.f32.mrf.mxu1 }
 0x2dc   : > { %8004 = vst [vmem:[%s12088_s13] sm:$0xff] %v8003_v46   ;;  %v7288_v47 = vadd.f32 %v7287_v29, %v7009_v24  ;;  %v7357_v15 = vadd.f32 %v7326_v45, %v7325_v54  ;;  %v6867_v24 = vadd.f32 %v8500_v1, %v11899_v56  ;;  %v6859_v46 = vadd.f32 %v8494_v8, %v11872_v36 }
 0x2dd   : > { %v8503_v36 = vadd.f32 %v12023_v12, %v12018_v31 }
 0x2de   : > { %v8619_v27 = vpop.f32.mrf.mxu0  ;;  %v7358_v63 = vadd.f32 %v7357_v15, %v7327_v32  ;;  %v7289_v59 = vadd.f32 %v7288_v47, %v7012_v14 }
 0x2df   : > { %v7025_v6 = vadd.f32 %v8619_v27, %v6864_v33  ;;  %v6872_v31 = vadd.f32 %v8503_v36, %v11905_v38 }
 0x2e0   : > { %v7016_v51 = vpop.f32.mrf.mxu0  ;;  %v7359_v19 = vadd.f32 %v7358_v63, %v7328_v13  ;;  %v8509_v63 = vadd.f32 %v12037_v48, %v12032_v57 }
 0x2e1   : > { %v7017_v5 = vadd.f32 %v7016_v51, %v6856_v49  ;;  %v7331_v8 = vmul.f32 %v7025_v6, %v7025_v6  ;;  %v8512_v49 = vadd.f32 %v12044_v34, %v12039_v0 }
 0x2e2   : > { %v8620_v54 = vpop.f32.mrf.mxu0 }
 0x2e3   : > { %v7290_v43 = vadd.f32 %v7289_v59, %v7017_v5  ;;  %v7329_v29 = vmul.f32 %v7017_v5, %v7017_v5  ;;  %v7028_v45 = vadd.f32 %v8620_v54, %v6867_v24  ;;  %v6883_v57 = vadd.f32 %v8512_v49, %v11924_v50 }
 0x2e4   : > { %v12112_v11 = vpop.f32.mrf.mxu1  ;;  %v7019_v14 = vpop.f32.mrf.mxu0  ;;  %v8515_v50 = vadd.f32 %v12051_v35, %v12046_v20 }
 0x2e5   : > { %v7360_v62 = vadd.f32 %v7359_v19, %v7329_v29  ;;  %v8018_v32 = vpack.c.bf16 %v7028_v45, %v7025_v6  ;;  %v7020_v47 = vadd.f32 %v7019_v14, %v6859_v46  ;;  %v7332_v59 = vmul.f32 %v7028_v45, %v7028_v45 }
 0x2e6   : > { %v12114_v53 = vpop.f32.mrf.mxu1  ;;  %v6880_v46 = vadd.f32 %v8509_v63, %v11919_v52  ;;  %v8518_v63 = vadd.f32 %v12058_v4, %v12053_v16 }
 0x2e7   : > { %8112 = vst [vmem:[%s12088_s13 + $0x18] sm:$0xff] %v8018_v32   ;;  %v8013_v41 = vpack.c.bf16 %v7020_v47, %v7017_v5  ;;  %v7291_v15 = vadd.f32 %v7290_v43, %v7020_v47  ;;  %v7330_v56 = vmul.f32 %v7020_v47, %v7020_v47  ;;  %v8506_v5 = vadd.f32 %v12030_v60, %v12025_v55 }
 0x2e8   : > { %v12117_v1 = vpop.f32.mrf.mxu1 }
 0x2e9   : > { %8111 = vst [vmem:[%s12088_s13 + $0x10] sm:$0xff] %v8013_v41   ;;  %v7292_v27 = vadd.f32 %v7291_v15, %v7025_v6  ;;  %v7361_v13 = vadd.f32 %v7360_v62, %v7330_v56  ;;  %v6875_v0 = vadd.f32 %v8506_v5, %v11911_v37  ;;  %v8521_v15 = vadd.f32 %v12071_v22, %v12060_v58 }
 0x2ea   : > { %v12128_v24 = vpop.f32.mrf.mxu1  ;;  %v8524_v56 = vadd.f32 %v12080_v39, %v12075_v17 }
 0x2eb   : > { %v7362_v51 = vadd.f32 %v7361_v13, %v7331_v8  ;;  %v7293_v33 = vadd.f32 %v7292_v27, %v7028_v45  ;;  %v6896_v58 = vadd.f32 %v8521_v15, %v11940_v25 }
 0x2ec   : > { %v6899_v39 = vadd.f32 %v8524_v56, %v11946_v10  ;;  %v8527_v10 = vadd.f32 %v12094_v26, %v12090_v42 }
 0x2ed   : > { %v7363_v12 = vadd.f32 %v7362_v51, %v7332_v59  ;;  %v6888_v59 = vadd.f32 %v8515_v50, %v11927_v44 }
 0x2ee   : > { %v8623_v19 = vpop.f32.mrf.mxu0  ;;  %v6904_v42 = vadd.f32 %v8527_v10, %v11953_v28 }
 0x2ef   : > { %v7041_v43 = vadd.f32 %v8623_v19, %v6880_v46 }
 0x2f0   : > { %v7032_v54 = vpop.f32.mrf.mxu0 }
 0x2f1   : > { %v7033_v6 = vadd.f32 %v7032_v54, %v6872_v31  ;;  %v7335_v36 = vmul.f32 %v7041_v43, %v7041_v43  ;;  %v6891_v31 = vadd.f32 %v8518_v63, %v11930_v61 }
 0x2f2   : > { %v8624_v48 = vpop.f32.mrf.mxu0 }
 0x2f3   : > { %v12134_v34 = vpop.f32.mrf.mxu1  ;;  %v7294_v55 = vadd.f32 %v7293_v33, %v7033_v6  ;;  %v7333_v60 = vmul.f32 %v7033_v6, %v7033_v6  ;;  %v7044_v29 = vadd.f32 %v8624_v48, %v6883_v57 }
 0x2f4   : > { %v7035_v45 = vpop.f32.mrf.mxu0 }
 0x2f5   : > { %v12136_v38 = vpop.f32.mrf.mxu1  ;;  %v7364_v14 = vadd.f32 %v7363_v12, %v7333_v60  ;;  %v8028_v62 = vpack.c.bf16 %v7044_v29, %v7041_v43  ;;  %v7036_v52 = vadd.f32 %v7035_v45, %v6875_v0  ;;  %v7336_v35 = vmul.f32 %v7044_v29, %v7044_v29 }
 0x2f6   : > { %v8533_v45 = vadd.f32 %v12114_v53, %v12112_v11 }
 0x2f7   : > { %v12138_v32 = vpop.f32.mrf.mxu1  ;;  %8114 = vst [vmem:[%s12088_s13 + $0x28] sm:$0xff] %v8028_v62   ;;  %v8023_v37 = vpack.c.bf16 %v7036_v52, %v7033_v6  ;;  %v7295_v47 = vadd.f32 %v7294_v55, %v7036_v52  ;;  %v7334_v41 = vmul.f32 %v7036_v52, %v7036_v52  ;;  %v8530_v52 = vadd.f32 %v12107_v2, %v12099_v9 }
 0x2f8   : > { %v6912_v56 = vadd.f32 %v8533_v45, %v11970_v7  ;;  %v8539_v7 = vadd.f32 %v12136_v38, %v12134_v34 }
 0x2f9   : > { %8113 = vst [vmem:[%s12088_s13 + $0x20] sm:$0xff] %v8023_v37   ;;  %v7296_v8 = vadd.f32 %v7295_v47, %v7041_v43  ;;  %v7365_v27 = vadd.f32 %v7364_v14, %v7334_v41  ;;  %v12148_v13 = vpop.f32.mrf.mxu1  ;;  %v8536_v14 = vadd.f32 %v12128_v24, %v12117_v1  ;;  %v6907_v24 = vadd.f32 %v8530_v52, %v11956_v30 }
 0x2fb   : > { %v8627_v20 = vpop.f32.mrf.mxu0  ;;  %v7366_v49 = vadd.f32 %v7365_v27, %v7335_v36  ;;  %v7297_v51 = vadd.f32 %v7296_v8, %v7044_v29  ;;  %v6915_v11 = vadd.f32 %v8536_v14, %v11977_v18 }
 0x2fc   : > { %v7057_v12 = vadd.f32 %v8627_v20, %v6896_v58 }
 0x2fd   : > { %v7048_v33 = vpop.f32.mrf.mxu0  ;;  %v7367_v17 = vadd.f32 %v7366_v49, %v7336_v35 }
 0x2fe   : > { %v7049_v22 = vadd.f32 %v7048_v33, %v6888_v59  ;;  %v8543_v5 = vpop.f32.mrf.mxu1  ;;  %v7339_v60 = vmul.f32 %v7057_v12, %v7057_v12 }
 0x2ff   : > { %v8628_v19 = vpop.f32.mrf.mxu0 }
 0x300   : > { %v7298_v16 = vadd.f32 %v7297_v51, %v7049_v22  ;;  %v7337_v4 = vmul.f32 %v7049_v22, %v7049_v22  ;;  %v7060_v54 = vadd.f32 %v8628_v19, %v6899_v39  ;;  %v8544_v46 = vpop.f32.mrf.mxu1  ;;  %v8542_v19 = vadd.f32 %v12148_v13, %v12138_v32 }
 0x301   : > { %v7051_v44 = vpop.f32.mrf.mxu0  ;;  %v8545_v58 = vadd.f32 %v8544_v46, %v8543_v5 }
 0x302   : > { %v7368_v6 = vadd.f32 %v7367_v17, %v7337_v4  ;;  %v8038_v57 = vpack.c.bf16 %v7060_v54, %v7057_v12  ;;  %v7052_v48 = vadd.f32 %v7051_v44, %v6891_v31  ;;  %v8546_v25 = vpop.f32.mrf.mxu1  ;;  %v7340_v50 = vmul.f32 %v7060_v54, %v7060_v54 }
 0x303   : > { %v6928_v44 = vadd.f32 %v8545_v58, %v12000_v21 }
 0x304   : > { %8116 = vst [vmem:[%s12088_s13 + $0x38] sm:$0xff] %v8038_v57   ;;  %v8033_v0 = vpack.c.bf16 %v7052_v48, %v7049_v22  ;;  %v7299_v43 = vadd.f32 %v7298_v16, %v7052_v48  ;;  %v7338_v55 = vmul.f32 %v7052_v48, %v7052_v48  ;;  %v8547_v62 = vpop.f32.mrf.mxu1  ;;  %v6923_v48 = vadd.f32 %v8542_v19, %v11993_v3 }
 0x305   : > { %v8548_v22 = vadd.f32 %v8547_v62, %v8546_v25 }
 0x306   : > { %8115 = vst [vmem:[%s12088_s13 + $0x30] sm:$0xff] %v8033_v0   ;;  %v7300_v61 = vadd.f32 %v7299_v43, %v7057_v12  ;;  %v7369_v29 = vadd.f32 %v7368_v6, %v7338_v55 }
 0x307   : > { %v6931_v46 = vadd.f32 %v8548_v22, %v12007_v40 }
 0x308   : > { %v7370_v37 = vadd.f32 %v7369_v29, %v7339_v60  ;;  %v7301_v41 = vadd.f32 %v7300_v61, %v7060_v54  ;;  %v6920_v54 = vadd.f32 %v8539_v7, %v11986_v23 }
 0x309   : > { %v8631_v47 = vpop.f32.mrf.mxu0 }
 0x30a   : > { %v7371_v15 = vadd.f32 %v7370_v37, %v7340_v50  ;;  %v7073_v8 = vadd.f32 %v8631_v47, %v6912_v56 }
 0x30b   : > { %v7064_v26 = vpop.f32.mrf.mxu0 }
 0x30c   : > { %v7065_v36 = vadd.f32 %v7064_v26, %v6904_v42  ;;  %v8549_v53 = vpop.f32.mrf.mxu1  ;;  %v7343_v30 = vmul.f32 %v7073_v8, %v7073_v8 }
 0x30d   : > { %v8632_v1 = vpop.f32.mrf.mxu0 }
 0x30e   : > { %v7302_v9 = vadd.f32 %v7301_v41, %v7065_v36  ;;  %v7341_v2 = vmul.f32 %v7065_v36, %v7065_v36  ;;  %v7076_v27 = vadd.f32 %v8632_v1, %v6915_v11  ;;  %v8550_v63 = vpop.f32.mrf.mxu1  ;;  %v12784_v11 = vld [vmem:[#allocation37_spill] sm:$0xff] }
 0x30f   : > { %v7067_v20 = vpop.f32.mrf.mxu0  ;;  %v8551_v21 = vadd.f32 %v8550_v63, %v8549_v53 }
 0x310   : > { %v7372_v28 = vadd.f32 %v7371_v15, %v7341_v2  ;;  %v8048_v35 = vpack.c.bf16 %v7076_v27, %v7073_v8  ;;  %v7068_v49 = vadd.f32 %v7067_v20, %v6907_v24  ;;  %v8552_v59 = vpop.f32.mrf.mxu1  ;;  %v7344_v16 = vmul.f32 %v7076_v27, %v7076_v27  ;;  %v12783_v15 = vld [vmem:[#allocation33_spill] sm:$0xff]  ;;  %v12785_v24 = vld [vmem:[#allocation38_spill] sm:$0xff] }
 0x311   : > { %v6936_v56 = vadd.f32 %v8551_v21, %v12783_v15  ;;  %v12786_v20 = vld [vmem:[#allocation34_spill] sm:$0xff] }
 0x312   : > { %8118 = vst [vmem:[%s12088_s13 + $0x48] sm:$0xff] %v8048_v35   ;;  %v8043_v18 = vpack.c.bf16 %v7068_v49, %v7065_v36  ;;  %v7303_v51 = vadd.f32 %v7302_v9, %v7068_v49  ;;  %v7342_v33 = vmul.f32 %v7068_v49, %v7068_v49  ;;  %v8553_v12 = vpop.f32.mrf.mxu1 }
 0x313   : > { %v8554_v42 = vadd.f32 %v8553_v12, %v8552_v59 }
 0x314   : > { %8117 = vst [vmem:[%s12088_s13 + $0x40] sm:$0xff] %v8043_v18   ;;  %v7304_v17 = vadd.f32 %v7303_v51, %v7073_v8  ;;  %v7373_v39 = vadd.f32 %v7372_v28, %v7342_v33 }
 0x315   : > { %v6939_v28 = vadd.f32 %v8554_v42, %v12786_v20 }
 0x316   : > { %v7374_v4 = vadd.f32 %v7373_v39, %v7343_v30  ;;  %v7305_v34 = vadd.f32 %v7304_v17, %v7076_v27 }
 0x317   : > { %v8635_v31 = vpop.f32.mrf.mxu0 }
 0x318   : > { %v7375_v5 = vadd.f32 %v7374_v4, %v7344_v16  ;;  %v7089_v32 = vadd.f32 %v8635_v31, %v6928_v44 }
 0x319   : > { %v7080_v38 = vpop.f32.mrf.mxu0 }
 0x31a   : > { %v7081_v6 = vadd.f32 %v7080_v38, %v6920_v54  ;;  %v7347_v3 = vmul.f32 %v7089_v32, %v7089_v32 }
 0x31b   : > { %v8636_v57 = vpop.f32.mrf.mxu0 }
 0x31c   : > { %v7306_v13 = vadd.f32 %v7305_v34, %v7081_v6  ;;  %v7345_v0 = vmul.f32 %v7081_v6, %v7081_v6  ;;  %v7092_v43 = vadd.f32 %v8636_v57, %v6931_v46 }
 0x31d   : > { %v8555_v25 = vpop.f32.mrf.mxu1  ;;  %v7083_v55 = vpop.f32.mrf.mxu0 }
 0x31e   : > { %v7376_v10 = vadd.f32 %v7375_v5, %v7345_v0  ;;  %v8058_v60 = vpack.c.bf16 %v7092_v43, %v7089_v32  ;;  %v7084_v61 = vadd.f32 %v7083_v55, %v6923_v48  ;;  %v7348_v41 = vmul.f32 %v7092_v43, %v7092_v43  ;;  %v12788_v0 = vld [vmem:[#allocation24_spill] sm:$0xff] }
 0x31f   : > { %v8556_v23 = vpop.f32.mrf.mxu1 }
 0x320   : > { %8120 = vst [vmem:[%s12088_s13 + $0x58] sm:$0xff] %v8058_v60   ;;  %v8053_v45 = vpack.c.bf16 %v7084_v61, %v7081_v6  ;;  %v7307_v14 = vadd.f32 %v7306_v13, %v7084_v61  ;;  %v7346_v40 = vmul.f32 %v7084_v61, %v7084_v61  ;;  %v8557_v62 = vadd.f32 %v8556_v23, %v8555_v25  ;;  %v12787_v6 = vld [vmem:[#allocation75_spill] sm:$0xff] }
 0x321   : > { %v8558_v29 = vpop.f32.mrf.mxu1 }
 0x322   : > { %8119 = vst [vmem:[%s12088_s13 + $0x50] sm:$0xff] %v8053_v45   ;;  %v7308_v50 = vadd.f32 %v7307_v14, %v7089_v32  ;;  %v7377_v37 = vadd.f32 %v7376_v10, %v7346_v40  ;;  %v6944_v53 = vadd.f32 %v8557_v62, %v12784_v11 }
 0x323   : > { %v8559_v52 = vpop.f32.mrf.mxu1 }
 0x324   : > { %v8560_v47 = vadd.f32 %v8559_v52, %v8558_v29  ;;  %v8639_v26 = vpop.f32.mrf.mxu0  ;;  %v7378_v36 = vadd.f32 %v7377_v37, %v7347_v3  ;;  %v7309_v1 = vadd.f32 %v7308_v50, %v7092_v43  ;;  %v12789_v50 = vld [vmem:[#allocation26_spill] sm:$0xff] }
 0x325   : > { %v7105_v35 = vadd.f32 %v8639_v26, %v6944_v53 }
 0x326   : > { %v6947_v8 = vadd.f32 %v8560_v47, %v12785_v24  ;;  %v7096_v9 = vpop.f32.mrf.mxu0  ;;  %v7379_v27 = vadd.f32 %v7378_v36, %v7348_v41  ;;  %v12790_v36 = vld [vmem:[#allocation25_spill] sm:$0xff] }
 0x327   : > { %v7097_v2 = vadd.f32 %v7096_v9, %v6936_v56  ;;  %v7351_v16 = vmul.f32 %v7105_v35, %v7105_v35 }
 0x328   : > { %v8640_v63 = vpop.f32.mrf.mxu0  ;;  %v8561_v18 = vpop.f32.mrf.mxu1 }
 0x329   : > { %v7310_v49 = vadd.f32 %v7309_v1, %v7097_v2  ;;  %v7349_v7 = vmul.f32 %v7097_v2, %v7097_v2  ;;  %v7108_v59 = vadd.f32 %v8640_v63, %v6947_v8 }
 0x32a   : > { %v7099_v51 = vpop.f32.mrf.mxu0  ;;  %v8562_v22 = vpop.f32.mrf.mxu1 }
 0x32b   : > { %v7380_v33 = vadd.f32 %v7379_v27, %v7349_v7  ;;  %v8068_v58 = vpack.c.bf16 %v7108_v59, %v7105_v35  ;;  %v7100_v30 = vadd.f32 %v7099_v51, %v6939_v28  ;;  %v8563_v31 = vadd.f32 %v8562_v22, %v8561_v18 }
 0x32c   : > { %v8564_v12 = vpop.f32.mrf.mxu1  ;;  %v7352_v4 = vmul.f32 %v7108_v59, %v7108_v59 }
 0x32d   : > { %8122 = vst [vmem:[%s12088_s13 + $0x68] sm:$0xff] %v8068_v58   ;;  %v8063_v17 = vpack.c.bf16 %v7100_v30, %v7097_v2  ;;  %v7311_v39 = vadd.f32 %v7310_v49, %v7100_v30  ;;  %v7350_v19 = vmul.f32 %v7100_v30, %v7100_v30  ;;  %v6952_v5 = vadd.f32 %v8563_v31, %v12787_v6 }
 0x32e   : > { %v8565_v38 = vpop.f32.mrf.mxu1 }
 0x32f   : > { %8121 = vst [vmem:[%s12088_s13 + $0x60] sm:$0xff] %v8063_v17   ;;  %v7312_v54 = vadd.f32 %v7311_v39, %v7105_v35  ;;  %v7381_v34 = vadd.f32 %v7380_v33, %v7350_v19  ;;  %v8566_v57 = vadd.f32 %v8565_v38, %v8564_v12 }
 0x331   : > { %v7382_v44 = vadd.f32 %v7381_v34, %v7351_v16  ;;  %v7313_v46 = vadd.f32 %v7312_v54, %v7108_v59  ;;  %v6955_v43 = vadd.f32 %v8566_v57, %v12788_v0 }
 0x332   : > { %v8643_v48 = vpop.f32.mrf.mxu0 }
 0x333   : > { %v7383_v25 = vadd.f32 %v7382_v44, %v7352_v4 }
 0x334   : > { %v7112_v32 = vpop.f32.mrf.mxu0 }
 0x335   : > { %v7113_v13 = vadd.f32 %v7112_v32, %v6952_v5  ;;  %v8567_v23 = vpop.f32.mrf.mxu1 }
 0x336   : > { %v8644_v55 = vpop.f32.mrf.mxu0 }
 0x337   : > { %v7314_v10 = vadd.f32 %v7313_v46, %v7113_v13  ;;  %v7353_v60 = vmul.f32 %v7113_v13, %v7113_v13  ;;  %v8568_v21 = vpop.f32.mrf.mxu1 }
 0x338   : > { %v7115_v61 = vpop.f32.mrf.mxu0  ;;  %v8569_v14 = vadd.f32 %v8568_v21, %v8567_v23 }
 0x339   : > { %v7384_v29 = vadd.f32 %v7383_v25, %v7353_v60  ;;  %v7116_v45 = vadd.f32 %v7115_v61, %v6955_v43  ;;  %v8570_v40 = vpop.f32.mrf.mxu1 }
 0x33a   : > { %v6960_v37 = vadd.f32 %v8569_v14, %v12789_v50 }
 0x33b   : > { %v8073_v62 = vpack.c.bf16 %v7116_v45, %v7113_v13  ;;  %v7315_v52 = vadd.f32 %v7314_v10, %v7116_v45  ;;  %v7354_v3 = vmul.f32 %v7116_v45, %v7116_v45  ;;  %v8571_v47 = vpop.f32.mrf.mxu1 }
 0x33c   : > { %v7121_v42 = vadd.f32 %v8643_v48, %v6960_v37  ;;  %v8572_v26 = vadd.f32 %v8571_v47, %v8570_v40 }
 0x33d   : > { %8123 = vst [vmem:[%s12088_s13 + $0x70] sm:$0xff] %v8073_v62   ;;  %v7385_v41 = vadd.f32 %v7384_v29, %v7354_v3 }
 0x33e   : > { %v7316_v15 = vadd.f32 %v7315_v52, %v7121_v42  ;;  %v7355_v56 = vmul.f32 %v7121_v42, %v7121_v42  ;;  %v6963_v11 = vadd.f32 %v8572_v26, %v12790_v36 }
 0x340   : > { %v7386_v53 = vadd.f32 %v7385_v41, %v7355_v56  ;;  %v7124_v1 = vadd.f32 %v8644_v55, %v6963_v11 }
 0x342   : > { %v8078_v24 = vpack.c.bf16 %v7124_v1, %v7121_v42  ;;  %v7317_v8 = vadd.f32 %v7316_v15, %v7124_v1  ;;  %v7356_v9 = vmul.f32 %v7124_v1, %v7124_v1 }
 0x344   : > { %8124 = vst [vmem:[%s12088_s13 + $0x78] sm:$0xff] %v8078_v24   ;;  %v7318_v2 = vrot.slane %v7317_v8, 4  ;;  %v7387_v27 = vadd.f32 %v7386_v53, %v7356_v9 }
 0x346   : > { %v7319_v63 = vadd.f32 %v7318_v2, %v7317_v8  ;;  %v7388_v20 = vrot.slane %v7387_v27, 4 }
 0x348   : > { %v7320_v28 = vrot.slane %v7319_v63, 2  ;;  %v7389_v35 = vadd.f32 %v7388_v20, %v7387_v27 }
 0x34a   : > { %v7321_v49 = vadd.f32 %v7320_v28, %v7319_v63  ;;  %v7390_v7 = vrot.slane %v7389_v35, 2 }
 0x34c   : > { %v7322_v59 = vrot.slane %v7321_v49, 1  ;;  %v7391_v18 = vadd.f32 %v7390_v7, %v7389_v35 }
 0x34e   : > { %v7323_v51 = vadd.f32 %v7322_v59, %v7321_v49  ;;  %v7392_v33 = vrot.slane %v7391_v18, 1 }
 0x350   : > { %7324 = vst [vmem:[%s268_s14] sm:$0x1] %v7323_v51  ;;  %v7393_v58 = vadd.f32 %v7392_v33, %v7391_v18 }
 0x352   : > { %7394 = vst [vmem:[%s271_s17] sm:$0x1] %v7393_v58 }
 0x353 PF: > { %s17_s21 = sadd.s32 1, %s8965_s21  }
 0x354   : > { %p14_p5 = scmp.ge.s32.totalorder %s17_s21, 6  }
 0x356   :  { %16 = sbr.rel (!%p14_p5) target bundleno = 1 (0x1), region = 90 }

</bundles_post_ra>
